<compile_context>
chip_gen: v6e
topology: v6e:2x2x1
jax: 0.10.0
libtpu: 0.0.40
codegen_flags: <defaults>
</compile_context>

<pallas_src>
import functools

import jax
import jax.numpy as jnp
import numpy as np
from jax import lax
from jax.experimental import pallas as pl
from jax.experimental.pallas import tpu as pltpu


def _conv_in_lrelu_kernel(x_ref, w_ref, g_ref, b_ref, o_ref, *,
                          nb, cin, cout, kh_sz, kw_sz, h_out, w_out,
                          eps, neg_slope):
    """nb samples of (3x3 conv -> InstanceNorm -> LeakyReLU), fused.

    x_ref: (nb, Cin, Hp, Wp)   zero-padded input tile, VMEM
    w_ref: (Cout*Cin*KH*KW,)   flattened conv weight, SMEM (scalar reads)
    g_ref: (Cout,)             InstanceNorm gamma, SMEM
    b_ref: (Cout,)             InstanceNorm beta,  SMEM
    o_ref: (nb, Cout, H, W)    output tile, VMEM
    """
    k_per_out = cin * kh_sz * kw_sz
    # Read all parameter scalars from SMEM once; reused across the nb samples.
    w = [w_ref[k] for k in range(cout * k_per_out)]
    gamma = [g_ref[c] for c in range(cout)]
    beta = [b_ref[c] for c in range(cout)]
    inv_hw = jnp.float32(1.0 / (h_out * w_out))

    for i in range(nb):  # static unroll (nb is kept small; see TODO above)
        # ---- Conv2d: in-kernel im2col via static shifted-window slices ----
        accs = [jnp.zeros((h_out, w_out), jnp.float32) for _ in range(cout)]
        for ci in range(cin):
            plane = x_ref[i, ci, :, :].astype(jnp.float32)      # (Hp, Wp)
            for kh in range(kh_sz):
                for kw in range(kw_sz):
                    tap = plane[kh:kh + h_out, kw:kw + w_out]   # (H, W)
                    base = (ci * kh_sz + kh) * kw_sz + kw
                    for co in range(cout):
                        accs[co] = accs[co] + w[co * k_per_out + base] * tap
        # Conv bias omitted: cancelled exactly by the mean subtraction below.

        # ---- InstanceNorm2d (two-pass, per channel) + LeakyReLU ----
        for co in range(cout):
            acc = accs[co]
            mean = jnp.sum(acc) * inv_hw
            centered = acc - mean
            var = jnp.sum(centered * centered) * inv_hw
            scale = gamma[co] * lax.rsqrt(var + eps)
            y = centered * scale + beta[co]
            y = jnp.maximum(y, neg_slope * y)        # LeakyReLU (slope < 1)
            o_ref[i, co, :, :] = y.astype(o_ref.dtype)


def _padded_plane_bytes(c, h, w, bytes_per_elem=4):
    """VMEM bytes of c (h, w) f32 planes after (8, 128) tile padding."""
    return c * (pl.cdiv(h, 8) * 8) * (pl.cdiv(w, 128) * 128) * bytes_per_elem


def multi_out_conv_block(x_nchw, weight, bias, gamma, beta, *,
                         padding=1, eps=1e-5, neg_slope=0.2):
    """Forward of _MultiOutBaseConvBlock (order='CNA'). Returns the tuple (y,)."""
    N, Cin, H, W = x_nchw.shape
    Cout, Cin_w, KH, KW = weight.shape
    assert Cin_w == Cin, "groups=1 expected by this block config"
    Hp, Wp = H + 2 * padding, W + 2 * padding
    H_out, W_out = Hp - KH + 1, Wp - KW + 1         # stride=1, dilation=1

    # Conv bias is exactly cancelled by InstanceNorm's per-channel mean
    # subtraction (order='CNA', norm directly after conv, no noise layer).
    del bias

    # ---------- thin glue (plain XLA): zero pad only; NO im2col in HBM ------
    x_pad = jnp.pad(x_nchw.astype(jnp.float32),
                    ((0, 0), (0, 0), (padding, padding), (padding, padding)))
    w_flat = weight.reshape(-1).astype(jnp.float32)        # (Cout*Cin*KH*KW,)
    g = gamma.reshape(-1).astype(jnp.float32)
    b = beta.reshape(-1).astype(jnp.float32)

    # ---------- batch-tile (nb) selection: VMEM-aware, >=2 grid steps -------
    per_sample = (_padded_plane_bytes(Cin, Hp, Wp)
                  + _padded_plane_bytes(Cout, H_out, W_out))
    budget = 24 << 20   # conservative: double-buffered blocks stay well under
                        # the smallest scoped VMEM (v7x / default limits)
    nb = 1
    for cand in range(N, 0, -1):
        if N % cand:
            continue
        if N >= 2 and N // cand < 2:
            # Keep at least 2 grid steps so the 'parallel' axis can shard
            # across the 2 TensorCores of a v7x chip.
            continue
        if 2 * cand * per_sample <= budget:
            nb = cand
            break
    grid = (N // nb,)

    block_bytes = nb * per_sample
    vmem_limit = int(min(max(4 * block_bytes + (4 << 20), 16 << 20), 64 << 20))

    kernel = functools.partial(
        _conv_in_lrelu_kernel, nb=nb, cin=Cin, cout=Cout, kh_sz=KH, kw_sz=KW,
        h_out=H_out, w_out=W_out, eps=eps, neg_slope=neg_slope)

    out = pl.pallas_call(
        kernel,
        out_shape=jax.ShapeDtypeStruct((N, Cout, H_out, W_out), x_nchw.dtype),
        grid_spec=pltpu.PrefetchScalarGridSpec(
            num_scalar_prefetch=0,
            grid=grid,
            in_specs=[
                pl.BlockSpec((nb, Cin, Hp, Wp), lambda bidx: (bidx, 0, 0, 0)),
                pl.BlockSpec(memory_space=pltpu.MemorySpace.SMEM),
                pl.BlockSpec(memory_space=pltpu.MemorySpace.SMEM),
                pl.BlockSpec(memory_space=pltpu.MemorySpace.SMEM),
            ],
            out_specs=pl.BlockSpec((nb, Cout, H_out, W_out),
                                   lambda bidx: (bidx, 0, 0, 0)),
        ),
        compiler_params=pltpu.CompilerParams(
            dimension_semantics=("parallel",),
            vmem_limit_bytes=vmem_limit),
    )(x_pad, w_flat, g, b)

    # No layer in this configuration produces extra outputs -> 1-tuple.
    return (out,)


def _reference(x_nchw, weight, bias, gamma, beta, *, padding=1, eps=1e-5,
               neg_slope=0.2):
    """Pure-JAX reference: Conv2d(+bias) -> InstanceNorm2d(affine) -> LeakyReLU."""
    y = lax.conv_general_dilated(
        x_nchw.astype(jnp.float32), weight.astype(jnp.float32),
        window_strides=(1, 1),
        padding=[(padding, padding), (padding, padding)],
        dimension_numbers=("NCHW", "OIHW", "NCHW"),
        precision=lax.Precision.HIGHEST)
    y = y + bias.astype(jnp.float32)[None, :, None, None]
    mean = jnp.mean(y, axis=(2, 3), keepdims=True)
    var = jnp.mean(jnp.square(y - mean), axis=(2, 3), keepdims=True)
    y = (y - mean) * lax.rsqrt(var + eps)
    y = y * gamma[None, :, None, None] + beta[None, :, None, None]
    return jnp.where(y >= 0, y, neg_slope * y)


if __name__ == "__main__":
    key = jax.random.PRNGKey(0)
    kx, kw, kb, kg, kbt = jax.random.split(key, 5)

    N, Cin, H, W = 2, 4, 16, 16
    Cout, KH, KW = 8, 3, 3

    x = jax.random.normal(kx, (N, Cin, H, W), jnp.float32)
    # Deterministic synthetic parameters (shapes per nn.Conv2d / InstanceNorm2d).
    weight = jax.random.normal(kw, (Cout, Cin, KH, KW), jnp.float32) * 0.1
    bias = jax.random.normal(kb, (Cout,), jnp.float32) * 0.1
    gamma = 1.0 + 0.1 * jax.random.normal(kg, (Cout,), jnp.float32)
    beta = 0.1 * jax.random.normal(kbt, (Cout,), jnp.float32)

    fwd = jax.jit(multi_out_conv_block)
    (y,) = fwd(x, weight, bias, gamma, beta)
    y = jax.block_until_ready(y)

    y_ref = jax.block_until_ready(_reference(x, weight, bias, gamma, beta))
    np.testing.assert_allclose(np.asarray(y), np.asarray(y_ref),
                               rtol=1e-3, atol=1e-3)
    print("KERNEL_OK")
</pallas_src>

<mosaic_0001>
module attributes {stable_mosaic.version = 11 : i64} {
  func.func @_conv_in_lrelu_kernel(%arg0: i32, %arg1: memref<1x4x18x18xf32, #tpu.memory_space<vmem>>, %arg2: memref<288xf32, #tpu.memory_space<smem>>, %arg3: memref<8xf32, #tpu.memory_space<smem>>, %arg4: memref<8xf32, #tpu.memory_space<smem>>, %arg5: memref<1x8x16x16xf32, #tpu.memory_space<vmem>>) attributes {dimension_semantics = [#tpu.dimension_semantics<parallel>], iteration_bounds = array<i64: 2>, scalar_prefetch = 0 : i64, scratch_operands = 0 : i64, tpu.core_type = #tpu.core_type<tc>, window_params = [{transform_indices = @transform_0, window_bounds = array<i64: 1, 4, 18, 18>}, {transform_indices = @transform_1, window_bounds = array<i64: 288>}, {transform_indices = @transform_2, window_bounds = array<i64: 8>}, {transform_indices = @transform_3, window_bounds = array<i64: 8>}, {transform_indices = @transform_4, window_bounds = array<i64: 1, 8, 16, 16>}]} {
    %c0 = arith.constant 0 : index
    %0 = memref.load %arg2[%c0] : memref<288xf32, #tpu.memory_space<smem>>
    %c1 = arith.constant 1 : index
    %1 = memref.load %arg2[%c1] : memref<288xf32, #tpu.memory_space<smem>>
    %c2 = arith.constant 2 : index
    %2 = memref.load %arg2[%c2] : memref<288xf32, #tpu.memory_space<smem>>
    %c3 = arith.constant 3 : index
    %3 = memref.load %arg2[%c3] : memref<288xf32, #tpu.memory_space<smem>>
    %c4 = arith.constant 4 : index
    %4 = memref.load %arg2[%c4] : memref<288xf32, #tpu.memory_space<smem>>
    %c5 = arith.constant 5 : index
    %5 = memref.load %arg2[%c5] : memref<288xf32, #tpu.memory_space<smem>>
    %c6 = arith.constant 6 : index
    %6 = memref.load %arg2[%c6] : memref<288xf32, #tpu.memory_space<smem>>
    %c7 = arith.constant 7 : index
    %7 = memref.load %arg2[%c7] : memref<288xf32, #tpu.memory_space<smem>>
    %c8 = arith.constant 8 : index
    %8 = memref.load %arg2[%c8] : memref<288xf32, #tpu.memory_space<smem>>
    %c9 = arith.constant 9 : index
    %9 = memref.load %arg2[%c9] : memref<288xf32, #tpu.memory_space<smem>>
    %c10 = arith.constant 10 : index
    %10 = memref.load %arg2[%c10] : memref<288xf32, #tpu.memory_space<smem>>
    %c11 = arith.constant 11 : index
    %11 = memref.load %arg2[%c11] : memref<288xf32, #tpu.memory_space<smem>>
    %c12 = arith.constant 12 : index
    %12 = memref.load %arg2[%c12] : memref<288xf32, #tpu.memory_space<smem>>
    %c13 = arith.constant 13 : index
    %13 = memref.load %arg2[%c13] : memref<288xf32, #tpu.memory_space<smem>>
    %c14 = arith.constant 14 : index
    %14 = memref.load %arg2[%c14] : memref<288xf32, #tpu.memory_space<smem>>
    %c15 = arith.constant 15 : index
    %15 = memref.load %arg2[%c15] : memref<288xf32, #tpu.memory_space<smem>>
    %c16 = arith.constant 16 : index
    %16 = memref.load %arg2[%c16] : memref<288xf32, #tpu.memory_space<smem>>
    %c17 = arith.constant 17 : index
    %17 = memref.load %arg2[%c17] : memref<288xf32, #tpu.memory_space<smem>>
    %c18 = arith.constant 18 : index
    %18 = memref.load %arg2[%c18] : memref<288xf32, #tpu.memory_space<smem>>
    %c19 = arith.constant 19 : index
    %19 = memref.load %arg2[%c19] : memref<288xf32, #tpu.memory_space<smem>>
    %c20 = arith.constant 20 : index
    %20 = memref.load %arg2[%c20] : memref<288xf32, #tpu.memory_space<smem>>
    %c21 = arith.constant 21 : index
    %21 = memref.load %arg2[%c21] : memref<288xf32, #tpu.memory_space<smem>>
    %c22 = arith.constant 22 : index
    %22 = memref.load %arg2[%c22] : memref<288xf32, #tpu.memory_space<smem>>
    %c23 = arith.constant 23 : index
    %23 = memref.load %arg2[%c23] : memref<288xf32, #tpu.memory_space<smem>>
    %c24 = arith.constant 24 : index
    %24 = memref.load %arg2[%c24] : memref<288xf32, #tpu.memory_space<smem>>
    %c25 = arith.constant 25 : index
    %25 = memref.load %arg2[%c25] : memref<288xf32, #tpu.memory_space<smem>>
    %c26 = arith.constant 26 : index
    %26 = memref.load %arg2[%c26] : memref<288xf32, #tpu.memory_space<smem>>
    %c27 = arith.constant 27 : index
    %27 = memref.load %arg2[%c27] : memref<288xf32, #tpu.memory_space<smem>>
    %c28 = arith.constant 28 : index
    %28 = memref.load %arg2[%c28] : memref<288xf32, #tpu.memory_space<smem>>
    %c29 = arith.constant 29 : index
    %29 = memref.load %arg2[%c29] : memref<288xf32, #tpu.memory_space<smem>>
    %c30 = arith.constant 30 : index
    %30 = memref.load %arg2[%c30] : memref<288xf32, #tpu.memory_space<smem>>
    %c31 = arith.constant 31 : index
    %31 = memref.load %arg2[%c31] : memref<288xf32, #tpu.memory_space<smem>>
    %c32 = arith.constant 32 : index
    %32 = memref.load %arg2[%c32] : memref<288xf32, #tpu.memory_space<smem>>
    %c33 = arith.constant 33 : index
    %33 = memref.load %arg2[%c33] : memref<288xf32, #tpu.memory_space<smem>>
    %c34 = arith.constant 34 : index
    %34 = memref.load %arg2[%c34] : memref<288xf32, #tpu.memory_space<smem>>
    %c35 = arith.constant 35 : index
    %35 = memref.load %arg2[%c35] : memref<288xf32, #tpu.memory_space<smem>>
    %c36 = arith.constant 36 : index
    %36 = memref.load %arg2[%c36] : memref<288xf32, #tpu.memory_space<smem>>
    %c37 = arith.constant 37 : index
    %37 = memref.load %arg2[%c37] : memref<288xf32, #tpu.memory_space<smem>>
    %c38 = arith.constant 38 : index
    %38 = memref.load %arg2[%c38] : memref<288xf32, #tpu.memory_space<smem>>
    %c39 = arith.constant 39 : index
    %39 = memref.load %arg2[%c39] : memref<288xf32, #tpu.memory_space<smem>>
    %c40 = arith.constant 40 : index
    %40 = memref.load %arg2[%c40] : memref<288xf32, #tpu.memory_space<smem>>
    %c41 = arith.constant 41 : index
    %41 = memref.load %arg2[%c41] : memref<288xf32, #tpu.memory_space<smem>>
    %c42 = arith.constant 42 : index
    %42 = memref.load %arg2[%c42] : memref<288xf32, #tpu.memory_space<smem>>
    %c43 = arith.constant 43 : index
    %43 = memref.load %arg2[%c43] : memref<288xf32, #tpu.memory_space<smem>>
    %c44 = arith.constant 44 : index
    %44 = memref.load %arg2[%c44] : memref<288xf32, #tpu.memory_space<smem>>
    %c45 = arith.constant 45 : index
    %45 = memref.load %arg2[%c45] : memref<288xf32, #tpu.memory_space<smem>>
    %c46 = arith.constant 46 : index
    %46 = memref.load %arg2[%c46] : memref<288xf32, #tpu.memory_space<smem>>
    %c47 = arith.constant 47 : index
    %47 = memref.load %arg2[%c47] : memref<288xf32, #tpu.memory_space<smem>>
    %c48 = arith.constant 48 : index
    %48 = memref.load %arg2[%c48] : memref<288xf32, #tpu.memory_space<smem>>
    %c49 = arith.constant 49 : index
    %49 = memref.load %arg2[%c49] : memref<288xf32, #tpu.memory_space<smem>>
    %c50 = arith.constant 50 : index
    %50 = memref.load %arg2[%c50] : memref<288xf32, #tpu.memory_space<smem>>
    %c51 = arith.constant 51 : index
    %51 = memref.load %arg2[%c51] : memref<288xf32, #tpu.memory_space<smem>>
    %c52 = arith.constant 52 : index
    %52 = memref.load %arg2[%c52] : memref<288xf32, #tpu.memory_space<smem>>
    %c53 = arith.constant 53 : index
    %53 = memref.load %arg2[%c53] : memref<288xf32, #tpu.memory_space<smem>>
    %c54 = arith.constant 54 : index
    %54 = memref.load %arg2[%c54] : memref<288xf32, #tpu.memory_space<smem>>
    %c55 = arith.constant 55 : index
    %55 = memref.load %arg2[%c55] : memref<288xf32, #tpu.memory_space<smem>>
    %c56 = arith.constant 56 : index
    %56 = memref.load %arg2[%c56] : memref<288xf32, #tpu.memory_space<smem>>
    %c57 = arith.constant 57 : index
    %57 = memref.load %arg2[%c57] : memref<288xf32, #tpu.memory_space<smem>>
    %c58 = arith.constant 58 : index
    %58 = memref.load %arg2[%c58] : memref<288xf32, #tpu.memory_space<smem>>
    %c59 = arith.constant 59 : index
    %59 = memref.load %arg2[%c59] : memref<288xf32, #tpu.memory_space<smem>>
    %c60 = arith.constant 60 : index
    %60 = memref.load %arg2[%c60] : memref<288xf32, #tpu.memory_space<smem>>
    %c61 = arith.constant 61 : index
    %61 = memref.load %arg2[%c61] : memref<288xf32, #tpu.memory_space<smem>>
    %c62 = arith.constant 62 : index
    %62 = memref.load %arg2[%c62] : memref<288xf32, #tpu.memory_space<smem>>
    %c63 = arith.constant 63 : index
    %63 = memref.load %arg2[%c63] : memref<288xf32, #tpu.memory_space<smem>>
    %c64 = arith.constant 64 : index
    %64 = memref.load %arg2[%c64] : memref<288xf32, #tpu.memory_space<smem>>
    %c65 = arith.constant 65 : index
    %65 = memref.load %arg2[%c65] : memref<288xf32, #tpu.memory_space<smem>>
    %c66 = arith.constant 66 : index
    %66 = memref.load %arg2[%c66] : memref<288xf32, #tpu.memory_space<smem>>
    %c67 = arith.constant 67 : index
    %67 = memref.load %arg2[%c67] : memref<288xf32, #tpu.memory_space<smem>>
    %c68 = arith.constant 68 : index
    %68 = memref.load %arg2[%c68] : memref<288xf32, #tpu.memory_space<smem>>
    %c69 = arith.constant 69 : index
    %69 = memref.load %arg2[%c69] : memref<288xf32, #tpu.memory_space<smem>>
    %c70 = arith.constant 70 : index
    %70 = memref.load %arg2[%c70] : memref<288xf32, #tpu.memory_space<smem>>
    %c71 = arith.constant 71 : index
    %71 = memref.load %arg2[%c71] : memref<288xf32, #tpu.memory_space<smem>>
    %c72 = arith.constant 72 : index
    %72 = memref.load %arg2[%c72] : memref<288xf32, #tpu.memory_space<smem>>
    %c73 = arith.constant 73 : index
    %73 = memref.load %arg2[%c73] : memref<288xf32, #tpu.memory_space<smem>>
    %c74 = arith.constant 74 : index
    %74 = memref.load %arg2[%c74] : memref<288xf32, #tpu.memory_space<smem>>
    %c75 = arith.constant 75 : index
    %75 = memref.load %arg2[%c75] : memref<288xf32, #tpu.memory_space<smem>>
    %c76 = arith.constant 76 : index
    %76 = memref.load %arg2[%c76] : memref<288xf32, #tpu.memory_space<smem>>
    %c77 = arith.constant 77 : index
    %77 = memref.load %arg2[%c77] : memref<288xf32, #tpu.memory_space<smem>>
    %c78 = arith.constant 78 : index
    %78 = memref.load %arg2[%c78] : memref<288xf32, #tpu.memory_space<smem>>
    %c79 = arith.constant 79 : index
    %79 = memref.load %arg2[%c79] : memref<288xf32, #tpu.memory_space<smem>>
    %c80 = arith.constant 80 : index
    %80 = memref.load %arg2[%c80] : memref<288xf32, #tpu.memory_space<smem>>
    %c81 = arith.constant 81 : index
    %81 = memref.load %arg2[%c81] : memref<288xf32, #tpu.memory_space<smem>>
    %c82 = arith.constant 82 : index
    %82 = memref.load %arg2[%c82] : memref<288xf32, #tpu.memory_space<smem>>
    %c83 = arith.constant 83 : index
    %83 = memref.load %arg2[%c83] : memref<288xf32, #tpu.memory_space<smem>>
    %c84 = arith.constant 84 : index
    %84 = memref.load %arg2[%c84] : memref<288xf32, #tpu.memory_space<smem>>
    %c85 = arith.constant 85 : index
    %85 = memref.load %arg2[%c85] : memref<288xf32, #tpu.memory_space<smem>>
    %c86 = arith.constant 86 : index
    %86 = memref.load %arg2[%c86] : memref<288xf32, #tpu.memory_space<smem>>
    %c87 = arith.constant 87 : index
    %87 = memref.load %arg2[%c87] : memref<288xf32, #tpu.memory_space<smem>>
    %c88 = arith.constant 88 : index
    %88 = memref.load %arg2[%c88] : memref<288xf32, #tpu.memory_space<smem>>
    %c89 = arith.constant 89 : index
    %89 = memref.load %arg2[%c89] : memref<288xf32, #tpu.memory_space<smem>>
    %c90 = arith.constant 90 : index
    %90 = memref.load %arg2[%c90] : memref<288xf32, #tpu.memory_space<smem>>
    %c91 = arith.constant 91 : index
    %91 = memref.load %arg2[%c91] : memref<288xf32, #tpu.memory_space<smem>>
    %c92 = arith.constant 92 : index
    %92 = memref.load %arg2[%c92] : memref<288xf32, #tpu.memory_space<smem>>
    %c93 = arith.constant 93 : index
    %93 = memref.load %arg2[%c93] : memref<288xf32, #tpu.memory_space<smem>>
    %c94 = arith.constant 94 : index
    %94 = memref.load %arg2[%c94] : memref<288xf32, #tpu.memory_space<smem>>
    %c95 = arith.constant 95 : index
    %95 = memref.load %arg2[%c95] : memref<288xf32, #tpu.memory_space<smem>>
    %c96 = arith.constant 96 : index
    %96 = memref.load %arg2[%c96] : memref<288xf32, #tpu.memory_space<smem>>
    %c97 = arith.constant 97 : index
    %97 = memref.load %arg2[%c97] : memref<288xf32, #tpu.memory_space<smem>>
    %c98 = arith.constant 98 : index
    %98 = memref.load %arg2[%c98] : memref<288xf32, #tpu.memory_space<smem>>
    %c99 = arith.constant 99 : index
    %99 = memref.load %arg2[%c99] : memref<288xf32, #tpu.memory_space<smem>>
    %c100 = arith.constant 100 : index
    %100 = memref.load %arg2[%c100] : memref<288xf32, #tpu.memory_space<smem>>
    %c101 = arith.constant 101 : index
    %101 = memref.load %arg2[%c101] : memref<288xf32, #tpu.memory_space<smem>>
    %c102 = arith.constant 102 : index
    %102 = memref.load %arg2[%c102] : memref<288xf32, #tpu.memory_space<smem>>
    %c103 = arith.constant 103 : index
    %103 = memref.load %arg2[%c103] : memref<288xf32, #tpu.memory_space<smem>>
    %c104 = arith.constant 104 : index
    %104 = memref.load %arg2[%c104] : memref<288xf32, #tpu.memory_space<smem>>
    %c105 = arith.constant 105 : index
    %105 = memref.load %arg2[%c105] : memref<288xf32, #tpu.memory_space<smem>>
    %c106 = arith.constant 106 : index
    %106 = memref.load %arg2[%c106] : memref<288xf32, #tpu.memory_space<smem>>
    %c107 = arith.constant 107 : index
    %107 = memref.load %arg2[%c107] : memref<288xf32, #tpu.memory_space<smem>>
    %c108 = arith.constant 108 : index
    %108 = memref.load %arg2[%c108] : memref<288xf32, #tpu.memory_space<smem>>
    %c109 = arith.constant 109 : index
    %109 = memref.load %arg2[%c109] : memref<288xf32, #tpu.memory_space<smem>>
    %c110 = arith.constant 110 : index
    %110 = memref.load %arg2[%c110] : memref<288xf32, #tpu.memory_space<smem>>
    %c111 = arith.constant 111 : index
    %111 = memref.load %arg2[%c111] : memref<288xf32, #tpu.memory_space<smem>>
    %c112 = arith.constant 112 : index
    %112 = memref.load %arg2[%c112] : memref<288xf32, #tpu.memory_space<smem>>
    %c113 = arith.constant 113 : index
    %113 = memref.load %arg2[%c113] : memref<288xf32, #tpu.memory_space<smem>>
    %c114 = arith.constant 114 : index
    %114 = memref.load %arg2[%c114] : memref<288xf32, #tpu.memory_space<smem>>
    %c115 = arith.constant 115 : index
    %115 = memref.load %arg2[%c115] : memref<288xf32, #tpu.memory_space<smem>>
    %c116 = arith.constant 116 : index
    %116 = memref.load %arg2[%c116] : memref<288xf32, #tpu.memory_space<smem>>
    %c117 = arith.constant 117 : index
    %117 = memref.load %arg2[%c117] : memref<288xf32, #tpu.memory_space<smem>>
    %c118 = arith.constant 118 : index
    %118 = memref.load %arg2[%c118] : memref<288xf32, #tpu.memory_space<smem>>
    %c119 = arith.constant 119 : index
    %119 = memref.load %arg2[%c119] : memref<288xf32, #tpu.memory_space<smem>>
    %c120 = arith.constant 120 : index
    %120 = memref.load %arg2[%c120] : memref<288xf32, #tpu.memory_space<smem>>
    %c121 = arith.constant 121 : index
    %121 = memref.load %arg2[%c121] : memref<288xf32, #tpu.memory_space<smem>>
    %c122 = arith.constant 122 : index
    %122 = memref.load %arg2[%c122] : memref<288xf32, #tpu.memory_space<smem>>
    %c123 = arith.constant 123 : index
    %123 = memref.load %arg2[%c123] : memref<288xf32, #tpu.memory_space<smem>>
    %c124 = arith.constant 124 : index
    %124 = memref.load %arg2[%c124] : memref<288xf32, #tpu.memory_space<smem>>
    %c125 = arith.constant 125 : index
    %125 = memref.load %arg2[%c125] : memref<288xf32, #tpu.memory_space<smem>>
    %c126 = arith.constant 126 : index
    %126 = memref.load %arg2[%c126] : memref<288xf32, #tpu.memory_space<smem>>
    %c127 = arith.constant 127 : index
    %127 = memref.load %arg2[%c127] : memref<288xf32, #tpu.memory_space<smem>>
    %c128 = arith.constant 128 : index
    %128 = memref.load %arg2[%c128] : memref<288xf32, #tpu.memory_space<smem>>
    %c129 = arith.constant 129 : index
    %129 = memref.load %arg2[%c129] : memref<288xf32, #tpu.memory_space<smem>>
    %c130 = arith.constant 130 : index
    %130 = memref.load %arg2[%c130] : memref<288xf32, #tpu.memory_space<smem>>
    %c131 = arith.constant 131 : index
    %131 = memref.load %arg2[%c131] : memref<288xf32, #tpu.memory_space<smem>>
    %c132 = arith.constant 132 : index
    %132 = memref.load %arg2[%c132] : memref<288xf32, #tpu.memory_space<smem>>
    %c133 = arith.constant 133 : index
    %133 = memref.load %arg2[%c133] : memref<288xf32, #tpu.memory_space<smem>>
    %c134 = arith.constant 134 : index
    %134 = memref.load %arg2[%c134] : memref<288xf32, #tpu.memory_space<smem>>
    %c135 = arith.constant 135 : index
    %135 = memref.load %arg2[%c135] : memref<288xf32, #tpu.memory_space<smem>>
    %c136 = arith.constant 136 : index
    %136 = memref.load %arg2[%c136] : memref<288xf32, #tpu.memory_space<smem>>
    %c137 = arith.constant 137 : index
    %137 = memref.load %arg2[%c137] : memref<288xf32, #tpu.memory_space<smem>>
    %c138 = arith.constant 138 : index
    %138 = memref.load %arg2[%c138] : memref<288xf32, #tpu.memory_space<smem>>
    %c139 = arith.constant 139 : index
    %139 = memref.load %arg2[%c139] : memref<288xf32, #tpu.memory_space<smem>>
    %c140 = arith.constant 140 : index
    %140 = memref.load %arg2[%c140] : memref<288xf32, #tpu.memory_space<smem>>
    %c141 = arith.constant 141 : index
    %141 = memref.load %arg2[%c141] : memref<288xf32, #tpu.memory_space<smem>>
    %c142 = arith.constant 142 : index
    %142 = memref.load %arg2[%c142] : memref<288xf32, #tpu.memory_space<smem>>
    %c143 = arith.constant 143 : index
    %143 = memref.load %arg2[%c143] : memref<288xf32, #tpu.memory_space<smem>>
    %c144 = arith.constant 144 : index
    %144 = memref.load %arg2[%c144] : memref<288xf32, #tpu.memory_space<smem>>
    %c145 = arith.constant 145 : index
    %145 = memref.load %arg2[%c145] : memref<288xf32, #tpu.memory_space<smem>>
    %c146 = arith.constant 146 : index
    %146 = memref.load %arg2[%c146] : memref<288xf32, #tpu.memory_space<smem>>
    %c147 = arith.constant 147 : index
    %147 = memref.load %arg2[%c147] : memref<288xf32, #tpu.memory_space<smem>>
    %c148 = arith.constant 148 : index
    %148 = memref.load %arg2[%c148] : memref<288xf32, #tpu.memory_space<smem>>
    %c149 = arith.constant 149 : index
    %149 = memref.load %arg2[%c149] : memref<288xf32, #tpu.memory_space<smem>>
    %c150 = arith.constant 150 : index
    %150 = memref.load %arg2[%c150] : memref<288xf32, #tpu.memory_space<smem>>
    %c151 = arith.constant 151 : index
    %151 = memref.load %arg2[%c151] : memref<288xf32, #tpu.memory_space<smem>>
    %c152 = arith.constant 152 : index
    %152 = memref.load %arg2[%c152] : memref<288xf32, #tpu.memory_space<smem>>
    %c153 = arith.constant 153 : index
    %153 = memref.load %arg2[%c153] : memref<288xf32, #tpu.memory_space<smem>>
    %c154 = arith.constant 154 : index
    %154 = memref.load %arg2[%c154] : memref<288xf32, #tpu.memory_space<smem>>
    %c155 = arith.constant 155 : index
    %155 = memref.load %arg2[%c155] : memref<288xf32, #tpu.memory_space<smem>>
    %c156 = arith.constant 156 : index
    %156 = memref.load %arg2[%c156] : memref<288xf32, #tpu.memory_space<smem>>
    %c157 = arith.constant 157 : index
    %157 = memref.load %arg2[%c157] : memref<288xf32, #tpu.memory_space<smem>>
    %c158 = arith.constant 158 : index
    %158 = memref.load %arg2[%c158] : memref<288xf32, #tpu.memory_space<smem>>
    %c159 = arith.constant 159 : index
    %159 = memref.load %arg2[%c159] : memref<288xf32, #tpu.memory_space<smem>>
    %c160 = arith.constant 160 : index
    %160 = memref.load %arg2[%c160] : memref<288xf32, #tpu.memory_space<smem>>
    %c161 = arith.constant 161 : index
    %161 = memref.load %arg2[%c161] : memref<288xf32, #tpu.memory_space<smem>>
    %c162 = arith.constant 162 : index
    %162 = memref.load %arg2[%c162] : memref<288xf32, #tpu.memory_space<smem>>
    %c163 = arith.constant 163 : index
    %163 = memref.load %arg2[%c163] : memref<288xf32, #tpu.memory_space<smem>>
    %c164 = arith.constant 164 : index
    %164 = memref.load %arg2[%c164] : memref<288xf32, #tpu.memory_space<smem>>
    %c165 = arith.constant 165 : index
    %165 = memref.load %arg2[%c165] : memref<288xf32, #tpu.memory_space<smem>>
    %c166 = arith.constant 166 : index
    %166 = memref.load %arg2[%c166] : memref<288xf32, #tpu.memory_space<smem>>
    %c167 = arith.constant 167 : index
    %167 = memref.load %arg2[%c167] : memref<288xf32, #tpu.memory_space<smem>>
    %c168 = arith.constant 168 : index
    %168 = memref.load %arg2[%c168] : memref<288xf32, #tpu.memory_space<smem>>
    %c169 = arith.constant 169 : index
    %169 = memref.load %arg2[%c169] : memref<288xf32, #tpu.memory_space<smem>>
    %c170 = arith.constant 170 : index
    %170 = memref.load %arg2[%c170] : memref<288xf32, #tpu.memory_space<smem>>
    %c171 = arith.constant 171 : index
    %171 = memref.load %arg2[%c171] : memref<288xf32, #tpu.memory_space<smem>>
    %c172 = arith.constant 172 : index
    %172 = memref.load %arg2[%c172] : memref<288xf32, #tpu.memory_space<smem>>
    %c173 = arith.constant 173 : index
    %173 = memref.load %arg2[%c173] : memref<288xf32, #tpu.memory_space<smem>>
    %c174 = arith.constant 174 : index
    %174 = memref.load %arg2[%c174] : memref<288xf32, #tpu.memory_space<smem>>
    %c175 = arith.constant 175 : index
    %175 = memref.load %arg2[%c175] : memref<288xf32, #tpu.memory_space<smem>>
    %c176 = arith.constant 176 : index
    %176 = memref.load %arg2[%c176] : memref<288xf32, #tpu.memory_space<smem>>
    %c177 = arith.constant 177 : index
    %177 = memref.load %arg2[%c177] : memref<288xf32, #tpu.memory_space<smem>>
    %c178 = arith.constant 178 : index
    %178 = memref.load %arg2[%c178] : memref<288xf32, #tpu.memory_space<smem>>
    %c179 = arith.constant 179 : index
    %179 = memref.load %arg2[%c179] : memref<288xf32, #tpu.memory_space<smem>>
    %c180 = arith.constant 180 : index
    %180 = memref.load %arg2[%c180] : memref<288xf32, #tpu.memory_space<smem>>
    %c181 = arith.constant 181 : index
    %181 = memref.load %arg2[%c181] : memref<288xf32, #tpu.memory_space<smem>>
    %c182 = arith.constant 182 : index
    %182 = memref.load %arg2[%c182] : memref<288xf32, #tpu.memory_space<smem>>
    %c183 = arith.constant 183 : index
    %183 = memref.load %arg2[%c183] : memref<288xf32, #tpu.memory_space<smem>>
    %c184 = arith.constant 184 : index
    %184 = memref.load %arg2[%c184] : memref<288xf32, #tpu.memory_space<smem>>
    %c185 = arith.constant 185 : index
    %185 = memref.load %arg2[%c185] : memref<288xf32, #tpu.memory_space<smem>>
    %c186 = arith.constant 186 : index
    %186 = memref.load %arg2[%c186] : memref<288xf32, #tpu.memory_space<smem>>
    %c187 = arith.constant 187 : index
    %187 = memref.load %arg2[%c187] : memref<288xf32, #tpu.memory_space<smem>>
    %c188 = arith.constant 188 : index
    %188 = memref.load %arg2[%c188] : memref<288xf32, #tpu.memory_space<smem>>
    %c189 = arith.constant 189 : index
    %189 = memref.load %arg2[%c189] : memref<288xf32, #tpu.memory_space<smem>>
    %c190 = arith.constant 190 : index
    %190 = memref.load %arg2[%c190] : memref<288xf32, #tpu.memory_space<smem>>
    %c191 = arith.constant 191 : index
    %191 = memref.load %arg2[%c191] : memref<288xf32, #tpu.memory_space<smem>>
    %c192 = arith.constant 192 : index
    %192 = memref.load %arg2[%c192] : memref<288xf32, #tpu.memory_space<smem>>
    %c193 = arith.constant 193 : index
    %193 = memref.load %arg2[%c193] : memref<288xf32, #tpu.memory_space<smem>>
    %c194 = arith.constant 194 : index
    %194 = memref.load %arg2[%c194] : memref<288xf32, #tpu.memory_space<smem>>
    %c195 = arith.constant 195 : index
    %195 = memref.load %arg2[%c195] : memref<288xf32, #tpu.memory_space<smem>>
    %c196 = arith.constant 196 : index
    %196 = memref.load %arg2[%c196] : memref<288xf32, #tpu.memory_space<smem>>
    %c197 = arith.constant 197 : index
    %197 = memref.load %arg2[%c197] : memref<288xf32, #tpu.memory_space<smem>>
    %c198 = arith.constant 198 : index
    %198 = memref.load %arg2[%c198] : memref<288xf32, #tpu.memory_space<smem>>
    %c199 = arith.constant 199 : index
    %199 = memref.load %arg2[%c199] : memref<288xf32, #tpu.memory_space<smem>>
    %c200 = arith.constant 200 : index
    %200 = memref.load %arg2[%c200] : memref<288xf32, #tpu.memory_space<smem>>
    %c201 = arith.constant 201 : index
    %201 = memref.load %arg2[%c201] : memref<288xf32, #tpu.memory_space<smem>>
    %c202 = arith.constant 202 : index
    %202 = memref.load %arg2[%c202] : memref<288xf32, #tpu.memory_space<smem>>
    %c203 = arith.constant 203 : index
    %203 = memref.load %arg2[%c203] : memref<288xf32, #tpu.memory_space<smem>>
    %c204 = arith.constant 204 : index
    %204 = memref.load %arg2[%c204] : memref<288xf32, #tpu.memory_space<smem>>
    %c205 = arith.constant 205 : index
    %205 = memref.load %arg2[%c205] : memref<288xf32, #tpu.memory_space<smem>>
    %c206 = arith.constant 206 : index
    %206 = memref.load %arg2[%c206] : memref<288xf32, #tpu.memory_space<smem>>
    %c207 = arith.constant 207 : index
    %207 = memref.load %arg2[%c207] : memref<288xf32, #tpu.memory_space<smem>>
    %c208 = arith.constant 208 : index
    %208 = memref.load %arg2[%c208] : memref<288xf32, #tpu.memory_space<smem>>
    %c209 = arith.constant 209 : index
    %209 = memref.load %arg2[%c209] : memref<288xf32, #tpu.memory_space<smem>>
    %c210 = arith.constant 210 : index
    %210 = memref.load %arg2[%c210] : memref<288xf32, #tpu.memory_space<smem>>
    %c211 = arith.constant 211 : index
    %211 = memref.load %arg2[%c211] : memref<288xf32, #tpu.memory_space<smem>>
    %c212 = arith.constant 212 : index
    %212 = memref.load %arg2[%c212] : memref<288xf32, #tpu.memory_space<smem>>
    %c213 = arith.constant 213 : index
    %213 = memref.load %arg2[%c213] : memref<288xf32, #tpu.memory_space<smem>>
    %c214 = arith.constant 214 : index
    %214 = memref.load %arg2[%c214] : memref<288xf32, #tpu.memory_space<smem>>
    %c215 = arith.constant 215 : index
    %215 = memref.load %arg2[%c215] : memref<288xf32, #tpu.memory_space<smem>>
    %c216 = arith.constant 216 : index
    %216 = memref.load %arg2[%c216] : memref<288xf32, #tpu.memory_space<smem>>
    %c217 = arith.constant 217 : index
    %217 = memref.load %arg2[%c217] : memref<288xf32, #tpu.memory_space<smem>>
    %c218 = arith.constant 218 : index
    %218 = memref.load %arg2[%c218] : memref<288xf32, #tpu.memory_space<smem>>
    %c219 = arith.constant 219 : index
    %219 = memref.load %arg2[%c219] : memref<288xf32, #tpu.memory_space<smem>>
    %c220 = arith.constant 220 : index
    %220 = memref.load %arg2[%c220] : memref<288xf32, #tpu.memory_space<smem>>
    %c221 = arith.constant 221 : index
    %221 = memref.load %arg2[%c221] : memref<288xf32, #tpu.memory_space<smem>>
    %c222 = arith.constant 222 : index
    %222 = memref.load %arg2[%c222] : memref<288xf32, #tpu.memory_space<smem>>
    %c223 = arith.constant 223 : index
    %223 = memref.load %arg2[%c223] : memref<288xf32, #tpu.memory_space<smem>>
    %c224 = arith.constant 224 : index
    %224 = memref.load %arg2[%c224] : memref<288xf32, #tpu.memory_space<smem>>
    %c225 = arith.constant 225 : index
    %225 = memref.load %arg2[%c225] : memref<288xf32, #tpu.memory_space<smem>>
    %c226 = arith.constant 226 : index
    %226 = memref.load %arg2[%c226] : memref<288xf32, #tpu.memory_space<smem>>
    %c227 = arith.constant 227 : index
    %227 = memref.load %arg2[%c227] : memref<288xf32, #tpu.memory_space<smem>>
    %c228 = arith.constant 228 : index
    %228 = memref.load %arg2[%c228] : memref<288xf32, #tpu.memory_space<smem>>
    %c229 = arith.constant 229 : index
    %229 = memref.load %arg2[%c229] : memref<288xf32, #tpu.memory_space<smem>>
    %c230 = arith.constant 230 : index
    %230 = memref.load %arg2[%c230] : memref<288xf32, #tpu.memory_space<smem>>
    %c231 = arith.constant 231 : index
    %231 = memref.load %arg2[%c231] : memref<288xf32, #tpu.memory_space<smem>>
    %c232 = arith.constant 232 : index
    %232 = memref.load %arg2[%c232] : memref<288xf32, #tpu.memory_space<smem>>
    %c233 = arith.constant 233 : index
    %233 = memref.load %arg2[%c233] : memref<288xf32, #tpu.memory_space<smem>>
    %c234 = arith.constant 234 : index
    %234 = memref.load %arg2[%c234] : memref<288xf32, #tpu.memory_space<smem>>
    %c235 = arith.constant 235 : index
    %235 = memref.load %arg2[%c235] : memref<288xf32, #tpu.memory_space<smem>>
    %c236 = arith.constant 236 : index
    %236 = memref.load %arg2[%c236] : memref<288xf32, #tpu.memory_space<smem>>
    %c237 = arith.constant 237 : index
    %237 = memref.load %arg2[%c237] : memref<288xf32, #tpu.memory_space<smem>>
    %c238 = arith.constant 238 : index
    %238 = memref.load %arg2[%c238] : memref<288xf32, #tpu.memory_space<smem>>
    %c239 = arith.constant 239 : index
    %239 = memref.load %arg2[%c239] : memref<288xf32, #tpu.memory_space<smem>>
    %c240 = arith.constant 240 : index
    %240 = memref.load %arg2[%c240] : memref<288xf32, #tpu.memory_space<smem>>
    %c241 = arith.constant 241 : index
    %241 = memref.load %arg2[%c241] : memref<288xf32, #tpu.memory_space<smem>>
    %c242 = arith.constant 242 : index
    %242 = memref.load %arg2[%c242] : memref<288xf32, #tpu.memory_space<smem>>
    %c243 = arith.constant 243 : index
    %243 = memref.load %arg2[%c243] : memref<288xf32, #tpu.memory_space<smem>>
    %c244 = arith.constant 244 : index
    %244 = memref.load %arg2[%c244] : memref<288xf32, #tpu.memory_space<smem>>
    %c245 = arith.constant 245 : index
    %245 = memref.load %arg2[%c245] : memref<288xf32, #tpu.memory_space<smem>>
    %c246 = arith.constant 246 : index
    %246 = memref.load %arg2[%c246] : memref<288xf32, #tpu.memory_space<smem>>
    %c247 = arith.constant 247 : index
    %247 = memref.load %arg2[%c247] : memref<288xf32, #tpu.memory_space<smem>>
    %c248 = arith.constant 248 : index
    %248 = memref.load %arg2[%c248] : memref<288xf32, #tpu.memory_space<smem>>
    %c249 = arith.constant 249 : index
    %249 = memref.load %arg2[%c249] : memref<288xf32, #tpu.memory_space<smem>>
    %c250 = arith.constant 250 : index
    %250 = memref.load %arg2[%c250] : memref<288xf32, #tpu.memory_space<smem>>
    %c251 = arith.constant 251 : index
    %251 = memref.load %arg2[%c251] : memref<288xf32, #tpu.memory_space<smem>>
    %c252 = arith.constant 252 : index
    %252 = memref.load %arg2[%c252] : memref<288xf32, #tpu.memory_space<smem>>
    %c253 = arith.constant 253 : index
    %253 = memref.load %arg2[%c253] : memref<288xf32, #tpu.memory_space<smem>>
    %c254 = arith.constant 254 : index
    %254 = memref.load %arg2[%c254] : memref<288xf32, #tpu.memory_space<smem>>
    %c255 = arith.constant 255 : index
    %255 = memref.load %arg2[%c255] : memref<288xf32, #tpu.memory_space<smem>>
    %c256 = arith.constant 256 : index
    %256 = memref.load %arg2[%c256] : memref<288xf32, #tpu.memory_space<smem>>
    %c257 = arith.constant 257 : index
    %257 = memref.load %arg2[%c257] : memref<288xf32, #tpu.memory_space<smem>>
    %c258 = arith.constant 258 : index
    %258 = memref.load %arg2[%c258] : memref<288xf32, #tpu.memory_space<smem>>
    %c259 = arith.constant 259 : index
    %259 = memref.load %arg2[%c259] : memref<288xf32, #tpu.memory_space<smem>>
    %c260 = arith.constant 260 : index
    %260 = memref.load %arg2[%c260] : memref<288xf32, #tpu.memory_space<smem>>
    %c261 = arith.constant 261 : index
    %261 = memref.load %arg2[%c261] : memref<288xf32, #tpu.memory_space<smem>>
    %c262 = arith.constant 262 : index
    %262 = memref.load %arg2[%c262] : memref<288xf32, #tpu.memory_space<smem>>
    %c263 = arith.constant 263 : index
    %263 = memref.load %arg2[%c263] : memref<288xf32, #tpu.memory_space<smem>>
    %c264 = arith.constant 264 : index
    %264 = memref.load %arg2[%c264] : memref<288xf32, #tpu.memory_space<smem>>
    %c265 = arith.constant 265 : index
    %265 = memref.load %arg2[%c265] : memref<288xf32, #tpu.memory_space<smem>>
    %c266 = arith.constant 266 : index
    %266 = memref.load %arg2[%c266] : memref<288xf32, #tpu.memory_space<smem>>
    %c267 = arith.constant 267 : index
    %267 = memref.load %arg2[%c267] : memref<288xf32, #tpu.memory_space<smem>>
    %c268 = arith.constant 268 : index
    %268 = memref.load %arg2[%c268] : memref<288xf32, #tpu.memory_space<smem>>
    %c269 = arith.constant 269 : index
    %269 = memref.load %arg2[%c269] : memref<288xf32, #tpu.memory_space<smem>>
    %c270 = arith.constant 270 : index
    %270 = memref.load %arg2[%c270] : memref<288xf32, #tpu.memory_space<smem>>
    %c271 = arith.constant 271 : index
    %271 = memref.load %arg2[%c271] : memref<288xf32, #tpu.memory_space<smem>>
    %c272 = arith.constant 272 : index
    %272 = memref.load %arg2[%c272] : memref<288xf32, #tpu.memory_space<smem>>
    %c273 = arith.constant 273 : index
    %273 = memref.load %arg2[%c273] : memref<288xf32, #tpu.memory_space<smem>>
    %c274 = arith.constant 274 : index
    %274 = memref.load %arg2[%c274] : memref<288xf32, #tpu.memory_space<smem>>
    %c275 = arith.constant 275 : index
    %275 = memref.load %arg2[%c275] : memref<288xf32, #tpu.memory_space<smem>>
    %c276 = arith.constant 276 : index
    %276 = memref.load %arg2[%c276] : memref<288xf32, #tpu.memory_space<smem>>
    %c277 = arith.constant 277 : index
    %277 = memref.load %arg2[%c277] : memref<288xf32, #tpu.memory_space<smem>>
    %c278 = arith.constant 278 : index
    %278 = memref.load %arg2[%c278] : memref<288xf32, #tpu.memory_space<smem>>
    %c279 = arith.constant 279 : index
    %279 = memref.load %arg2[%c279] : memref<288xf32, #tpu.memory_space<smem>>
    %c280 = arith.constant 280 : index
    %280 = memref.load %arg2[%c280] : memref<288xf32, #tpu.memory_space<smem>>
    %c281 = arith.constant 281 : index
    %281 = memref.load %arg2[%c281] : memref<288xf32, #tpu.memory_space<smem>>
    %c282 = arith.constant 282 : index
    %282 = memref.load %arg2[%c282] : memref<288xf32, #tpu.memory_space<smem>>
    %c283 = arith.constant 283 : index
    %283 = memref.load %arg2[%c283] : memref<288xf32, #tpu.memory_space<smem>>
    %c284 = arith.constant 284 : index
    %284 = memref.load %arg2[%c284] : memref<288xf32, #tpu.memory_space<smem>>
    %c285 = arith.constant 285 : index
    %285 = memref.load %arg2[%c285] : memref<288xf32, #tpu.memory_space<smem>>
    %c286 = arith.constant 286 : index
    %286 = memref.load %arg2[%c286] : memref<288xf32, #tpu.memory_space<smem>>
    %c287 = arith.constant 287 : index
    %287 = memref.load %arg2[%c287] : memref<288xf32, #tpu.memory_space<smem>>
    %c0_0 = arith.constant 0 : index
    %288 = memref.load %arg3[%c0_0] : memref<8xf32, #tpu.memory_space<smem>>
    %c1_1 = arith.constant 1 : index
    %289 = memref.load %arg3[%c1_1] : memref<8xf32, #tpu.memory_space<smem>>
    %c2_2 = arith.constant 2 : index
    %290 = memref.load %arg3[%c2_2] : memref<8xf32, #tpu.memory_space<smem>>
    %c3_3 = arith.constant 3 : index
    %291 = memref.load %arg3[%c3_3] : memref<8xf32, #tpu.memory_space<smem>>
    %c4_4 = arith.constant 4 : index
    %292 = memref.load %arg3[%c4_4] : memref<8xf32, #tpu.memory_space<smem>>
    %c5_5 = arith.constant 5 : index
    %293 = memref.load %arg3[%c5_5] : memref<8xf32, #tpu.memory_space<smem>>
    %c6_6 = arith.constant 6 : index
    %294 = memref.load %arg3[%c6_6] : memref<8xf32, #tpu.memory_space<smem>>
    %c7_7 = arith.constant 7 : index
    %295 = memref.load %arg3[%c7_7] : memref<8xf32, #tpu.memory_space<smem>>
    %c0_8 = arith.constant 0 : index
    %296 = memref.load %arg4[%c0_8] : memref<8xf32, #tpu.memory_space<smem>>
    %c1_9 = arith.constant 1 : index
    %297 = memref.load %arg4[%c1_9] : memref<8xf32, #tpu.memory_space<smem>>
    %c2_10 = arith.constant 2 : index
    %298 = memref.load %arg4[%c2_10] : memref<8xf32, #tpu.memory_space<smem>>
    %c3_11 = arith.constant 3 : index
    %299 = memref.load %arg4[%c3_11] : memref<8xf32, #tpu.memory_space<smem>>
    %c4_12 = arith.constant 4 : index
    %300 = memref.load %arg4[%c4_12] : memref<8xf32, #tpu.memory_space<smem>>
    %c5_13 = arith.constant 5 : index
    %301 = memref.load %arg4[%c5_13] : memref<8xf32, #tpu.memory_space<smem>>
    %c6_14 = arith.constant 6 : index
    %302 = memref.load %arg4[%c6_14] : memref<8xf32, #tpu.memory_space<smem>>
    %c7_15 = arith.constant 7 : index
    %303 = memref.load %arg4[%c7_15] : memref<8xf32, #tpu.memory_space<smem>>
    %cst = arith.constant 0.000000e+00 : f32
    %304 = vector.broadcast %cst : f32 to vector<16x16xf32>
    %cst_16 = arith.constant 0.000000e+00 : f32
    %305 = vector.broadcast %cst_16 : f32 to vector<16x16xf32>
    %cst_17 = arith.constant 0.000000e+00 : f32
    %306 = vector.broadcast %cst_17 : f32 to vector<16x16xf32>
    %cst_18 = arith.constant 0.000000e+00 : f32
    %307 = vector.broadcast %cst_18 : f32 to vector<16x16xf32>
    %cst_19 = arith.constant 0.000000e+00 : f32
    %308 = vector.broadcast %cst_19 : f32 to vector<16x16xf32>
    %cst_20 = arith.constant 0.000000e+00 : f32
    %309 = vector.broadcast %cst_20 : f32 to vector<16x16xf32>
    %cst_21 = arith.constant 0.000000e+00 : f32
    %310 = vector.broadcast %cst_21 : f32 to vector<16x16xf32>
    %cst_22 = arith.constant 0.000000e+00 : f32
    %311 = vector.broadcast %cst_22 : f32 to vector<16x16xf32>
    %c0_23 = arith.constant 0 : index
    %c0_24 = arith.constant 0 : index
    %c0_25 = arith.constant 0 : index
    %c0_26 = arith.constant 0 : index
    %312 = vector.load %arg1[%c0_23, %c0_24, %c0_25, %c0_26] : memref<1x4x18x18xf32, #tpu.memory_space<vmem>>, vector<1x1x18x18xf32>
    %313 = vector.shape_cast %312 : vector<1x1x18x18xf32> to vector<18x18xf32>
    %314 = vector.extract_strided_slice %313 {offsets = [0, 0], sizes = [16, 16], strides = [1, 1]} : vector<18x18xf32> to vector<16x16xf32>
    %315 = vector.broadcast %0 : f32 to vector<16x16xf32>
    %316 = arith.mulf %315, %314 : vector<16x16xf32>
    %317 = arith.addf %304, %316 : vector<16x16xf32>
    %318 = vector.broadcast %36 : f32 to vector<16x16xf32>
    %319 = arith.mulf %318, %314 : vector<16x16xf32>
    %320 = arith.addf %305, %319 : vector<16x16xf32>
    %321 = vector.broadcast %72 : f32 to vector<16x16xf32>
    %322 = arith.mulf %321, %314 : vector<16x16xf32>
    %323 = arith.addf %306, %322 : vector<16x16xf32>
    %324 = vector.broadcast %108 : f32 to vector<16x16xf32>
    %325 = arith.mulf %324, %314 : vector<16x16xf32>
    %326 = arith.addf %307, %325 : vector<16x16xf32>
    %327 = vector.broadcast %144 : f32 to vector<16x16xf32>
    %328 = arith.mulf %327, %314 : vector<16x16xf32>
    %329 = arith.addf %308, %328 : vector<16x16xf32>
    %330 = vector.broadcast %180 : f32 to vector<16x16xf32>
    %331 = arith.mulf %330, %314 : vector<16x16xf32>
    %332 = arith.addf %309, %331 : vector<16x16xf32>
    %333 = vector.broadcast %216 : f32 to vector<16x16xf32>
    %334 = arith.mulf %333, %314 : vector<16x16xf32>
    %335 = arith.addf %310, %334 : vector<16x16xf32>
    %336 = vector.broadcast %252 : f32 to vector<16x16xf32>
    %337 = arith.mulf %336, %314 : vector<16x16xf32>
    %338 = arith.addf %311, %337 : vector<16x16xf32>
    %339 = vector.extract_strided_slice %313 {offsets = [0, 1], sizes = [16, 16], strides = [1, 1]} : vector<18x18xf32> to vector<16x16xf32>
    %340 = vector.broadcast %1 : f32 to vector<16x16xf32>
    %341 = arith.mulf %340, %339 : vector<16x16xf32>
    %342 = arith.addf %317, %341 : vector<16x16xf32>
    %343 = vector.broadcast %37 : f32 to vector<16x16xf32>
    %344 = arith.mulf %343, %339 : vector<16x16xf32>
    %345 = arith.addf %320, %344 : vector<16x16xf32>
    %346 = vector.broadcast %73 : f32 to vector<16x16xf32>
    %347 = arith.mulf %346, %339 : vector<16x16xf32>
    %348 = arith.addf %323, %347 : vector<16x16xf32>
    %349 = vector.broadcast %109 : f32 to vector<16x16xf32>
    %350 = arith.mulf %349, %339 : vector<16x16xf32>
    %351 = arith.addf %326, %350 : vector<16x16xf32>
    %352 = vector.broadcast %145 : f32 to vector<16x16xf32>
    %353 = arith.mulf %352, %339 : vector<16x16xf32>
    %354 = arith.addf %329, %353 : vector<16x16xf32>
    %355 = vector.broadcast %181 : f32 to vector<16x16xf32>
    %356 = arith.mulf %355, %339 : vector<16x16xf32>
    %357 = arith.addf %332, %356 : vector<16x16xf32>
    %358 = vector.broadcast %217 : f32 to vector<16x16xf32>
    %359 = arith.mulf %358, %339 : vector<16x16xf32>
    %360 = arith.addf %335, %359 : vector<16x16xf32>
    %361 = vector.broadcast %253 : f32 to vector<16x16xf32>
    %362 = arith.mulf %361, %339 : vector<16x16xf32>
    %363 = arith.addf %338, %362 : vector<16x16xf32>
    %364 = vector.extract_strided_slice %313 {offsets = [0, 2], sizes = [16, 16], strides = [1, 1]} : vector<18x18xf32> to vector<16x16xf32>
    %365 = vector.broadcast %2 : f32 to vector<16x16xf32>
    %366 = arith.mulf %365, %364 : vector<16x16xf32>
    %367 = arith.addf %342, %366 : vector<16x16xf32>
    %368 = vector.broadcast %38 : f32 to vector<16x16xf32>
    %369 = arith.mulf %368, %364 : vector<16x16xf32>
    %370 = arith.addf %345, %369 : vector<16x16xf32>
    %371 = vector.broadcast %74 : f32 to vector<16x16xf32>
    %372 = arith.mulf %371, %364 : vector<16x16xf32>
    %373 = arith.addf %348, %372 : vector<16x16xf32>
    %374 = vector.broadcast %110 : f32 to vector<16x16xf32>
    %375 = arith.mulf %374, %364 : vector<16x16xf32>
    %376 = arith.addf %351, %375 : vector<16x16xf32>
    %377 = vector.broadcast %146 : f32 to vector<16x16xf32>
    %378 = arith.mulf %377, %364 : vector<16x16xf32>
    %379 = arith.addf %354, %378 : vector<16x16xf32>
    %380 = vector.broadcast %182 : f32 to vector<16x16xf32>
    %381 = arith.mulf %380, %364 : vector<16x16xf32>
    %382 = arith.addf %357, %381 : vector<16x16xf32>
    %383 = vector.broadcast %218 : f32 to vector<16x16xf32>
    %384 = arith.mulf %383, %364 : vector<16x16xf32>
    %385 = arith.addf %360, %384 : vector<16x16xf32>
    %386 = vector.broadcast %254 : f32 to vector<16x16xf32>
    %387 = arith.mulf %386, %364 : vector<16x16xf32>
    %388 = arith.addf %363, %387 : vector<16x16xf32>
    %389 = vector.extract_strided_slice %313 {offsets = [1, 0], sizes = [16, 16], strides = [1, 1]} : vector<18x18xf32> to vector<16x16xf32>
    %390 = vector.broadcast %3 : f32 to vector<16x16xf32>
    %391 = arith.mulf %390, %389 : vector<16x16xf32>
    %392 = arith.addf %367, %391 : vector<16x16xf32>
    %393 = vector.broadcast %39 : f32 to vector<16x16xf32>
    %394 = arith.mulf %393, %389 : vector<16x16xf32>
    %395 = arith.addf %370, %394 : vector<16x16xf32>
    %396 = vector.broadcast %75 : f32 to vector<16x16xf32>
    %397 = arith.mulf %396, %389 : vector<16x16xf32>
    %398 = arith.addf %373, %397 : vector<16x16xf32>
    %399 = vector.broadcast %111 : f32 to vector<16x16xf32>
    %400 = arith.mulf %399, %389 : vector<16x16xf32>
    %401 = arith.addf %376, %400 : vector<16x16xf32>
    %402 = vector.broadcast %147 : f32 to vector<16x16xf32>
    %403 = arith.mulf %402, %389 : vector<16x16xf32>
    %404 = arith.addf %379, %403 : vector<16x16xf32>
    %405 = vector.broadcast %183 : f32 to vector<16x16xf32>
    %406 = arith.mulf %405, %389 : vector<16x16xf32>
    %407 = arith.addf %382, %406 : vector<16x16xf32>
    %408 = vector.broadcast %219 : f32 to vector<16x16xf32>
    %409 = arith.mulf %408, %389 : vector<16x16xf32>
    %410 = arith.addf %385, %409 : vector<16x16xf32>
    %411 = vector.broadcast %255 : f32 to vector<16x16xf32>
    %412 = arith.mulf %411, %389 : vector<16x16xf32>
    %413 = arith.addf %388, %412 : vector<16x16xf32>
    %414 = vector.extract_strided_slice %313 {offsets = [1, 1], sizes = [16, 16], strides = [1, 1]} : vector<18x18xf32> to vector<16x16xf32>
    %415 = vector.broadcast %4 : f32 to vector<16x16xf32>
    %416 = arith.mulf %415, %414 : vector<16x16xf32>
    %417 = arith.addf %392, %416 : vector<16x16xf32>
    %418 = vector.broadcast %40 : f32 to vector<16x16xf32>
    %419 = arith.mulf %418, %414 : vector<16x16xf32>
    %420 = arith.addf %395, %419 : vector<16x16xf32>
    %421 = vector.broadcast %76 : f32 to vector<16x16xf32>
    %422 = arith.mulf %421, %414 : vector<16x16xf32>
    %423 = arith.addf %398, %422 : vector<16x16xf32>
    %424 = vector.broadcast %112 : f32 to vector<16x16xf32>
    %425 = arith.mulf %424, %414 : vector<16x16xf32>
    %426 = arith.addf %401, %425 : vector<16x16xf32>
    %427 = vector.broadcast %148 : f32 to vector<16x16xf32>
    %428 = arith.mulf %427, %414 : vector<16x16xf32>
    %429 = arith.addf %404, %428 : vector<16x16xf32>
    %430 = vector.broadcast %184 : f32 to vector<16x16xf32>
    %431 = arith.mulf %430, %414 : vector<16x16xf32>
    %432 = arith.addf %407, %431 : vector<16x16xf32>
    %433 = vector.broadcast %220 : f32 to vector<16x16xf32>
    %434 = arith.mulf %433, %414 : vector<16x16xf32>
    %435 = arith.addf %410, %434 : vector<16x16xf32>
    %436 = vector.broadcast %256 : f32 to vector<16x16xf32>
    %437 = arith.mulf %436, %414 : vector<16x16xf32>
    %438 = arith.addf %413, %437 : vector<16x16xf32>
    %439 = vector.extract_strided_slice %313 {offsets = [1, 2], sizes = [16, 16], strides = [1, 1]} : vector<18x18xf32> to vector<16x16xf32>
    %440 = vector.broadcast %5 : f32 to vector<16x16xf32>
    %441 = arith.mulf %440, %439 : vector<16x16xf32>
    %442 = arith.addf %417, %441 : vector<16x16xf32>
    %443 = vector.broadcast %41 : f32 to vector<16x16xf32>
    %444 = arith.mulf %443, %439 : vector<16x16xf32>
    %445 = arith.addf %420, %444 : vector<16x16xf32>
    %446 = vector.broadcast %77 : f32 to vector<16x16xf32>
    %447 = arith.mulf %446, %439 : vector<16x16xf32>
    %448 = arith.addf %423, %447 : vector<16x16xf32>
    %449 = vector.broadcast %113 : f32 to vector<16x16xf32>
    %450 = arith.mulf %449, %439 : vector<16x16xf32>
    %451 = arith.addf %426, %450 : vector<16x16xf32>
    %452 = vector.broadcast %149 : f32 to vector<16x16xf32>
    %453 = arith.mulf %452, %439 : vector<16x16xf32>
    %454 = arith.addf %429, %453 : vector<16x16xf32>
    %455 = vector.broadcast %185 : f32 to vector<16x16xf32>
    %456 = arith.mulf %455, %439 : vector<16x16xf32>
    %457 = arith.addf %432, %456 : vector<16x16xf32>
    %458 = vector.broadcast %221 : f32 to vector<16x16xf32>
    %459 = arith.mulf %458, %439 : vector<16x16xf32>
    %460 = arith.addf %435, %459 : vector<16x16xf32>
    %461 = vector.broadcast %257 : f32 to vector<16x16xf32>
    %462 = arith.mulf %461, %439 : vector<16x16xf32>
    %463 = arith.addf %438, %462 : vector<16x16xf32>
    %464 = vector.extract_strided_slice %313 {offsets = [2, 0], sizes = [16, 16], strides = [1, 1]} : vector<18x18xf32> to vector<16x16xf32>
    %465 = vector.broadcast %6 : f32 to vector<16x16xf32>
    %466 = arith.mulf %465, %464 : vector<16x16xf32>
    %467 = arith.addf %442, %466 : vector<16x16xf32>
    %468 = vector.broadcast %42 : f32 to vector<16x16xf32>
    %469 = arith.mulf %468, %464 : vector<16x16xf32>
    %470 = arith.addf %445, %469 : vector<16x16xf32>
    %471 = vector.broadcast %78 : f32 to vector<16x16xf32>
    %472 = arith.mulf %471, %464 : vector<16x16xf32>
    %473 = arith.addf %448, %472 : vector<16x16xf32>
    %474 = vector.broadcast %114 : f32 to vector<16x16xf32>
    %475 = arith.mulf %474, %464 : vector<16x16xf32>
    %476 = arith.addf %451, %475 : vector<16x16xf32>
    %477 = vector.broadcast %150 : f32 to vector<16x16xf32>
    %478 = arith.mulf %477, %464 : vector<16x16xf32>
    %479 = arith.addf %454, %478 : vector<16x16xf32>
    %480 = vector.broadcast %186 : f32 to vector<16x16xf32>
    %481 = arith.mulf %480, %464 : vector<16x16xf32>
    %482 = arith.addf %457, %481 : vector<16x16xf32>
    %483 = vector.broadcast %222 : f32 to vector<16x16xf32>
    %484 = arith.mulf %483, %464 : vector<16x16xf32>
    %485 = arith.addf %460, %484 : vector<16x16xf32>
    %486 = vector.broadcast %258 : f32 to vector<16x16xf32>
    %487 = arith.mulf %486, %464 : vector<16x16xf32>
    %488 = arith.addf %463, %487 : vector<16x16xf32>
    %489 = vector.extract_strided_slice %313 {offsets = [2, 1], sizes = [16, 16], strides = [1, 1]} : vector<18x18xf32> to vector<16x16xf32>
    %490 = vector.broadcast %7 : f32 to vector<16x16xf32>
    %491 = arith.mulf %490, %489 : vector<16x16xf32>
    %492 = arith.addf %467, %491 : vector<16x16xf32>
    %493 = vector.broadcast %43 : f32 to vector<16x16xf32>
    %494 = arith.mulf %493, %489 : vector<16x16xf32>
    %495 = arith.addf %470, %494 : vector<16x16xf32>
    %496 = vector.broadcast %79 : f32 to vector<16x16xf32>
    %497 = arith.mulf %496, %489 : vector<16x16xf32>
    %498 = arith.addf %473, %497 : vector<16x16xf32>
    %499 = vector.broadcast %115 : f32 to vector<16x16xf32>
    %500 = arith.mulf %499, %489 : vector<16x16xf32>
    %501 = arith.addf %476, %500 : vector<16x16xf32>
    %502 = vector.broadcast %151 : f32 to vector<16x16xf32>
    %503 = arith.mulf %502, %489 : vector<16x16xf32>
    %504 = arith.addf %479, %503 : vector<16x16xf32>
    %505 = vector.broadcast %187 : f32 to vector<16x16xf32>
    %506 = arith.mulf %505, %489 : vector<16x16xf32>
    %507 = arith.addf %482, %506 : vector<16x16xf32>
    %508 = vector.broadcast %223 : f32 to vector<16x16xf32>
    %509 = arith.mulf %508, %489 : vector<16x16xf32>
    %510 = arith.addf %485, %509 : vector<16x16xf32>
    %511 = vector.broadcast %259 : f32 to vector<16x16xf32>
    %512 = arith.mulf %511, %489 : vector<16x16xf32>
    %513 = arith.addf %488, %512 : vector<16x16xf32>
    %514 = vector.extract_strided_slice %313 {offsets = [2, 2], sizes = [16, 16], strides = [1, 1]} : vector<18x18xf32> to vector<16x16xf32>
    %515 = vector.broadcast %8 : f32 to vector<16x16xf32>
    %516 = arith.mulf %515, %514 : vector<16x16xf32>
    %517 = arith.addf %492, %516 : vector<16x16xf32>
    %518 = vector.broadcast %44 : f32 to vector<16x16xf32>
    %519 = arith.mulf %518, %514 : vector<16x16xf32>
    %520 = arith.addf %495, %519 : vector<16x16xf32>
    %521 = vector.broadcast %80 : f32 to vector<16x16xf32>
    %522 = arith.mulf %521, %514 : vector<16x16xf32>
    %523 = arith.addf %498, %522 : vector<16x16xf32>
    %524 = vector.broadcast %116 : f32 to vector<16x16xf32>
    %525 = arith.mulf %524, %514 : vector<16x16xf32>
    %526 = arith.addf %501, %525 : vector<16x16xf32>
    %527 = vector.broadcast %152 : f32 to vector<16x16xf32>
    %528 = arith.mulf %527, %514 : vector<16x16xf32>
    %529 = arith.addf %504, %528 : vector<16x16xf32>
    %530 = vector.broadcast %188 : f32 to vector<16x16xf32>
    %531 = arith.mulf %530, %514 : vector<16x16xf32>
    %532 = arith.addf %507, %531 : vector<16x16xf32>
    %533 = vector.broadcast %224 : f32 to vector<16x16xf32>
    %534 = arith.mulf %533, %514 : vector<16x16xf32>
    %535 = arith.addf %510, %534 : vector<16x16xf32>
    %536 = vector.broadcast %260 : f32 to vector<16x16xf32>
    %537 = arith.mulf %536, %514 : vector<16x16xf32>
    %538 = arith.addf %513, %537 : vector<16x16xf32>
    %c0_27 = arith.constant 0 : index
    %c1_28 = arith.constant 1 : index
    %c0_29 = arith.constant 0 : index
    %c0_30 = arith.constant 0 : index
    %539 = vector.load %arg1[%c0_27, %c1_28, %c0_29, %c0_30] : memref<1x4x18x18xf32, #tpu.memory_space<vmem>>, vector<1x1x18x18xf32>
    %540 = vector.shape_cast %539 : vector<1x1x18x18xf32> to vector<18x18xf32>
    %541 = vector.extract_strided_slice %540 {offsets = [0, 0], sizes = [16, 16], strides = [1, 1]} : vector<18x18xf32> to vector<16x16xf32>
    %542 = vector.broadcast %9 : f32 to vector<16x16xf32>
    %543 = arith.mulf %542, %541 : vector<16x16xf32>
    %544 = arith.addf %517, %543 : vector<16x16xf32>
    %545 = vector.broadcast %45 : f32 to vector<16x16xf32>
    %546 = arith.mulf %545, %541 : vector<16x16xf32>
    %547 = arith.addf %520, %546 : vector<16x16xf32>
    %548 = vector.broadcast %81 : f32 to vector<16x16xf32>
    %549 = arith.mulf %548, %541 : vector<16x16xf32>
    %550 = arith.addf %523, %549 : vector<16x16xf32>
    %551 = vector.broadcast %117 : f32 to vector<16x16xf32>
    %552 = arith.mulf %551, %541 : vector<16x16xf32>
    %553 = arith.addf %526, %552 : vector<16x16xf32>
    %554 = vector.broadcast %153 : f32 to vector<16x16xf32>
    %555 = arith.mulf %554, %541 : vector<16x16xf32>
    %556 = arith.addf %529, %555 : vector<16x16xf32>
    %557 = vector.broadcast %189 : f32 to vector<16x16xf32>
    %558 = arith.mulf %557, %541 : vector<16x16xf32>
    %559 = arith.addf %532, %558 : vector<16x16xf32>
    %560 = vector.broadcast %225 : f32 to vector<16x16xf32>
    %561 = arith.mulf %560, %541 : vector<16x16xf32>
    %562 = arith.addf %535, %561 : vector<16x16xf32>
    %563 = vector.broadcast %261 : f32 to vector<16x16xf32>
    %564 = arith.mulf %563, %541 : vector<16x16xf32>
    %565 = arith.addf %538, %564 : vector<16x16xf32>
    %566 = vector.extract_strided_slice %540 {offsets = [0, 1], sizes = [16, 16], strides = [1, 1]} : vector<18x18xf32> to vector<16x16xf32>
    %567 = vector.broadcast %10 : f32 to vector<16x16xf32>
    %568 = arith.mulf %567, %566 : vector<16x16xf32>
    %569 = arith.addf %544, %568 : vector<16x16xf32>
    %570 = vector.broadcast %46 : f32 to vector<16x16xf32>
    %571 = arith.mulf %570, %566 : vector<16x16xf32>
    %572 = arith.addf %547, %571 : vector<16x16xf32>
    %573 = vector.broadcast %82 : f32 to vector<16x16xf32>
    %574 = arith.mulf %573, %566 : vector<16x16xf32>
    %575 = arith.addf %550, %574 : vector<16x16xf32>
    %576 = vector.broadcast %118 : f32 to vector<16x16xf32>
    %577 = arith.mulf %576, %566 : vector<16x16xf32>
    %578 = arith.addf %553, %577 : vector<16x16xf32>
    %579 = vector.broadcast %154 : f32 to vector<16x16xf32>
    %580 = arith.mulf %579, %566 : vector<16x16xf32>
    %581 = arith.addf %556, %580 : vector<16x16xf32>
    %582 = vector.broadcast %190 : f32 to vector<16x16xf32>
    %583 = arith.mulf %582, %566 : vector<16x16xf32>
    %584 = arith.addf %559, %583 : vector<16x16xf32>
    %585 = vector.broadcast %226 : f32 to vector<16x16xf32>
    %586 = arith.mulf %585, %566 : vector<16x16xf32>
    %587 = arith.addf %562, %586 : vector<16x16xf32>
    %588 = vector.broadcast %262 : f32 to vector<16x16xf32>
    %589 = arith.mulf %588, %566 : vector<16x16xf32>
    %590 = arith.addf %565, %589 : vector<16x16xf32>
    %591 = vector.extract_strided_slice %540 {offsets = [0, 2], sizes = [16, 16], strides = [1, 1]} : vector<18x18xf32> to vector<16x16xf32>
    %592 = vector.broadcast %11 : f32 to vector<16x16xf32>
    %593 = arith.mulf %592, %591 : vector<16x16xf32>
    %594 = arith.addf %569, %593 : vector<16x16xf32>
    %595 = vector.broadcast %47 : f32 to vector<16x16xf32>
    %596 = arith.mulf %595, %591 : vector<16x16xf32>
    %597 = arith.addf %572, %596 : vector<16x16xf32>
    %598 = vector.broadcast %83 : f32 to vector<16x16xf32>
    %599 = arith.mulf %598, %591 : vector<16x16xf32>
    %600 = arith.addf %575, %599 : vector<16x16xf32>
    %601 = vector.broadcast %119 : f32 to vector<16x16xf32>
    %602 = arith.mulf %601, %591 : vector<16x16xf32>
    %603 = arith.addf %578, %602 : vector<16x16xf32>
    %604 = vector.broadcast %155 : f32 to vector<16x16xf32>
    %605 = arith.mulf %604, %591 : vector<16x16xf32>
    %606 = arith.addf %581, %605 : vector<16x16xf32>
    %607 = vector.broadcast %191 : f32 to vector<16x16xf32>
    %608 = arith.mulf %607, %591 : vector<16x16xf32>
    %609 = arith.addf %584, %608 : vector<16x16xf32>
    %610 = vector.broadcast %227 : f32 to vector<16x16xf32>
    %611 = arith.mulf %610, %591 : vector<16x16xf32>
    %612 = arith.addf %587, %611 : vector<16x16xf32>
    %613 = vector.broadcast %263 : f32 to vector<16x16xf32>
    %614 = arith.mulf %613, %591 : vector<16x16xf32>
    %615 = arith.addf %590, %614 : vector<16x16xf32>
    %616 = vector.extract_strided_slice %540 {offsets = [1, 0], sizes = [16, 16], strides = [1, 1]} : vector<18x18xf32> to vector<16x16xf32>
    %617 = vector.broadcast %12 : f32 to vector<16x16xf32>
    %618 = arith.mulf %617, %616 : vector<16x16xf32>
    %619 = arith.addf %594, %618 : vector<16x16xf32>
    %620 = vector.broadcast %48 : f32 to vector<16x16xf32>
    %621 = arith.mulf %620, %616 : vector<16x16xf32>
    %622 = arith.addf %597, %621 : vector<16x16xf32>
    %623 = vector.broadcast %84 : f32 to vector<16x16xf32>
    %624 = arith.mulf %623, %616 : vector<16x16xf32>
    %625 = arith.addf %600, %624 : vector<16x16xf32>
    %626 = vector.broadcast %120 : f32 to vector<16x16xf32>
    %627 = arith.mulf %626, %616 : vector<16x16xf32>
    %628 = arith.addf %603, %627 : vector<16x16xf32>
    %629 = vector.broadcast %156 : f32 to vector<16x16xf32>
    %630 = arith.mulf %629, %616 : vector<16x16xf32>
    %631 = arith.addf %606, %630 : vector<16x16xf32>
    %632 = vector.broadcast %192 : f32 to vector<16x16xf32>
    %633 = arith.mulf %632, %616 : vector<16x16xf32>
    %634 = arith.addf %609, %633 : vector<16x16xf32>
    %635 = vector.broadcast %228 : f32 to vector<16x16xf32>
    %636 = arith.mulf %635, %616 : vector<16x16xf32>
    %637 = arith.addf %612, %636 : vector<16x16xf32>
    %638 = vector.broadcast %264 : f32 to vector<16x16xf32>
    %639 = arith.mulf %638, %616 : vector<16x16xf32>
    %640 = arith.addf %615, %639 : vector<16x16xf32>
    %641 = vector.extract_strided_slice %540 {offsets = [1, 1], sizes = [16, 16], strides = [1, 1]} : vector<18x18xf32> to vector<16x16xf32>
    %642 = vector.broadcast %13 : f32 to vector<16x16xf32>
    %643 = arith.mulf %642, %641 : vector<16x16xf32>
    %644 = arith.addf %619, %643 : vector<16x16xf32>
    %645 = vector.broadcast %49 : f32 to vector<16x16xf32>
    %646 = arith.mulf %645, %641 : vector<16x16xf32>
    %647 = arith.addf %622, %646 : vector<16x16xf32>
    %648 = vector.broadcast %85 : f32 to vector<16x16xf32>
    %649 = arith.mulf %648, %641 : vector<16x16xf32>
    %650 = arith.addf %625, %649 : vector<16x16xf32>
    %651 = vector.broadcast %121 : f32 to vector<16x16xf32>
    %652 = arith.mulf %651, %641 : vector<16x16xf32>
    %653 = arith.addf %628, %652 : vector<16x16xf32>
    %654 = vector.broadcast %157 : f32 to vector<16x16xf32>
    %655 = arith.mulf %654, %641 : vector<16x16xf32>
    %656 = arith.addf %631, %655 : vector<16x16xf32>
    %657 = vector.broadcast %193 : f32 to vector<16x16xf32>
    %658 = arith.mulf %657, %641 : vector<16x16xf32>
    %659 = arith.addf %634, %658 : vector<16x16xf32>
    %660 = vector.broadcast %229 : f32 to vector<16x16xf32>
    %661 = arith.mulf %660, %641 : vector<16x16xf32>
    %662 = arith.addf %637, %661 : vector<16x16xf32>
    %663 = vector.broadcast %265 : f32 to vector<16x16xf32>
    %664 = arith.mulf %663, %641 : vector<16x16xf32>
    %665 = arith.addf %640, %664 : vector<16x16xf32>
    %666 = vector.extract_strided_slice %540 {offsets = [1, 2], sizes = [16, 16], strides = [1, 1]} : vector<18x18xf32> to vector<16x16xf32>
    %667 = vector.broadcast %14 : f32 to vector<16x16xf32>
    %668 = arith.mulf %667, %666 : vector<16x16xf32>
    %669 = arith.addf %644, %668 : vector<16x16xf32>
    %670 = vector.broadcast %50 : f32 to vector<16x16xf32>
    %671 = arith.mulf %670, %666 : vector<16x16xf32>
    %672 = arith.addf %647, %671 : vector<16x16xf32>
    %673 = vector.broadcast %86 : f32 to vector<16x16xf32>
    %674 = arith.mulf %673, %666 : vector<16x16xf32>
    %675 = arith.addf %650, %674 : vector<16x16xf32>
    %676 = vector.broadcast %122 : f32 to vector<16x16xf32>
    %677 = arith.mulf %676, %666 : vector<16x16xf32>
    %678 = arith.addf %653, %677 : vector<16x16xf32>
    %679 = vector.broadcast %158 : f32 to vector<16x16xf32>
    %680 = arith.mulf %679, %666 : vector<16x16xf32>
    %681 = arith.addf %656, %680 : vector<16x16xf32>
    %682 = vector.broadcast %194 : f32 to vector<16x16xf32>
    %683 = arith.mulf %682, %666 : vector<16x16xf32>
    %684 = arith.addf %659, %683 : vector<16x16xf32>
    %685 = vector.broadcast %230 : f32 to vector<16x16xf32>
    %686 = arith.mulf %685, %666 : vector<16x16xf32>
    %687 = arith.addf %662, %686 : vector<16x16xf32>
    %688 = vector.broadcast %266 : f32 to vector<16x16xf32>
    %689 = arith.mulf %688, %666 : vector<16x16xf32>
    %690 = arith.addf %665, %689 : vector<16x16xf32>
    %691 = vector.extract_strided_slice %540 {offsets = [2, 0], sizes = [16, 16], strides = [1, 1]} : vector<18x18xf32> to vector<16x16xf32>
    %692 = vector.broadcast %15 : f32 to vector<16x16xf32>
    %693 = arith.mulf %692, %691 : vector<16x16xf32>
    %694 = arith.addf %669, %693 : vector<16x16xf32>
    %695 = vector.broadcast %51 : f32 to vector<16x16xf32>
    %696 = arith.mulf %695, %691 : vector<16x16xf32>
    %697 = arith.addf %672, %696 : vector<16x16xf32>
    %698 = vector.broadcast %87 : f32 to vector<16x16xf32>
    %699 = arith.mulf %698, %691 : vector<16x16xf32>
    %700 = arith.addf %675, %699 : vector<16x16xf32>
    %701 = vector.broadcast %123 : f32 to vector<16x16xf32>
    %702 = arith.mulf %701, %691 : vector<16x16xf32>
    %703 = arith.addf %678, %702 : vector<16x16xf32>
    %704 = vector.broadcast %159 : f32 to vector<16x16xf32>
    %705 = arith.mulf %704, %691 : vector<16x16xf32>
    %706 = arith.addf %681, %705 : vector<16x16xf32>
    %707 = vector.broadcast %195 : f32 to vector<16x16xf32>
    %708 = arith.mulf %707, %691 : vector<16x16xf32>
    %709 = arith.addf %684, %708 : vector<16x16xf32>
    %710 = vector.broadcast %231 : f32 to vector<16x16xf32>
    %711 = arith.mulf %710, %691 : vector<16x16xf32>
    %712 = arith.addf %687, %711 : vector<16x16xf32>
    %713 = vector.broadcast %267 : f32 to vector<16x16xf32>
    %714 = arith.mulf %713, %691 : vector<16x16xf32>
    %715 = arith.addf %690, %714 : vector<16x16xf32>
    %716 = vector.extract_strided_slice %540 {offsets = [2, 1], sizes = [16, 16], strides = [1, 1]} : vector<18x18xf32> to vector<16x16xf32>
    %717 = vector.broadcast %16 : f32 to vector<16x16xf32>
    %718 = arith.mulf %717, %716 : vector<16x16xf32>
    %719 = arith.addf %694, %718 : vector<16x16xf32>
    %720 = vector.broadcast %52 : f32 to vector<16x16xf32>
    %721 = arith.mulf %720, %716 : vector<16x16xf32>
    %722 = arith.addf %697, %721 : vector<16x16xf32>
    %723 = vector.broadcast %88 : f32 to vector<16x16xf32>
    %724 = arith.mulf %723, %716 : vector<16x16xf32>
    %725 = arith.addf %700, %724 : vector<16x16xf32>
    %726 = vector.broadcast %124 : f32 to vector<16x16xf32>
    %727 = arith.mulf %726, %716 : vector<16x16xf32>
    %728 = arith.addf %703, %727 : vector<16x16xf32>
    %729 = vector.broadcast %160 : f32 to vector<16x16xf32>
    %730 = arith.mulf %729, %716 : vector<16x16xf32>
    %731 = arith.addf %706, %730 : vector<16x16xf32>
    %732 = vector.broadcast %196 : f32 to vector<16x16xf32>
    %733 = arith.mulf %732, %716 : vector<16x16xf32>
    %734 = arith.addf %709, %733 : vector<16x16xf32>
    %735 = vector.broadcast %232 : f32 to vector<16x16xf32>
    %736 = arith.mulf %735, %716 : vector<16x16xf32>
    %737 = arith.addf %712, %736 : vector<16x16xf32>
    %738 = vector.broadcast %268 : f32 to vector<16x16xf32>
    %739 = arith.mulf %738, %716 : vector<16x16xf32>
    %740 = arith.addf %715, %739 : vector<16x16xf32>
    %741 = vector.extract_strided_slice %540 {offsets = [2, 2], sizes = [16, 16], strides = [1, 1]} : vector<18x18xf32> to vector<16x16xf32>
    %742 = vector.broadcast %17 : f32 to vector<16x16xf32>
    %743 = arith.mulf %742, %741 : vector<16x16xf32>
    %744 = arith.addf %719, %743 : vector<16x16xf32>
    %745 = vector.broadcast %53 : f32 to vector<16x16xf32>
    %746 = arith.mulf %745, %741 : vector<16x16xf32>
    %747 = arith.addf %722, %746 : vector<16x16xf32>
    %748 = vector.broadcast %89 : f32 to vector<16x16xf32>
    %749 = arith.mulf %748, %741 : vector<16x16xf32>
    %750 = arith.addf %725, %749 : vector<16x16xf32>
    %751 = vector.broadcast %125 : f32 to vector<16x16xf32>
    %752 = arith.mulf %751, %741 : vector<16x16xf32>
    %753 = arith.addf %728, %752 : vector<16x16xf32>
    %754 = vector.broadcast %161 : f32 to vector<16x16xf32>
    %755 = arith.mulf %754, %741 : vector<16x16xf32>
    %756 = arith.addf %731, %755 : vector<16x16xf32>
    %757 = vector.broadcast %197 : f32 to vector<16x16xf32>
    %758 = arith.mulf %757, %741 : vector<16x16xf32>
    %759 = arith.addf %734, %758 : vector<16x16xf32>
    %760 = vector.broadcast %233 : f32 to vector<16x16xf32>
    %761 = arith.mulf %760, %741 : vector<16x16xf32>
    %762 = arith.addf %737, %761 : vector<16x16xf32>
    %763 = vector.broadcast %269 : f32 to vector<16x16xf32>
    %764 = arith.mulf %763, %741 : vector<16x16xf32>
    %765 = arith.addf %740, %764 : vector<16x16xf32>
    %c0_31 = arith.constant 0 : index
    %c2_32 = arith.constant 2 : index
    %c0_33 = arith.constant 0 : index
    %c0_34 = arith.constant 0 : index
    %766 = vector.load %arg1[%c0_31, %c2_32, %c0_33, %c0_34] : memref<1x4x18x18xf32, #tpu.memory_space<vmem>>, vector<1x1x18x18xf32>
    %767 = vector.shape_cast %766 : vector<1x1x18x18xf32> to vector<18x18xf32>
    %768 = vector.extract_strided_slice %767 {offsets = [0, 0], sizes = [16, 16], strides = [1, 1]} : vector<18x18xf32> to vector<16x16xf32>
    %769 = vector.broadcast %18 : f32 to vector<16x16xf32>
    %770 = arith.mulf %769, %768 : vector<16x16xf32>
    %771 = arith.addf %744, %770 : vector<16x16xf32>
    %772 = vector.broadcast %54 : f32 to vector<16x16xf32>
    %773 = arith.mulf %772, %768 : vector<16x16xf32>
    %774 = arith.addf %747, %773 : vector<16x16xf32>
    %775 = vector.broadcast %90 : f32 to vector<16x16xf32>
    %776 = arith.mulf %775, %768 : vector<16x16xf32>
    %777 = arith.addf %750, %776 : vector<16x16xf32>
    %778 = vector.broadcast %126 : f32 to vector<16x16xf32>
    %779 = arith.mulf %778, %768 : vector<16x16xf32>
    %780 = arith.addf %753, %779 : vector<16x16xf32>
    %781 = vector.broadcast %162 : f32 to vector<16x16xf32>
    %782 = arith.mulf %781, %768 : vector<16x16xf32>
    %783 = arith.addf %756, %782 : vector<16x16xf32>
    %784 = vector.broadcast %198 : f32 to vector<16x16xf32>
    %785 = arith.mulf %784, %768 : vector<16x16xf32>
    %786 = arith.addf %759, %785 : vector<16x16xf32>
    %787 = vector.broadcast %234 : f32 to vector<16x16xf32>
    %788 = arith.mulf %787, %768 : vector<16x16xf32>
    %789 = arith.addf %762, %788 : vector<16x16xf32>
    %790 = vector.broadcast %270 : f32 to vector<16x16xf32>
    %791 = arith.mulf %790, %768 : vector<16x16xf32>
    %792 = arith.addf %765, %791 : vector<16x16xf32>
    %793 = vector.extract_strided_slice %767 {offsets = [0, 1], sizes = [16, 16], strides = [1, 1]} : vector<18x18xf32> to vector<16x16xf32>
    %794 = vector.broadcast %19 : f32 to vector<16x16xf32>
    %795 = arith.mulf %794, %793 : vector<16x16xf32>
    %796 = arith.addf %771, %795 : vector<16x16xf32>
    %797 = vector.broadcast %55 : f32 to vector<16x16xf32>
    %798 = arith.mulf %797, %793 : vector<16x16xf32>
    %799 = arith.addf %774, %798 : vector<16x16xf32>
    %800 = vector.broadcast %91 : f32 to vector<16x16xf32>
    %801 = arith.mulf %800, %793 : vector<16x16xf32>
    %802 = arith.addf %777, %801 : vector<16x16xf32>
    %803 = vector.broadcast %127 : f32 to vector<16x16xf32>
    %804 = arith.mulf %803, %793 : vector<16x16xf32>
    %805 = arith.addf %780, %804 : vector<16x16xf32>
    %806 = vector.broadcast %163 : f32 to vector<16x16xf32>
    %807 = arith.mulf %806, %793 : vector<16x16xf32>
    %808 = arith.addf %783, %807 : vector<16x16xf32>
    %809 = vector.broadcast %199 : f32 to vector<16x16xf32>
    %810 = arith.mulf %809, %793 : vector<16x16xf32>
    %811 = arith.addf %786, %810 : vector<16x16xf32>
    %812 = vector.broadcast %235 : f32 to vector<16x16xf32>
    %813 = arith.mulf %812, %793 : vector<16x16xf32>
    %814 = arith.addf %789, %813 : vector<16x16xf32>
    %815 = vector.broadcast %271 : f32 to vector<16x16xf32>
    %816 = arith.mulf %815, %793 : vector<16x16xf32>
    %817 = arith.addf %792, %816 : vector<16x16xf32>
    %818 = vector.extract_strided_slice %767 {offsets = [0, 2], sizes = [16, 16], strides = [1, 1]} : vector<18x18xf32> to vector<16x16xf32>
    %819 = vector.broadcast %20 : f32 to vector<16x16xf32>
    %820 = arith.mulf %819, %818 : vector<16x16xf32>
    %821 = arith.addf %796, %820 : vector<16x16xf32>
    %822 = vector.broadcast %56 : f32 to vector<16x16xf32>
    %823 = arith.mulf %822, %818 : vector<16x16xf32>
    %824 = arith.addf %799, %823 : vector<16x16xf32>
    %825 = vector.broadcast %92 : f32 to vector<16x16xf32>
    %826 = arith.mulf %825, %818 : vector<16x16xf32>
    %827 = arith.addf %802, %826 : vector<16x16xf32>
    %828 = vector.broadcast %128 : f32 to vector<16x16xf32>
    %829 = arith.mulf %828, %818 : vector<16x16xf32>
    %830 = arith.addf %805, %829 : vector<16x16xf32>
    %831 = vector.broadcast %164 : f32 to vector<16x16xf32>
    %832 = arith.mulf %831, %818 : vector<16x16xf32>
    %833 = arith.addf %808, %832 : vector<16x16xf32>
    %834 = vector.broadcast %200 : f32 to vector<16x16xf32>
    %835 = arith.mulf %834, %818 : vector<16x16xf32>
    %836 = arith.addf %811, %835 : vector<16x16xf32>
    %837 = vector.broadcast %236 : f32 to vector<16x16xf32>
    %838 = arith.mulf %837, %818 : vector<16x16xf32>
    %839 = arith.addf %814, %838 : vector<16x16xf32>
    %840 = vector.broadcast %272 : f32 to vector<16x16xf32>
    %841 = arith.mulf %840, %818 : vector<16x16xf32>
    %842 = arith.addf %817, %841 : vector<16x16xf32>
    %843 = vector.extract_strided_slice %767 {offsets = [1, 0], sizes = [16, 16], strides = [1, 1]} : vector<18x18xf32> to vector<16x16xf32>
    %844 = vector.broadcast %21 : f32 to vector<16x16xf32>
    %845 = arith.mulf %844, %843 : vector<16x16xf32>
    %846 = arith.addf %821, %845 : vector<16x16xf32>
    %847 = vector.broadcast %57 : f32 to vector<16x16xf32>
    %848 = arith.mulf %847, %843 : vector<16x16xf32>
    %849 = arith.addf %824, %848 : vector<16x16xf32>
    %850 = vector.broadcast %93 : f32 to vector<16x16xf32>
    %851 = arith.mulf %850, %843 : vector<16x16xf32>
    %852 = arith.addf %827, %851 : vector<16x16xf32>
    %853 = vector.broadcast %129 : f32 to vector<16x16xf32>
    %854 = arith.mulf %853, %843 : vector<16x16xf32>
    %855 = arith.addf %830, %854 : vector<16x16xf32>
    %856 = vector.broadcast %165 : f32 to vector<16x16xf32>
    %857 = arith.mulf %856, %843 : vector<16x16xf32>
    %858 = arith.addf %833, %857 : vector<16x16xf32>
    %859 = vector.broadcast %201 : f32 to vector<16x16xf32>
    %860 = arith.mulf %859, %843 : vector<16x16xf32>
    %861 = arith.addf %836, %860 : vector<16x16xf32>
    %862 = vector.broadcast %237 : f32 to vector<16x16xf32>
    %863 = arith.mulf %862, %843 : vector<16x16xf32>
    %864 = arith.addf %839, %863 : vector<16x16xf32>
    %865 = vector.broadcast %273 : f32 to vector<16x16xf32>
    %866 = arith.mulf %865, %843 : vector<16x16xf32>
    %867 = arith.addf %842, %866 : vector<16x16xf32>
    %868 = vector.extract_strided_slice %767 {offsets = [1, 1], sizes = [16, 16], strides = [1, 1]} : vector<18x18xf32> to vector<16x16xf32>
    %869 = vector.broadcast %22 : f32 to vector<16x16xf32>
    %870 = arith.mulf %869, %868 : vector<16x16xf32>
    %871 = arith.addf %846, %870 : vector<16x16xf32>
    %872 = vector.broadcast %58 : f32 to vector<16x16xf32>
    %873 = arith.mulf %872, %868 : vector<16x16xf32>
    %874 = arith.addf %849, %873 : vector<16x16xf32>
    %875 = vector.broadcast %94 : f32 to vector<16x16xf32>
    %876 = arith.mulf %875, %868 : vector<16x16xf32>
    %877 = arith.addf %852, %876 : vector<16x16xf32>
    %878 = vector.broadcast %130 : f32 to vector<16x16xf32>
    %879 = arith.mulf %878, %868 : vector<16x16xf32>
    %880 = arith.addf %855, %879 : vector<16x16xf32>
    %881 = vector.broadcast %166 : f32 to vector<16x16xf32>
    %882 = arith.mulf %881, %868 : vector<16x16xf32>
    %883 = arith.addf %858, %882 : vector<16x16xf32>
    %884 = vector.broadcast %202 : f32 to vector<16x16xf32>
    %885 = arith.mulf %884, %868 : vector<16x16xf32>
    %886 = arith.addf %861, %885 : vector<16x16xf32>
    %887 = vector.broadcast %238 : f32 to vector<16x16xf32>
    %888 = arith.mulf %887, %868 : vector<16x16xf32>
    %889 = arith.addf %864, %888 : vector<16x16xf32>
    %890 = vector.broadcast %274 : f32 to vector<16x16xf32>
    %891 = arith.mulf %890, %868 : vector<16x16xf32>
    %892 = arith.addf %867, %891 : vector<16x16xf32>
    %893 = vector.extract_strided_slice %767 {offsets = [1, 2], sizes = [16, 16], strides = [1, 1]} : vector<18x18xf32> to vector<16x16xf32>
    %894 = vector.broadcast %23 : f32 to vector<16x16xf32>
    %895 = arith.mulf %894, %893 : vector<16x16xf32>
    %896 = arith.addf %871, %895 : vector<16x16xf32>
    %897 = vector.broadcast %59 : f32 to vector<16x16xf32>
    %898 = arith.mulf %897, %893 : vector<16x16xf32>
    %899 = arith.addf %874, %898 : vector<16x16xf32>
    %900 = vector.broadcast %95 : f32 to vector<16x16xf32>
    %901 = arith.mulf %900, %893 : vector<16x16xf32>
    %902 = arith.addf %877, %901 : vector<16x16xf32>
    %903 = vector.broadcast %131 : f32 to vector<16x16xf32>
    %904 = arith.mulf %903, %893 : vector<16x16xf32>
    %905 = arith.addf %880, %904 : vector<16x16xf32>
    %906 = vector.broadcast %167 : f32 to vector<16x16xf32>
    %907 = arith.mulf %906, %893 : vector<16x16xf32>
    %908 = arith.addf %883, %907 : vector<16x16xf32>
    %909 = vector.broadcast %203 : f32 to vector<16x16xf32>
    %910 = arith.mulf %909, %893 : vector<16x16xf32>
    %911 = arith.addf %886, %910 : vector<16x16xf32>
    %912 = vector.broadcast %239 : f32 to vector<16x16xf32>
    %913 = arith.mulf %912, %893 : vector<16x16xf32>
    %914 = arith.addf %889, %913 : vector<16x16xf32>
    %915 = vector.broadcast %275 : f32 to vector<16x16xf32>
    %916 = arith.mulf %915, %893 : vector<16x16xf32>
    %917 = arith.addf %892, %916 : vector<16x16xf32>
    %918 = vector.extract_strided_slice %767 {offsets = [2, 0], sizes = [16, 16], strides = [1, 1]} : vector<18x18xf32> to vector<16x16xf32>
    %919 = vector.broadcast %24 : f32 to vector<16x16xf32>
    %920 = arith.mulf %919, %918 : vector<16x16xf32>
    %921 = arith.addf %896, %920 : vector<16x16xf32>
    %922 = vector.broadcast %60 : f32 to vector<16x16xf32>
    %923 = arith.mulf %922, %918 : vector<16x16xf32>
    %924 = arith.addf %899, %923 : vector<16x16xf32>
    %925 = vector.broadcast %96 : f32 to vector<16x16xf32>
    %926 = arith.mulf %925, %918 : vector<16x16xf32>
    %927 = arith.addf %902, %926 : vector<16x16xf32>
    %928 = vector.broadcast %132 : f32 to vector<16x16xf32>
    %929 = arith.mulf %928, %918 : vector<16x16xf32>
    %930 = arith.addf %905, %929 : vector<16x16xf32>
    %931 = vector.broadcast %168 : f32 to vector<16x16xf32>
    %932 = arith.mulf %931, %918 : vector<16x16xf32>
    %933 = arith.addf %908, %932 : vector<16x16xf32>
    %934 = vector.broadcast %204 : f32 to vector<16x16xf32>
    %935 = arith.mulf %934, %918 : vector<16x16xf32>
    %936 = arith.addf %911, %935 : vector<16x16xf32>
    %937 = vector.broadcast %240 : f32 to vector<16x16xf32>
    %938 = arith.mulf %937, %918 : vector<16x16xf32>
    %939 = arith.addf %914, %938 : vector<16x16xf32>
    %940 = vector.broadcast %276 : f32 to vector<16x16xf32>
    %941 = arith.mulf %940, %918 : vector<16x16xf32>
    %942 = arith.addf %917, %941 : vector<16x16xf32>
    %943 = vector.extract_strided_slice %767 {offsets = [2, 1], sizes = [16, 16], strides = [1, 1]} : vector<18x18xf32> to vector<16x16xf32>
    %944 = vector.broadcast %25 : f32 to vector<16x16xf32>
    %945 = arith.mulf %944, %943 : vector<16x16xf32>
    %946 = arith.addf %921, %945 : vector<16x16xf32>
    %947 = vector.broadcast %61 : f32 to vector<16x16xf32>
    %948 = arith.mulf %947, %943 : vector<16x16xf32>
    %949 = arith.addf %924, %948 : vector<16x16xf32>
    %950 = vector.broadcast %97 : f32 to vector<16x16xf32>
    %951 = arith.mulf %950, %943 : vector<16x16xf32>
    %952 = arith.addf %927, %951 : vector<16x16xf32>
    %953 = vector.broadcast %133 : f32 to vector<16x16xf32>
    %954 = arith.mulf %953, %943 : vector<16x16xf32>
    %955 = arith.addf %930, %954 : vector<16x16xf32>
    %956 = vector.broadcast %169 : f32 to vector<16x16xf32>
    %957 = arith.mulf %956, %943 : vector<16x16xf32>
    %958 = arith.addf %933, %957 : vector<16x16xf32>
    %959 = vector.broadcast %205 : f32 to vector<16x16xf32>
    %960 = arith.mulf %959, %943 : vector<16x16xf32>
    %961 = arith.addf %936, %960 : vector<16x16xf32>
    %962 = vector.broadcast %241 : f32 to vector<16x16xf32>
    %963 = arith.mulf %962, %943 : vector<16x16xf32>
    %964 = arith.addf %939, %963 : vector<16x16xf32>
    %965 = vector.broadcast %277 : f32 to vector<16x16xf32>
    %966 = arith.mulf %965, %943 : vector<16x16xf32>
    %967 = arith.addf %942, %966 : vector<16x16xf32>
    %968 = vector.extract_strided_slice %767 {offsets = [2, 2], sizes = [16, 16], strides = [1, 1]} : vector<18x18xf32> to vector<16x16xf32>
    %969 = vector.broadcast %26 : f32 to vector<16x16xf32>
    %970 = arith.mulf %969, %968 : vector<16x16xf32>
    %971 = arith.addf %946, %970 : vector<16x16xf32>
    %972 = vector.broadcast %62 : f32 to vector<16x16xf32>
    %973 = arith.mulf %972, %968 : vector<16x16xf32>
    %974 = arith.addf %949, %973 : vector<16x16xf32>
    %975 = vector.broadcast %98 : f32 to vector<16x16xf32>
    %976 = arith.mulf %975, %968 : vector<16x16xf32>
    %977 = arith.addf %952, %976 : vector<16x16xf32>
    %978 = vector.broadcast %134 : f32 to vector<16x16xf32>
    %979 = arith.mulf %978, %968 : vector<16x16xf32>
    %980 = arith.addf %955, %979 : vector<16x16xf32>
    %981 = vector.broadcast %170 : f32 to vector<16x16xf32>
    %982 = arith.mulf %981, %968 : vector<16x16xf32>
    %983 = arith.addf %958, %982 : vector<16x16xf32>
    %984 = vector.broadcast %206 : f32 to vector<16x16xf32>
    %985 = arith.mulf %984, %968 : vector<16x16xf32>
    %986 = arith.addf %961, %985 : vector<16x16xf32>
    %987 = vector.broadcast %242 : f32 to vector<16x16xf32>
    %988 = arith.mulf %987, %968 : vector<16x16xf32>
    %989 = arith.addf %964, %988 : vector<16x16xf32>
    %990 = vector.broadcast %278 : f32 to vector<16x16xf32>
    %991 = arith.mulf %990, %968 : vector<16x16xf32>
    %992 = arith.addf %967, %991 : vector<16x16xf32>
    %c0_35 = arith.constant 0 : index
    %c3_36 = arith.constant 3 : index
    %c0_37 = arith.constant 0 : index
    %c0_38 = arith.constant 0 : index
    %993 = vector.load %arg1[%c0_35, %c3_36, %c0_37, %c0_38] : memref<1x4x18x18xf32, #tpu.memory_space<vmem>>, vector<1x1x18x18xf32>
    %994 = vector.shape_cast %993 : vector<1x1x18x18xf32> to vector<18x18xf32>
    %995 = vector.extract_strided_slice %994 {offsets = [0, 0], sizes = [16, 16], strides = [1, 1]} : vector<18x18xf32> to vector<16x16xf32>
    %996 = vector.broadcast %27 : f32 to vector<16x16xf32>
    %997 = arith.mulf %996, %995 : vector<16x16xf32>
    %998 = arith.addf %971, %997 : vector<16x16xf32>
    %999 = vector.broadcast %63 : f32 to vector<16x16xf32>
    %1000 = arith.mulf %999, %995 : vector<16x16xf32>
    %1001 = arith.addf %974, %1000 : vector<16x16xf32>
    %1002 = vector.broadcast %99 : f32 to vector<16x16xf32>
    %1003 = arith.mulf %1002, %995 : vector<16x16xf32>
    %1004 = arith.addf %977, %1003 : vector<16x16xf32>
    %1005 = vector.broadcast %135 : f32 to vector<16x16xf32>
    %1006 = arith.mulf %1005, %995 : vector<16x16xf32>
    %1007 = arith.addf %980, %1006 : vector<16x16xf32>
    %1008 = vector.broadcast %171 : f32 to vector<16x16xf32>
    %1009 = arith.mulf %1008, %995 : vector<16x16xf32>
    %1010 = arith.addf %983, %1009 : vector<16x16xf32>
    %1011 = vector.broadcast %207 : f32 to vector<16x16xf32>
    %1012 = arith.mulf %1011, %995 : vector<16x16xf32>
    %1013 = arith.addf %986, %1012 : vector<16x16xf32>
    %1014 = vector.broadcast %243 : f32 to vector<16x16xf32>
    %1015 = arith.mulf %1014, %995 : vector<16x16xf32>
    %1016 = arith.addf %989, %1015 : vector<16x16xf32>
    %1017 = vector.broadcast %279 : f32 to vector<16x16xf32>
    %1018 = arith.mulf %1017, %995 : vector<16x16xf32>
    %1019 = arith.addf %992, %1018 : vector<16x16xf32>
    %1020 = vector.extract_strided_slice %994 {offsets = [0, 1], sizes = [16, 16], strides = [1, 1]} : vector<18x18xf32> to vector<16x16xf32>
    %1021 = vector.broadcast %28 : f32 to vector<16x16xf32>
    %1022 = arith.mulf %1021, %1020 : vector<16x16xf32>
    %1023 = arith.addf %998, %1022 : vector<16x16xf32>
    %1024 = vector.broadcast %64 : f32 to vector<16x16xf32>
    %1025 = arith.mulf %1024, %1020 : vector<16x16xf32>
    %1026 = arith.addf %1001, %1025 : vector<16x16xf32>
    %1027 = vector.broadcast %100 : f32 to vector<16x16xf32>
    %1028 = arith.mulf %1027, %1020 : vector<16x16xf32>
    %1029 = arith.addf %1004, %1028 : vector<16x16xf32>
    %1030 = vector.broadcast %136 : f32 to vector<16x16xf32>
    %1031 = arith.mulf %1030, %1020 : vector<16x16xf32>
    %1032 = arith.addf %1007, %1031 : vector<16x16xf32>
    %1033 = vector.broadcast %172 : f32 to vector<16x16xf32>
    %1034 = arith.mulf %1033, %1020 : vector<16x16xf32>
    %1035 = arith.addf %1010, %1034 : vector<16x16xf32>
    %1036 = vector.broadcast %208 : f32 to vector<16x16xf32>
    %1037 = arith.mulf %1036, %1020 : vector<16x16xf32>
    %1038 = arith.addf %1013, %1037 : vector<16x16xf32>
    %1039 = vector.broadcast %244 : f32 to vector<16x16xf32>
    %1040 = arith.mulf %1039, %1020 : vector<16x16xf32>
    %1041 = arith.addf %1016, %1040 : vector<16x16xf32>
    %1042 = vector.broadcast %280 : f32 to vector<16x16xf32>
    %1043 = arith.mulf %1042, %1020 : vector<16x16xf32>
    %1044 = arith.addf %1019, %1043 : vector<16x16xf32>
    %1045 = vector.extract_strided_slice %994 {offsets = [0, 2], sizes = [16, 16], strides = [1, 1]} : vector<18x18xf32> to vector<16x16xf32>
    %1046 = vector.broadcast %29 : f32 to vector<16x16xf32>
    %1047 = arith.mulf %1046, %1045 : vector<16x16xf32>
    %1048 = arith.addf %1023, %1047 : vector<16x16xf32>
    %1049 = vector.broadcast %65 : f32 to vector<16x16xf32>
    %1050 = arith.mulf %1049, %1045 : vector<16x16xf32>
    %1051 = arith.addf %1026, %1050 : vector<16x16xf32>
    %1052 = vector.broadcast %101 : f32 to vector<16x16xf32>
    %1053 = arith.mulf %1052, %1045 : vector<16x16xf32>
    %1054 = arith.addf %1029, %1053 : vector<16x16xf32>
    %1055 = vector.broadcast %137 : f32 to vector<16x16xf32>
    %1056 = arith.mulf %1055, %1045 : vector<16x16xf32>
    %1057 = arith.addf %1032, %1056 : vector<16x16xf32>
    %1058 = vector.broadcast %173 : f32 to vector<16x16xf32>
    %1059 = arith.mulf %1058, %1045 : vector<16x16xf32>
    %1060 = arith.addf %1035, %1059 : vector<16x16xf32>
    %1061 = vector.broadcast %209 : f32 to vector<16x16xf32>
    %1062 = arith.mulf %1061, %1045 : vector<16x16xf32>
    %1063 = arith.addf %1038, %1062 : vector<16x16xf32>
    %1064 = vector.broadcast %245 : f32 to vector<16x16xf32>
    %1065 = arith.mulf %1064, %1045 : vector<16x16xf32>
    %1066 = arith.addf %1041, %1065 : vector<16x16xf32>
    %1067 = vector.broadcast %281 : f32 to vector<16x16xf32>
    %1068 = arith.mulf %1067, %1045 : vector<16x16xf32>
    %1069 = arith.addf %1044, %1068 : vector<16x16xf32>
    %1070 = vector.extract_strided_slice %994 {offsets = [1, 0], sizes = [16, 16], strides = [1, 1]} : vector<18x18xf32> to vector<16x16xf32>
    %1071 = vector.broadcast %30 : f32 to vector<16x16xf32>
    %1072 = arith.mulf %1071, %1070 : vector<16x16xf32>
    %1073 = arith.addf %1048, %1072 : vector<16x16xf32>
    %1074 = vector.broadcast %66 : f32 to vector<16x16xf32>
    %1075 = arith.mulf %1074, %1070 : vector<16x16xf32>
    %1076 = arith.addf %1051, %1075 : vector<16x16xf32>
    %1077 = vector.broadcast %102 : f32 to vector<16x16xf32>
    %1078 = arith.mulf %1077, %1070 : vector<16x16xf32>
    %1079 = arith.addf %1054, %1078 : vector<16x16xf32>
    %1080 = vector.broadcast %138 : f32 to vector<16x16xf32>
    %1081 = arith.mulf %1080, %1070 : vector<16x16xf32>
    %1082 = arith.addf %1057, %1081 : vector<16x16xf32>
    %1083 = vector.broadcast %174 : f32 to vector<16x16xf32>
    %1084 = arith.mulf %1083, %1070 : vector<16x16xf32>
    %1085 = arith.addf %1060, %1084 : vector<16x16xf32>
    %1086 = vector.broadcast %210 : f32 to vector<16x16xf32>
    %1087 = arith.mulf %1086, %1070 : vector<16x16xf32>
    %1088 = arith.addf %1063, %1087 : vector<16x16xf32>
    %1089 = vector.broadcast %246 : f32 to vector<16x16xf32>
    %1090 = arith.mulf %1089, %1070 : vector<16x16xf32>
    %1091 = arith.addf %1066, %1090 : vector<16x16xf32>
    %1092 = vector.broadcast %282 : f32 to vector<16x16xf32>
    %1093 = arith.mulf %1092, %1070 : vector<16x16xf32>
    %1094 = arith.addf %1069, %1093 : vector<16x16xf32>
    %1095 = vector.extract_strided_slice %994 {offsets = [1, 1], sizes = [16, 16], strides = [1, 1]} : vector<18x18xf32> to vector<16x16xf32>
    %1096 = vector.broadcast %31 : f32 to vector<16x16xf32>
    %1097 = arith.mulf %1096, %1095 : vector<16x16xf32>
    %1098 = arith.addf %1073, %1097 : vector<16x16xf32>
    %1099 = vector.broadcast %67 : f32 to vector<16x16xf32>
    %1100 = arith.mulf %1099, %1095 : vector<16x16xf32>
    %1101 = arith.addf %1076, %1100 : vector<16x16xf32>
    %1102 = vector.broadcast %103 : f32 to vector<16x16xf32>
    %1103 = arith.mulf %1102, %1095 : vector<16x16xf32>
    %1104 = arith.addf %1079, %1103 : vector<16x16xf32>
    %1105 = vector.broadcast %139 : f32 to vector<16x16xf32>
    %1106 = arith.mulf %1105, %1095 : vector<16x16xf32>
    %1107 = arith.addf %1082, %1106 : vector<16x16xf32>
    %1108 = vector.broadcast %175 : f32 to vector<16x16xf32>
    %1109 = arith.mulf %1108, %1095 : vector<16x16xf32>
    %1110 = arith.addf %1085, %1109 : vector<16x16xf32>
    %1111 = vector.broadcast %211 : f32 to vector<16x16xf32>
    %1112 = arith.mulf %1111, %1095 : vector<16x16xf32>
    %1113 = arith.addf %1088, %1112 : vector<16x16xf32>
    %1114 = vector.broadcast %247 : f32 to vector<16x16xf32>
    %1115 = arith.mulf %1114, %1095 : vector<16x16xf32>
    %1116 = arith.addf %1091, %1115 : vector<16x16xf32>
    %1117 = vector.broadcast %283 : f32 to vector<16x16xf32>
    %1118 = arith.mulf %1117, %1095 : vector<16x16xf32>
    %1119 = arith.addf %1094, %1118 : vector<16x16xf32>
    %1120 = vector.extract_strided_slice %994 {offsets = [1, 2], sizes = [16, 16], strides = [1, 1]} : vector<18x18xf32> to vector<16x16xf32>
    %1121 = vector.broadcast %32 : f32 to vector<16x16xf32>
    %1122 = arith.mulf %1121, %1120 : vector<16x16xf32>
    %1123 = arith.addf %1098, %1122 : vector<16x16xf32>
    %1124 = vector.broadcast %68 : f32 to vector<16x16xf32>
    %1125 = arith.mulf %1124, %1120 : vector<16x16xf32>
    %1126 = arith.addf %1101, %1125 : vector<16x16xf32>
    %1127 = vector.broadcast %104 : f32 to vector<16x16xf32>
    %1128 = arith.mulf %1127, %1120 : vector<16x16xf32>
    %1129 = arith.addf %1104, %1128 : vector<16x16xf32>
    %1130 = vector.broadcast %140 : f32 to vector<16x16xf32>
    %1131 = arith.mulf %1130, %1120 : vector<16x16xf32>
    %1132 = arith.addf %1107, %1131 : vector<16x16xf32>
    %1133 = vector.broadcast %176 : f32 to vector<16x16xf32>
    %1134 = arith.mulf %1133, %1120 : vector<16x16xf32>
    %1135 = arith.addf %1110, %1134 : vector<16x16xf32>
    %1136 = vector.broadcast %212 : f32 to vector<16x16xf32>
    %1137 = arith.mulf %1136, %1120 : vector<16x16xf32>
    %1138 = arith.addf %1113, %1137 : vector<16x16xf32>
    %1139 = vector.broadcast %248 : f32 to vector<16x16xf32>
    %1140 = arith.mulf %1139, %1120 : vector<16x16xf32>
    %1141 = arith.addf %1116, %1140 : vector<16x16xf32>
    %1142 = vector.broadcast %284 : f32 to vector<16x16xf32>
    %1143 = arith.mulf %1142, %1120 : vector<16x16xf32>
    %1144 = arith.addf %1119, %1143 : vector<16x16xf32>
    %1145 = vector.extract_strided_slice %994 {offsets = [2, 0], sizes = [16, 16], strides = [1, 1]} : vector<18x18xf32> to vector<16x16xf32>
    %1146 = vector.broadcast %33 : f32 to vector<16x16xf32>
    %1147 = arith.mulf %1146, %1145 : vector<16x16xf32>
    %1148 = arith.addf %1123, %1147 : vector<16x16xf32>
    %1149 = vector.broadcast %69 : f32 to vector<16x16xf32>
    %1150 = arith.mulf %1149, %1145 : vector<16x16xf32>
    %1151 = arith.addf %1126, %1150 : vector<16x16xf32>
    %1152 = vector.broadcast %105 : f32 to vector<16x16xf32>
    %1153 = arith.mulf %1152, %1145 : vector<16x16xf32>
    %1154 = arith.addf %1129, %1153 : vector<16x16xf32>
    %1155 = vector.broadcast %141 : f32 to vector<16x16xf32>
    %1156 = arith.mulf %1155, %1145 : vector<16x16xf32>
    %1157 = arith.addf %1132, %1156 : vector<16x16xf32>
    %1158 = vector.broadcast %177 : f32 to vector<16x16xf32>
    %1159 = arith.mulf %1158, %1145 : vector<16x16xf32>
    %1160 = arith.addf %1135, %1159 : vector<16x16xf32>
    %1161 = vector.broadcast %213 : f32 to vector<16x16xf32>
    %1162 = arith.mulf %1161, %1145 : vector<16x16xf32>
    %1163 = arith.addf %1138, %1162 : vector<16x16xf32>
    %1164 = vector.broadcast %249 : f32 to vector<16x16xf32>
    %1165 = arith.mulf %1164, %1145 : vector<16x16xf32>
    %1166 = arith.addf %1141, %1165 : vector<16x16xf32>
    %1167 = vector.broadcast %285 : f32 to vector<16x16xf32>
    %1168 = arith.mulf %1167, %1145 : vector<16x16xf32>
    %1169 = arith.addf %1144, %1168 : vector<16x16xf32>
    %1170 = vector.extract_strided_slice %994 {offsets = [2, 1], sizes = [16, 16], strides = [1, 1]} : vector<18x18xf32> to vector<16x16xf32>
    %1171 = vector.broadcast %34 : f32 to vector<16x16xf32>
    %1172 = arith.mulf %1171, %1170 : vector<16x16xf32>
    %1173 = arith.addf %1148, %1172 : vector<16x16xf32>
    %1174 = vector.broadcast %70 : f32 to vector<16x16xf32>
    %1175 = arith.mulf %1174, %1170 : vector<16x16xf32>
    %1176 = arith.addf %1151, %1175 : vector<16x16xf32>
    %1177 = vector.broadcast %106 : f32 to vector<16x16xf32>
    %1178 = arith.mulf %1177, %1170 : vector<16x16xf32>
    %1179 = arith.addf %1154, %1178 : vector<16x16xf32>
    %1180 = vector.broadcast %142 : f32 to vector<16x16xf32>
    %1181 = arith.mulf %1180, %1170 : vector<16x16xf32>
    %1182 = arith.addf %1157, %1181 : vector<16x16xf32>
    %1183 = vector.broadcast %178 : f32 to vector<16x16xf32>
    %1184 = arith.mulf %1183, %1170 : vector<16x16xf32>
    %1185 = arith.addf %1160, %1184 : vector<16x16xf32>
    %1186 = vector.broadcast %214 : f32 to vector<16x16xf32>
    %1187 = arith.mulf %1186, %1170 : vector<16x16xf32>
    %1188 = arith.addf %1163, %1187 : vector<16x16xf32>
    %1189 = vector.broadcast %250 : f32 to vector<16x16xf32>
    %1190 = arith.mulf %1189, %1170 : vector<16x16xf32>
    %1191 = arith.addf %1166, %1190 : vector<16x16xf32>
    %1192 = vector.broadcast %286 : f32 to vector<16x16xf32>
    %1193 = arith.mulf %1192, %1170 : vector<16x16xf32>
    %1194 = arith.addf %1169, %1193 : vector<16x16xf32>
    %1195 = vector.extract_strided_slice %994 {offsets = [2, 2], sizes = [16, 16], strides = [1, 1]} : vector<18x18xf32> to vector<16x16xf32>
    %1196 = vector.broadcast %35 : f32 to vector<16x16xf32>
    %1197 = arith.mulf %1196, %1195 : vector<16x16xf32>
    %1198 = arith.addf %1173, %1197 : vector<16x16xf32>
    %1199 = vector.broadcast %71 : f32 to vector<16x16xf32>
    %1200 = arith.mulf %1199, %1195 : vector<16x16xf32>
    %1201 = arith.addf %1176, %1200 : vector<16x16xf32>
    %1202 = vector.broadcast %107 : f32 to vector<16x16xf32>
    %1203 = arith.mulf %1202, %1195 : vector<16x16xf32>
    %1204 = arith.addf %1179, %1203 : vector<16x16xf32>
    %1205 = vector.broadcast %143 : f32 to vector<16x16xf32>
    %1206 = arith.mulf %1205, %1195 : vector<16x16xf32>
    %1207 = arith.addf %1182, %1206 : vector<16x16xf32>
    %1208 = vector.broadcast %179 : f32 to vector<16x16xf32>
    %1209 = arith.mulf %1208, %1195 : vector<16x16xf32>
    %1210 = arith.addf %1185, %1209 : vector<16x16xf32>
    %1211 = vector.broadcast %215 : f32 to vector<16x16xf32>
    %1212 = arith.mulf %1211, %1195 : vector<16x16xf32>
    %1213 = arith.addf %1188, %1212 : vector<16x16xf32>
    %1214 = vector.broadcast %251 : f32 to vector<16x16xf32>
    %1215 = arith.mulf %1214, %1195 : vector<16x16xf32>
    %1216 = arith.addf %1191, %1215 : vector<16x16xf32>
    %1217 = vector.broadcast %287 : f32 to vector<16x16xf32>
    %1218 = arith.mulf %1217, %1195 : vector<16x16xf32>
    %1219 = arith.addf %1194, %1218 : vector<16x16xf32>
    %1220 = vector.shape_cast %1198 : vector<16x16xf32> to vector<1x16x16xf32>
    %cst_39 = arith.constant dense<0.000000e+00> : vector<1xf32>
    %1221 = vector.multi_reduction <add>, %1220, %cst_39 [1, 2] : vector<1x16x16xf32> to vector<1xf32>
    %1222 = vector.shape_cast %1221 : vector<1xf32> to vector<1x1x1xf32>
    %1223 = vector.extract %1222[0, 0, 0] : f32 from vector<1x1x1xf32>
    %cst_40 = arith.constant 3.906250e-03 : f32
    %1224 = arith.mulf %1223, %cst_40 : f32
    %1225 = vector.broadcast %1224 : f32 to vector<16x16xf32>
    %1226 = arith.subf %1198, %1225 : vector<16x16xf32>
    %1227 = arith.mulf %1226, %1226 : vector<16x16xf32>
    %1228 = vector.shape_cast %1227 : vector<16x16xf32> to vector<1x16x16xf32>
    %cst_41 = arith.constant dense<0.000000e+00> : vector<1xf32>
    %1229 = vector.multi_reduction <add>, %1228, %cst_41 [1, 2] : vector<1x16x16xf32> to vector<1xf32>
    %1230 = vector.shape_cast %1229 : vector<1xf32> to vector<1x1x1xf32>
    %1231 = vector.extract %1230[0, 0, 0] : f32 from vector<1x1x1xf32>
    %cst_42 = arith.constant 3.906250e-03 : f32
    %1232 = arith.mulf %1231, %cst_42 : f32
    %cst_43 = arith.constant 9.99999974E-6 : f32
    %1233 = arith.addf %1232, %cst_43 : f32
    %1234 = math.rsqrt %1233 : f32
    %1235 = arith.mulf %288, %1234 : f32
    %1236 = vector.broadcast %1235 : f32 to vector<16x16xf32>
    %1237 = arith.mulf %1226, %1236 : vector<16x16xf32>
    %1238 = vector.broadcast %296 : f32 to vector<16x16xf32>
    %1239 = arith.addf %1237, %1238 : vector<16x16xf32>
    %cst_44 = arith.constant 2.000000e-01 : f32
    %1240 = vector.broadcast %cst_44 : f32 to vector<16x16xf32>
    %1241 = arith.mulf %1240, %1239 : vector<16x16xf32>
    %1242 = arith.maximumf %1239, %1241 : vector<16x16xf32>
    %c0_45 = arith.constant 0 : index
    %c0_46 = arith.constant 0 : index
    %c0_47 = arith.constant 0 : index
    %c0_48 = arith.constant 0 : index
    %1243 = vector.load %arg5[%c0_45, %c0_46, %c0_47, %c0_48] : memref<1x8x16x16xf32, #tpu.memory_space<vmem>>, vector<1x1x16x16xf32>
    %1244 = vector.shape_cast %1243 : vector<1x1x16x16xf32> to vector<16x16xf32>
    %1245 = vector.shape_cast %1242 : vector<16x16xf32> to vector<1x1x16x16xf32>
    tpu.vector_store %arg5[%c0_45, %c0_46, %c0_47, %c0_48], %1245 {strides = array<i32>} : memref<1x8x16x16xf32, #tpu.memory_space<vmem>>, vector<1x1x16x16xf32>,
    %1246 = vector.shape_cast %1201 : vector<16x16xf32> to vector<1x16x16xf32>
    %cst_49 = arith.constant dense<0.000000e+00> : vector<1xf32>
    %1247 = vector.multi_reduction <add>, %1246, %cst_49 [1, 2] : vector<1x16x16xf32> to vector<1xf32>
    %1248 = vector.shape_cast %1247 : vector<1xf32> to vector<1x1x1xf32>
    %1249 = vector.extract %1248[0, 0, 0] : f32 from vector<1x1x1xf32>
    %cst_50 = arith.constant 3.906250e-03 : f32
    %1250 = arith.mulf %1249, %cst_50 : f32
    %1251 = vector.broadcast %1250 : f32 to vector<16x16xf32>
    %1252 = arith.subf %1201, %1251 : vector<16x16xf32>
    %1253 = arith.mulf %1252, %1252 : vector<16x16xf32>
    %1254 = vector.shape_cast %1253 : vector<16x16xf32> to vector<1x16x16xf32>
    %cst_51 = arith.constant dense<0.000000e+00> : vector<1xf32>
    %1255 = vector.multi_reduction <add>, %1254, %cst_51 [1, 2] : vector<1x16x16xf32> to vector<1xf32>
    %1256 = vector.shape_cast %1255 : vector<1xf32> to vector<1x1x1xf32>
    %1257 = vector.extract %1256[0, 0, 0] : f32 from vector<1x1x1xf32>
    %cst_52 = arith.constant 3.906250e-03 : f32
    %1258 = arith.mulf %1257, %cst_52 : f32
    %cst_53 = arith.constant 9.99999974E-6 : f32
    %1259 = arith.addf %1258, %cst_53 : f32
    %1260 = math.rsqrt %1259 : f32
    %1261 = arith.mulf %289, %1260 : f32
    %1262 = vector.broadcast %1261 : f32 to vector<16x16xf32>
    %1263 = arith.mulf %1252, %1262 : vector<16x16xf32>
    %1264 = vector.broadcast %297 : f32 to vector<16x16xf32>
    %1265 = arith.addf %1263, %1264 : vector<16x16xf32>
    %cst_54 = arith.constant 2.000000e-01 : f32
    %1266 = vector.broadcast %cst_54 : f32 to vector<16x16xf32>
    %1267 = arith.mulf %1266, %1265 : vector<16x16xf32>
    %1268 = arith.maximumf %1265, %1267 : vector<16x16xf32>
    %c0_55 = arith.constant 0 : index
    %c1_56 = arith.constant 1 : index
    %c0_57 = arith.constant 0 : index
    %c0_58 = arith.constant 0 : index
    %1269 = vector.load %arg5[%c0_55, %c1_56, %c0_57, %c0_58] : memref<1x8x16x16xf32, #tpu.memory_space<vmem>>, vector<1x1x16x16xf32>
    %1270 = vector.shape_cast %1269 : vector<1x1x16x16xf32> to vector<16x16xf32>
    %1271 = vector.shape_cast %1268 : vector<16x16xf32> to vector<1x1x16x16xf32>
    tpu.vector_store %arg5[%c0_55, %c1_56, %c0_57, %c0_58], %1271 {strides = array<i32>} : memref<1x8x16x16xf32, #tpu.memory_space<vmem>>, vector<1x1x16x16xf32>,
    %1272 = vector.shape_cast %1204 : vector<16x16xf32> to vector<1x16x16xf32>
    %cst_59 = arith.constant dense<0.000000e+00> : vector<1xf32>
    %1273 = vector.multi_reduction <add>, %1272, %cst_59 [1, 2] : vector<1x16x16xf32> to vector<1xf32>
    %1274 = vector.shape_cast %1273 : vector<1xf32> to vector<1x1x1xf32>
    %1275 = vector.extract %1274[0, 0, 0] : f32 from vector<1x1x1xf32>
    %cst_60 = arith.constant 3.906250e-03 : f32
    %1276 = arith.mulf %1275, %cst_60 : f32
    %1277 = vector.broadcast %1276 : f32 to vector<16x16xf32>
    %1278 = arith.subf %1204, %1277 : vector<16x16xf32>
    %1279 = arith.mulf %1278, %1278 : vector<16x16xf32>
    %1280 = vector.shape_cast %1279 : vector<16x16xf32> to vector<1x16x16xf32>
    %cst_61 = arith.constant dense<0.000000e+00> : vector<1xf32>
    %1281 = vector.multi_reduction <add>, %1280, %cst_61 [1, 2] : vector<1x16x16xf32> to vector<1xf32>
    %1282 = vector.shape_cast %1281 : vector<1xf32> to vector<1x1x1xf32>
    %1283 = vector.extract %1282[0, 0, 0] : f32 from vector<1x1x1xf32>
    %cst_62 = arith.constant 3.906250e-03 : f32
    %1284 = arith.mulf %1283, %cst_62 : f32
    %cst_63 = arith.constant 9.99999974E-6 : f32
    %1285 = arith.addf %1284, %cst_63 : f32
    %1286 = math.rsqrt %1285 : f32
    %1287 = arith.mulf %290, %1286 : f32
    %1288 = vector.broadcast %1287 : f32 to vector<16x16xf32>
    %1289 = arith.mulf %1278, %1288 : vector<16x16xf32>
    %1290 = vector.broadcast %298 : f32 to vector<16x16xf32>
    %1291 = arith.addf %1289, %1290 : vector<16x16xf32>
    %cst_64 = arith.constant 2.000000e-01 : f32
    %1292 = vector.broadcast %cst_64 : f32 to vector<16x16xf32>
    %1293 = arith.mulf %1292, %1291 : vector<16x16xf32>
    %1294 = arith.maximumf %1291, %1293 : vector<16x16xf32>
    %c0_65 = arith.constant 0 : index
    %c2_66 = arith.constant 2 : index
    %c0_67 = arith.constant 0 : index
    %c0_68 = arith.constant 0 : index
    %1295 = vector.load %arg5[%c0_65, %c2_66, %c0_67, %c0_68] : memref<1x8x16x16xf32, #tpu.memory_space<vmem>>, vector<1x1x16x16xf32>
    %1296 = vector.shape_cast %1295 : vector<1x1x16x16xf32> to vector<16x16xf32>
    %1297 = vector.shape_cast %1294 : vector<16x16xf32> to vector<1x1x16x16xf32>
    tpu.vector_store %arg5[%c0_65, %c2_66, %c0_67, %c0_68], %1297 {strides = array<i32>} : memref<1x8x16x16xf32, #tpu.memory_space<vmem>>, vector<1x1x16x16xf32>,
    %1298 = vector.shape_cast %1207 : vector<16x16xf32> to vector<1x16x16xf32>
    %cst_69 = arith.constant dense<0.000000e+00> : vector<1xf32>
    %1299 = vector.multi_reduction <add>, %1298, %cst_69 [1, 2] : vector<1x16x16xf32> to vector<1xf32>
    %1300 = vector.shape_cast %1299 : vector<1xf32> to vector<1x1x1xf32>
    %1301 = vector.extract %1300[0, 0, 0] : f32 from vector<1x1x1xf32>
    %cst_70 = arith.constant 3.906250e-03 : f32
    %1302 = arith.mulf %1301, %cst_70 : f32
    %1303 = vector.broadcast %1302 : f32 to vector<16x16xf32>
    %1304 = arith.subf %1207, %1303 : vector<16x16xf32>
    %1305 = arith.mulf %1304, %1304 : vector<16x16xf32>
    %1306 = vector.shape_cast %1305 : vector<16x16xf32> to vector<1x16x16xf32>
    %cst_71 = arith.constant dense<0.000000e+00> : vector<1xf32>
    %1307 = vector.multi_reduction <add>, %1306, %cst_71 [1, 2] : vector<1x16x16xf32> to vector<1xf32>
    %1308 = vector.shape_cast %1307 : vector<1xf32> to vector<1x1x1xf32>
    %1309 = vector.extract %1308[0, 0, 0] : f32 from vector<1x1x1xf32>
    %cst_72 = arith.constant 3.906250e-03 : f32
    %1310 = arith.mulf %1309, %cst_72 : f32
    %cst_73 = arith.constant 9.99999974E-6 : f32
    %1311 = arith.addf %1310, %cst_73 : f32
    %1312 = math.rsqrt %1311 : f32
    %1313 = arith.mulf %291, %1312 : f32
    %1314 = vector.broadcast %1313 : f32 to vector<16x16xf32>
    %1315 = arith.mulf %1304, %1314 : vector<16x16xf32>
    %1316 = vector.broadcast %299 : f32 to vector<16x16xf32>
    %1317 = arith.addf %1315, %1316 : vector<16x16xf32>
    %cst_74 = arith.constant 2.000000e-01 : f32
    %1318 = vector.broadcast %cst_74 : f32 to vector<16x16xf32>
    %1319 = arith.mulf %1318, %1317 : vector<16x16xf32>
    %1320 = arith.maximumf %1317, %1319 : vector<16x16xf32>
    %c0_75 = arith.constant 0 : index
    %c3_76 = arith.constant 3 : index
    %c0_77 = arith.constant 0 : index
    %c0_78 = arith.constant 0 : index
    %1321 = vector.load %arg5[%c0_75, %c3_76, %c0_77, %c0_78] : memref<1x8x16x16xf32, #tpu.memory_space<vmem>>, vector<1x1x16x16xf32>
    %1322 = vector.shape_cast %1321 : vector<1x1x16x16xf32> to vector<16x16xf32>
    %1323 = vector.shape_cast %1320 : vector<16x16xf32> to vector<1x1x16x16xf32>
    tpu.vector_store %arg5[%c0_75, %c3_76, %c0_77, %c0_78], %1323 {strides = array<i32>} : memref<1x8x16x16xf32, #tpu.memory_space<vmem>>, vector<1x1x16x16xf32>,
    %1324 = vector.shape_cast %1210 : vector<16x16xf32> to vector<1x16x16xf32>
    %cst_79 = arith.constant dense<0.000000e+00> : vector<1xf32>
    %1325 = vector.multi_reduction <add>, %1324, %cst_79 [1, 2] : vector<1x16x16xf32> to vector<1xf32>
    %1326 = vector.shape_cast %1325 : vector<1xf32> to vector<1x1x1xf32>
    %1327 = vector.extract %1326[0, 0, 0] : f32 from vector<1x1x1xf32>
    %cst_80 = arith.constant 3.906250e-03 : f32
    %1328 = arith.mulf %1327, %cst_80 : f32
    %1329 = vector.broadcast %1328 : f32 to vector<16x16xf32>
    %1330 = arith.subf %1210, %1329 : vector<16x16xf32>
    %1331 = arith.mulf %1330, %1330 : vector<16x16xf32>
    %1332 = vector.shape_cast %1331 : vector<16x16xf32> to vector<1x16x16xf32>
    %cst_81 = arith.constant dense<0.000000e+00> : vector<1xf32>
    %1333 = vector.multi_reduction <add>, %1332, %cst_81 [1, 2] : vector<1x16x16xf32> to vector<1xf32>
    %1334 = vector.shape_cast %1333 : vector<1xf32> to vector<1x1x1xf32>
    %1335 = vector.extract %1334[0, 0, 0] : f32 from vector<1x1x1xf32>
    %cst_82 = arith.constant 3.906250e-03 : f32
    %1336 = arith.mulf %1335, %cst_82 : f32
    %cst_83 = arith.constant 9.99999974E-6 : f32
    %1337 = arith.addf %1336, %cst_83 : f32
    %1338 = math.rsqrt %1337 : f32
    %1339 = arith.mulf %292, %1338 : f32
    %1340 = vector.broadcast %1339 : f32 to vector<16x16xf32>
    %1341 = arith.mulf %1330, %1340 : vector<16x16xf32>
    %1342 = vector.broadcast %300 : f32 to vector<16x16xf32>
    %1343 = arith.addf %1341, %1342 : vector<16x16xf32>
    %cst_84 = arith.constant 2.000000e-01 : f32
    %1344 = vector.broadcast %cst_84 : f32 to vector<16x16xf32>
    %1345 = arith.mulf %1344, %1343 : vector<16x16xf32>
    %1346 = arith.maximumf %1343, %1345 : vector<16x16xf32>
    %c0_85 = arith.constant 0 : index
    %c4_86 = arith.constant 4 : index
    %c0_87 = arith.constant 0 : index
    %c0_88 = arith.constant 0 : index
    %1347 = vector.load %arg5[%c0_85, %c4_86, %c0_87, %c0_88] : memref<1x8x16x16xf32, #tpu.memory_space<vmem>>, vector<1x1x16x16xf32>
    %1348 = vector.shape_cast %1347 : vector<1x1x16x16xf32> to vector<16x16xf32>
    %1349 = vector.shape_cast %1346 : vector<16x16xf32> to vector<1x1x16x16xf32>
    tpu.vector_store %arg5[%c0_85, %c4_86, %c0_87, %c0_88], %1349 {strides = array<i32>} : memref<1x8x16x16xf32, #tpu.memory_space<vmem>>, vector<1x1x16x16xf32>,
    %1350 = vector.shape_cast %1213 : vector<16x16xf32> to vector<1x16x16xf32>
    %cst_89 = arith.constant dense<0.000000e+00> : vector<1xf32>
    %1351 = vector.multi_reduction <add>, %1350, %cst_89 [1, 2] : vector<1x16x16xf32> to vector<1xf32>
    %1352 = vector.shape_cast %1351 : vector<1xf32> to vector<1x1x1xf32>
    %1353 = vector.extract %1352[0, 0, 0] : f32 from vector<1x1x1xf32>
    %cst_90 = arith.constant 3.906250e-03 : f32
    %1354 = arith.mulf %1353, %cst_90 : f32
    %1355 = vector.broadcast %1354 : f32 to vector<16x16xf32>
    %1356 = arith.subf %1213, %1355 : vector<16x16xf32>
    %1357 = arith.mulf %1356, %1356 : vector<16x16xf32>
    %1358 = vector.shape_cast %1357 : vector<16x16xf32> to vector<1x16x16xf32>
    %cst_91 = arith.constant dense<0.000000e+00> : vector<1xf32>
    %1359 = vector.multi_reduction <add>, %1358, %cst_91 [1, 2] : vector<1x16x16xf32> to vector<1xf32>
    %1360 = vector.shape_cast %1359 : vector<1xf32> to vector<1x1x1xf32>
    %1361 = vector.extract %1360[0, 0, 0] : f32 from vector<1x1x1xf32>
    %cst_92 = arith.constant 3.906250e-03 : f32
    %1362 = arith.mulf %1361, %cst_92 : f32
    %cst_93 = arith.constant 9.99999974E-6 : f32
    %1363 = arith.addf %1362, %cst_93 : f32
    %1364 = math.rsqrt %1363 : f32
    %1365 = arith.mulf %293, %1364 : f32
    %1366 = vector.broadcast %1365 : f32 to vector<16x16xf32>
    %1367 = arith.mulf %1356, %1366 : vector<16x16xf32>
    %1368 = vector.broadcast %301 : f32 to vector<16x16xf32>
    %1369 = arith.addf %1367, %1368 : vector<16x16xf32>
    %cst_94 = arith.constant 2.000000e-01 : f32
    %1370 = vector.broadcast %cst_94 : f32 to vector<16x16xf32>
    %1371 = arith.mulf %1370, %1369 : vector<16x16xf32>
    %1372 = arith.maximumf %1369, %1371 : vector<16x16xf32>
    %c0_95 = arith.constant 0 : index
    %c5_96 = arith.constant 5 : index
    %c0_97 = arith.constant 0 : index
    %c0_98 = arith.constant 0 : index
    %1373 = vector.load %arg5[%c0_95, %c5_96, %c0_97, %c0_98] : memref<1x8x16x16xf32, #tpu.memory_space<vmem>>, vector<1x1x16x16xf32>
    %1374 = vector.shape_cast %1373 : vector<1x1x16x16xf32> to vector<16x16xf32>
    %1375 = vector.shape_cast %1372 : vector<16x16xf32> to vector<1x1x16x16xf32>
    tpu.vector_store %arg5[%c0_95, %c5_96, %c0_97, %c0_98], %1375 {strides = array<i32>} : memref<1x8x16x16xf32, #tpu.memory_space<vmem>>, vector<1x1x16x16xf32>,
    %1376 = vector.shape_cast %1216 : vector<16x16xf32> to vector<1x16x16xf32>
    %cst_99 = arith.constant dense<0.000000e+00> : vector<1xf32>
    %1377 = vector.multi_reduction <add>, %1376, %cst_99 [1, 2] : vector<1x16x16xf32> to vector<1xf32>
    %1378 = vector.shape_cast %1377 : vector<1xf32> to vector<1x1x1xf32>
    %1379 = vector.extract %1378[0, 0, 0] : f32 from vector<1x1x1xf32>
    %cst_100 = arith.constant 3.906250e-03 : f32
    %1380 = arith.mulf %1379, %cst_100 : f32
    %1381 = vector.broadcast %1380 : f32 to vector<16x16xf32>
    %1382 = arith.subf %1216, %1381 : vector<16x16xf32>
    %1383 = arith.mulf %1382, %1382 : vector<16x16xf32>
    %1384 = vector.shape_cast %1383 : vector<16x16xf32> to vector<1x16x16xf32>
    %cst_101 = arith.constant dense<0.000000e+00> : vector<1xf32>
    %1385 = vector.multi_reduction <add>, %1384, %cst_101 [1, 2] : vector<1x16x16xf32> to vector<1xf32>
    %1386 = vector.shape_cast %1385 : vector<1xf32> to vector<1x1x1xf32>
    %1387 = vector.extract %1386[0, 0, 0] : f32 from vector<1x1x1xf32>
    %cst_102 = arith.constant 3.906250e-03 : f32
    %1388 = arith.mulf %1387, %cst_102 : f32
    %cst_103 = arith.constant 9.99999974E-6 : f32
    %1389 = arith.addf %1388, %cst_103 : f32
    %1390 = math.rsqrt %1389 : f32
    %1391 = arith.mulf %294, %1390 : f32
    %1392 = vector.broadcast %1391 : f32 to vector<16x16xf32>
    %1393 = arith.mulf %1382, %1392 : vector<16x16xf32>
    %1394 = vector.broadcast %302 : f32 to vector<16x16xf32>
    %1395 = arith.addf %1393, %1394 : vector<16x16xf32>
    %cst_104 = arith.constant 2.000000e-01 : f32
    %1396 = vector.broadcast %cst_104 : f32 to vector<16x16xf32>
    %1397 = arith.mulf %1396, %1395 : vector<16x16xf32>
    %1398 = arith.maximumf %1395, %1397 : vector<16x16xf32>
    %c0_105 = arith.constant 0 : index
    %c6_106 = arith.constant 6 : index
    %c0_107 = arith.constant 0 : index
    %c0_108 = arith.constant 0 : index
    %1399 = vector.load %arg5[%c0_105, %c6_106, %c0_107, %c0_108] : memref<1x8x16x16xf32, #tpu.memory_space<vmem>>, vector<1x1x16x16xf32>
    %1400 = vector.shape_cast %1399 : vector<1x1x16x16xf32> to vector<16x16xf32>
    %1401 = vector.shape_cast %1398 : vector<16x16xf32> to vector<1x1x16x16xf32>
    tpu.vector_store %arg5[%c0_105, %c6_106, %c0_107, %c0_108], %1401 {strides = array<i32>} : memref<1x8x16x16xf32, #tpu.memory_space<vmem>>, vector<1x1x16x16xf32>,
    %1402 = vector.shape_cast %1219 : vector<16x16xf32> to vector<1x16x16xf32>
    %cst_109 = arith.constant dense<0.000000e+00> : vector<1xf32>
    %1403 = vector.multi_reduction <add>, %1402, %cst_109 [1, 2] : vector<1x16x16xf32> to vector<1xf32>
    %1404 = vector.shape_cast %1403 : vector<1xf32> to vector<1x1x1xf32>
    %1405 = vector.extract %1404[0, 0, 0] : f32 from vector<1x1x1xf32>
    %cst_110 = arith.constant 3.906250e-03 : f32
    %1406 = arith.mulf %1405, %cst_110 : f32
    %1407 = vector.broadcast %1406 : f32 to vector<16x16xf32>
    %1408 = arith.subf %1219, %1407 : vector<16x16xf32>
    %1409 = arith.mulf %1408, %1408 : vector<16x16xf32>
    %1410 = vector.shape_cast %1409 : vector<16x16xf32> to vector<1x16x16xf32>
    %cst_111 = arith.constant dense<0.000000e+00> : vector<1xf32>
    %1411 = vector.multi_reduction <add>, %1410, %cst_111 [1, 2] : vector<1x16x16xf32> to vector<1xf32>
    %1412 = vector.shape_cast %1411 : vector<1xf32> to vector<1x1x1xf32>
    %1413 = vector.extract %1412[0, 0, 0] : f32 from vector<1x1x1xf32>
    %cst_112 = arith.constant 3.906250e-03 : f32
    %1414 = arith.mulf %1413, %cst_112 : f32
    %cst_113 = arith.constant 9.99999974E-6 : f32
    %1415 = arith.addf %1414, %cst_113 : f32
    %1416 = math.rsqrt %1415 : f32
    %1417 = arith.mulf %295, %1416 : f32
    %1418 = vector.broadcast %1417 : f32 to vector<16x16xf32>
    %1419 = arith.mulf %1408, %1418 : vector<16x16xf32>
    %1420 = vector.broadcast %303 : f32 to vector<16x16xf32>
    %1421 = arith.addf %1419, %1420 : vector<16x16xf32>
    %cst_114 = arith.constant 2.000000e-01 : f32
    %1422 = vector.broadcast %cst_114 : f32 to vector<16x16xf32>
    %1423 = arith.mulf %1422, %1421 : vector<16x16xf32>
    %1424 = arith.maximumf %1421, %1423 : vector<16x16xf32>
    %c0_115 = arith.constant 0 : index
    %c7_116 = arith.constant 7 : index
    %c0_117 = arith.constant 0 : index
    %c0_118 = arith.constant 0 : index
    %1425 = vector.load %arg5[%c0_115, %c7_116, %c0_117, %c0_118] : memref<1x8x16x16xf32, #tpu.memory_space<vmem>>, vector<1x1x16x16xf32>
    %1426 = vector.shape_cast %1425 : vector<1x1x16x16xf32> to vector<16x16xf32>
    %1427 = vector.shape_cast %1424 : vector<16x16xf32> to vector<1x1x16x16xf32>
    tpu.vector_store %arg5[%c0_115, %c7_116, %c0_117, %c0_118], %1427 {strides = array<i32>} : memref<1x8x16x16xf32, #tpu.memory_space<vmem>>, vector<1x1x16x16xf32>,
    return
  }
  func.func @transform_0(%arg0: i32) -> (i32, i32, i32, i32) {
    %c0_i32 = arith.constant 0 : i32
    %c0_i32_0 = arith.constant 0 : i32
    %c0_i32_1 = arith.constant 0 : i32
    %c0_i32_2 = arith.constant 0 : i32
    return %arg0, %c0_i32, %c0_i32_0, %c0_i32_1 : i32, i32, i32, i32
  }
  func.func @transform_1(%arg0: i32) -> i32 {
    %c0_i32 = arith.constant 0 : i32
    %c0_i32_0 = arith.constant 0 : i32
    return %c0_i32 : i32
  }
  func.func @transform_2(%arg0: i32) -> i32 {
    %c0_i32 = arith.constant 0 : i32
    %c0_i32_0 = arith.constant 0 : i32
    return %c0_i32 : i32
  }
  func.func @transform_3(%arg0: i32) -> i32 {
    %c0_i32 = arith.constant 0 : i32
    %c0_i32_0 = arith.constant 0 : i32
    return %c0_i32 : i32
  }
  func.func @transform_4(%arg0: i32) -> (i32, i32, i32, i32) {
    %c0_i32 = arith.constant 0 : i32
    %c0_i32_0 = arith.constant 0 : i32
    %c0_i32_1 = arith.constant 0 : i32
    %c0_i32_2 = arith.constant 0 : i32
    return %arg0, %c0_i32, %c0_i32_0, %c0_i32_1 : i32, i32, i32, i32
  }
}

</mosaic_0001>

<bundles_post_ra>
// kernel: multi_out_conv_block.1
= control target key start
LH: loop header
LB: loop body
LE: loop exit
PB: predicated region body
PF: predicated region fallthrough
CT: control target
= control target key end

     0   :  { %9 = vsyncpa [#allocation4], 0  ;;  %s10031_s0 = inlined_call_operand.vmem [shape: f32[2,4,18,18], index: 0, kind: input, shape index: {}]   ;;  %s10032_s1 = inlined_call_operand.vmem [shape: f32[288], index: 1, kind: input, shape index: {}]   ;;  %s10033_s2 = inlined_call_operand.vmem [shape: f32[8], index: 2, kind: input, shape index: {}]   ;;  %s10034_s3 = inlined_call_operand.vmem [shape: f32[8], index: 3, kind: input, shape index: {}]   ;;  %s10035_s4 = inlined_call_operand.hbm [shape: f32[2,8,16,16], index: 4, kind: output, shape index: {}]  }
   0x1   :  { %10 = vsyncpa [#allocation6], 0 }
   0x2   :  { %11 = vsyncpa [#allocation3], 0 }
   0x3   :  { %13 = vsyncpa [#allocation3 + $0x1], 0  ;;  %s6332_s15 = smov 0   ;;  %s6334_s16 = smov 0  }
   0x4   :  { %s6336_s17 = smov 0   ;;  %s6338_s18 = smov 0  }
   0x5 LB: > { %s6353_s19 = sadd.s32 4294967295, %s6297_s18   ;;  %s5631_s20 = sadd.s32 4294967294, %s6297_s18   ;;  %s6297_s18 = sphi %s6338_s18, %s10053_s18   ;;  %s6293_s17 = sphi %s6336_s17, %s10052_s17   ;;  %s6289_s16 = sphi %s6334_s16, %s10051_s16   ;;  %s6285_s15 = sphi %s6332_s15, %s10050_s15  }
   0x6   : > { %s6357_s21 = sadd.s32 1, %s6297_s18   ;;  %s115_s22 = sadd.s32 1, %s6293_s17 }
   0x7   : > { %s112_s23 = ssub.s32 %s6297_s18, %s6357_s21  ;;  %p125_p0 = scmp.ne.s32.totalorder %s6293_s17, %s6289_s16 }
   0x8   : > { %p113_p1 = scmp.eq.s32.totalorder %s112_s23, 0  ;;  %p126_p2 = scmp.eq.s32.totalorder %s6353_s19, 1 }
   0x9   : > { %p131_p3 = scmp.ne.s32.totalorder %s6289_s16, %s6285_s15  ;;  %p132_p4 = scmp.eq.s32.totalorder %s5631_s20, 1 }
   0xa   : > { %s6368_s24 = scalar_select %p113_p1, %s6293_s17, %s115_s22  }
   0xb   : > { %p6370_p5 = por %p126_p2, %p125_p0  ;;  %p6374_p6 = por %p132_p4, %p131_p3 }
   0xc   : > { %p5632_p7 = scmp.ge.s32.totalorder %s6297_s18, 1  ;;  %p139_p8 = scmp.lt.s32.totalorder %s6297_s18, 3 }
   0xd   : > { %s10039_s25 = scalar_select %p6370_p5, 1, 0 }
   0xe   : > { %s10040_s26 = scalar_select %p6374_p6, 1, 0 }
   0xf   : > { %p10036_p9 = scmp.eq.s32.totalorder %s6353_s19, 0  ;;  %p6381_p10 = pnand %p5632_p7, %p139_p8 }
  0x10   : > { %s163_s30 = sshll.u32 %s10033_s2, 4  ;;  %s152_s7 = sshll.u32 %s10032_s1, 4  ;;  %s164_s30 = int_to_ptr.vmem [resolvable:$true] %s163_s30  ;;  %s153_s7 = int_to_ptr.vmem [resolvable:$true] %s152_s7 }
  0x11   : > { %s10041_s27 = scalar_select %p6381_p10, 1, 0 }
  0x12   : > { %p6036_p11 = pneg %p6381_p10  ;;  %s174_s11 = sshll.u32 %s10034_s3, 4  ;;  %s6402_s11 = int_to_ptr.vmem [resolvable:$true] %s174_s11 }
  0x13   : > { %s6184_s12 = scalar_lea.vmem %s164_s30, 16  ;;  %p6192_p3 = scmp.lt.s32.totalorder %s164_s30, %s164_s30 }
  0x14   : > { %p6395_p12 = pnand %p10036_p9, %p6036_p11  ;;  %p6185_p13 = scmp.ne.s32.totalorder %s164_s30, %s6184_s12 }
  0x15   : > { %p6193_p4 = scmp.lt.s32.totalorder %s6184_s12, %s6184_s12 }
  0x16   : > { %p6186_p0 = pneg %p6395_p12 }
  0x17   : > { %p6194_p7 = por %p6193_p4, %p6192_p3 }
  0x18   : > { %p6187_p1 = pnand %p6186_p0, %p6185_p13 }
  0x1a   : > { %p6188_p2 = pneg %p6187_p1 }
  0x1c   : > { %p6195_p8 = pnand %p6194_p7, %p6188_p2 }
  0x1e   : > { %6198 = shalt.err (!%p6195_p8)
}
  0x1f   : > { %s6299_s13 = smov [#allocation5]   ;;  %s6199_s14 = scalar_lea.vmem %s153_s7, 48 }
  0x20   : > { %6042 = dma.vmem_to_smem (!%p6395_p12), %s164_s30, 16, %s6299_s13, [#allocation6]  }
  0x21   : > { %p6200_p11 = scmp.ne.s32.totalorder %s153_s7, %s6199_s14  ;;  %s6206_s20 = scalar_lea.vmem %s153_s7, 64 }
  0x22   : > { %p6207_p5 = scmp.lt.s32.totalorder %s153_s7, %s153_s7  ;;  %p6208_p13 = scmp.lt.s32.totalorder %s6206_s20, %s6199_s14 }
  0x23   : > { %p6202_p9 = pnand %p6200_p11, %p6186_p0 }
  0x24   : > { %p6209_p1 = por %p6208_p13, %p6207_p5 }
  0x25   : > { %p6203_p6 = pneg %p6202_p9 }
  0x27   : > { %p6210_p10 = pnand %p6209_p1, %p6203_p6 }
  0x29   : > { %6213 = shalt.err (!%p6210_p10)
}
  0x2a   : > { %s6300_s22 = smov [#allocation2]   ;;  %s6214_s23 = scalar_lea.vmem %s6402_s11, 16 }
  0x2b   : > { %6039 = dma.vmem_to_smem (!%p6395_p12), %s153_s7, 48, %s6300_s22, [#allocation4]  }
  0x2c   : > { %p6215_p2 = scmp.ne.s32.totalorder %s6402_s11, %s6214_s23  ;;  %p6222_p4 = scmp.lt.s32.totalorder %s6402_s11, %s6402_s11 }
  0x2d   : > { %p6223_p7 = scmp.lt.s32.totalorder %s6214_s23, %s6214_s23 }
  0x2e   : > { %p6217_p3 = pnand %p6215_p2, %p6186_p0 }
  0x2f   : > { %p6224_p5 = por %p6223_p7, %p6222_p4 }
  0x30   : > { %p6218_p9 = pneg %p6217_p3 }
  0x32   : > { %p6225_p6 = pnand %p6224_p5, %p6218_p9 }
  0x34   : > { %6228 = shalt.err (!%p6225_p6)
}
  0x35   : > { %s6301_s28 = smov [#allocation7]   ;;  %p10043_p10 = scmp.ne.s32.totalorder %s10041_s27, 0 }
  0x36   : > { %6045 = dma.vmem_to_smem (!%p6395_p12), %s6402_s11, 16, %s6301_s28, [#allocation6]  }
  0x37   : > { %195 = sbr.rel (%p10043_p10) target bundleno = 2753 (0xac1), region = 36  ;;  %p10044_p8 = scmp.eq.s32.totalorder (!%p10043_p10), %s6353_s19, 0 }
  0x3c   : > { %6272 = dma.done.wait (%p10044_p8), [#allocation4], 48   ;;  %p10045_p0 = pmov %p10044_p8 }
  0x3e   : > { %6274 = vsyncadd (%p10045_p0), [#allocation4], 4294967248  ;;  %p10046_p11 = pmov %p10045_p0 }
  0x3f   : > { %p10047_p13 = pmov %p10045_p0 }
  0x40   : > { %6276 = dma.done.wait (%p10046_p11), [#allocation6], 32  }
  0x41   : > { %6278 = vsyncadd (%p10047_p13), [#allocation6], 4294967264 }
  0x42   : > { %209 = sfence }
  0x43   : > { %p230_p1 = scmp.lt.s32.totalorder %s6353_s19, 1  ;;  %s5644_s29 = sld [smem:[#allocation2 + $0x2]]  ;;  %vm797_vm0 = vcmask 1046528   ;;  %vm1246_vm1 = vcmask 1045504   ;;  %vm5132_vm2 = vcmask 130048  }
  0x44   : > { %s5643_s30 = sld [smem:[#allocation2 + $0x1]]  ;;  %s6302_s13 = smov 126  }
  0x45   : > { %s231_s27 = scalar_select %p230_p1, %s6353_s19, 1 }
  0x46   : > { %s5646_s5 = sld [smem:[#allocation2 + $0x4]]  ;;  %s6303_s14 = smov 127  }
  0x47   : > { %s5973_s6 = smul.u32 96, %s231_s27  ;;  %s5647_s7 = sld [smem:[#allocation2 + $0x5]] }
  0x48   : > { %s5649_s8 = sld [smem:[#allocation2 + $0x7]]  ;;  %p10048_p2 = scmp.ne.s32.totalorder %s10039_s25, 0 }
  0x49   : > { %s6441_s11 = scalar_lea.vmem %s10031_s0, %s5973_s6  ;;  %v686_v0 = vstv %s5644_s29  ;;  %s5650_s12 = sld [smem:[#allocation2 + $0x8]] }
  0x4a   : > { %v6444_v1 = vld [vmem:[%s6441_s11] sm:$0xff]  ;;  %v6447_v2 = vld [vmem:[%s6441_s11 + $0x8] sm:$0xff]  ;;  %v582_v3 = vstv %s5643_s30  ;;  %v6450_v4 = vld [vmem:[%s6441_s11 + $0x10] sm:$0x3]  ;;  %s5652_s20 = sld [smem:[#allocation2 + $0xa]] }
  0x4b   : > { %v687_v5 = vmul.f32 %v686_v0, %v6444_v1  ;;  %v583_v6 = vmul.f32 %v582_v3, %v6444_v1  ;;  %v688_v7 = vmul.f32 %v686_v0, %v6447_v2  ;;  %v584_v8 = vmul.f32 %v582_v3, %v6447_v2  ;;  %s5655_s22 = sld [smem:[#allocation2 + $0xd]]  ;;  %v6487_v45 = vld [vmem:[%s6441_s11 + $0x20] sm:$0xff]  ;;  %v6490_v47 = vld [vmem:[%s6441_s11 + $0x18] sm:$0xff]  ;;  %v6493_v48 = vld [vmem:[%s6441_s11 + $0x28] sm:$0x3] }
  0x4c   : > { %v919_v9 = vstv %s5646_s5  ;;  %s5653_s23 = sld [smem:[#allocation2 + $0xb]] }
  0x4d   : > { %691 = vrot.lane.b32.xlu1 %v687_v5, %s6302_s13  ;;  %587 = vrot.lane.b32.xlu0 %v583_v6, %s6303_s14  ;;  %v921_v10 = vmul.f32 %v919_v9, %v6447_v2  ;;  %v922_v11 = vmul.f32 %v919_v9, %v6450_v4  ;;  %v920_v12 = vmul.f32 %v919_v9, %v6444_v1  ;;  %v1079_v13 = vstv %s5647_s7  ;;  %s5656_s28 = sld [smem:[#allocation2 + $0xe]] }
  0x4e   : > { %v1081_v14 = vmul.f32 %v1079_v13, %v6447_v2  ;;  %v1082_v15 = vmul.f32 %v1079_v13, %v6450_v4  ;;  %v1080_v16 = vmul.f32 %v1079_v13, %v6444_v1  ;;  %v1368_v17 = vstv %s5649_s8  ;;  %s5658_s29 = sld [smem:[#allocation2 + $0x10]] }
  0x4f   : > { %v927_v18 = vrot.slane %v921_v10, 1  ;;  %v929_v19 = vrot.slane %v922_v11, 1  ;;  %v926_v20 = vrot.slane %v920_v12, 1  ;;  %v1370_v21 = vmul.f32 %v1368_v17, %v6447_v2  ;;  %s5659_s30 = sld [smem:[#allocation2 + $0x11]] }
  0x50   : > { %v1087_v22 = vrot.slane %v1081_v14, 1  ;;  %v1089_v23 = vrot.slane %v1082_v15, 1  ;;  %v1086_v24 = vrot.slane %v1080_v16, 1  ;;  %v1371_v25 = vmul.f32 %v1368_v17, %v6450_v4  ;;  %s5661_s27 = sld [smem:[#allocation2 + $0x13]] }
  0x51   : > { %693 = vrot.lane.b32.xlu1 %v688_v7, %s6302_s13  ;;  %589 = vrot.lane.b32.xlu0 %v584_v8, %s6303_s14  ;;  %v930_v26 = vsel %vm797_vm0, %v927_v18, %v929_v19  ;;  %v928_v27 = vsel %vm797_vm0, %v926_v20, %v927_v18  ;;  %v1369_v28 = vmul.f32 %v1368_v17, %v6444_v1  ;;  %v1528_v29 = vstv %s5650_s12  ;;  %s5664_s5 = sld [smem:[#allocation2 + $0x16]] }
  0x52   : > { %v1090_v30 = vsel %vm797_vm0, %v1087_v22, %v1089_v23  ;;  %v1088_v31 = vsel %vm797_vm0, %v1086_v24, %v1087_v22  ;;  %v1376_v32 = vrot.slane %v1370_v21, 2  ;;  %v1378_v33 = vrot.slane %v1371_v25, 2  ;;  %s5662_s6 = sld [smem:[#allocation2 + $0x14]] }
  0x53   : > { %v1375_v34 = vrot.slane %v1369_v28, 2  ;;  %v1530_v35 = vmul.f32 %v1528_v29, %v6447_v2  ;;  %v1531_v36 = vmul.f32 %v1528_v29, %v6450_v4  ;;  %v1529_v37 = vmul.f32 %v1528_v29, %v6444_v1  ;;  %s5665_s7 = sld [smem:[#allocation2 + $0x17]]  ;;  %v6532_v29 = vld [vmem:[%s6441_s11 + $0x38] sm:$0xff] }
  0x54   : > { %v1379_v38 = vsel %vm1246_vm1, %v1376_v32, %v1378_v33  ;;  %v1732_v46 = vstv %s5652_s20  ;;  %v2068_v49 = vstv %s5655_s22  ;;  %v1836_v52 = vstv %s5653_s23  ;;  %s5667_s8 = sld [smem:[#allocation2 + $0x19]] }
  0x55   : > { %933 = vrot.lane.b32.xlu1 %v930_v26, %s6303_s14  ;;  %931 = vrot.lane.b32.xlu0 %v928_v27, %s6303_s14  ;;  %v1377_v39 = vsel %vm1246_vm1, %v1375_v34, %v1376_v32  ;;  %v1536_v40 = vrot.slane %v1530_v35, 2  ;;  %v1538_v41 = vrot.slane %v1531_v36, 2  ;;  %v1535_v42 = vrot.slane %v1529_v37, 2  ;;  %v6538_v32 = vld [vmem:[%s6441_s11 + $0x40] sm:$0x3]  ;;  %s5668_s9 = sld [smem:[#allocation2 + $0x1a]] }
  0x56   : > { %v1734_v50 = vmul.f32 %v6487_v45, %v1732_v46  ;;  %v1733_v51 = vmul.f32 %v6490_v47, %v1732_v46  ;;  %v2070_v53 = vmul.f32 %v6487_v45, %v2068_v49  ;;  %v2071_v54 = vmul.f32 %v6493_v48, %v2068_v49  ;;  %s5670_s10 = sld [smem:[#allocation2 + $0x1c]] }
  0x57   : > { %v1539_v43 = vsel %vm1246_vm1, %v1536_v40, %v1538_v41  ;;  %v1537_v44 = vsel %vm1246_vm1, %v1535_v42, %v1536_v40  ;;  %v2069_v55 = vmul.f32 %v6490_v47, %v2068_v49  ;;  %v2228_v56 = vstv %s5656_s28  ;;  %s5673_s12 = sld [smem:[#allocation2 + $0x1f]] }
  0x58   : > { %v1838_v57 = vmul.f32 %v6487_v45, %v1836_v52  ;;  %v1837_v58 = vmul.f32 %v6490_v47, %v1836_v52  ;;  %v2230_v59 = vmul.f32 %v6487_v45, %v2228_v56  ;;  %v2231_v60 = vmul.f32 %v6493_v48, %v2228_v56  ;;  %s5671_s20 = sld [smem:[#allocation2 + $0x1d]] }
  0x59   : > { %1093 = vrot.lane.b32.xlu1 %v1090_v30, %s6302_s13  ;;  %1091 = vrot.lane.b32.xlu0 %v1088_v31, %s6302_s13  ;;  %v2516_v61 = vstv %s5658_s29  ;;  %v2076_v62 = vrot.slane %v2070_v53, 1  ;;  %v2078_v63 = vrot.slane %v2071_v54, 1  ;;  %v2075_v0 = vrot.slane %v2069_v55, 1  ;;  %v6535_v31 = vld [vmem:[%s6441_s11 + $0x30] sm:$0xff]  ;;  %s5674_s22 = sld [smem:[#allocation2 + $0x20]] }
  0x5a   : > { %v2229_v3 = vmul.f32 %v6490_v47, %v2228_v56  ;;  %v2518_v5 = vmul.f32 %v6487_v45, %v2516_v61  ;;  %v2236_v6 = vrot.slane %v2230_v59, 1  ;;  %v2238_v7 = vrot.slane %v2231_v60, 1  ;;  %s5676_s23 = sld [smem:[#allocation2 + $0x22]] }
  0x5b   : > { %v2519_v8 = vmul.f32 %v6493_v48, %v2516_v61  ;;  %v2517_v9 = vmul.f32 %v6490_v47, %v2516_v61  ;;  %v2079_v10 = vsel %vm797_vm0, %v2076_v62, %v2078_v63  ;;  %v2077_v11 = vsel %vm797_vm0, %v2075_v0, %v2076_v62  ;;  %s5677_s28 = sld [smem:[#allocation2 + $0x23]] }
  0x5c   : > { %v2235_v12 = vrot.slane %v2229_v3, 1  ;;  %v2676_v13 = vstv %s5659_s30  ;;  %v2239_v14 = vsel %vm797_vm0, %v2236_v6, %v2238_v7  ;;  %v2524_v15 = vrot.slane %v2518_v5, 2  ;;  %s5679_s29 = sld [smem:[#allocation2 + $0x25]] }
  0x5d   : > { %1382 = vrot.lane.b32.xlu1 %v1379_v38, %s6303_s14  ;;  %1380 = vrot.lane.b32.xlu0 %v1377_v39, %s6303_s14  ;;  %v2526_v16 = vrot.slane %v2519_v8, 2  ;;  %v2523_v17 = vrot.slane %v2517_v9, 2  ;;  %v2678_v19 = vmul.f32 %v6487_v45, %v2676_v13  ;;  %v2679_v20 = vmul.f32 %v6493_v48, %v2676_v13  ;;  %s5685_s30 = sld [smem:[#allocation2 + $0x2b]] }
  0x5e   : > { %v2237_v18 = vsel %vm797_vm0, %v2235_v12, %v2236_v6  ;;  %v2677_v21 = vmul.f32 %v6490_v47, %v2676_v13  ;;  %v2880_v30 = vstv %s5661_s27  ;;  %v3216_v33 = vstv %s5664_s5  ;;  %s5680_s27 = sld [smem:[#allocation2 + $0x26]] }
  0x5f   : > { %v2527_v22 = vsel %vm1246_vm1, %v2524_v15, %v2526_v16  ;;  %v2525_v23 = vsel %vm1246_vm1, %v2523_v17, %v2524_v15  ;;  %v2684_v24 = vrot.slane %v2678_v19, 2  ;;  %v2686_v25 = vrot.slane %v2679_v20, 2  ;;  %v6577_v16 = vld [vmem:[%s6441_s11 + $0x50] sm:$0xff]  ;;  %v6583_v19 = vld [vmem:[%s6441_s11 + $0x58] sm:$0x3]  ;;  %s5682_s5 = sld [smem:[#allocation2 + $0x28]] }
  0x60   : > { %v2683_v26 = vrot.slane %v2677_v21, 2  ;;  %v2882_v34 = vmul.f32 %v6532_v29, %v2880_v30  ;;  %v2881_v35 = vmul.f32 %v6535_v31, %v2880_v30  ;;  %v2984_v36 = vstv %s5662_s6  ;;  %s6631_s6 = sld [smem:[#allocation2]] }
  0x61   : > { %1542 = vrot.lane.b32.xlu1 %v1539_v43, %s6302_s13  ;;  %1540 = vrot.lane.b32.xlu0 %v1537_v44, %s6302_s13  ;;  %v2687_v27 = vsel %vm1246_vm1, %v2684_v24, %v2686_v25  ;;  %v3218_v37 = vmul.f32 %v6532_v29, %v3216_v33  ;;  %v3219_v38 = vmul.f32 %v6538_v32, %v3216_v33  ;;  %v3376_v40 = vstv %s5665_s7  ;;  %s5683_s7 = sld [smem:[#allocation2 + $0x29]] }
  0x62   : > { %v2685_v28 = vsel %vm1246_vm1, %v2683_v26, %v2684_v24  ;;  %v3217_v39 = vmul.f32 %v6535_v31, %v3216_v33  ;;  %v2986_v41 = vmul.f32 %v6532_v29, %v2984_v36  ;;  %v2985_v42 = vmul.f32 %v6535_v31, %v2984_v36 }
  0x63   : > { %v3378_v43 = vmul.f32 %v6532_v29, %v3376_v40  ;;  %v3379_v44 = vmul.f32 %v6538_v32, %v3376_v40  ;;  %v3377_v46 = vmul.f32 %v6535_v31, %v3376_v40  ;;  %v3664_v49 = vstv %s5667_s8  ;;  %s5645_s8 = sld [smem:[#allocation2 + $0x3]] }
  0x64   : > { %v3223_v52 = vrot.slane %v3217_v39, 1  ;;  %v3666_v53 = vmul.f32 %v6532_v29, %v3664_v49  ;;  %v3665_v60 = vmul.f32 %v6535_v31, %v3664_v49  ;;  %v3824_v61 = vstv %s5668_s9  ;;  %s5648_s9 = sld [smem:[#allocation2 + $0x6]] }
  0x65   : > { %1739 = vrot.lane.b32.xlu1 %v1734_v50, %s6303_s14  ;;  %1737 = vrot.lane.b32.xlu0 %v1733_v51, %s6303_s14  ;;  %v3224_v50 = vrot.slane %v3218_v37, 1  ;;  %v3226_v51 = vrot.slane %v3219_v38, 1  ;;  %v3384_v54 = vrot.slane %v3378_v43, 1  ;;  %v3386_v55 = vrot.slane %v3379_v44, 1 }
  0x66   : > { %v3383_v56 = vrot.slane %v3377_v46, 1  ;;  %v3672_v0 = vrot.slane %v3666_v53, 2  ;;  %v3671_v5 = vrot.slane %v3665_v60, 2  ;;  %v3826_v6 = vmul.f32 %v6532_v29, %v3824_v61 }
  0x67   : > { %v3225_v59 = vsel %vm797_vm0, %v3223_v52, %v3224_v50  ;;  %v3387_v62 = vsel %vm797_vm0, %v3384_v54, %v3386_v55  ;;  %v3827_v7 = vmul.f32 %v6538_v32, %v3824_v61  ;;  %v3825_v8 = vmul.f32 %v6535_v31, %v3824_v61 }
  0x68   : > { %v3385_v63 = vsel %vm797_vm0, %v3383_v56, %v3384_v54  ;;  %v4028_v17 = vstv %s5670_s10  ;;  %v4364_v20 = vstv %s5673_s12  ;;  %v4812_v36 = vstv %s5676_s23  ;;  %s5686_s10 = sld [smem:[#allocation2 + $0x2c]] }
  0x69   : > { %1843 = vrot.lane.b32.xlu1 %v1838_v57, %s6302_s13  ;;  %1841 = vrot.lane.b32.xlu0 %v1837_v58, %s6302_s13  ;;  %v3667_v57 = vmul.f32 %v6538_v32, %v3664_v49  ;;  %v3227_v58 = vsel %vm797_vm0, %v3224_v50, %v3226_v51  ;;  %v3834_v12 = vrot.slane %v3827_v7, 2  ;;  %v3831_v13 = vrot.slane %v3825_v8, 2  ;;  %s5691_s12 = sld [smem:[#allocation2 + $0x31]] }
  0x6a   : > { %v4030_v21 = vmul.f32 %v6577_v16, %v4028_v17  ;;  %v4366_v24 = vmul.f32 %v6577_v16, %v4364_v20  ;;  %v4367_v25 = vmul.f32 %v6583_v19, %v4364_v20  ;;  %v4814_v40 = vmul.f32 %v6577_v16, %v4812_v36  ;;  %s6686_s23 = sld [smem:[#allocation2 + $0x9]] }
  0x6b   : > { %v3674_v3 = vrot.slane %v3667_v57, 2  ;;  %v4815_v44 = vmul.f32 %v6583_v19, %v4812_v36  ;;  %v4972_v51 = vstv %s5677_s28  ;;  %v1388_v7 = vstv %s5685_s30  ;;  %s5695_s28 = sld [smem:[#allocation2 + $0x35]] }
  0x6c   : > { %v4372_v37 = vrot.slane %v4366_v24, 1  ;;  %v4374_v38 = vrot.slane %v4367_v25, 1  ;;  %v4820_v54 = vrot.slane %v4814_v40, 2  ;;  %v4974_v57 = vmul.f32 %v6577_v16, %v4972_v51  ;;  %s6716_s30 = sld [smem:[#allocation2 + $0x2e]] }
  0x6d   : > { %2082 = vrot.lane.b32.xlu1 %v2079_v10, %s6303_s14  ;;  %2080 = vrot.lane.b32.xlu0 %v2077_v11, %s6303_s14  ;;  %v3675_v9 = vsel %vm1246_vm1, %v3672_v0, %v3674_v3  ;;  %v3673_v10 = vsel %vm1246_vm1, %v3671_v5, %v3672_v0  ;;  %v3832_v11 = vrot.slane %v3826_v6, 2  ;;  %v4822_v55 = vrot.slane %v4815_v44, 2 }
  0x6e   : > { %v4375_v46 = vsel %vm797_vm0, %v4372_v37, %v4374_v38  ;;  %v595_v6 = vstv %s5679_s29  ;;  %s6704_s29 = sld [smem:[#allocation2 + $0xc]] }
  0x6f   : > { %v3833_v15 = vsel %vm1246_vm1, %v3831_v13, %v3832_v11  ;;  %v4823_v60 = vsel %vm1246_vm1, %v4820_v54, %v4822_v55  ;;  %v596_v8 = vmul.f32 %v595_v6, %v6444_v1 }
  0x71   : > { %2242 = vrot.lane.b32.xlu1 %v2239_v14, %s6302_s13  ;;  %2240 = vrot.lane.b32.xlu0 %v2237_v18, %s6302_s13  ;;  %v3835_v14 = vsel %vm1246_vm1, %v3832_v11, %v3834_v12  ;;  %v6580_v18 = vld [vmem:[%s6441_s11 + $0x48] sm:$0xff]  ;;  %v597_v11 = vmul.f32 %v595_v6, %v6447_v2 }
  0x72   : > { %v4365_v26 = vmul.f32 %v6580_v18, %v4364_v20  ;;  %v4813_v50 = vmul.f32 %v6580_v18, %v4812_v36 }
  0x74   : > { %v4371_v39 = vrot.slane %v4365_v26, 1  ;;  %v4819_v56 = vrot.slane %v4813_v50, 2 }
  0x75   : > { %2530 = vrot.lane.b32.xlu1 %v2527_v22, %s6303_s14  ;;  %2528 = vrot.lane.b32.xlu0 %v2525_v23, %s6303_s14  ;;  %v4029_v22 = vmul.f32 %v6580_v18, %v4028_v17  ;;  %v4132_v23 = vstv %s5671_s20  ;;  %s5692_s20 = sld [smem:[#allocation2 + $0x32]] }
  0x76   : > { %v4133_v30 = vmul.f32 %v6580_v18, %v4132_v23  ;;  %v4373_v49 = vsel %vm797_vm0, %v4371_v39, %v4372_v37  ;;  %v4821_v61 = vsel %vm1246_vm1, %v4819_v56, %v4820_v54 }
  0x79   : > { %2690 = vrot.lane.b32.xlu1 %v2687_v27, %s6302_s13  ;;  %2688 = vrot.lane.b32.xlu0 %v2685_v28, %s6302_s13  ;;  %v4524_v27 = vstv %s5674_s22  ;;  %v4134_v28 = vmul.f32 %v6577_v16, %v4132_v23  ;;  %s6679_s22 = sld [smem:[#allocation2 + $0x34]] }
  0x7a   : > { %v4526_v33 = vmul.f32 %v6577_v16, %v4524_v27 }
  0x7d   : > { %2887 = vrot.lane.b32.xlu1 %v2882_v34, %s6303_s14  ;;  %2885 = vrot.lane.b32.xlu0 %v2881_v35, %s6303_s14  ;;  %v4527_v34 = vmul.f32 %v6583_v19, %v4524_v27  ;;  %v4525_v35 = vmul.f32 %v6580_v18, %v4524_v27  ;;  %v1099_v27 = vstv %s5683_s7  ;;  %s5701_s7 = sld [smem:[#allocation2 + $0x3b]] }
  0x7e   : > { %v1100_v36 = vmul.f32 %v1099_v27, %v6444_v1  ;;  %v1101_v37 = vmul.f32 %v1099_v27, %v6447_v2  ;;  %v1102_v50 = vmul.f32 %v1099_v27, %v6450_v4 }
  0x7f   : > { %v4531_v43 = vrot.slane %v4525_v35, 1 }
  0x81   : > { %2991 = vrot.lane.b32.xlu1 %v2986_v41, %s6302_s13  ;;  %2989 = vrot.lane.b32.xlu0 %v2985_v42, %s6302_s13  ;;  %v4532_v41 = vrot.slane %v4526_v33, 1  ;;  %v4534_v42 = vrot.slane %v4527_v34, 1  ;;  %v1239_v33 = vstv %s5648_s9  ;;  %s5703_s9 = sld [smem:[#allocation2 + $0x3d]] }
  0x83   : > { %v4535_v52 = vsel %vm797_vm0, %v4532_v41, %v4534_v42  ;;  %v4533_v53 = vsel %vm797_vm0, %v4531_v43, %v4532_v41  ;;  %v6655_v42 = vmul.f32 %v1239_v33, %v6447_v2  ;;  %v6658_v43 = vmul.f32 %v1239_v33, %v6450_v4 }
  0x85   : > { %3230 = vrot.lane.b32.xlu1 %v3227_v58, %s6303_s14  ;;  %3228 = vrot.lane.b32.xlu0 %v3225_v59, %s6303_s14  ;;  %v4975_v58 = vmul.f32 %v6583_v19, %v4972_v51  ;;  %v4973_v59 = vmul.f32 %v6580_v18, %v4972_v51 }
  0x87   : > { %v4979_v0 = vrot.slane %v4973_v59, 2  ;;  %v1248_v59 = vrot.slane %v6655_v42, 2 }
  0x89   : > { %3390 = vrot.lane.b32.xlu1 %v3387_v62, %s6302_s13  ;;  %3388 = vrot.lane.b32.xlu0 %v3385_v63, %s6302_s13  ;;  %v4980_v62 = vrot.slane %v4974_v57, 2  ;;  %v4982_v63 = vrot.slane %v4975_v58, 2  ;;  %v1548_v58 = vstv %s5686_s10  ;;  %s5704_s10 = sld [smem:[#allocation2 + $0x3e]] }
  0x8a   : > { %v1551_v42 = vmul.f32 %v1548_v58, %v6450_v4 }
  0x8b   : > { %v4983_v3 = vsel %vm1246_vm1, %v4980_v62, %v4982_v63  ;;  %v4981_v5 = vsel %vm1246_vm1, %v4979_v0, %v4980_v62  ;;  %v1250_v62 = vrot.slane %v6658_v43, 2  ;;  %v1109_v0 = vrot.slane %v1102_v50, 1 }
  0x8c   : > { %v6714_v43 = vstv %s6679_s22  ;;  %s6858_s22 = sld [smem:[#allocation2 + $0x37]] }
  0x8d   : > { %3678 = vrot.lane.b32.xlu1 %v3675_v9, %s6303_s14  ;;  %3676 = vrot.lane.b32.xlu0 %v3673_v10, %s6303_s14  ;;  %v6625_v9 = vmul.f32 %v1388_v7, %v6447_v2  ;;  %v1389_v10 = vmul.f32 %v1388_v7, %v6444_v1 }
  0x8f   : > { %v1396_v12 = vrot.slane %v6625_v9, 2  ;;  %v1395_v13 = vrot.slane %v1389_v10, 2  ;;  %v1549_v10 = vmul.f32 %v1548_v58, %v6444_v1  ;;  %v2539_v9 = vmul.f32 %v6493_v48, %v6714_v43 }
  0x91   : > { %3838 = vrot.lane.b32.xlu1 %v3835_v14, %s6302_s13  ;;  %3836 = vrot.lane.b32.xlu0 %v3833_v15, %s6302_s13  ;;  %v699_v14 = vstv %s5680_s27  ;;  %v939_v15 = vstv %s5682_s5  ;;  %v6636_v17 = vsel %vm1246_vm1, %v1395_v13, %v1396_v12  ;;  %s6733_s27 = sld [smem:[#allocation2 + $0xf]] }
  0x92   : > { %v700_v20 = vmul.f32 %v699_v14, %v6444_v1  ;;  %v701_v23 = vmul.f32 %v699_v14, %v6447_v2  ;;  %v942_v26 = vmul.f32 %v939_v15, %v6450_v4  ;;  %s6756_s5 = sld [smem:[#allocation2 + $0x2f]] }
  0x94   : > { %v949_v35 = vrot.slane %v942_v26, 1 }
  0x95   : > { %4035 = vrot.lane.b32.xlu1 %v4030_v21, %s6303_s14  ;;  %4033 = vrot.lane.b32.xlu0 %v4029_v22, %s6303_s14  ;;  %v940_v21 = vmul.f32 %v939_v15, %v6444_v1  ;;  %v941_v22 = vmul.f32 %v939_v15, %v6447_v2 }
  0x97   : > { %v946_v24 = vrot.slane %v940_v21, 1  ;;  %v947_v25 = vrot.slane %v941_v22, 1 }
  0x99   : > { %4139 = vrot.lane.b32.xlu1 %v4134_v28, %s6302_s13  ;;  %4137 = vrot.lane.b32.xlu0 %v4133_v30, %s6302_s13  ;;  %v790_v28 = vstv %s5645_s8  ;;  %v542_v30 = vstv %s6631_s6  ;;  %v948_v34 = vsel %vm797_vm0, %v946_v24, %v947_v25  ;;  %v950_v44 = vsel %vm797_vm0, %v947_v25, %v949_v35  ;;  %s5700_s6 = sld [smem:[#allocation2 + $0x3a]] }
  0x9a   : > { %v792_v38 = vmul.f32 %v790_v28, %v6447_v2  ;;  %v543_v39 = vmul.f32 %v542_v30, %v6444_v1  ;;  %v793_v40 = vmul.f32 %v790_v28, %v6450_v4  ;;  %v791_v41 = vmul.f32 %v790_v28, %v6444_v1  ;;  %s6779_s8 = sld [smem:[#allocation2 + $0x12]] }
  0x9c   : > { %v799_v54 = vrot.slane %v792_v38, 1  ;;  %v801_v56 = vrot.slane %v793_v40, 1  ;;  %v798_v57 = vrot.slane %v791_v41, 1 }
  0x9d   : > { %4378 = vrot.lane.b32.xlu1 %v4375_v46, %s6303_s14  ;;  %4376 = vrot.lane.b32.xlu0 %v4373_v49, %s6303_s14  ;;  %v1106_v46 = vrot.slane %v1100_v36, 1  ;;  %v1107_v49 = vrot.slane %v1101_v37, 1 }
  0x9e   : > { %v802_v14 = vsel %vm797_vm0, %v799_v54, %v801_v56  ;;  %v800_v15 = vsel %vm797_vm0, %v798_v57, %v799_v54  ;;  %v1692_v56 = vstv %s6686_s23  ;;  %s6867_s23 = sld [smem:[#allocation2 + $0x38]] }
  0x9f   : > { %v1108_v63 = vsel %vm797_vm0, %v1106_v46, %v1107_v49  ;;  %v1110_v25 = vsel %vm797_vm0, %v1107_v49, %v1109_v0  ;;  %v6725_v49 = vmul.f32 %v6487_v45, %v6714_v43 }
  0xa1   : > { %4538 = vrot.lane.b32.xlu1 %v4535_v52, %s6302_s13  ;;  %4536 = vrot.lane.b32.xlu0 %v4533_v53, %s6302_s13  ;;  %v544_v53 = vmul.f32 %v542_v30, %v6447_v2  ;;  %v2544_v54 = vrot.slane %v6725_v49, 2 }
  0xa5   : > { %4826 = vrot.lane.b32.xlu1 %v4823_v60, %s6303_s14  ;;  %4824 = vrot.lane.b32.xlu0 %v4821_v61, %s6303_s14  ;;  %v1240_v60 = vmul.f32 %v1239_v33, %v6444_v1  ;;  %v1391_v61 = vmul.f32 %v1388_v7, %v6450_v4  ;;  %v1251_v4 = vsel %vm1246_vm1, %v1248_v59, %v1250_v62 }
  0xa7   : > { %v1398_v1 = vrot.slane %v1391_v61, 2  ;;  %v1247_v33 = vrot.slane %v1240_v60, 2  ;;  %v6737_v60 = vstv %s5695_s28  ;;  %s5709_s28 = sld [smem:[#allocation2 + $0x43]] }
  0xa9   : > { %4986 = vrot.lane.b32.xlu1 %v4983_v3, %s6302_s13  ;;  %4984 = vrot.lane.b32.xlu0 %v4981_v5, %s6302_s13  ;;  %v6670_v3 = vstv %s5691_s12  ;;  %v1399_v41 = vsel %vm1246_vm1, %v1396_v12, %v1398_v1  ;;  %s6810_s12 = sld [smem:[#allocation2 + $0x15]] }
  0xaa   : > { %v2091_v13 = vmul.f32 %v6493_v48, %v6670_v3 }
  0xac   : > { %v2098_v22 = vrot.slane %v2091_v13, 1  ;;  %v1694_v13 = vmul.f32 %v6487_v45, %v1692_v56 }
  0xad   : > { %600 = vrot.lane.b32.xlu1 %v596_v8, %s6303_s14 }
  0xb1   : > { %602 = vrot.lane.b32.xlu1 %v597_v11, %s6303_s14  ;;  %v6675_v11 = vmul.f32 %v6487_v45, %v6670_v3 }
  0xb3   : > { %v2096_v21 = vrot.slane %v6675_v11, 1 }
  0xb5   : > { %704 = vrot.lane.b32.xlu1 %v700_v20, %s6302_s13  ;;  %v6684_v20 = vmul.f32 %v1548_v58, %v6447_v2  ;;  %v6702_v35 = vsel %vm797_vm0, %v2096_v21, %v2098_v22  ;;  %v1558_v58 = vrot.slane %v1551_v42, 2  ;;  %v1745_v22 = vstv %s6716_s30  ;;  %s6903_s30 = sld [smem:[#allocation2 + $0x1b]] }
  0xb7   : > { %v1556_v37 = vrot.slane %v6684_v20, 2 }
  0xb9   : > { %706 = vrot.lane.b32.xlu1 %v701_v23, %s6302_s13  ;;  %v6690_v23 = vstv %s5692_s20  ;;  %v1559_v1 = vsel %vm1246_vm1, %v1556_v37, %v1558_v58  ;;  %s6836_s20 = sld [smem:[#allocation2 + $0x18]] }
  0xba   : > { %v6695_v26 = vmul.f32 %v6487_v45, %v6690_v23  ;;  %v2251_v2 = vmul.f32 %v6493_v48, %v6690_v23 }
  0xbc   : > { %v2256_v38 = vrot.slane %v6695_v26, 1 }
  0xbd   : > { %951 = vrot.lane.b32.xlu1 %v948_v34, %s6303_s14  ;;  %v1555_v34 = vrot.slane %v1549_v10, 2 }
  0xbf   : > { %v692_v51 = vpop.permute.xlu1 %691  ;;  %v588_v52 = vpop.permute.xlu0 %587  ;;  %v1557_v57 = vsel %vm1246_vm1, %v1555_v34, %v1556_v37  ;;  %v1746_v37 = vmul.f32 %v6490_v47, %v1745_v22 }
  0xc0   : > { %v593_v55 = vadd.f32 %v588_v52, %v543_v39  ;;  %v2258_v39 = vrot.slane %v2251_v2, 1 }
  0xc1   : > { %953 = vrot.lane.b32.xlu1 %v950_v44, %s6303_s14 }
  0xc2   : > { %v697_v5 = vadd.f32 %v692_v51, %v593_v55  ;;  %v6721_v46 = vsel %vm797_vm0, %v2256_v38, %v2258_v39  ;;  %v1249_v51 = vsel %vm1246_vm1, %v1247_v33, %v1248_v59  ;;  %v2546_v55 = vrot.slane %v2539_v9, 2 }
  0xc3   : > { %v694_v6 = vpop.permute.xlu1 %693  ;;  %v590_v8 = vpop.permute.xlu0 %589 }
  0xc4   : > { %v594_v7 = vadd.f32 %v590_v8, %v544_v53  ;;  %v805_v30 = vadd.f32 %v800_v15, %v697_v5  ;;  %v6742_v59 = vsel %vm1246_vm1, %v2544_v54, %v2546_v55  ;;  %v1940_v8 = vstv %s6704_s29  ;;  %s5710_s29 = sld [smem:[#allocation2 + $0x44]] }
  0xc5   : > { %1111 = vrot.lane.b32.xlu1 %v1108_v63, %s6302_s13  ;;  %v6746_v63 = vmul.f32 %v6487_v45, %v6737_v60  ;;  %v1942_v2 = vmul.f32 %v6487_v45, %v1940_v8  ;;  %v6777_v55 = vstv %s5700_s6  ;;  %s5675_s6 = sld [smem:[#allocation2 + $0x21]] }
  0xc6   : > { %v698_v24 = vadd.f32 %v694_v6, %v594_v7  ;;  %v2699_v6 = vmul.f32 %v6493_v48, %v6737_v60  ;;  %v1693_v7 = vmul.f32 %v6490_v47, %v1692_v56 }
  0xc7   : > { %v934_v27 = vpop.permute.xlu1 %933  ;;  %v932_v28 = vpop.permute.xlu0 %931  ;;  %v2704_v10 = vrot.slane %v6746_v63, 2  ;;  %v3237_v63 = vmul.f32 %v6535_v31, %v6777_v55 }
  0xc8   : > { %v806_v36 = vadd.f32 %v802_v14, %v698_v24  ;;  %v937_v40 = vadd.f32 %v932_v28, %v805_v30  ;;  %v2706_v14 = vrot.slane %v2699_v6, 2  ;;  %v1941_v28 = vmul.f32 %v6490_v47, %v1940_v8 }
  0xc9   : > { %1113 = vrot.lane.b32.xlu1 %v1110_v25, %s6302_s13 }
  0xca   : > { %v938_v44 = vadd.f32 %v934_v27, %v806_v36  ;;  %v1943_v27 = vmul.f32 %v6493_v48, %v1940_v8  ;;  %v6765_v30 = vsel %vm1246_vm1, %v2704_v10, %v2706_v14  ;;  %v2388_v36 = vstv %s6733_s27  ;;  %s6906_s27 = sld [smem:[#allocation2 + $0x1e]] }
  0xcb   : > { %v1094_v12 = vpop.permute.xlu1 %1093  ;;  %v1092_v50 = vpop.permute.xlu0 %1091 }
  0xcc   : > { %v1098_v52 = vadd.f32 %v1094_v12, %v938_v44  ;;  %v1097_v53 = vadd.f32 %v1092_v50, %v937_v40  ;;  %v1948_v44 = vrot.slane %v1942_v2, 1  ;;  %v1950_v9 = vrot.slane %v1943_v27, 1 }
  0xcd   : > { %1402 = vrot.lane.b32.xlu1 %v1399_v41, %s6303_s14  ;;  %v1947_v12 = vrot.slane %v1941_v28, 1  ;;  %v2089_v50 = vmul.f32 %v6490_v47, %v6670_v3  ;;  %v6783_v3 = vmul.f32 %v6532_v29, %v6777_v55 }
  0xce   : > { %v1255_v61 = vadd.f32 %v1251_v4, %v1098_v52  ;;  %v1254_v62 = vadd.f32 %v1249_v51, %v1097_v53  ;;  %v2390_v4 = vmul.f32 %v6487_v45, %v2388_v36  ;;  %v2391_v51 = vmul.f32 %v6493_v48, %v2388_v36 }
  0xcf   : > { %v1383_v0 = vpop.permute.xlu1 %1382  ;;  %v1381_v5 = vpop.permute.xlu0 %1380  ;;  %v2389_v52 = vmul.f32 %v6490_v47, %v2388_v36  ;;  %v1747_v53 = vmul.f32 %v6487_v45, %v1745_v22  ;;  %v3239_v48 = vmul.f32 %v6538_v32, %v6777_v55  ;;  %v1949_v45 = vsel %vm797_vm0, %v1947_v12, %v1948_v44 }
  0xd0   : > { %v1387_v15 = vadd.f32 %v1383_v0, %v1255_v61  ;;  %v1386_v20 = vadd.f32 %v1381_v5, %v1254_v62  ;;  %v1951_v62 = vsel %vm797_vm0, %v1948_v44, %v1950_v9  ;;  %v1849_v0 = vstv %s6756_s5  ;;  %s5712_s5 = sld [smem:[#allocation2 + $0x46]] }
  0xd1   : > { %1560 = vrot.lane.b32.xlu1 %v1557_v57, %s6302_s13  ;;  %v2095_v5 = vrot.slane %v2089_v50, 1  ;;  %v1850_v14 = vmul.f32 %v6490_v47, %v1849_v0  ;;  %v2396_v28 = vrot.slane %v2390_v4, 2 }
  0xd3   : > { %v1543_v24 = vpop.permute.xlu1 %1542  ;;  %v1541_v25 = vpop.permute.xlu0 %1540  ;;  %v2097_v36 = vsel %vm797_vm0, %v2095_v5, %v2096_v21 }
  0xd4   : > { %v1547_v33 = vadd.f32 %v1543_v24, %v1387_v15  ;;  %v1546_v34 = vadd.f32 %v1541_v25, %v1386_v20  ;;  %v2249_v15 = vmul.f32 %v6490_v47, %v6690_v23  ;;  %v6797_v20 = vstv %s5701_s7  ;;  %s6949_s7 = sld [smem:[#allocation2 + $0x40]] }
  0xd5   : > { %1562 = vrot.lane.b32.xlu1 %v1559_v1, %s6302_s13  ;;  %v6806_v25 = vmul.f32 %v6532_v29, %v6797_v20  ;;  %v3399_v23 = vmul.f32 %v6538_v32, %v6797_v20 }
  0xd6   : > { %v1696_v39 = vadd.f32 %v1694_v13, %v1547_v33  ;;  %v1695_v40 = vadd.f32 %v1693_v7, %v1546_v34  ;;  %v3244_v13 = vrot.slane %v6783_v3, 1  ;;  %v3246_v7 = vrot.slane %v3239_v48, 1 }
  0xd7   : > { %v1740_v41 = vpop.permute.xlu1 %1739  ;;  %v1738_v42 = vpop.permute.xlu0 %1737  ;;  %v2398_v33 = vrot.slane %v2391_v51, 2  ;;  %v2395_v34 = vrot.slane %v2389_v52, 2  ;;  %v2840_v52 = vstv %s6779_s8  ;;  %v4236_v3 = vstv %s6906_s27  ;;  %s6960_s8 = sld [smem:[#allocation2 + $0x41]] }
  0xd8   : > { %v1744_v56 = vadd.f32 %v1740_v41, %v1696_v39  ;;  %v1743_v57 = vadd.f32 %v1738_v42, %v1695_v40  ;;  %v6802_v24 = vsel %vm797_vm0, %v3244_v13, %v3246_v7  ;;  %v2255_v39 = vrot.slane %v2249_v15, 1  ;;  %s5702_s27 = sld [smem:[#allocation2 + $0x3c]] }
  0xd9   : > { %1750 = vrot.lane.b32.xlu1 %v1746_v37, %s6303_s14  ;;  %v3404_v37 = vrot.slane %v6806_v25, 1  ;;  %v2537_v40 = vmul.f32 %v6490_v47, %v6714_v43  ;;  %v3406_v41 = vrot.slane %v3399_v23, 1  ;;  %v6819_v42 = vstv %s5703_s9  ;;  %s5713_s9 = sld [smem:[#allocation2 + $0x47]] }
  0xda   : > { %v6823_v12 = vmul.f32 %v6532_v29, %v6819_v42  ;;  %v3687_v11 = vmul.f32 %v6538_v32, %v6819_v42  ;;  %v2399_v4 = vsel %vm1246_vm1, %v2396_v28, %v2398_v33  ;;  %v2397_v51 = vsel %vm1246_vm1, %v2395_v34, %v2396_v28 }
  0xdb   : > { %v1844_v58 = vpop.permute.xlu1 %1843  ;;  %v1842_v61 = vpop.permute.xlu0 %1841  ;;  %v6833_v43 = vsel %vm797_vm0, %v3404_v37, %v3406_v41  ;;  %v3088_v15 = vstv %s6810_s12  ;;  %v4239_v25 = vmul.f32 %v6583_v19, %v4236_v3  ;;  %s5681_s12 = sld [smem:[#allocation2 + $0x27]] }
  0xdc   : > { %v1848_v6 = vadd.f32 %v1844_v58, %v1744_v56  ;;  %v1847_v8 = vadd.f32 %v1842_v61, %v1743_v57  ;;  %v3692_v57 = vrot.slane %v6823_v12, 2  ;;  %v3694_v48 = vrot.slane %v3687_v11, 2 }
  0xdd   : > { %1752 = vrot.lane.b32.xlu1 %v1747_v53, %s6303_s14  ;;  %v2257_v58 = vsel %vm797_vm0, %v2255_v39, %v2256_v38  ;;  %v2543_v61 = vrot.slane %v2537_v40, 2  ;;  %v3091_v39 = vmul.f32 %v6538_v32, %v3088_v15  ;;  %v3089_v40 = vmul.f32 %v6535_v31, %v3088_v15 }
  0xde   : > { %v1955_v1 = vadd.f32 %v1951_v62, %v1848_v6  ;;  %v1954_v22 = vadd.f32 %v1949_v45, %v1847_v8  ;;  %v2697_v62 = vmul.f32 %v6490_v47, %v6737_v60  ;;  %v6844_v45 = vstv %s5704_s10  ;;  %s5678_s10 = sld [smem:[#allocation2 + $0x24]] }
  0xdf   : > { %v2083_v2 = vpop.permute.xlu1 %2082  ;;  %v2081_v27 = vpop.permute.xlu0 %2080  ;;  %v6849_v8 = vsel %vm1246_vm1, %v3692_v57, %v3694_v48  ;;  %v6853_v7 = vmul.f32 %v6532_v29, %v6844_v45  ;;  %v3847_v38 = vmul.f32 %v6538_v32, %v6844_v45  ;;  %v2842_v60 = vmul.f32 %v6532_v29, %v2840_v52 }
  0xe0   : > { %v2087_v44 = vadd.f32 %v2083_v2, %v1955_v1  ;;  %v2086_v9 = vadd.f32 %v2081_v27, %v1954_v22  ;;  %v2841_v1 = vmul.f32 %v6535_v31, %v2840_v52  ;;  %v2545_v28 = vsel %vm1246_vm1, %v2543_v61, %v2544_v54 }
  0xe1   : > { %1854 = vrot.lane.b32.xlu1 %v1850_v14, %s6302_s13  ;;  %v3852_v47 = vrot.slane %v6853_v7, 2  ;;  %v3854_v22 = vrot.slane %v3847_v38, 2  ;;  %v2703_v33 = vrot.slane %v2697_v62, 2  ;;  %v3098_v52 = vrot.slane %v3091_v39, 1 }
  0xe2   : > { %v2893_v48 = vstv %s6858_s22  ;;  %s5687_s22 = sld [smem:[#allocation2 + $0x2d]] }
  0xe3   : > { %v2243_v21 = vpop.permute.xlu1 %2242  ;;  %v2241_v50 = vpop.permute.xlu0 %2240  ;;  %v6875_v41 = vsel %vm1246_vm1, %v3852_v47, %v3854_v22  ;;  %v2894_v61 = vmul.f32 %v6535_v31, %v2893_v48 }
  0xe4   : > { %v2247_v53 = vadd.f32 %v2243_v21, %v2087_v44  ;;  %v2246_v56 = vadd.f32 %v2241_v50, %v2086_v9  ;;  %v3536_v44 = vstv %s6836_s20  ;;  %v2705_v21 = vsel %vm1246_vm1, %v2703_v33, %v2704_v10  ;;  %s5684_s20 = sld [smem:[#allocation2 + $0x2a]] }
  0xe5   : > { %2100 = vrot.lane.b32.xlu1 %v2097_v36, %s6303_s14  ;;  %v3090_v36 = vmul.f32 %v6532_v29, %v3088_v15  ;;  %v6891_v10 = vstv %s5709_s28  ;;  %v3537_v55 = vmul.f32 %v6535_v31, %v3536_v44  ;;  %v2997_v15 = vstv %s6867_s23  ;;  %s5690_s23 = sld [smem:[#allocation2 + $0x30]] }
  0xe6   : > { %v2403_v5 = vadd.f32 %v2399_v4, %v2247_v53  ;;  %v2402_v6 = vadd.f32 %v2397_v51, %v2246_v56  ;;  %v3095_v53 = vrot.slane %v3089_v40, 1  ;;  %v3538_v56 = vmul.f32 %v6532_v29, %v3536_v44  ;;  %s5693_s28 = sld [smem:[#allocation2 + $0x33]] }
  0xe7   : > { %v2531_v26 = vpop.permute.xlu1 %2530  ;;  %v2529_v14 = vpop.permute.xlu0 %2528  ;;  %v3096_v51 = vrot.slane %v3090_v36, 1  ;;  %v6895_v29 = vmul.f32 %v6577_v16, %v6891_v10  ;;  %v3397_v33 = vmul.f32 %v6535_v31, %v6797_v20  ;;  %v4385_v7 = vmul.f32 %v6580_v18, %v6891_v10 }
  0xe8   : > { %v2535_v2 = vadd.f32 %v2531_v26, %v2403_v5  ;;  %v2534_v27 = vadd.f32 %v2529_v14, %v2402_v6 }
  0xe9   : > { %2260 = vrot.lane.b32.xlu1 %v2257_v58, %s6302_s13  ;;  %v3539_v58 = vmul.f32 %v6538_v32, %v3536_v44  ;;  %v4387_v32 = vmul.f32 %v6583_v19, %v6891_v10  ;;  %v3099_v14 = vsel %vm797_vm0, %v3096_v51, %v3098_v52  ;;  %v3097_v38 = vsel %vm797_vm0, %v3095_v53, %v3096_v51 }
  0xea   : > { %v4392_v22 = vrot.slane %v6895_v29, 1  ;;  %v3544_v44 = vrot.slane %v3538_v56, 2  ;;  %v3685_v56 = vmul.f32 %v6535_v31, %v6819_v42 }
  0xeb   : > { %v2691_v34 = vpop.permute.xlu1 %2690  ;;  %v2689_v23 = vpop.permute.xlu0 %2688 }
  0xec   : > { %v2695_v49 = vadd.f32 %v2691_v34, %v2535_v2  ;;  %v2694_v54 = vadd.f32 %v2689_v23, %v2534_v27  ;;  %v4394_v2 = vrot.slane %v4387_v32, 1  ;;  %v2998_v27 = vmul.f32 %v6535_v31, %v2997_v15 }
  0xed   : > { %2548 = vrot.lane.b32.xlu1 %v2545_v28, %s6303_s14  ;;  %v3243_v28 = vrot.slane %v3237_v63, 1  ;;  %v6914_v34 = vstv %s5710_s29  ;;  %s5699_s29 = sld [smem:[#allocation2 + $0x39]] }
  0xee   : > { %v2844_v9 = vadd.f32 %v2842_v60, %v2695_v49  ;;  %v2843_v11 = vadd.f32 %v2841_v1, %v2694_v54  ;;  %v6919_v39 = vsel %vm797_vm0, %v4392_v22, %v4394_v2  ;;  %v6923_v40 = vmul.f32 %v6577_v16, %v6914_v34 }
  0xef   : > { %v2888_v50 = vpop.permute.xlu1 %2887  ;;  %v2886_v4 = vpop.permute.xlu0 %2885  ;;  %v4547_v20 = vmul.f32 %v6583_v19, %v6914_v34  ;;  %v3245_v53 = vsel %vm797_vm0, %v3243_v28, %v3244_v13  ;;  %v4238_v28 = vmul.f32 %v6577_v16, %v4236_v3 }
  0xf0   : > { %v2892_v62 = vadd.f32 %v2888_v50, %v2844_v9  ;;  %v2891_v5 = vadd.f32 %v2886_v4, %v2843_v11  ;;  %v3546_v9 = vrot.slane %v3539_v58, 2  ;;  %v3543_v11 = vrot.slane %v3537_v55, 2 }
  0xf1   : > { %2708 = vrot.lane.b32.xlu1 %v2705_v21, %s6302_s13  ;;  %v4552_v21 = vrot.slane %v6923_v40, 1  ;;  %v3403_v50 = vrot.slane %v3397_v33, 1  ;;  %v4554_v4 = vrot.slane %v4547_v20, 1  ;;  %v3845_v55 = vmul.f32 %v6535_v31, %v6844_v45 }
  0xf2   : > { %v3547_v63 = vsel %vm1246_vm1, %v3544_v44, %v3546_v9  ;;  %v4244_v9 = vrot.slane %v4238_v28, 1 }
  0xf3   : > { %v2992_v6 = vpop.permute.xlu1 %2991  ;;  %v2990_v26 = vpop.permute.xlu0 %2989  ;;  %v3405_v13 = vsel %vm797_vm0, %v3403_v50, %v3404_v37  ;;  %v3851_v45 = vrot.slane %v3845_v55, 2  ;;  %v4246_v50 = vrot.slane %v4239_v25, 1 }
  0xf4   : > { %v2996_v60 = vadd.f32 %v2992_v6, %v2892_v62  ;;  %v2995_v1 = vadd.f32 %v2990_v26, %v2891_v5  ;;  %v3545_v62 = vsel %vm1246_vm1, %v3543_v11, %v3544_v44  ;;  %v6939_v5 = vsel %vm797_vm0, %v4552_v21, %v4554_v4 }
  0xf5   : > { %2898 = vrot.lane.b32.xlu1 %v2894_v61, %s6303_s14  ;;  %v3988_v26 = vstv %s6903_s30  ;;  %v3853_v12 = vsel %vm1246_vm1, %v3851_v45, %v3852_v47  ;;  %s5696_s30 = sld [smem:[#allocation2 + $0x36]] }
  0xf6   : > { %v3103_v23 = vadd.f32 %v3099_v14, %v2996_v60  ;;  %v3102_v36 = vadd.f32 %v3097_v38, %v2995_v1  ;;  %v3691_v38 = vrot.slane %v3685_v56, 2  ;;  %v3990_v2 = vmul.f32 %v6577_v16, %v3988_v26 }
  0xf7   : > { %v3231_v49 = vpop.permute.xlu1 %3230  ;;  %v3229_v54 = vpop.permute.xlu0 %3228 }
  0xf8   : > { %v3235_v51 = vadd.f32 %v3231_v49, %v3103_v23  ;;  %v3234_v52 = vadd.f32 %v3229_v54, %v3102_v36  ;;  %v3693_v31 = vsel %vm1246_vm1, %v3691_v38, %v3692_v57  ;;  %v4237_v49 = vmul.f32 %v6580_v18, %v4236_v3 }
  0xf9   : > { %3002 = vrot.lane.b32.xlu1 %v2998_v27, %s6302_s13  ;;  %v3989_v27 = vmul.f32 %v6580_v18, %v3988_v26 }
  0xfb   : > { %v3391_v58 = vpop.permute.xlu1 %3390  ;;  %v3389_v61 = vpop.permute.xlu0 %3388 }
  0xfc   : > { %v3395_v32 = vadd.f32 %v3391_v58, %v3235_v51  ;;  %v3394_v6 = vadd.f32 %v3389_v61, %v3234_v52  ;;  %v4243_v51 = vrot.slane %v4237_v49, 1  ;;  %v4684_v52 = vstv %s5675_s6  ;;  %s7164_s6 = sld [smem:[#allocation2 + $0x3f]] }
  0xfd   : > { %3248 = vrot.lane.b32.xlu1 %v3245_v53, %s6303_s14  ;;  %v4041_v53 = vstv %s6949_s7  ;;  %v4687_v26 = vmul.f32 %v6583_v19, %v4684_v52  ;;  %v4685_v3 = vmul.f32 %v6580_v18, %v4684_v52  ;;  %s5708_s7 = sld [smem:[#allocation2 + $0x42]] }
  0xfe   : > { %v3551_v42 = vadd.f32 %v3547_v63, %v3395_v32  ;;  %v3550_v14 = vadd.f32 %v3545_v62, %v3394_v6  ;;  %v4042_v56 = vmul.f32 %v6580_v18, %v4041_v53  ;;  %v4247_v63 = vsel %vm797_vm0, %v4244_v9, %v4246_v50 }
  0xff   : > { %v3679_v60 = vpop.permute.xlu1 %3678  ;;  %v3677_v1 = vpop.permute.xlu0 %3676  ;;  %v4245_v32 = vsel %vm797_vm0, %v4243_v51, %v4244_v9  ;;  %v4686_v6 = vmul.f32 %v6577_v16, %v4684_v52  ;;  %v4694_v25 = vrot.slane %v4687_v26, 2 }
 0x100   : > { %v3683_v37 = vadd.f32 %v3679_v60, %v3551_v42  ;;  %v3682_v33 = vadd.f32 %v3677_v1, %v3550_v14  ;;  %v4145_v14 = vstv %s6960_s8  ;;  %v4391_v60 = vrot.slane %v4385_v7, 1  ;;  %s5711_s8 = sld [smem:[#allocation2 + $0x45]] }
 0x101   : > { %3408 = vrot.lane.b32.xlu1 %v3405_v13, %s6302_s13  ;;  %v4146_v38 = vmul.f32 %v6580_v18, %v4145_v14  ;;  %v4545_v1 = vmul.f32 %v6580_v18, %v6914_v34  ;;  %v4692_v28 = vrot.slane %v4686_v6, 2 }
 0x102   : > { %v4393_v45 = vsel %vm797_vm0, %v4391_v60, %v4392_v22 }
 0x103   : > { %v3839_v23 = vpop.permute.xlu1 %3838  ;;  %v3837_v36 = vpop.permute.xlu0 %3836 }
 0x104   : > { %v3843_v54 = vadd.f32 %v3839_v23, %v3683_v37  ;;  %v3842_v44 = vadd.f32 %v3837_v36, %v3682_v33  ;;  %v4691_v37 = vrot.slane %v4685_v3, 2  ;;  %v4551_v23 = vrot.slane %v4545_v1, 1 }
 0x105   : > { %3696 = vrot.lane.b32.xlu1 %v3693_v31, %s6303_s14  ;;  %v4992_v3 = vstv %s5713_s9 }
 0x106   : > { %v3992_v11 = vadd.f32 %v3990_v2, %v3843_v54  ;;  %v3991_v20 = vadd.f32 %v3989_v27, %v3842_v44  ;;  %v4695_v54 = vsel %vm1246_vm1, %v4692_v28, %v4694_v25  ;;  %v4693_v34 = vsel %vm1246_vm1, %v4691_v37, %v4692_v28 }
 0x107   : > { %v4036_v57 = vpop.permute.xlu1 %4035  ;;  %v4034_v4 = vpop.permute.xlu0 %4033  ;;  %v4553_v50 = vsel %vm797_vm0, %v4551_v23, %v4552_v21  ;;  %v547_v37 = vstv %s5678_s10  ;;  %s7195_s10 = sld [smem:[#allocation2 + $0x49]] }
 0x108   : > { %v4040_v58 = vadd.f32 %v4036_v57, %v3992_v11  ;;  %v4039_v61 = vadd.f32 %v4034_v4, %v3991_v20 }
 0x109   : > { %3856 = vrot.lane.b32.xlu1 %v3853_v12, %s6302_s13 }
 0x10b   : > { %v4140_v47 = vpop.permute.xlu1 %4139  ;;  %v4138_v62 = vpop.permute.xlu0 %4137 }
 0x10c   : > { %v4144_v13 = vadd.f32 %v4140_v47, %v4040_v58  ;;  %v4143_v42 = vadd.f32 %v4138_v62, %v4039_v61  ;;  %v7007_v61 = vld [vmem:[%s6441_s11 + $0x20] sm:$0xff] }
 0x10d   : > { %4046 = vrot.lane.b32.xlu1 %v4042_v56, %s6303_s14 }
 0x10e   : > { %v4251_v55 = vadd.f32 %v4247_v63, %v4144_v13  ;;  %v4250_v10 = vadd.f32 %v4245_v32, %v4143_v42  ;;  %v1851_v63 = vmul.f32 %v7007_v61, %v1849_v0 }
 0x10f   : > { %v4379_v2 = vpop.permute.xlu1 %4378  ;;  %v4377_v27 = vpop.permute.xlu0 %4376 }
 0x110   : > { %v4383_v33 = vadd.f32 %v4379_v2, %v4251_v55  ;;  %v4382_v31 = vadd.f32 %v4377_v27, %v4250_v10 }
 0x111   : > { %4150 = vrot.lane.b32.xlu1 %v4146_v38, %s6302_s13 }
 0x113   : > { %v4539_v36 = vpop.permute.xlu1 %4538  ;;  %v4537_v49 = vpop.permute.xlu0 %4536 }
 0x114   : > { %v4543_v44 = vadd.f32 %v4539_v36, %v4383_v33  ;;  %v4542_v9 = vadd.f32 %v4537_v49, %v4382_v31  ;;  %v807_v33 = vstv %s5681_s12  ;;  %v7088_v31 = vld [vmem:[%s6441_s11 + $0x8] sm:$0xff]  ;;  %v7093_v36 = vld [vmem:[%s6441_s11 + $0x10] sm:$0x3]  ;;  %s5716_s12 = sld [smem:[#allocation2 + $0x4a]] }
 0x115   : > { %4396 = vrot.lane.b32.xlu1 %v4393_v45, %s6303_s14  ;;  %v549_v45 = vmul.f32 %v7088_v31, %v547_v37  ;;  %v809_v23 = vmul.f32 %v7088_v31, %v807_v33  ;;  %v810_v49 = vmul.f32 %v7093_v36, %v807_v33 }
 0x116   : > { %v4699_v11 = vadd.f32 %v4695_v54, %v4543_v44  ;;  %v4698_v20 = vadd.f32 %v4693_v34, %v4542_v9 }
 0x117   : > { %v4827_v29 = vpop.permute.xlu1 %4826  ;;  %v4825_v22 = vpop.permute.xlu0 %4824  ;;  %v815_v44 = vrot.slane %v809_v23, 1  ;;  %v817_v9 = vrot.slane %v810_v49, 1 }
 0x118   : > { %v4831_v12 = vadd.f32 %v4827_v29, %v4699_v11  ;;  %v4830_v57 = vadd.f32 %v4825_v22, %v4698_v20  ;;  %v1256_v29 = vstv %s5684_s20  ;;  %v7100_v22 = vld [vmem:[%s6441_s11] sm:$0xff]  ;;  %s5718_s20 = sld [smem:[#allocation2 + $0x4c]] }
 0x119   : > { %4556 = vrot.lane.b32.xlu1 %v4553_v50, %s6302_s13  ;;  %v818_v50 = vsel %vm797_vm0, %v815_v44, %v817_v9 }
 0x11b   : > { %v4987_v4 = vpop.permute.xlu1 %4986  ;;  %v4985_v51 = vpop.permute.xlu0 %4984 }
 0x11c   : > { %v6996_v52 = vadd.f32 %v4987_v4, %v4831_v12  ;;  %v6998_v56 = vadd.f32 %v4985_v51, %v4830_v57  ;;  %v548_v12 = vmul.f32 %v7100_v22, %v547_v37  ;;  %v808_v4 = vmul.f32 %v7100_v22, %v807_v33  ;;  %v7132_v37 = vld [vmem:[%s6441_s11 + $0x18] sm:$0xff] }
 0x11d   : > { %v1258_v51 = vmul.f32 %v7088_v31, %v1256_v29 }
 0x11e   : > { %v5133_v40 = vsel %vm5132_vm2, %v6998_v56, 0.0  ;;  %v5134_v21 = vsel %vm5132_vm2, %v6996_v52, 0.0 }
 0x11f   : > { %v5135_v58 = vadd.f32 %v5134_v21, %v5133_v40  ;;  %v7017_v7 = vpop.permute.xlu1 %600  ;;  %v1259_v40 = vmul.f32 %v7093_v36, %v1256_v29 }
 0x121   : > { %5136 = vadd.xlane.f32.xlu0 %v5135_v58  ;;  %v606_v58 = vadd.f32 %v7017_v7, %v548_v12  ;;  %v1257_v7 = vmul.f32 %v7100_v22, %v1256_v29 }
 0x123   : > { %v603_v47 = vpop.permute.xlu1 %602 }
 0x124   : > { %v607_v34 = vadd.f32 %v603_v47, %v549_v45  ;;  %v1264_v47 = vrot.slane %v1258_v51, 2 }
 0x137   : > { %1400 = vrot.lane.b32.xlu0 %v6636_v17, %s6303_s14  ;;  %v7024_v17 = vld [vmem:[%s6441_s11 + $0x38] sm:$0xff] }
 0x138   : > { %v2895_v0 = vmul.f32 %v7024_v17, %v2893_v48  ;;  %v4043_v48 = vmul.f32 %v6577_v16, %v4041_v53 }
 0x13b   : > { %1856 = vrot.lane.b32.xlu0 %v1851_v63, %s6302_s13 }
 0x13f   : > { %2102 = vrot.lane.b32.xlu0 %v6702_v35, %s6303_s14  ;;  %v2999_v35 = vmul.f32 %v7024_v17, %v2997_v15 }
 0x143   : > { %2262 = vrot.lane.b32.xlu0 %v6721_v46, %s6302_s13  ;;  %v7033_v46 = vpop.permute.xlu1 %704 }
 0x147   : > { %2550 = vrot.lane.b32.xlu0 %v6742_v59, %s6303_s14  ;;  %v707_v59 = vpop.permute.xlu1 %706 }
 0x148   : > { %v711_v20 = vadd.f32 %v707_v59, %v607_v34 }
 0x14a   : > { %v822_v57 = vadd.f32 %v818_v50, %v711_v20  ;;  %v2404_v20 = vstv %s5693_s28  ;;  %s5722_s28 = sld [smem:[#allocation2 + $0x50]] }
 0x14b   : > { %2710 = vrot.lane.b32.xlu0 %v6765_v30, %s6302_s13  ;;  %v7040_v30 = vpop.permute.xlu1 %951 }
 0x14f   : > { %2900 = vrot.lane.b32.xlu0 %v2895_v0, %s6303_s14  ;;  %v7049_v15 = vpop.permute.xlu1 %953  ;;  %v814_v0 = vrot.slane %v808_v4, 1  ;;  %v2406_v4 = vmul.f32 %v7007_v61, %v2404_v20 }
 0x150   : > { %v958_v63 = vadd.f32 %v7049_v15, %v822_v57 }
 0x153   : > { %3004 = vrot.lane.b32.xlu0 %v2999_v35, %s6302_s13  ;;  %v7055_v62 = vpop.permute.xlu1 %1111  ;;  %v1266_v35 = vrot.slane %v1259_v40, 2 }
 0x157   : > { %3250 = vrot.lane.b32.xlu0 %v6802_v24, %s6303_s14  ;;  %v4147_v24 = vmul.f32 %v6577_v16, %v4145_v14  ;;  %v1114_v26 = vpop.permute.xlu1 %1113  ;;  %v7067_v14 = vld [vmem:[%s6441_s11 + $0x48] sm:$0xff] }
 0x15b   : > { %3410 = vrot.lane.b32.xlu0 %v6833_v43, %s6302_s13  ;;  %v4832_v43 = vstv %s5712_s5  ;;  %v1403_v38 = vpop.permute.xlu1 %1402 }
 0x15c   : > { %v4835_v6 = vmul.f32 %v6583_v19, %v4832_v43 }
 0x15e   : > { %v4842_v42 = vrot.slane %v4835_v6, 2 }
 0x15f   : > { %3698 = vrot.lane.b32.xlu0 %v6849_v8, %s6303_s14  ;;  %v4833_v8 = vmul.f32 %v6580_v18, %v4832_v43  ;;  %v7071_v18 = vld [vmem:[%s6441_s11 + $0x50] sm:$0xff]  ;;  %v7082_v27 = vpop.permute.xlu1 %1560 }
 0x161   : > { %v4839_v53 = vrot.slane %v4833_v8, 2  ;;  %v1267_v8 = vsel %vm1246_vm1, %v1264_v47, %v1266_v35  ;;  %v2405_v35 = vmul.f32 %v7132_v37, %v2404_v20 }
 0x163   : > { %3858 = vrot.lane.b32.xlu0 %v6875_v41, %s6302_s13  ;;  %v4834_v41 = vmul.f32 %v6577_v16, %v4832_v43  ;;  %v4993_v16 = vmul.f32 %v7067_v14, %v4992_v3  ;;  %v1563_v25 = vpop.permute.xlu1 %1562  ;;  %v816_v43 = vsel %vm797_vm0, %v814_v0, %v815_v44 }
 0x165   : > { %v4840_v32 = vrot.slane %v4834_v41, 2  ;;  %v4999_v55 = vrot.slane %v4993_v16, 2 }
 0x167   : > { %4048 = vrot.lane.b32.xlu0 %v4043_v48, %s6303_s14  ;;  %v4841_v13 = vsel %vm1246_vm1, %v4839_v53, %v4840_v32  ;;  %v4843_v19 = vsel %vm1246_vm1, %v4840_v32, %v4842_v42  ;;  %v7096_v54 = vpop.permute.xlu1 %1750  ;;  %v710_v48 = vadd.f32 %v7033_v46, %v606_v58 }
 0x169   : > { %v821_v41 = vadd.f32 %v816_v43, %v710_v48  ;;  %v2412_v43 = vrot.slane %v2406_v4, 2 }
 0x16b   : > { %4152 = vrot.lane.b32.xlu0 %v4147_v24, %s6302_s13  ;;  %v1753_v11 = vpop.permute.xlu1 %1752  ;;  %v1118_v24 = vadd.f32 %v1114_v26, %v958_v63  ;;  %v957_v32 = vadd.f32 %v7040_v30, %v821_v41 }
 0x16d   : > { %v1271_v53 = vadd.f32 %v1267_v8, %v1118_v24  ;;  %v1117_v26 = vadd.f32 %v7055_v62, %v957_v32  ;;  %v2411_v32 = vrot.slane %v2405_v35, 2 }
 0x16f   : > { %4398 = vrot.lane.b32.xlu0 %v6919_v39, %s6303_s14  ;;  %v4994_v39 = vmul.f32 %v7071_v18, %v4992_v3  ;;  %v7106_v21 = vpop.permute.xlu1 %1854  ;;  %v1407_v6 = vadd.f32 %v1403_v38, %v1271_v53 }
 0x171   : > { %v5000_v10 = vrot.slane %v4994_v39, 2  ;;  %v1567_v42 = vadd.f32 %v1563_v25, %v1407_v6  ;;  %v1956_v39 = vstv %s5690_s23  ;;  %s5721_s23 = sld [smem:[#allocation2 + $0x4f]] }
 0x172   : > { %v1957_v49 = vmul.f32 %v7132_v37, %v1956_v39 }
 0x173   : > { %4558 = vrot.lane.b32.xlu0 %v6939_v5, %s6302_s13  ;;  %v7077_v5 = vld [vmem:[%s6441_s11 + $0x58] sm:$0x3]  ;;  %v5001_v1 = vsel %vm1246_vm1, %v4999_v55, %v5000_v10  ;;  %v7110_v59 = vpop.permute.xlu1 %2100 }
 0x174   : > { %v4995_v60 = vmul.f32 %v7077_v5, %v4992_v3  ;;  %v1263_v3 = vrot.slane %v1257_v7, 2  ;;  %v1963_v40 = vrot.slane %v1957_v49, 1 }
 0x176   : > { %v5002_v2 = vrot.slane %v4995_v60, 2  ;;  %v7126_v60 = vld [vmem:[%s6441_s11 + $0x28] sm:$0x3] }
 0x177   : > { %4844 = vrot.lane.b32.xlu0 %v4841_v13, %s6303_s14  ;;  %v7116_v15 = vpop.permute.xlu1 %2260  ;;  %v1697_v13 = vstv %s5687_s22  ;;  %v1959_v30 = vmul.f32 %v7126_v60, %v1956_v39  ;;  %v2407_v51 = vmul.f32 %v7126_v60, %v2404_v20  ;;  %s5719_s22 = sld [smem:[#allocation2 + $0x4d]] }
 0x178   : > { %v5003_v28 = vsel %vm1246_vm1, %v5000_v10, %v5002_v2  ;;  %v1699_v16 = vmul.f32 %v7007_v61, %v1697_v13  ;;  %v1958_v10 = vmul.f32 %v7007_v61, %v1956_v39  ;;  %v1698_v33 = vmul.f32 %v7132_v37, %v1697_v13 }
 0x179   : > { %v1966_v23 = vrot.slane %v1959_v30, 1  ;;  %v2414_v8 = vrot.slane %v2407_v51, 2 }
 0x17a   : > { %v1701_v2 = vadd.f32 %v1699_v16, %v1567_v42  ;;  %v1964_v45 = vrot.slane %v1958_v10, 1  ;;  %v2413_v16 = vsel %vm1246_vm1, %v2411_v32, %v2412_v43 }
 0x17b   : > { %4846 = vrot.lane.b32.xlu0 %v4843_v19, %s6303_s14  ;;  %v7119_v46 = vpop.permute.xlu1 %2548  ;;  %v1265_v19 = vsel %vm1246_vm1, %v1263_v3, %v1264_v47 }
 0x17c   : > { %v1757_v9 = vadd.f32 %v1753_v11, %v1701_v2  ;;  %v1967_v57 = vsel %vm797_vm0, %v1964_v45, %v1966_v23  ;;  %v1965_v41 = vsel %vm797_vm0, %v1963_v40, %v1964_v45 }
 0x17f   : > { %5004 = vrot.lane.b32.xlu0 %v5001_v1, %s6302_s13  ;;  %v1270_v1 = vadd.f32 %v1265_v19, %v1117_v26  ;;  %v2415_v26 = vsel %vm1246_vm1, %v2412_v43, %v2414_v8 }
 0x183   : > { %5006 = vrot.lane.b32.xlu0 %v5003_v28, %s6302_s13  ;;  %v7129_v28 = vpop.permute.xlu1 %2708 }
 0x187   : > { %v2899_v58 = vpop.permute.xlu1 %2898 }
 0x18b   : > { %v3003_v6 = vpop.permute.xlu1 %3002 }
 0x18f   : > { %v3249_v30 = vpop.permute.xlu1 %3248 }
 0x1aa   : > { %v5137_v55 = vpop.xlane.xlu0 %5136 }
 0x1ab   : > { %v5138_v38 = vrot.slane %v5137_v55, 4 }
 0x1ad   : > { %v5139_v62 = vadd.f32 %v5138_v38, %v5137_v55  ;;  %v3104_v55 = vstv %s5699_s29  ;;  %s5724_s29 = sld [smem:[#allocation2 + $0x52]] }
 0x1ae   : > { %v1401_v25 = vpop.permute.xlu0 %1400  ;;  %v3106_v2 = vmul.f32 %v7024_v17, %v3104_v55 }
 0x1af   : > { %v1406_v34 = vadd.f32 %v1401_v25, %v1270_v1  ;;  %v5140_v44 = vrot.slane %v5139_v62, 2 }
 0x1b0   : > { %v3112_v20 = vrot.slane %v3106_v2, 1 }
 0x1b1   : > { %v1566_v50 = vadd.f32 %v7082_v27, %v1406_v34  ;;  %v5141_v29 = vadd.f32 %v5140_v44, %v5139_v62  ;;  %v7150_v62 = vld [vmem:[%s6441_s11 + $0x30] sm:$0xff] }
 0x1b2   : > { %v1857_v12 = vpop.permute.xlu0 %1856  ;;  %v3105_v25 = vmul.f32 %v7150_v62, %v3104_v55 }
 0x1b3   : > { %v5142_v63 = vrot.slane %v5141_v29, 1  ;;  %v1700_v0 = vadd.f32 %v1698_v33, %v1566_v50  ;;  %v1861_v47 = vadd.f32 %v1857_v12, %v1757_v9  ;;  %v3552_v9 = vstv %s5702_s27  ;;  %s5725_s27 = sld [smem:[#allocation2 + $0x53]] }
 0x1b4   : > { %v3111_v50 = vrot.slane %v3105_v25, 1  ;;  %v3553_v40 = vmul.f32 %v7150_v62, %v3552_v9 }
 0x1b5   : > { %v5143_v48 = vadd.f32 %v5142_v63, %v5141_v29  ;;  %v1756_v11 = vadd.f32 %v7096_v54, %v1700_v0  ;;  %v1971_v24 = vadd.f32 %v1967_v57, %v1861_v47  ;;  %v3409_v29 = vpop.permute.xlu1 %3408 }
 0x1b6   : > { %v2103_v27 = vpop.permute.xlu0 %2102  ;;  %v3113_v47 = vsel %vm797_vm0, %v3111_v50, %v3112_v20 }
 0x1b7   : > { %5974 = vpush %v5143_v48  ;;  %v2107_v53 = vadd.f32 %v2103_v27, %v1971_v24  ;;  %v1860_v7 = vadd.f32 %v7106_v21, %v1756_v11  ;;  %v2845_v21 = vstv %s5696_s30  ;;  %v3559_v27 = vrot.slane %v3553_v40, 2  ;;  %s5727_s30 = sld [smem:[#allocation2 + $0x55]] }
 0x1b8   : > { %v2846_v45 = vmul.f32 %v7150_v62, %v2845_v21 }
 0x1b9   : > { %v1970_v3 = vadd.f32 %v1965_v41, %v1860_v7  ;;  %v3697_v43 = vpop.permute.xlu1 %3696 }
 0x1ba   : > { %v2263_v13 = vpop.permute.xlu0 %2262 }
 0x1bb   : > { %v2267_v54 = vadd.f32 %v2263_v13, %v2107_v53  ;;  %v2106_v42 = vadd.f32 %v7110_v59, %v1970_v3  ;;  %v2847_v59 = vmul.f32 %v7024_v17, %v2845_v21 }
 0x1bd   : > { %v2419_v39 = vadd.f32 %v2415_v26, %v2267_v54  ;;  %v2266_v19 = vadd.f32 %v7116_v15, %v2106_v42  ;;  %v7157_v15 = vld [vmem:[%s6441_s11 + $0x40] sm:$0x3]  ;;  %v3993_v26 = vstv %s7164_s6  ;;  %v3857_v54 = vpop.permute.xlu1 %3856  ;;  %s5728_s6 = sld [smem:[#allocation2 + $0x56]] }
 0x1be   : > { %v2551_v10 = vpop.permute.xlu0 %2550  ;;  %v3107_v49 = vmul.f32 %v7157_v15, %v3104_v55  ;;  %v3555_v11 = vmul.f32 %v7157_v15, %v3552_v9 }
 0x1bf   : > { %v2555_v38 = vadd.f32 %v2551_v10, %v2419_v39  ;;  %v2418_v1 = vadd.f32 %v2413_v16, %v2266_v19  ;;  %v3994_v10 = vmul.f32 %v7067_v14, %v3993_v26 }
 0x1c0   : > { %v3114_v51 = vrot.slane %v3107_v49, 1  ;;  %v3562_v32 = vrot.slane %v3555_v11, 2 }
 0x1c1   : > { %v2554_v33 = vadd.f32 %v7119_v46, %v2418_v1  ;;  %v3554_v46 = vmul.f32 %v7024_v17, %v3552_v9  ;;  %v4047_v2 = vpop.permute.xlu1 %4046 }
 0x1c2   : > { %v2711_v23 = vpop.permute.xlu0 %2710  ;;  %v3115_v48 = vsel %vm797_vm0, %v3112_v20, %v3114_v51 }
 0x1c3   : > { %v2715_v34 = vadd.f32 %v2711_v23, %v2555_v38  ;;  %v2714_v44 = vadd.f32 %v7129_v28, %v2554_v33  ;;  %v3560_v24 = vrot.slane %v3554_v46, 2  ;;  %v3995_v23 = vmul.f32 %v7071_v18, %v3993_v26 }
 0x1c5   : > { %v2849_v12 = vadd.f32 %v2847_v59, %v2715_v34  ;;  %v2848_v57 = vadd.f32 %v2846_v45, %v2714_v44  ;;  %v3561_v3 = vsel %vm1246_vm1, %v3559_v27, %v3560_v24  ;;  %v3563_v39 = vsel %vm1246_vm1, %v3560_v24, %v3562_v32  ;;  %v4151_v50 = vpop.permute.xlu1 %4150 }
 0x1c6   : > { %v2901_v4 = vpop.permute.xlu0 %2900 }
 0x1c7   : > { %v2905_v63 = vadd.f32 %v2901_v4, %v2849_v12  ;;  %v2904_v0 = vadd.f32 %v2899_v58, %v2848_v57 }
 0x1c9   : > { %v3008_v35 = vadd.f32 %v3003_v6, %v2904_v0 }
 0x1ca   : > { %v3005_v28 = vpop.permute.xlu0 %3004 }
 0x1cb   : > { %v3009_v8 = vadd.f32 %v3005_v28, %v2905_v63  ;;  %v3118_v41 = vadd.f32 %v3113_v47, %v3008_v35  ;;  %v4700_v63 = vstv %s5711_s8  ;;  %v4397_v47 = vpop.permute.xlu1 %4396  ;;  %s5731_s8 = sld [smem:[#allocation2 + $0x59]] }
 0x1cc   : > { %v4702_v11 = vmul.f32 %v7071_v18, %v4700_v63  ;;  %v4701_v24 = vmul.f32 %v7067_v14, %v4700_v63 }
 0x1cd   : > { %v3119_v53 = vadd.f32 %v3115_v48, %v3009_v8  ;;  %v3254_v7 = vadd.f32 %v3249_v30, %v3118_v41  ;;  %v4252_v30 = vstv %s5708_s7  ;;  %v4703_v41 = vmul.f32 %v7077_v5, %v4700_v63  ;;  %s5730_s7 = sld [smem:[#allocation2 + $0x58]] }
 0x1ce   : > { %v3251_v58 = vpop.permute.xlu0 %3250  ;;  %v4254_v33 = vmul.f32 %v7071_v18, %v4252_v30  ;;  %v4253_v45 = vmul.f32 %v7067_v14, %v4252_v30  ;;  %v4255_v9 = vmul.f32 %v7077_v5, %v4252_v30 }
 0x1cf   : > { %v3255_v13 = vadd.f32 %v3251_v58, %v3119_v53  ;;  %v3414_v6 = vadd.f32 %v3409_v29, %v3254_v7  ;;  %v4708_v53 = vrot.slane %v4702_v11, 2  ;;  %v4707_v7 = vrot.slane %v4701_v24, 2  ;;  %v4557_v58 = vpop.permute.xlu1 %4556 }
 0x1d0   : > { %v4260_v20 = vrot.slane %v4254_v33, 1  ;;  %v4259_v29 = vrot.slane %v4253_v45, 1  ;;  %v4262_v46 = vrot.slane %v4255_v9, 1  ;;  %v608_v9 = vstv %s7195_s10  ;;  %s5734_s10 = sld [smem:[#allocation2 + $0x5c]] }
 0x1d1   : > { %v3566_v42 = vadd.f32 %v3561_v3, %v3414_v6 }
 0x1d2   : > { %v3411_v16 = vpop.permute.xlu0 %3410  ;;  %v4261_v40 = vsel %vm797_vm0, %v4259_v29, %v4260_v20  ;;  %v4263_v48 = vsel %vm797_vm0, %v4260_v20, %v4262_v46  ;;  %v712_v29 = vstv %s5716_s12  ;;  %s5737_s12 = sld [smem:[#allocation2 + $0x5f]] }
 0x1d3   : > { %v3415_v19 = vadd.f32 %v3411_v16, %v3255_v13  ;;  %v3702_v55 = vadd.f32 %v3697_v43, %v3566_v42  ;;  %v4710_v42 = vrot.slane %v4703_v41, 2  ;;  %v4709_v16 = vsel %vm1246_vm1, %v4707_v7, %v4708_v53 }
 0x1d4   : > { %v714_v46 = vmul.f32 %v7088_v31, %v712_v29 }
 0x1d5   : > { %v3567_v21 = vadd.f32 %v3563_v39, %v3415_v19  ;;  %v3862_v38 = vadd.f32 %v3857_v54, %v3702_v55  ;;  %v4711_v30 = vsel %vm1246_vm1, %v4708_v53, %v4710_v42  ;;  %v610_v53 = vmul.f32 %v7088_v31, %v608_v9 }
 0x1d6   : > { %v3699_v1 = vpop.permute.xlu0 %3698 }
 0x1d7   : > { %v3703_v25 = vadd.f32 %v3699_v1, %v3567_v21  ;;  %v3996_v59 = vadd.f32 %v3994_v10, %v3862_v38 }
 0x1d9   : > { %v4052_v44 = vadd.f32 %v4047_v2, %v3996_v59 }
 0x1da   : > { %v3859_v49 = vpop.permute.xlu0 %3858 }
 0x1db   : > { %v3863_v34 = vadd.f32 %v3859_v49, %v3703_v25  ;;  %v4156_v51 = vadd.f32 %v4151_v50, %v4052_v44  ;;  %v609_v50 = vmul.f32 %v7100_v22, %v608_v9  ;;  %v1862_v9 = vstv %s5725_s27  ;;  %s5748_s27 = sld [smem:[#allocation2 + $0x6a]] }
 0x1dd   : > { %v3997_v12 = vadd.f32 %v3995_v23, %v3863_v34  ;;  %v4266_v28 = vadd.f32 %v4261_v40, %v4156_v51 }
 0x1de   : > { %v4049_v57 = vpop.permute.xlu0 %4048 }
 0x1df   : > { %v4053_v4 = vadd.f32 %v4049_v57, %v3997_v12  ;;  %v4402_v8 = vadd.f32 %v4397_v47, %v4266_v28  ;;  %v959_v12 = vstv %s5718_s20  ;;  %v713_v57 = vmul.f32 %v7100_v22, %v712_v29  ;;  %s5739_s20 = sld [smem:[#allocation2 + $0x61]] }
 0x1e0   : > { %v961_v51 = vmul.f32 %v7088_v31, %v959_v12  ;;  %v1119_v47 = vstv %s5719_s22  ;;  %v2268_v29 = vstv %s5728_s6  ;;  %s5740_s22 = sld [smem:[#allocation2 + $0x62]] }
 0x1e1   : > { %v4562_v6 = vadd.f32 %v4557_v58, %v4402_v8  ;;  %v1121_v11 = vmul.f32 %v7088_v31, %v1119_v47  ;;  %v1122_v24 = vmul.f32 %v7093_v36, %v1119_v47  ;;  %s5749_s6 = sld [smem:[#allocation2 + $0x6b]] }
 0x1e2   : > { %v4153_v0 = vpop.permute.xlu0 %4152  ;;  %v967_v63 = vrot.slane %v961_v51, 1  ;;  %v1864_v51 = vmul.f32 %v7007_v61, %v1862_v9 }
 0x1e3   : > { %v4157_v35 = vadd.f32 %v4153_v0, %v4053_v4  ;;  %v4714_v21 = vadd.f32 %v4709_v16, %v4562_v6  ;;  %v960_v4 = vmul.f32 %v7100_v22, %v959_v12  ;;  %v962_v0 = vmul.f32 %v7093_v36, %v959_v12 }
 0x1e4   : > { %v1127_v7 = vrot.slane %v1121_v11, 1  ;;  %v1129_v58 = vrot.slane %v1122_v24, 1  ;;  %v1863_v12 = vmul.f32 %v7132_v37, %v1862_v9 }
 0x1e5   : > { %v4267_v43 = vadd.f32 %v4263_v48, %v4157_v35  ;;  %v966_v40 = vrot.slane %v960_v4, 1  ;;  %v969_v28 = vrot.slane %v962_v0, 1  ;;  %v1120_v48 = vmul.f32 %v7100_v22, %v1119_v47 }
 0x1e6   : > { %v4399_v27 = vpop.permute.xlu0 %4398  ;;  %v2269_v4 = vmul.f32 %v7132_v37, %v2268_v29  ;;  %v2556_v47 = vstv %s5730_s7  ;;  %s5714_s7 = sld [smem:[#allocation2 + $0x48]] }
 0x1e7   : > { %v4403_v13 = vadd.f32 %v4399_v27, %v4267_v43  ;;  %v968_v35 = vsel %vm797_vm0, %v966_v40, %v967_v63  ;;  %v1408_v27 = vstv %s5721_s23  ;;  %v970_v43 = vsel %vm797_vm0, %v967_v63, %v969_v28  ;;  %s5742_s23 = sld [smem:[#allocation2 + $0x64]] }
 0x1e8   : > { %s5975_s5 = spop %5974  ;;  %v1126_v8 = vrot.slane %v1120_v48, 1  ;;  %v1409_v41 = vmul.f32 %v7100_v22, %v1408_v27  ;;  %v2271_v40 = vmul.f32 %v7126_v60, %v2268_v29  ;;  %v2275_v28 = vrot.slane %v2269_v4, 1 }
 0x1e9   : > { %s5145_s9 = smul.f32 0.00390625, %s5975_s5  ;;  %v2557_v48 = vmul.f32 %v7132_v37, %v2556_v47  ;;  %s5733_s5 = sld [smem:[#allocation2 + $0x5b]] }
 0x1ea   : > { %v4559_v32 = vpop.permute.xlu0 %4558  ;;  %v1128_v6 = vsel %vm797_vm0, %v1126_v8, %v1127_v7  ;;  %v1415_v42 = vrot.slane %v1409_v41, 2  ;;  %v2278_v24 = vrot.slane %v2271_v40, 1  ;;  %v2559_v8 = vmul.f32 %v7126_v60, %v2556_v47 }
 0x1eb   : > { %v5146_v3 = vstv %s5145_s9  ;;  %v4563_v10 = vadd.f32 %v4559_v32, %v4403_v13  ;;  %v1410_v32 = vmul.f32 %v7088_v31, %v1408_v27  ;;  %v1568_v13 = vstv %s5722_s28  ;;  %s5736_s9 = sld [smem:[#allocation2 + $0x5e]] }
 0x1ec   : > { %v7182_v26 = vsub.f32 %v6998_v56, %v5146_v3  ;;  %v7185_v54 = vsub.f32 %v6996_v52, %v5146_v3  ;;  %v1411_v3 = vmul.f32 %v7093_v36, %v1408_v27  ;;  %v1569_v16 = vmul.f32 %v7100_v22, %v1568_v13  ;;  %s5745_s28 = sld [smem:[#allocation2 + $0x67]] }
 0x1ed   : > { %v4715_v2 = vadd.f32 %v4711_v30, %v4563_v10  ;;  %v1570_v10 = vmul.f32 %v7088_v31, %v1568_v13  ;;  %v2716_v41 = vstv %s5731_s8  ;;  %s5717_s8 = sld [smem:[#allocation2 + $0x4b]] }
 0x1ee   : > { %v5149_v39 = vmul.f32 %v7182_v26, %v7182_v26  ;;  %v5150_v19 = vmul.f32 %v7185_v54, %v7185_v54  ;;  %v4845_v55 = vpop.permute.xlu0 %4844 }
 0x1ef   : > { %v4850_v25 = vadd.f32 %v4845_v55, %v4714_v21  ;;  %v1418_v55 = vrot.slane %v1411_v3, 2  ;;  %v1571_v21 = vmul.f32 %v7093_v36, %v1568_v13  ;;  %v2566_v13 = vrot.slane %v2559_v8, 2 }
 0x1f0   : > { %v5151_v38 = vsel %vm5132_vm2, %v5149_v39, 0.0  ;;  %v5152_v56 = vsel %vm5132_vm2, %v5150_v19, 0.0  ;;  %v1130_v39 = vsel %vm797_vm0, %v1127_v7, %v1129_v58  ;;  %v1416_v19 = vrot.slane %v1410_v32, 2 }
 0x1f1   : > { %v5153_v52 = vadd.f32 %v5152_v56, %v5151_v38  ;;  %v1575_v56 = vrot.slane %v1569_v16, 2  ;;  %v2563_v7 = vrot.slane %v2557_v48, 2  ;;  %v2717_v58 = vmul.f32 %v7132_v37, %v2716_v41 }
 0x1f2   : > { %v4847_v1 = vpop.permute.xlu0 %4846  ;;  %v1417_v38 = vsel %vm1246_vm1, %v1415_v42, %v1416_v19  ;;  %v1419_v30 = vsel %vm1246_vm1, %v1416_v19, %v1418_v55  ;;  %v2719_v42 = vmul.f32 %v7126_v60, %v2716_v41 }
 0x1f3   : > { %5154 = vadd.xlane.f32.xlu1 %v5153_v52  ;;  %v4851_v33 = vadd.f32 %v4847_v1, %v4715_v2  ;;  %v1576_v52 = vrot.slane %v1570_v10, 2  ;;  %v1578_v1 = vrot.slane %v1571_v21, 2 }
 0x1f4   : > { %v2726_v10 = vrot.slane %v2719_v42, 2  ;;  %v4054_v42 = vstv %s5742_s23  ;;  %s5738_s23 = sld [smem:[#allocation2 + $0x60]] }
 0x1f5   : > { %v1577_v2 = vsel %vm1246_vm1, %v1575_v56, %v1576_v52  ;;  %v3256_v56 = vstv %s5736_s9  ;;  %s5726_s9 = sld [smem:[#allocation2 + $0x54]] }
 0x1f6   : > { %v5005_v59 = vpop.permute.xlu0 %5004 }
 0x1f7   : > { %v7197_v45 = vadd.f32 %v5005_v59, %v4850_v25  ;;  %v1579_v25 = vsel %vm1246_vm1, %v1576_v52, %v1578_v1  ;;  %v1758_v59 = vstv %s5724_s29  ;;  %v3257_v52 = vmul.f32 %v7150_v62, %v3256_v56  ;;  %s5743_s29 = sld [smem:[#allocation2 + $0x65]] }
 0x1f9   : > { %v5181_v34 = vsel %vm5132_vm2, %v7197_v45, 0.0 }
 0x1fa   : > { %v5007_v23 = vpop.permute.xlu0 %5006 }
 0x1fb   : > { %v7199_v49 = vadd.f32 %v5007_v23, %v4851_v33  ;;  %v2108_v33 = vstv %s5727_s30  ;;  %v1759_v23 = vmul.f32 %v7132_v37, %v1758_v59  ;;  %s5746_s30 = sld [smem:[#allocation2 + $0x68]] }
 0x1fd   : > { %v5182_v44 = vsel %vm5132_vm2, %v7199_v49, 0.0 }
 0x1fe   : > { %v5183_v20 = vadd.f32 %v5182_v44, %v5181_v34  ;;  %v2109_v34 = vmul.f32 %v7132_v37, %v2108_v33  ;;  %v1760_v44 = vmul.f32 %v7007_v61, %v1758_v59  ;;  %v3259_v59 = vmul.f32 %v7157_v15, %v3256_v56 }
 0x200   : > { %5184 = vadd.xlane.f32.xlu0 %v5183_v20  ;;  %v2110_v20 = vmul.f32 %v7007_v61, %v2108_v33 }
 0x202   : > { %v2116_v63 = vrot.slane %v2110_v20, 1 }
 0x204   : > { %613 = vrot.lane.b32.xlu1 %v609_v50, %s6303_s14  ;;  %v2111_v50 = vmul.f32 %v7126_v60, %v2108_v33  ;;  %v3416_v33 = vstv %s5737_s12  ;;  %s5729_s12 = sld [smem:[#allocation2 + $0x57]] }
 0x205   : > { %v3418_v20 = vmul.f32 %v7024_v17, %v3416_v33 }
 0x206   : > { %v2118_v0 = vrot.slane %v2111_v50, 1  ;;  %v3419_v50 = vmul.f32 %v7157_v15, %v3416_v33 }
 0x207   : > { %v3424_v40 = vrot.slane %v3418_v20, 1 }
 0x208   : > { %717 = vrot.lane.b32.xlu1 %v713_v57, %s6302_s13  ;;  %v2115_v57 = vrot.slane %v2109_v34, 1  ;;  %v2119_v27 = vsel %vm797_vm0, %v2116_v63, %v2118_v0  ;;  %v3263_v34 = vrot.slane %v3257_v52, 1 }
 0x20c   : > { %719 = vrot.lane.b32.xlu1 %v714_v46, %s6302_s13  ;;  %v2270_v46 = vmul.f32 %v7007_v61, %v2268_v29 }
 0x20e   : > { %v2276_v11 = vrot.slane %v2270_v46, 1 }
 0x210   : > { %971 = vrot.lane.b32.xlu1 %v968_v35, %s6303_s14  ;;  %v2117_v35 = vsel %vm797_vm0, %v2115_v57, %v2116_v63  ;;  %v2279_v32 = vsel %vm797_vm0, %v2276_v11, %v2278_v24  ;;  %v3704_v57 = vstv %s5739_s20  ;;  %v3426_v63 = vrot.slane %v3419_v50, 1  ;;  %s7376_s20 = sld [smem:[#allocation2 + $0x5a]] }
 0x211   : > { %v3705_v46 = vmul.f32 %v7150_v62, %v3704_v57 }
 0x214   : > { %973 = vrot.lane.b32.xlu1 %v970_v43, %s6303_s14  ;;  %v2558_v43 = vmul.f32 %v7007_v61, %v2556_v47  ;;  %v3706_v47 = vmul.f32 %v7024_v17, %v3704_v57 }
 0x216   : > { %615 = vrot.lane.b32.xlu0 %v610_v53, %s6303_s14  ;;  %v2277_v53 = vsel %vm797_vm0, %v2275_v28, %v2276_v11  ;;  %v2564_v3 = vrot.slane %v2558_v43, 2  ;;  %v3864_v28 = vstv %s5740_s22  ;;  %v3711_v11 = vrot.slane %v3705_v46, 2  ;;  %s5735_s22 = sld [smem:[#allocation2 + $0x5d]] }
 0x217   : > { %v3865_v24 = vmul.f32 %v7150_v62, %v3864_v28  ;;  %v3712_v43 = vrot.slane %v3706_v47, 2 }
 0x218   : > { %1131 = vrot.lane.b32.xlu1 %v1128_v6, %s6302_s13  ;;  %v2718_v6 = vmul.f32 %v7007_v61, %v2716_v41  ;;  %v2565_v16 = vsel %vm1246_vm1, %v2563_v7, %v2564_v3  ;;  %v2567_v19 = vsel %vm1246_vm1, %v2564_v3, %v2566_v13  ;;  %v3866_v41 = vmul.f32 %v7024_v17, %v3864_v28 }
 0x219   : > { %v3713_v7 = vsel %vm1246_vm1, %v3711_v11, %v3712_v43 }
 0x21a   : > { %1133 = vrot.lane.b32.xlu0 %v1130_v39, %s6302_s13  ;;  %v2723_v39 = vrot.slane %v2717_v58, 2  ;;  %v2724_v55 = vrot.slane %v2718_v6, 2  ;;  %v3871_v58 = vrot.slane %v3865_v24, 2  ;;  %v3872_v3 = vrot.slane %v3866_v41, 2 }
 0x21c   : > { %1420 = vrot.lane.b32.xlu1 %v1417_v38, %s6303_s14  ;;  %v2725_v61 = vsel %vm1246_vm1, %v2723_v39, %v2724_v55  ;;  %v2727_v21 = vsel %vm1246_vm1, %v2724_v55, %v2726_v10  ;;  %v2906_v38 = vstv %s5733_s5  ;;  %v4055_v39 = vmul.f32 %v7067_v14, %v4054_v42  ;;  %s5720_s5 = sld [smem:[#allocation2 + $0x4e]] }
 0x21d   : > { %v2908_v1 = vmul.f32 %v7024_v17, %v2906_v38  ;;  %v4056_v55 = vmul.f32 %v7071_v18, %v4054_v42  ;;  %v4158_v10 = vstv %s5743_s29 }
 0x21e   : > { %1422 = vrot.lane.b32.xlu0 %v1419_v30, %s6303_s14  ;;  %v2907_v30 = vmul.f32 %v7150_v62, %v2906_v38  ;;  %v4564_v38 = vstv %s5746_s30  ;;  %s7395_s30 = sld [smem:[#allocation2 + $0x63]] }
 0x21f   : > { %v4565_v52 = vmul.f32 %v7067_v14, %v4564_v38 }
 0x220   : > { %1580 = vrot.lane.b32.xlu1 %v1577_v2, %s6302_s13  ;;  %v3010_v2 = vstv %s5734_s10  ;;  %s5723_s10 = sld [smem:[#allocation2 + $0x51]] }
 0x221   : > { %v3012_v9 = vmul.f32 %v7024_v17, %v3010_v2 }
 0x222   : > { %1582 = vrot.lane.b32.xlu0 %v1579_v25, %s6302_s13  ;;  %v3258_v25 = vmul.f32 %v7024_v17, %v3256_v56  ;;  %v3873_v17 = vsel %vm1246_vm1, %v3871_v58, %v3872_v3  ;;  %v4159_v56 = vmul.f32 %v7067_v14, %v4158_v10  ;;  %v823_v58 = vstv %s5717_s8  ;;  %s5755_s8 = sld [smem:[#allocation2 + $0x71]] }
 0x224   : > { %1763 = vrot.lane.b32.xlu1 %v1759_v23, %s6303_s14  ;;  %v3011_v23 = vmul.f32 %v7150_v62, %v3010_v2  ;;  %v3264_v29 = vrot.slane %v3258_v25, 1  ;;  %v4566_v2 = vmul.f32 %v7071_v18, %v4564_v38 }
 0x226   : > { %1765 = vrot.lane.b32.xlu0 %v1760_v44, %s6303_s14  ;;  %v3417_v44 = vmul.f32 %v7150_v62, %v3416_v33  ;;  %v3265_v4 = vsel %vm797_vm0, %v3263_v34, %v3264_v29  ;;  %v4567_v33 = vmul.f32 %v7077_v5, %v4564_v38  ;;  %v4572_v50 = vrot.slane %v4566_v2, 1 }
 0x228   : > { %1867 = vrot.lane.b32.xlu1 %v1863_v12, %s6302_s13  ;;  %v3266_v12 = vrot.slane %v3259_v59, 1 }
 0x22a   : > { %1869 = vrot.lane.b32.xlu0 %v1864_v51, %s6302_s13  ;;  %v3423_v51 = vrot.slane %v3417_v44, 1  ;;  %v3267_v0 = vsel %vm797_vm0, %v3264_v29, %v3266_v12  ;;  %v4571_v44 = vrot.slane %v4565_v52, 1  ;;  %v4574_v29 = vrot.slane %v4567_v33, 1 }
 0x22c   : > { %2120 = vrot.lane.b32.xlu1 %v2117_v35, %s6303_s14  ;;  %v3707_v35 = vmul.f32 %v7157_v15, %v3704_v57  ;;  %v3425_v48 = vsel %vm797_vm0, %v3423_v51, %v3424_v40  ;;  %v4573_v57 = vsel %vm797_vm0, %v4571_v44, %v4572_v50 }
 0x22e   : > { %2122 = vrot.lane.b32.xlu0 %v2119_v27, %s6303_s14  ;;  %v3427_v27 = vsel %vm797_vm0, %v3424_v40, %v3426_v63  ;;  %v3714_v8 = vrot.slane %v3707_v35, 2  ;;  %v5012_v63 = vstv %s5749_s6  ;;  %s5744_s6 = sld [smem:[#allocation2 + $0x66]] }
 0x22f   : > { %v5013_v35 = vmul.f32 %v7067_v14, %v5012_v63 }
 0x230   : > { %2280 = vrot.lane.b32.xlu1 %v2277_v53, %s6302_s13  ;;  %v3867_v53 = vmul.f32 %v7157_v15, %v3864_v28  ;;  %v5014_v28 = vmul.f32 %v7071_v18, %v5012_v63 }
 0x231   : > { %v5019_v11 = vrot.slane %v5013_v35, 2 }
 0x232   : > { %2282 = vrot.lane.b32.xlu0 %v2279_v32, %s6302_s13  ;;  %v3715_v32 = vsel %vm1246_vm1, %v3712_v43, %v3714_v8  ;;  %v3874_v13 = vrot.slane %v3867_v53, 2  ;;  %v5020_v24 = vrot.slane %v5014_v28, 2  ;;  %v552_v53 = vstv %s5714_s7  ;;  %s5747_s7 = sld [smem:[#allocation2 + $0x69]] }
 0x233   : > { %v554_v52 = vmul.f32 %v7088_v31, %v552_v53  ;;  %v1972_v28 = vstv %s5726_s9  ;;  %s523_s9 = sld [smem:[#allocation5]] }
 0x234   : > { %2568 = vrot.lane.b32.xlu1 %v2565_v16, %s6303_s14  ;;  %v3875_v6 = vsel %vm1246_vm1, %v3872_v3, %v3874_v13  ;;  %v4404_v16 = vstv %s5745_s28  ;;  %v5021_v43 = vsel %vm1246_vm1, %v5019_v11, %v5020_v24  ;;  %v553_v3 = vmul.f32 %v7100_v22, %v552_v53 }
 0x235   : > { %v824_v13 = vmul.f32 %v7100_v22, %v823_v58 }
 0x236   : > { %2570 = vrot.lane.b32.xlu0 %v2567_v19, %s6303_s14  ;;  %v4405_v19 = vmul.f32 %v7067_v14, %v4404_v16 }
 0x238   : > { %2728 = vrot.lane.b32.xlu1 %v2725_v61, %s6302_s13  ;;  %v4406_v61 = vmul.f32 %v7071_v18, %v4404_v16 }
 0x23a   : > { %2730 = vrot.lane.b32.xlu0 %v2727_v21, %s6302_s13  ;;  %v4407_v21 = vmul.f32 %v7077_v5, %v4404_v16  ;;  %v4412_v25 = vrot.slane %v4406_v61, 1  ;;  %v826_v61 = vmul.f32 %v7093_v36, %v823_v58 }
 0x23c   : > { %2911 = vrot.lane.b32.xlu1 %v2907_v30, %s6303_s14  ;;  %v4411_v30 = vrot.slane %v4405_v19, 1  ;;  %v4414_v59 = vrot.slane %v4407_v21, 1  ;;  %v830_v19 = vrot.slane %v824_v13, 1  ;;  %v833_v2 = vrot.slane %v826_v61, 1 }
 0x23e   : > { %2913 = vrot.lane.b32.xlu0 %v2908_v1, %s6303_s14  ;;  %v4160_v1 = vmul.f32 %v7071_v18, %v4158_v10  ;;  %v4413_v34 = vsel %vm797_vm0, %v4411_v30, %v4412_v25  ;;  %v4415_v20 = vsel %vm797_vm0, %v4412_v25, %v4414_v59  ;;  %v1272_v30 = vstv %s5720_s5  ;;  %s5757_s5 = sld [smem:[#allocation2 + $0x73]] }
 0x23f   : > { %v1274_v59 = vmul.f32 %v7088_v31, %v1272_v30  ;;  %v1273_v33 = vmul.f32 %v7100_v22, %v1272_v30  ;;  %v1275_v44 = vmul.f32 %v7093_v36, %v1272_v30 }
 0x240   : > { %3015 = vrot.lane.b32.xlu1 %v3011_v23, %s6302_s13  ;;  %v4852_v23 = vstv %s5748_s27 }
 0x241   : > { %v4854_v12 = vmul.f32 %v7071_v18, %v4852_v23  ;;  %v4855_v40 = vmul.f32 %v7077_v5, %v4852_v23 }
 0x242   : > { %3017 = vrot.lane.b32.xlu0 %v3012_v9, %s6302_s13  ;;  %v4853_v9 = vmul.f32 %v7067_v14, %v4852_v23 }
 0x243   : > { %v4860_v46 = vrot.slane %v4854_v12, 2  ;;  %v4862_v47 = vrot.slane %v4855_v40, 2  ;;  %v1280_v12 = vrot.slane %v1274_v59, 2 }
 0x244   : > { %3268 = vrot.lane.b32.xlu1 %v3265_v4, %s6303_s14  ;;  %v4575_v4 = vsel %vm797_vm0, %v4572_v50, %v4574_v29  ;;  %v4859_v51 = vrot.slane %v4853_v9, 2 }
 0x246   : > { %3270 = vrot.lane.b32.xlu0 %v3267_v0, %s6303_s14  ;;  %v4861_v0 = vsel %vm1246_vm1, %v4859_v51, %v4860_v46 }
 0x248   : > { %3428 = vrot.lane.b32.xlu1 %v3425_v48, %s6302_s13  ;;  %v4863_v48 = vsel %vm1246_vm1, %v4860_v46, %v4862_v47  ;;  %v1282_v46 = vrot.slane %v1275_v44, 2 }
 0x24a   : > { %3430 = vrot.lane.b32.xlu0 %v3427_v27, %s6302_s13  ;;  %v5015_v27 = vmul.f32 %v7077_v5, %v5012_v63  ;;  %v1283_v36 = vsel %vm1246_vm1, %v1280_v12, %v1282_v46 }
 0x24c   : > { %3716 = vrot.lane.b32.xlu1 %v3713_v7, %s6303_s14  ;;  %v5022_v8 = vrot.slane %v5015_v27, 2 }
 0x24e   : > { %3718 = vrot.lane.b32.xlu0 %v3715_v32, %s6303_s14  ;;  %v5023_v41 = vsel %vm1246_vm1, %v5020_v24, %v5022_v8 }
 0x250   : > { %3876 = vrot.lane.b32.xlu1 %v3873_v17, %s6302_s13  ;;  %v825_v17 = vmul.f32 %v7088_v31, %v823_v58 }
 0x252   : > { %3878 = vrot.lane.b32.xlu0 %v3875_v6, %s6302_s13 }
 0x254   : > { %4059 = vrot.lane.b32.xlu1 %v4055_v39, %s6303_s14 }
 0x256   : > { %4061 = vrot.lane.b32.xlu0 %v4056_v55, %s6303_s14  ;;  %v831_v55 = vrot.slane %v825_v17, 1 }
 0x258   : > { %4163 = vrot.lane.b32.xlu1 %v4159_v56, %s6302_s13 }
 0x25a   : > { %4165 = vrot.lane.b32.xlu0 %v4160_v1, %s6302_s13  ;;  %v832_v1 = vsel %vm797_vm0, %v830_v19, %v831_v55 }
 0x25c   : > { %4416 = vrot.lane.b32.xlu1 %v4413_v34, %s6303_s14 }
 0x25e   : > { %4418 = vrot.lane.b32.xlu0 %v4415_v20, %s6303_s14  ;;  %v834_v20 = vsel %vm797_vm0, %v831_v55, %v833_v2 }
 0x260   : > { %4576 = vrot.lane.b32.xlu1 %v4573_v57, %s6302_s13  ;;  %v1279_v57 = vrot.slane %v1273_v33, 2 }
 0x262   : > { %4578 = vrot.lane.b32.xlu0 %v4575_v4, %s6302_s13  ;;  %v1281_v63 = vsel %vm1246_vm1, %v1279_v57, %v1280_v12 }
 0x266   : > { %4864 = vrot.lane.b32.xlu0 %v4861_v0, %s6303_s14 }
 0x26a   : > { %4866 = vrot.lane.b32.xlu0 %v4863_v48, %s6303_s14  ;;  %v1702_v48 = vstv %s5723_s10  ;;  %s7431_s10 = sld [smem:[#allocation2 + $0x6d]] }
 0x26b   : > { %v1703_v58 = vmul.f32 %v7132_v37, %v1702_v48 }
 0x26e   : > { %5024 = vrot.lane.b32.xlu0 %v5021_v43, %s6302_s13 }
 0x272   : > { %5026 = vrot.lane.b32.xlu0 %v5023_v41, %s6302_s13  ;;  %v7365_v41 = vld [vmem:[%s6441_s11 + $0x20] sm:$0xff] }
 0x27c   : > { %v5155_v14 = vpop.xlane.xlu1 %5154 }
 0x27d   : > { %v5156_v18 = vrot.slane %v5155_v14, 4 }
 0x27f   : > { %v5157_v7 = vadd.f32 %v5156_v18, %v5155_v14  ;;  %v1974_v14 = vmul.f32 %v7365_v41, %v1972_v28  ;;  %v1975_v18 = vmul.f32 %v7126_v60, %v1972_v28 }
 0x280   : > { %v614_v32 = vpop.permute.xlu1 %613 }
 0x281   : > { %v5158_v5 = vrot.slane %v5157_v7, 2  ;;  %v619_v39 = vadd.f32 %v614_v32, %v553_v3  ;;  %v1973_v3 = vmul.f32 %v7132_v37, %v1972_v28  ;;  %v7383_v28 = vld [vmem:[%s6441_s11 + $0x38] sm:$0xff] }
 0x283   : > { %v5159_v6 = vadd.f32 %v5158_v5, %v5157_v7  ;;  %v1704_v7 = vmul.f32 %v7365_v41, %v1702_v48  ;;  %v1979_v61 = vrot.slane %v1973_v3, 1 }
 0x284   : > { %v718_v42 = vpop.permute.xlu1 %717 }
 0x285   : > { %v5160_v16 = vrot.slane %v5159_v6, 1  ;;  %v723_v56 = vadd.f32 %v718_v42, %v619_v39  ;;  %v1982_v42 = vrot.slane %v1975_v18, 1  ;;  %v2420_v39 = vstv %s5729_s12  ;;  %s531_s12 = sld [smem:[#allocation7]] }
 0x287   : > { %v5161_v10 = vadd.f32 %v5160_v16, %v5159_v6  ;;  %v837_v34 = vadd.f32 %v832_v1, %v723_v56  ;;  %v1980_v6 = vrot.slane %v1974_v14, 1  ;;  %v2423_v1 = vmul.f32 %v7126_v60, %v2420_v39 }
 0x288   : > { %v720_v21 = vpop.permute.xlu1 %719 }
 0x289   : > { %5976 = vpush %v5161_v10  ;;  %v7354_v38 = vpop.xlane.xlu0 %5184  ;;  %v1983_v56 = vsel %vm797_vm0, %v1980_v6, %v1982_v42  ;;  %v1981_v33 = vsel %vm797_vm0, %v1979_v61, %v1980_v6  ;;  %v3568_v6 = vstv %s5738_s23 }
 0x28c   : > { %v972_v25 = vpop.permute.xlu1 %971 }
 0x28d   : > { %v616_v23 = vpop.permute.xlu0 %615  ;;  %v977_v51 = vadd.f32 %v972_v25, %v837_v34 }
 0x28e   : > { %v620_v9 = vadd.f32 %v616_v23, %v554_v52  ;;  %v2422_v52 = vmul.f32 %v7365_v41, %v2420_v39  ;;  %v2421_v23 = vmul.f32 %v7132_v37, %v2420_v39 }
 0x290   : > { %v724_v50 = vadd.f32 %v720_v21, %v620_v9  ;;  %v974_v29 = vpop.permute.xlu1 %973  ;;  %v2428_v9 = vrot.slane %v2422_v52, 2  ;;  %v2427_v60 = vrot.slane %v2421_v23, 2 }
 0x291   : > { %v1134_v4 = vpop.permute.xlu0 %1133 }
 0x292   : > { %v838_v40 = vadd.f32 %v834_v20, %v724_v50  ;;  %v2430_v20 = vrot.slane %v2423_v1, 2  ;;  %v2429_v37 = vsel %vm1246_vm1, %v2427_v60, %v2428_v9 }
 0x294   : > { %v978_v31 = vadd.f32 %v974_v29, %v838_v40  ;;  %v1132_v22 = vpop.permute.xlu1 %1131 }
 0x295   : > { %v1423_v0 = vpop.permute.xlu0 %1422  ;;  %v1137_v47 = vadd.f32 %v1132_v22, %v977_v51 }
 0x296   : > { %v1138_v35 = vadd.f32 %v1134_v4, %v978_v31  ;;  %v2431_v4 = vsel %vm1246_vm1, %v2428_v9, %v2430_v20 }
 0x297   : > { %v1286_v11 = vadd.f32 %v1281_v63, %v1137_v47 }
 0x298   : > { %v1287_v24 = vadd.f32 %v1283_v36, %v1138_v35  ;;  %v1421_v27 = vpop.permute.xlu1 %1420  ;;  %v3120_v36 = vstv %s5735_s22 }
 0x299   : > { %v1583_v43 = vpop.permute.xlu0 %1582  ;;  %v1426_v8 = vadd.f32 %v1421_v27, %v1286_v11  ;;  %v3123_v27 = vmul.f32 %v7157_v15, %v3120_v36 }
 0x29a   : > { %v1427_v53 = vadd.f32 %v1423_v0, %v1287_v24  ;;  %v2850_v0 = vstv %s7376_s20  ;;  %v3122_v24 = vmul.f32 %v7383_v28, %v3120_v36  ;;  %s5758_s20 = sld [smem:[#allocation2 + $0x74]] }
 0x29b   : > { %v2852_v48 = vmul.f32 %v7383_v28, %v2850_v0  ;;  %v2851_v18 = vmul.f32 %v7150_v62, %v2850_v0 }
 0x29c   : > { %v1587_v32 = vadd.f32 %v1583_v43, %v1427_v53  ;;  %v1581_v5 = vpop.permute.xlu1 %1580 }
 0x29d   : > { %v1766_v13 = vpop.permute.xlu0 %1765  ;;  %v1586_v17 = vadd.f32 %v1581_v5, %v1426_v8  ;;  %v3121_v5 = vmul.f32 %v7150_v62, %v3120_v36  ;;  %v7403_v36 = vld [vmem:[%s6441_s11 + $0x50] sm:$0xff] }
 0x29e   : > { %v1706_v16 = vadd.f32 %v1704_v7, %v1587_v32  ;;  %v3130_v32 = vrot.slane %v3123_v27, 1 }
 0x29f   : > { %v1705_v19 = vadd.f32 %v1703_v58, %v1586_v17  ;;  %v3128_v58 = vrot.slane %v3122_v24, 1 }
 0x2a0   : > { %v1770_v55 = vadd.f32 %v1766_v13, %v1706_v16  ;;  %v1764_v10 = vpop.permute.xlu1 %1763 }
 0x2a1   : > { %v1870_v21 = vpop.permute.xlu0 %1869  ;;  %v1769_v30 = vadd.f32 %v1764_v10, %v1705_v19  ;;  %v3131_v16 = vsel %vm797_vm0, %v3128_v58, %v3130_v32  ;;  %v3127_v19 = vrot.slane %v3121_v5, 1 }
 0x2a2   : > { %v1874_v2 = vadd.f32 %v1870_v21, %v1770_v55  ;;  %v5186_v55 = vrot.slane %v7354_v38, 4  ;;  %v3570_v21 = vmul.f32 %v7383_v28, %v3568_v6 }
 0x2a4   : > { %v1987_v25 = vadd.f32 %v1983_v56, %v1874_v2  ;;  %v1868_v59 = vpop.permute.xlu1 %1867  ;;  %v3571_v56 = vmul.f32 %v7157_v15, %v3568_v6  ;;  %v3129_v2 = vsel %vm797_vm0, %v3127_v19, %v3128_v58 }
 0x2a5   : > { %v2123_v34 = vpop.permute.xlu0 %2122  ;;  %v1873_v44 = vadd.f32 %v1868_v59, %v1769_v30  ;;  %v5187_v59 = vadd.f32 %v5186_v55, %v7354_v38 }
 0x2a6   : > { %v2127_v50 = vadd.f32 %v2123_v34, %v1987_v25  ;;  %v3569_v25 = vmul.f32 %v7150_v62, %v3568_v6  ;;  %v3576_v34 = vrot.slane %v3570_v21, 2 }
 0x2a7   : > { %v1986_v29 = vadd.f32 %v1981_v33, %v1873_v44  ;;  %v3578_v44 = vrot.slane %v3571_v56, 2  ;;  %v4716_v56 = vstv %s5747_s7  ;;  %s5763_s7 = sld [smem:[#allocation2 + $0x79]] }
 0x2a8   : > { %v2121_v12 = vpop.permute.xlu1 %2120 }
 0x2a9   : > { %v2283_v57 = vpop.permute.xlu0 %2282  ;;  %v2126_v51 = vadd.f32 %v2121_v12, %v1986_v29  ;;  %v3575_v29 = vrot.slane %v3569_v25, 2  ;;  %v5188_v12 = vrot.slane %v5187_v59, 2  ;;  %v3579_v62 = vsel %vm1246_vm1, %v3576_v34, %v3578_v44 }
 0x2aa   : > { %v2287_v46 = vadd.f32 %v2283_v57, %v2127_v50  ;;  %v4718_v25 = vmul.f32 %v7403_v36, %v4716_v56 }
 0x2ac   : > { %v2435_v40 = vadd.f32 %v2431_v4, %v2287_v46  ;;  %v2281_v31 = vpop.permute.xlu1 %2280  ;;  %v3577_v46 = vsel %vm1246_vm1, %v3575_v29, %v3576_v34 }
 0x2ad   : > { %v2571_v22 = vpop.permute.xlu0 %2570  ;;  %v2286_v63 = vadd.f32 %v2281_v31, %v2126_v51 }
 0x2ae   : > { %v2575_v47 = vadd.f32 %v2571_v22, %v2435_v40  ;;  %v5189_v40 = vadd.f32 %v5188_v12, %v5187_v59  ;;  %v3998_v22 = vstv %s7395_s30  ;;  %s227_s30 = sand.u32 1, %s6289_s16  }
 0x2af   : > { %v2434_v35 = vadd.f32 %v2429_v37, %v2286_v63 }
 0x2b0   : > { %v2569_v11 = vpop.permute.xlu1 %2568 }
 0x2b1   : > { %v2731_v43 = vpop.permute.xlu0 %2730  ;;  %v2574_v8 = vadd.f32 %v2569_v11, %v2434_v35  ;;  %v5190_v11 = vrot.slane %v5189_v40, 1 }
 0x2b2   : > { %v2735_v14 = vadd.f32 %v2731_v43, %v2575_v47  ;;  %v4000_v47 = vmul.f32 %v7403_v36, %v3998_v22 }
 0x2b4   : > { %v2854_v53 = vadd.f32 %v2852_v48, %v2735_v14  ;;  %v2729_v7 = vpop.permute.xlu1 %2728  ;;  %v4268_v48 = vstv %s5744_s6  ;;  %v7408_v14 = vld [vmem:[%s6441_s11 + $0x58] sm:$0x3]  ;;  %s7488_s6 = sld [smem:[#allocation2 + $0x76]] }
 0x2b5   : > { %v2914_v3 = vpop.permute.xlu0 %2913  ;;  %v2734_v13 = vadd.f32 %v2729_v7, %v2574_v8  ;;  %v4270_v8 = vmul.f32 %v7403_v36, %v4268_v48 }
 0x2b6   : > { %v2918_v17 = vadd.f32 %v2914_v3, %v2854_v53  ;;  %v7412_v53 = vld [vmem:[%s6441_s11 + $0x48] sm:$0xff] }
 0x2b7   : > { %v2853_v42 = vadd.f32 %v2851_v18, %v2734_v13  ;;  %v4271_v18 = vmul.f32 %v7408_v14, %v4268_v48  ;;  %v3999_v7 = vmul.f32 %v7412_v53, %v3998_v22  ;;  %v4269_v5 = vmul.f32 %v7412_v53, %v4268_v48 }
 0x2b8   : > { %v2912_v39 = vpop.permute.xlu1 %2911  ;;  %v5191_v13 = vadd.f32 %v5190_v11, %v5189_v40  ;;  %v4717_v59 = vmul.f32 %v7412_v53, %v4716_v56 }
 0x2b9   : > { %v3018_v10 = vpop.permute.xlu0 %3017  ;;  %v2917_v61 = vadd.f32 %v2912_v39, %v2853_v42  ;;  %v4278_v39 = vrot.slane %v4271_v18, 1  ;;  %v7436_v18 = vld [vmem:[%s6441_s11 + $0x8] sm:$0xff] }
 0x2ba   : > { %s5977_s28 = spop %5976  ;;  %v3022_v30 = vadd.f32 %v3018_v10, %v2918_v17  ;;  %v4275_v10 = vrot.slane %v4269_v5, 1  ;;  %v7447_v5 = vstv %s5757_s5  ;;  %s5764_s5 = sld [smem:[#allocation2 + $0x7a]] }
 0x2bb   : > { %s5163_s29 = smul.f32 0.00390625, %s5977_s28 }
 0x2bc   : > { %v3135_v52 = vadd.f32 %v3131_v16, %v3022_v30  ;;  %v3016_v1 = vpop.permute.xlu1 %3015  ;;  %v4276_v16 = vrot.slane %v4270_v8, 1  ;;  %v7433_v8 = vstv %s5755_s8  ;;  %s7493_s8 = sld [smem:[#allocation2 + $0x77]] }
 0x2bd   : > { %s5164_s27 = sadd.f32 1e-05, %s5163_s29  ;;  %v3271_v33 = vpop.permute.xlu0 %3270  ;;  %v3021_v23 = vadd.f32 %v3016_v1, %v2917_v61 }
 0x2be   : > { %v3275_v9 = vadd.f32 %v3271_v33, %v3135_v52  ;;  %v4279_v52 = vsel %vm797_vm0, %v4276_v16, %v4278_v39 }
 0x2bf   : > { %v5165_v15 = vstv %s5164_s27  ;;  %v3134_v20 = vadd.f32 %v3129_v2, %v3021_v23  ;;  %v4277_v2 = vsel %vm797_vm0, %v4275_v10, %v4276_v16  ;;  %s5641_s27 = sshll.u32 %s227_s30, 7 }
 0x2c0   : > { %6096 = vrsqrt.f32 %v5165_v15  ;;  %v3269_v50 = vpop.permute.xlu1 %3268 }
 0x2c1   : > { %v3431_v60 = vpop.permute.xlu0 %3430  ;;  %v3274_v57 = vadd.f32 %v3269_v50, %v3134_v20  ;;  %v4724_v20 = vrot.slane %v4718_v25, 2  ;;  %v4723_v50 = vrot.slane %v4717_v59, 2 }
 0x2c2   : > { %v3435_v38 = vadd.f32 %v3431_v60, %v3275_v9  ;;  %v4719_v9 = vmul.f32 %v7408_v14, %v4716_v56 }
 0x2c4   : > { %v3583_v4 = vadd.f32 %v3579_v62, %v3435_v38  ;;  %v3429_v51 = vpop.permute.xlu1 %3428  ;;  %v4726_v62 = vrot.slane %v4719_v9, 2 }
 0x2c5   : > { %v3719_v31 = vpop.permute.xlu0 %3718  ;;  %v3434_v37 = vadd.f32 %v3429_v51, %v3274_v57  ;;  %v4725_v57 = vsel %vm1246_vm1, %v4723_v50, %v4724_v20 }
 0x2c6   : > { %v3723_v63 = vadd.f32 %v3719_v31, %v3583_v4  ;;  %v4727_v40 = vsel %vm1246_vm1, %v4724_v20, %v4726_v62  ;;  %v1771_v62 = vstv %s7488_s6  ;;  %s5784_s6 = sld [smem:[#allocation2 + $0x8e]] }
 0x2c7   : > { %v3582_v0 = vadd.f32 %v3577_v46, %v3434_v37 }
 0x2c8   : > { %v3717_v35 = vpop.permute.xlu1 %3716 }
 0x2c9   : > { %v3879_v24 = vpop.permute.xlu0 %3878  ;;  %v3722_v27 = vadd.f32 %v3717_v35, %v3582_v0 }
 0x2ca   : > { %v3883_v43 = vadd.f32 %v3879_v24, %v3723_v63 }
 0x2cc   : > { %v4002_v58 = vadd.f32 %v4000_v47, %v3883_v43  ;;  %v3877_v32 = vpop.permute.xlu1 %3876 }
 0x2cd   : > { %v6097_v3 = vpop.eup %6096  ;;  %v4062_v17 = vpop.permute.xlu0 %4061  ;;  %v3882_v6 = vadd.f32 %v3877_v32, %v3722_v27 }
 0x2ce   : > { %5978 = vpush %v6097_v3  ;;  %v4066_v42 = vadd.f32 %v4062_v17, %v4002_v58  ;;  %v7443_v58 = vld [vmem:[%s6441_s11 + $0x10] sm:$0x3]  ;;  %v621_v3 = vstv %s7431_s10  ;;  %s7578_s10 = sld [smem:[#allocation2 + $0x7f]] }
 0x2cf   : > { %5980 = vpush %v5191_v13  ;;  %v4001_v19 = vadd.f32 %v3999_v7, %v3882_v6  ;;  %v7440_v7 = vmul.f32 %v7436_v18, %v7433_v8  ;;  %v1142_v32 = vmul.f32 %v7443_v58, %v7433_v8  ;;  %v623_v6 = vmul.f32 %v7436_v18, %v621_v3 }
 0x2d0   : > { %v4060_v55 = vpop.permute.xlu1 %4059  ;;  %v1431_v16 = vmul.f32 %v7443_v58, %v7447_v5 }
 0x2d1   : > { %v4166_v61 = vpop.permute.xlu0 %4165  ;;  %v4065_v21 = vadd.f32 %v4060_v55, %v4001_v19  ;;  %v1147_v13 = vrot.slane %v7440_v7, 1  ;;  %v1149_v17 = vrot.slane %v1142_v32, 1  ;;  %v5172_v19 = vstv %s531_s12  ;;  %s5766_s12 = sld [smem:[#allocation2 + $0x7c]] }
 0x2d2   : > { %v4170_v30 = vadd.f32 %v4166_v61, %v4066_v42  ;;  %v7456_v42 = vmul.f32 %v7436_v18, %v7447_v5 }
 0x2d4   : > { %v4164_v1 = vpop.permute.xlu1 %4163  ;;  %v4283_v34 = vadd.f32 %v4279_v52, %v4170_v30  ;;  %v1150_v52 = vsel %vm797_vm0, %v1147_v13, %v1149_v17 }
 0x2d5   : > { %v4419_v33 = vpop.permute.xlu0 %4418  ;;  %v4169_v23 = vadd.f32 %v4164_v1, %v4065_v21  ;;  %v7463_v21 = vstv %s5758_s20  ;;  %s7512_s20 = sld [smem:[#allocation2 + $0x6e]] }
 0x2d6   : > { %v4423_v60 = vadd.f32 %v4419_v33, %v4283_v34  ;;  %v7484_v25 = vmul.f32 %v7436_v18, %v7463_v21  ;;  %v1591_v59 = vmul.f32 %v7443_v58, %v7463_v21 }
 0x2d7   : > { %v4282_v44 = vadd.f32 %v4277_v2, %v4169_v23 }
 0x2d8   : > { %v4417_v15 = vpop.permute.xlu1 %4416 }
 0x2d9   : > { %v4579_v29 = vpop.permute.xlu0 %4578  ;;  %v4422_v12 = vadd.f32 %v4417_v15, %v4282_v44 }
 0x2da   : > { %v4583_v46 = vadd.f32 %v4579_v29, %v4423_v60  ;;  %v1596_v29 = vrot.slane %v7484_v25, 2  ;;  %v7676_v25 = vld [vmem:[%s6441_s11 + $0x18] sm:$0xff] }
 0x2dc   : > { %v4577_v38 = vpop.permute.xlu1 %4576  ;;  %v4731_v22 = vadd.f32 %v4727_v40, %v4583_v46  ;;  %v7524_v46 = vld [vmem:[%s6441_s11 + $0x28] sm:$0x3] }
 0x2dd   : > { %v4865_v4 = vpop.permute.xlu0 %4864  ;;  %v4582_v51 = vadd.f32 %v4577_v38, %v4422_v12  ;;  %v1598_v12 = vrot.slane %v1591_v59, 2  ;;  %v1773_v38 = vmul.f32 %v7365_v41, %v1771_v62 }
 0x2df   : > { %v4730_v31 = vadd.f32 %v4725_v57, %v4582_v51  ;;  %v1599_v60 = vsel %vm1246_vm1, %v1596_v29, %v1598_v12  ;;  %v7510_v57 = vstv %s5763_s7  ;;  %v2919_v12 = vstv %s7578_s10  ;;  %s5775_s7 = sld [smem:[#allocation2 + $0x85]] }
 0x2e0   : > { %v7521_v51 = vmul.f32 %v7365_v41, %v7510_v57  ;;  %v2131_v40 = vmul.f32 %v7524_v46, %v7510_v57  ;;  %s5750_s10 = sld [smem:[#allocation2 + $0x6c]] }
 0x2e1   : > { %v4867_v37 = vpop.permute.xlu0 %4866  ;;  %v4870_v63 = vadd.f32 %v4865_v4, %v4730_v31  ;;  %v1875_v4 = vstv %s7493_s8  ;;  %v7528_v31 = vstv %s5764_s5  ;;  %s5776_s5 = sld [smem:[#allocation2 + $0x86]] }
 0x2e2   : > { %v4871_v47 = vadd.f32 %v4867_v37, %v4731_v22  ;;  %v1877_v37 = vmul.f32 %v7365_v41, %v1875_v4  ;;  %v7536_v22 = vmul.f32 %v7365_v41, %v7528_v31  ;;  %s5785_s8 = sld [smem:[#allocation2 + $0x8f]] }
 0x2e4   : > { %v2296_v32 = vrot.slane %v7536_v22, 1 }
 0x2e5   : > { %v5025_v0 = vpop.permute.xlu0 %5024 }
 0x2e6   : > { %v7423_v35 = vadd.f32 %v5025_v0, %v4870_v63  ;;  %v2291_v63 = vmul.f32 %v7524_v46, %v7528_v31  ;;  %v2136_v0 = vrot.slane %v7521_v51, 1 }
 0x2e8   : > { %v5230_v11 = vsel %vm5132_vm2, %v7423_v35, 0.0  ;;  %v2298_v17 = vrot.slane %v2291_v63, 1 }
 0x2e9   : > { %v5027_v48 = vpop.permute.xlu0 %5026 }
 0x2ea   : > { %v7427_v24 = vadd.f32 %v5027_v48, %v4871_v47  ;;  %v2138_v47 = vrot.slane %v2131_v40, 1  ;;  %v7541_v48 = vstv %s5766_s12  ;;  %s7672_s12 = sld [smem:[#allocation2 + $0x88]] }
 0x2ec   : > { %v5231_v27 = vsel %vm5132_vm2, %v7427_v24, 0.0 }
 0x2ed   : > { %v5232_v43 = vadd.f32 %v5231_v27, %v5230_v11  ;;  %v7544_v11 = vld [vmem:[%s6441_s11] sm:$0xff] }
 0x2ee   : > { %v622_v27 = vmul.f32 %v7544_v11, %v621_v3 }
 0x2ef   : > { %5233 = vadd.xlane.f32.xlu0 %v5232_v43  ;;  %v725_v43 = vstv %s7512_s20  ;;  %s5781_s20 = sld [smem:[#allocation2 + $0x8b]] }
 0x2f0   : > { %v726_v3 = vmul.f32 %v7544_v11, %v725_v43 }
 0x2ff   : > { %s5979_s22 = spop %5978 }
 0x300   : > { %s5168_s23 = smul.f32 %s5979_s22, %s523_s9  ;;  %s5981_s28 = spop %5980 }
 0x301   : > { %s5193_s29 = smul.f32 0.00390625, %s5981_s28  ;;  %s7499_s9 = scalar_lea.vmem [#allocation8], %s5641_s27 }
 0x302   : > { %v5169_v39 = vstv %s5168_s23  ;;  %s5754_s22 = sld [smem:[#allocation2 + $0x70]] }
 0x303   : > { %v5170_v55 = vmul.f32 %v5169_v39, %v7182_v26  ;;  %v5171_v10 = vmul.f32 %v5169_v39, %v7185_v54  ;;  %v5194_v61 = vstv %s5193_s29  ;;  %v1436_v26 = vrot.slane %v7456_v42, 2  ;;  %s5767_s23 = sld [smem:[#allocation2 + $0x7d]] }
 0x304   : > { %v7466_v56 = vsub.f32 %v7197_v45, %v5194_v61  ;;  %v7469_v30 = vsub.f32 %v7199_v49, %v5194_v61  ;;  %v1438_v54 = vrot.slane %v1431_v16, 2  ;;  %v2139_v16 = vsel %vm797_vm0, %v2136_v0, %v2138_v47  ;;  %s5772_s28 = sld [smem:[#allocation2 + $0x82]] }
 0x305   : > { %v5173_v1 = vadd.f32 %v5172_v19, %v5170_v55  ;;  %v5174_v2 = vadd.f32 %v5172_v19, %v5171_v10  ;;  %628 = vrot.lane.b32.xlu0 %v623_v6, %s6303_s14  ;;  %v7557_v39 = vmul.f32 %v7365_v41, %v7541_v48  ;;  %v2579_v19 = vmul.f32 %v7524_v46, %v7541_v48  ;;  %s7584_s29 = sld [smem:[#allocation2 + $0x80]] }
 0x306   : > { %v5197_v45 = vmul.f32 %v7466_v56, %v7466_v56  ;;  %v5198_v49 = vmul.f32 %v7469_v30, %v7469_v30  ;;  %v1439_v50 = vsel %vm1246_vm1, %v1436_v26, %v1438_v54  ;;  %s5773_s27 = sld [smem:[#allocation2 + $0x83]] }
 0x307   : > { %v5175_v33 = vmul.f32 0.2, %v5173_v1  ;;  %v5176_v23 = vmul.f32 0.2, %v5174_v2 }
 0x308   : > { %v5199_v34 = vsel %vm5132_vm2, %v5197_v45, 0.0  ;;  %v5200_v44 = vsel %vm5132_vm2, %v5198_v49, 0.0  ;;  %v979_v6 = vstv %s5754_s22  ;;  %v727_v49 = vmul.f32 %v7436_v18, %v725_v43  ;;  %s7684_s22 = sld [smem:[#allocation2 + $0x89]] }
 0x309   : > { %v5177_v9 = vmax.f32 %v5173_v1, %v5175_v33  ;;  %v5178_v15 = vmax.f32 %v5174_v2, %v5176_v23  ;;  %v5201_v20 = vadd.f32 %v5200_v44, %v5199_v34  ;;  %1153 = vrot.lane.b32.xlu0 %v1150_v52, %s6302_s13  ;;  %v7561_v55 = vstv %s5767_s23  ;;  %s5782_s23 = sld [smem:[#allocation2 + $0x8c]] }
 0x30a   : > { %v980_v10 = vmul.f32 %v7544_v11, %v979_v6  ;;  %v981_v61 = vmul.f32 %v7436_v18, %v979_v6  ;;  %v2299_v52 = vsel %vm797_vm0, %v2296_v32, %v2298_v17  ;;  %v2584_v1 = vrot.slane %v7557_v39, 2 }
 0x30b   : > { %5179 = vst.msk [vmem:[%s7499_s9] sm:$0xff] %vm5132_vm2, %v5177_v9  ;;  %5180 = vst.msk [vmem:[%s7499_s9 + $0x8] sm:$0xff] %vm5132_vm2, %v5178_v15  ;;  %5202 = vadd.xlane.f32.xlu1 %v5201_v20  ;;  %v2586_v2 = vrot.slane %v2579_v19, 2  ;;  %v7574_v54 = vmul.f32 %v7365_v41, %v7561_v55  ;;  %v2739_v45 = vmul.f32 %v7524_v46, %v7561_v55  ;;  %v3023_v63 = vstv %s7584_s29  ;;  %s5756_s29 = sld [smem:[#allocation2 + $0x72]] }
 0x30c   : > { %v986_v59 = vrot.slane %v980_v10, 1  ;;  %v987_v33 = vrot.slane %v981_v61, 1  ;;  %v982_v23 = vmul.f32 %v7443_v58, %v979_v6  ;;  %v1140_v9 = vmul.f32 %v7544_v11, %v7433_v8 }
 0x30d   : > { %1442 = vrot.lane.b32.xlu0 %v1439_v50, %s6303_s14  ;;  %v2587_v41 = vsel %vm1246_vm1, %v2584_v1, %v2586_v2  ;;  %v2744_v34 = vrot.slane %v7574_v54, 2  ;;  %v2746_v44 = vrot.slane %v2739_v45, 2  ;;  %v1429_v8 = vmul.f32 %v7544_v11, %v7447_v5 }
 0x30e   : > { %v988_v15 = vsel %vm797_vm0, %v986_v59, %v987_v33  ;;  %v989_v20 = vrot.slane %v982_v23, 1  ;;  %v7619_v17 = vstv %s5773_s27  ;;  %v3025_v19 = vmul.f32 %v7383_v28, %v3023_v63  ;;  %s5762_s27 = sld [smem:[#allocation2 + $0x78]] }
 0x30f   : > { %v2747_v50 = vsel %vm1246_vm1, %v2744_v34, %v2746_v44  ;;  %v1435_v6 = vrot.slane %v1429_v8, 2 }
 0x310   : > { %v990_v40 = vsel %vm797_vm0, %v987_v33, %v989_v20  ;;  %v2129_v20 = vmul.f32 %v7676_v25, %v7510_v57  ;;  %v2289_v57 = vmul.f32 %v7676_v25, %v7528_v31  ;;  %v2577_v31 = vmul.f32 %v7676_v25, %v7541_v48 }
 0x311   : > { %1602 = vrot.lane.b32.xlu0 %v1599_v60, %s6302_s13  ;;  %v7599_v60 = vstv %s5772_s28  ;;  %v2737_v48 = vmul.f32 %v7676_v25, %v7561_v55  ;;  %s5753_s28 = sld [smem:[#allocation2 + $0x6f]] }
 0x312   : > { %v7612_v47 = vmul.f32 %v7383_v28, %v7599_v60 }
 0x314   : > { %v3284_v7 = vrot.slane %v7612_v47, 1 }
 0x315   : > { %1778 = vrot.lane.b32.xlu0 %v1773_v38, %s6303_s14  ;;  %v1146_v38 = vrot.slane %v1140_v9, 1 }
 0x317   : > { %v1148_v5 = vsel %vm797_vm0, %v1146_v38, %v1147_v13  ;;  %v7638_v13 = vstv %s5775_s7  ;;  %s7850_s7 = sld [smem:[#allocation2 + $0x75]] }
 0x318   : > { %v7651_v59 = vmul.f32 %v7383_v28, %v7638_v13 }
 0x319   : > { %1882 = vrot.lane.b32.xlu0 %v1877_v37, %s6302_s13  ;;  %v2921_v37 = vmul.f32 %v7383_v28, %v2919_v12 }
 0x31c   : > { %626 = vrot.lane.b32.xlu1 %v622_v27, %s6303_s14  ;;  %v7615_v27 = vld [vmem:[%s6441_s11 + $0x40] sm:$0x3] }
 0x31d   : > { %2142 = vrot.lane.b32.xlu0 %v2139_v16, %s6303_s14  ;;  %v3279_v43 = vmul.f32 %v7615_v27, %v7599_v60  ;;  %v1589_v16 = vmul.f32 %v7544_v11, %v7463_v21  ;;  %v3439_v10 = vmul.f32 %v7615_v27, %v7619_v17  ;;  %v1437_v21 = vsel %vm1246_vm1, %v1435_v6, %v1436_v26 }
 0x31e   : > { %v3727_v42 = vmul.f32 %v7615_v27, %v7638_v13  ;;  %v7655_v26 = vstv %s5776_s5  ;;  %v2295_v6 = vrot.slane %v2289_v57, 1  ;;  %v5032_v57 = vstv %s5785_s8  ;;  %s5765_s5 = sld [smem:[#allocation2 + $0x7b]] }
 0x31f   : > { %v3286_v61 = vrot.slane %v3279_v43, 1  ;;  %v3446_v45 = vrot.slane %v3439_v10, 1  ;;  %v7668_v9 = vmul.f32 %v7383_v28, %v7655_v26  ;;  %v4067_v43 = vstv %s7672_s12  ;;  %s5771_s12 = sld [smem:[#allocation2 + $0x81]] }
 0x320   : > { %730 = vrot.lane.b32.xlu1 %v726_v3, %s6302_s13  ;;  %v7633_v3 = vmul.f32 %v7383_v28, %v7619_v17  ;;  %v3734_v44 = vrot.slane %v3727_v42, 2  ;;  %v2297_v51 = vsel %vm797_vm0, %v2295_v6, %v2296_v32  ;;  %v4872_v32 = vstv %s5784_s6  ;;  %s5780_s6 = sld [smem:[#allocation2 + $0x8a]] }
 0x321   : > { %2302 = vrot.lane.b32.xlu0 %v2299_v52, %s6302_s13  ;;  %v1595_v52 = vrot.slane %v1589_v16, 2  ;;  %v3892_v38 = vrot.slane %v7668_v9, 2  ;;  %v4069_v16 = vmul.f32 %v7403_v36, %v4067_v43 }
 0x322   : > { %v3444_v2 = vrot.slane %v7633_v3, 1 }
 0x323   : > { %v1597_v33 = vsel %vm1246_vm1, %v1595_v52, %v1596_v29  ;;  %v1772_v29 = vmul.f32 %v7676_v25, %v1771_v62  ;;  %v1876_v62 = vmul.f32 %v7676_v25, %v1875_v4 }
 0x324   : > { %732 = vrot.lane.b32.xlu1 %v727_v49, %s6302_s13  ;;  %v3287_v49 = vsel %vm797_vm0, %v3284_v7, %v3286_v61  ;;  %v3447_v23 = vsel %vm797_vm0, %v3444_v2, %v3446_v45 }
 0x325   : > { %2590 = vrot.lane.b32.xlu0 %v2587_v41, %s6303_s14  ;;  %v3732_v41 = vrot.slane %v7651_v59, 2 }
 0x328   : > { %991 = vrot.lane.b32.xlu1 %v988_v15, %s6303_s14  ;;  %v3887_v15 = vmul.f32 %v7615_v27, %v7655_v26 }
 0x329   : > { %2750 = vrot.lane.b32.xlu0 %v2747_v50, %s6302_s13  ;;  %v3735_v50 = vsel %vm1246_vm1, %v3732_v41, %v3734_v44 }
 0x32a   : > { %v3894_v8 = vrot.slane %v3887_v15, 2 }
 0x32c   : > { %993 = vrot.lane.b32.xlu1 %v990_v40, %s6303_s14  ;;  %v2135_v40 = vrot.slane %v2129_v20, 1  ;;  %v4874_v20 = vmul.f32 %v7403_v36, %v4872_v32 }
 0x32d   : > { %2926 = vrot.lane.b32.xlu0 %v2921_v37, %s6303_s14  ;;  %v3895_v37 = vsel %vm1246_vm1, %v3892_v38, %v3894_v8 }
 0x32e   : > { %v2137_v4 = vsel %vm797_vm0, %v2135_v40, %v2136_v0  ;;  %v2583_v0 = vrot.slane %v2577_v31, 2  ;;  %v4880_v8 = vrot.slane %v4874_v20, 2  ;;  %v7759_v40 = vld [vmem:[%s6441_s11 + $0x30] sm:$0xff]  ;;  %v5034_v31 = vmul.f32 %v7403_v36, %v5032_v57 }
 0x32f   : > { %v3277_v54 = vmul.f32 %v7759_v40, %v7599_v60  ;;  %v557_v20 = vstv %s5750_s10 }
 0x330   : > { %1151 = vrot.lane.b32.xlu1 %v1148_v5, %s6302_s13  ;;  %v7701_v5 = vstv %s5781_s20  ;;  %v2585_v55 = vsel %vm1246_vm1, %v2583_v0, %v2584_v1  ;;  %v5040_v0 = vrot.slane %v5034_v31, 2  ;;  %s7876_s20 = sld [smem:[#allocation2 + $0x7e]] }
 0x331   : > { %3030 = vrot.lane.b32.xlu0 %v3025_v19, %s6302_s13  ;;  %v4171_v19 = vstv %s7684_s22  ;;  %v7716_v10 = vmul.f32 %v7403_v36, %v7701_v5  ;;  %v4427_v61 = vmul.f32 %v7408_v14, %v7701_v5  ;;  %s5774_s22 = sld [smem:[#allocation2 + $0x84]] }
 0x332   : > { %v4173_v52 = vmul.f32 %v7403_v36, %v4171_v19  ;;  %v4172_v59 = vmul.f32 %v7412_v53, %v4171_v19 }
 0x333   : > { %v4434_v42 = vrot.slane %v4427_v61, 1  ;;  %v3283_v61 = vrot.slane %v3277_v54, 1 }
 0x334   : > { %1440 = vrot.lane.b32.xlu1 %v1437_v21, %s6303_s14  ;;  %v7720_v21 = vstv %s5782_s23  ;;  %s7898_s23 = sld [smem:[#allocation2 + $0x87]] }
 0x335   : > { %3290 = vrot.lane.b32.xlu0 %v3287_v49, %s6303_s14  ;;  %v7734_v45 = vmul.f32 %v7403_v36, %v7720_v21  ;;  %v4432_v49 = vrot.slane %v7716_v10, 1  ;;  %v4587_v22 = vmul.f32 %v7408_v14, %v7720_v21 }
 0x337   : > { %v4435_v44 = vsel %vm797_vm0, %v4432_v49, %v4434_v42  ;;  %v4594_v15 = vrot.slane %v4587_v22, 1 }
 0x338   : > { %1600 = vrot.lane.b32.xlu1 %v1597_v33, %s6302_s13  ;;  %v2743_v33 = vrot.slane %v2737_v48, 2  ;;  %v5035_v48 = vmul.f32 %v7408_v14, %v5032_v57 }
 0x339   : > { %3450 = vrot.lane.b32.xlu0 %v3447_v23, %s6302_s13  ;;  %v4592_v23 = vrot.slane %v7734_v45, 1 }
 0x33a   : > { %v2745_v39 = vsel %vm1246_vm1, %v2743_v33, %v2744_v34  ;;  %v5042_v42 = vrot.slane %v5035_v48, 2  ;;  %v4585_v33 = vmul.f32 %v7412_v53, %v7720_v21 }
 0x33b   : > { %v4595_v1 = vsel %vm797_vm0, %v4592_v23, %v4594_v15 }
 0x33c   : > { %1776 = vrot.lane.b32.xlu1 %v1772_v29, %s6303_s14  ;;  %v4873_v29 = vmul.f32 %v7412_v53, %v4872_v32 }
 0x33d   : > { %3738 = vrot.lane.b32.xlu0 %v3735_v50, %s6303_s14 }
 0x33e   : > { %v4879_v50 = vrot.slane %v4873_v29, 2 }
 0x340   : > { %1880 = vrot.lane.b32.xlu1 %v1876_v62, %s6302_s13  ;;  %v4875_v62 = vmul.f32 %v7408_v14, %v4872_v32  ;;  %v4881_v34 = vsel %vm1246_vm1, %v4879_v50, %v4880_v8 }
 0x341   : > { %3898 = vrot.lane.b32.xlu0 %v3895_v37, %s6302_s13  ;;  %v2920_v37 = vmul.f32 %v7759_v40, %v2919_v12  ;;  %v3437_v12 = vmul.f32 %v7759_v40, %v7619_v17 }
 0x342   : > { %v4882_v6 = vrot.slane %v4875_v62, 2 }
 0x343   : > { %v3443_v45 = vrot.slane %v3437_v12, 1 }
 0x344   : > { %2140 = vrot.lane.b32.xlu1 %v2137_v4, %s6303_s14  ;;  %v5033_v4 = vmul.f32 %v7412_v53, %v5032_v57  ;;  %v4883_v60 = vsel %vm1246_vm1, %v4880_v8, %v4882_v6  ;;  %v558_v57 = vmul.f32 %v7544_v11, %v557_v20 }
 0x345   : > { %4074 = vrot.lane.b32.xlu0 %v4069_v16, %s6303_s14  ;;  %v3024_v16 = vmul.f32 %v7759_v40, %v3023_v63  ;;  %v3725_v63 = vmul.f32 %v7759_v40, %v7638_v13  ;;  %v3445_v22 = vsel %vm797_vm0, %v3443_v45, %v3444_v2  ;;  %v5043_v13 = vsel %vm1246_vm1, %v5040_v0, %v5042_v42 }
 0x346   : > { %v4068_v2 = vmul.f32 %v7412_v53, %v4067_v43  ;;  %v1288_v45 = vstv %s5756_s29  ;;  %s5783_s29 = sld [smem:[#allocation2 + $0x8d]] }
 0x347   : > { %v3731_v47 = vrot.slane %v3725_v63, 2 }
 0x348   : > { %2300 = vrot.lane.b32.xlu1 %v2297_v51, %s6302_s13  ;;  %v5039_v51 = vrot.slane %v5033_v4, 2 }
 0x349   : > { %4178 = vrot.lane.b32.xlu0 %v4173_v52, %s6302_s13  ;;  %v3285_v52 = vsel %vm797_vm0, %v3283_v61, %v3284_v7  ;;  %v3885_v7 = vmul.f32 %v7759_v40, %v7655_v26  ;;  %v3733_v32 = vsel %vm1246_vm1, %v3731_v47, %v3732_v41  ;;  %v4425_v26 = vmul.f32 %v7412_v53, %v7701_v5 }
 0x34a   : > { %v5041_v17 = vsel %vm1246_vm1, %v5039_v51, %v5040_v0 }
 0x34b   : > { %v4431_v41 = vrot.slane %v4425_v26, 1 }
 0x34c   : > { %2588 = vrot.lane.b32.xlu1 %v2585_v55, %s6303_s14  ;;  %v3891_v55 = vrot.slane %v3885_v7, 2 }
 0x34d   : > { %4438 = vrot.lane.b32.xlu0 %v4435_v44, %s6303_s14  ;;  %v4433_v9 = vsel %vm797_vm0, %v4431_v41, %v4432_v49 }
 0x34e   : > { %v3893_v3 = vsel %vm1246_vm1, %v3891_v55, %v3892_v38  ;;  %v4591_v38 = vrot.slane %v4585_v33, 1 }
 0x350   : > { %2748 = vrot.lane.b32.xlu1 %v2745_v39, %s6302_s13  ;;  %v4593_v43 = vsel %vm797_vm0, %v4591_v38, %v4592_v23 }
 0x351   : > { %4598 = vrot.lane.b32.xlu0 %v4595_v1, %s6302_s13  ;;  %v839_v1 = vstv %s5753_s28 }
 0x352   : > { %v840_v54 = vmul.f32 %v7544_v11, %v839_v1  ;;  %v842_v6 = vmul.f32 %v7443_v58, %v839_v1 }
 0x354   : > { %2924 = vrot.lane.b32.xlu1 %v2920_v37, %s6303_s14  ;;  %v559_v37 = vmul.f32 %v7436_v18, %v557_v20  ;;  %v846_v51 = vrot.slane %v840_v54, 1  ;;  %v849_v48 = vrot.slane %v842_v6, 1  ;;  %v1988_v20 = vstv %s5762_s27  ;;  %s5791_s27 = sld [smem:[#allocation2 + $0x95]] }
 0x355   : > { %4884 = vrot.lane.b32.xlu0 %v4881_v34, %s6303_s14  ;;  %v841_v34 = vmul.f32 %v7436_v18, %v839_v1  ;;  %v1707_v1 = vstv %s7850_s7  ;;  %s5793_s7 = sld [smem:[#allocation2 + $0x97]] }
 0x357   : > { %v847_v0 = vrot.slane %v841_v34, 1  ;;  %v1991_v34 = vmul.f32 %v7524_v46, %v1988_v20 }
 0x358   : > { %3028 = vrot.lane.b32.xlu1 %v3024_v16, %s6302_s13 }
 0x359   : > { %4886 = vrot.lane.b32.xlu0 %v4883_v60, %s6303_s14  ;;  %v848_v47 = vsel %vm797_vm0, %v846_v51, %v847_v0  ;;  %v850_v7 = vsel %vm797_vm0, %v847_v0, %v849_v48  ;;  %v1998_v0 = vrot.slane %v1991_v34, 1 }
 0x35c   : > { %3288 = vrot.lane.b32.xlu1 %v3285_v52, %s6303_s14 }
 0x35d   : > { %5044 = vrot.lane.b32.xlu0 %v5041_v17, %s6302_s13 }
 0x360   : > { %3448 = vrot.lane.b32.xlu1 %v3445_v22, %s6302_s13 }
 0x361   : > { %5046 = vrot.lane.b32.xlu0 %v5043_v13, %s6302_s13  ;;  %v1290_v13 = vmul.f32 %v7436_v18, %v1288_v45 }
 0x364   : > { %3736 = vrot.lane.b32.xlu1 %v3733_v32, %s6303_s14  ;;  %v1291_v32 = vmul.f32 %v7443_v58, %v1288_v45 }
 0x366   : > { %v1298_v41 = vrot.slane %v1291_v32, 2 }
 0x368   : > { %3896 = vrot.lane.b32.xlu1 %v3893_v3, %s6302_s13  ;;  %v1289_v3 = vmul.f32 %v7544_v11, %v1288_v45  ;;  %v1708_v45 = vmul.f32 %v7676_v25, %v1707_v1 }
 0x36a   : > { %v1295_v38 = vrot.slane %v1289_v3, 2 }
 0x36c   : > { %4072 = vrot.lane.b32.xlu1 %v4068_v2, %s6303_s14 }
 0x370   : > { %4176 = vrot.lane.b32.xlu1 %v4172_v59, %s6302_s13  ;;  %v1296_v59 = vrot.slane %v1290_v13, 2 }
 0x372   : > { %v1297_v11 = vsel %vm1246_vm1, %v1295_v38, %v1296_v59 }
 0x374   : > { %4436 = vrot.lane.b32.xlu1 %v4433_v9, %s6303_s14 }
 0x378   : > { %v7822_v5 = vpop.xlane.xlu0 %5233  ;;  %4596 = vrot.lane.b32.xlu1 %v4593_v43, %s6302_s13 }
 0x37c   : > { %v629_v19 = vpop.permute.xlu0 %628 }
 0x37d   : > { %v633_v60 = vadd.f32 %v629_v19, %v559_v37  ;;  %v7861_v37 = vld [vmem:[%s6441_s11 + $0x20] sm:$0xff] }
 0x37e   : > { %v1990_v54 = vmul.f32 %v7861_v37, %v1988_v20 }
 0x380   : > { %v1154_v44 = vpop.permute.xlu0 %1153  ;;  %v1996_v51 = vrot.slane %v1990_v54, 1 }
 0x384   : > { %v7825_v15 = vpop.permute.xlu0 %1442 }
 0x388   : > { %v7827_v53 = vpop.permute.xlu0 %1602 }
 0x38c   : > { %v7829_v21 = vpop.permute.xlu0 %1778 }
 0x390   : > { %v7831_v10 = vpop.permute.xlu0 %1882 }
 0x394   : > { %v5203_v49 = vpop.xlane.xlu1 %5202  ;;  %v7833_v29 = vpop.permute.xlu0 %2142 }
 0x395   : > { %v5204_v23 = vrot.slane %v5203_v49, 4 }
 0x397   : > { %v5205_v39 = vadd.f32 %v5204_v23, %v5203_v49  ;;  %v1299_v49 = vsel %vm1246_vm1, %v1296_v59, %v1298_v41 }
 0x398   : > { %v627_v50 = vpop.permute.xlu1 %626  ;;  %v7835_v8 = vpop.permute.xlu0 %2302 }
 0x399   : > { %v5206_v62 = vrot.slane %v5205_v39, 2  ;;  %v632_v12 = vadd.f32 %v627_v50, %v558_v57 }
 0x39b   : > { %v5207_v4 = vadd.f32 %v5206_v62, %v5205_v39 }
 0x39c   : > { %v731_v31 = vpop.permute.xlu1 %730  ;;  %v7842_v16 = vpop.permute.xlu0 %2590 }
 0x39d   : > { %v5208_v61 = vrot.slane %v5207_v4, 1  ;;  %v736_v42 = vadd.f32 %v731_v31, %v632_v12 }
 0x39f   : > { %v5209_v52 = vadd.f32 %v5208_v61, %v5207_v4  ;;  %v853_v2 = vadd.f32 %v848_v47, %v736_v42  ;;  %v1709_v4 = vmul.f32 %v7861_v37, %v1707_v1 }
 0x3a0   : > { %v733_v63 = vpop.permute.xlu1 %732  ;;  %v7844_v17 = vpop.permute.xlu0 %2750 }
 0x3a1   : > { %5982 = vpush %v5209_v52  ;;  %v737_v22 = vadd.f32 %v733_v63, %v633_v60  ;;  %v2436_v60 = vstv %s5765_s5  ;;  %s7940_s5 = sld [smem:[#allocation2 + $0x91]] }
 0x3a2   : > { %v2438_v42 = vmul.f32 %v7861_v37, %v2436_v60 }
 0x3a3   : > { %v854_v26 = vadd.f32 %v850_v7, %v737_v22  ;;  %v1989_v22 = vmul.f32 %v7676_v25, %v1988_v20  ;;  %v3136_v20 = vstv %s5771_s12  ;;  %s5794_s12 = sld [smem:[#allocation2 + $0x98]] }
 0x3a4   : > { %v992_v55 = vpop.permute.xlu1 %991  ;;  %v7853_v33 = vpop.permute.xlu0 %2926  ;;  %v2444_v3 = vrot.slane %v2438_v42, 2  ;;  %v3139_v34 = vmul.f32 %v7615_v27, %v3136_v20 }
 0x3a5   : > { %v997_v43 = vadd.f32 %v992_v55, %v853_v2 }
 0x3a8   : > { %v994_v9 = vpop.permute.xlu1 %993  ;;  %v7858_v50 = vpop.permute.xlu0 %3030 }
 0x3a9   : > { %v998_v19 = vadd.f32 %v994_v9, %v854_v26  ;;  %v1995_v26 = vrot.slane %v1989_v22, 1 }
 0x3ab   : > { %v1158_v23 = vadd.f32 %v1154_v44, %v998_v19  ;;  %v1997_v19 = vsel %vm797_vm0, %v1995_v26, %v1996_v51 }
 0x3ac   : > { %v1152_v39 = vpop.permute.xlu1 %1151  ;;  %v7868_v48 = vpop.permute.xlu0 %3290 }
 0x3ad   : > { %v1303_v62 = vadd.f32 %v1299_v49, %v1158_v23  ;;  %v1157_v57 = vadd.f32 %v1152_v39, %v997_v43  ;;  %v2855_v39 = vstv %s7876_s20  ;;  %s5930_s20 = sld [smem:[#allocation5 + $0x1]] }
 0x3af   : > { %v1447_v6 = vadd.f32 %v7825_v15, %v1303_v62  ;;  %v1302_v44 = vadd.f32 %v1297_v11, %v1157_v57  ;;  %v2439_v15 = vmul.f32 %v7524_v46, %v2436_v60 }
 0x3b0   : > { %v1441_v31 = vpop.permute.xlu1 %1440  ;;  %v3451_v59 = vpop.permute.xlu0 %3450 }
 0x3b1   : > { %v1607_v61 = vadd.f32 %v7827_v53, %v1447_v6  ;;  %v1446_v12 = vadd.f32 %v1441_v31, %v1302_v44  ;;  %v1999_v53 = vsel %vm797_vm0, %v1996_v51, %v1998_v0  ;;  %v2446_v2 = vrot.slane %v2439_v15, 2  ;;  %v7889_v44 = vld [vmem:[%s6441_s11 + $0x38] sm:$0xff] }
 0x3b2   : > { %v3584_v31 = vstv %s5774_s22  ;;  %v3146_v51 = vrot.slane %v3139_v34, 1  ;;  %s7953_s22 = sld [smem:[#allocation7 + $0x1]] }
 0x3b3   : > { %v1711_v52 = vadd.f32 %v1709_v4, %v1607_v61  ;;  %v2447_v43 = vsel %vm1246_vm1, %v2444_v3, %v2446_v2  ;;  %v3137_v2 = vmul.f32 %v7759_v40, %v3136_v20 }
 0x3b4   : > { %v1601_v63 = vpop.permute.xlu1 %1600  ;;  %v3739_v1 = vpop.permute.xlu0 %3738 }
 0x3b5   : > { %v1783_v47 = vadd.f32 %v7829_v21, %v1711_v52  ;;  %v1606_v7 = vadd.f32 %v1601_v63, %v1446_v12 }
 0x3b7   : > { %v1887_v13 = vadd.f32 %v7831_v10, %v1783_v47  ;;  %v1710_v32 = vadd.f32 %v1708_v45, %v1606_v7  ;;  %v2437_v10 = vmul.f32 %v7676_v25, %v2436_v60  ;;  %v2857_v25 = vmul.f32 %v7889_v44, %v2855_v39 }
 0x3b8   : > { %v1777_v55 = vpop.permute.xlu1 %1776  ;;  %v3899_v0 = vpop.permute.xlu0 %3898  ;;  %v3586_v45 = vmul.f32 %v7889_v44, %v3584_v31 }
 0x3b9   : > { %v2003_v41 = vadd.f32 %v1999_v53, %v1887_v13  ;;  %v1782_v9 = vadd.f32 %v1777_v55, %v1710_v32  ;;  %v2443_v54 = vrot.slane %v2437_v10, 2  ;;  %v2856_v55 = vmul.f32 %v7759_v40, %v2855_v39 }
 0x3ba   : > { %v3592_v7 = vrot.slane %v3586_v45, 2  ;;  %v5235_v10 = vrot.slane %v7822_v5, 4 }
 0x3bb   : > { %v2147_v38 = vadd.f32 %v7833_v29, %v2003_v41  ;;  %v3138_v29 = vmul.f32 %v7383_v28, %v3136_v20  ;;  %v2445_v12 = vsel %vm1246_vm1, %v2443_v54, %v2444_v3 }
 0x3bc   : > { %v1881_v21 = vpop.permute.xlu1 %1880  ;;  %v4075_v13 = vpop.permute.xlu0 %4074 }
 0x3bd   : > { %v2307_v49 = vadd.f32 %v7835_v8, %v2147_v38  ;;  %v1886_v23 = vadd.f32 %v1881_v21, %v1782_v9  ;;  %v3144_v60 = vrot.slane %v3138_v29, 1  ;;  %v4284_v29 = vstv %s5780_s6 }
 0x3bf   : > { %v2451_v11 = vadd.f32 %v2447_v43, %v2307_v49  ;;  %v2002_v62 = vadd.f32 %v1997_v19, %v1886_v23  ;;  %v3147_v22 = vsel %vm797_vm0, %v3144_v60, %v3146_v51  ;;  %v4003_v43 = vstv %s7898_s23  ;;  %s7979_s23 = sld [smem:[#allocation2 + $0x9a]] }
 0x3c0   : > { %v2141_v57 = vpop.permute.xlu1 %2140  ;;  %v4179_v19 = vpop.permute.xlu0 %4178  ;;  %v4005_v20 = vmul.f32 %v7403_v36, %v4003_v43  ;;  %v7912_v36 = vld [vmem:[%s6441_s11 + $0x50] sm:$0xff] }
 0x3c1   : > { %v2595_v6 = vadd.f32 %v7842_v16, %v2451_v11  ;;  %v2146_v4 = vadd.f32 %v2141_v57, %v2002_v62  ;;  %v3587_v16 = vmul.f32 %v7615_v27, %v3584_v31  ;;  %v3585_v62 = vmul.f32 %v7759_v40, %v3584_v31 }
 0x3c3   : > { %v2755_v8 = vadd.f32 %v7844_v17, %v2595_v6  ;;  %v3594_v53 = vrot.slane %v3587_v16, 2 }
 0x3c4   : > { %v2301_v61 = vpop.permute.xlu1 %2300  ;;  %v4439_v34 = vpop.permute.xlu0 %4438 }
 0x3c5   : > { %v2306_v52 = vadd.f32 %v2301_v61, %v2146_v4  ;;  %v2859_v28 = vadd.f32 %v2857_v25, %v2755_v8  ;;  %v3595_v41 = vsel %vm1246_vm1, %v3592_v7, %v3594_v53  ;;  %v3591_v8 = vrot.slane %v3585_v62, 2 }
 0x3c6   : > { %v4286_v61 = vmul.f32 %v7912_v36, %v4284_v29 }
 0x3c7   : > { %v2931_v63 = vadd.f32 %v7853_v33, %v2859_v28  ;;  %v2450_v42 = vadd.f32 %v2445_v12, %v2306_v52  ;;  %v4287_v12 = vmul.f32 %v7408_v14, %v4284_v29  ;;  %v3593_v51 = vsel %vm1246_vm1, %v3591_v8, %v3592_v7 }
 0x3c8   : > { %v2589_v15 = vpop.permute.xlu1 %2588  ;;  %v4599_v28 = vpop.permute.xlu0 %4598 }
 0x3c9   : > { %v2594_v17 = vadd.f32 %v2589_v15, %v2450_v42  ;;  %v3035_v47 = vadd.f32 %v7858_v50, %v2931_v63  ;;  %v3143_v50 = vrot.slane %v3137_v2, 1  ;;  %v4294_v52 = vrot.slane %v4287_v12, 1 }
 0x3cb   : > { %v3151_v32 = vadd.f32 %v3147_v22, %v3035_v47  ;;  %v3145_v11 = vsel %vm797_vm0, %v3143_v50, %v3144_v60  ;;  %v4732_v47 = vstv %s5783_s29 }
 0x3cc   : > { %v2749_v3 = vpop.permute.xlu1 %2748  ;;  %v4885_v53 = vpop.permute.xlu0 %4884  ;;  %v4734_v2 = vmul.f32 %v7912_v36, %v4732_v47 }
 0x3cd   : > { %v2754_v33 = vadd.f32 %v2749_v3, %v2594_v17  ;;  %v3295_v26 = vadd.f32 %v7868_v48, %v3151_v32  ;;  %v7919_v32 = vld [vmem:[%s6441_s11 + $0x48] sm:$0xff] }
 0x3ce   : > { %v4004_v7 = vmul.f32 %v7919_v32, %v4003_v43  ;;  %v4285_v3 = vmul.f32 %v7919_v32, %v4284_v29 }
 0x3cf   : > { %v2858_v9 = vadd.f32 %v2856_v55, %v2754_v33  ;;  %v3455_v38 = vadd.f32 %v3451_v59, %v3295_v26  ;;  %v5236_v59 = vadd.f32 %v5235_v10, %v7822_v5  ;;  %v7925_v33 = vld [vmem:[%s6441_s11 + $0x58] sm:$0x3] }
 0x3d0   : > { %v2925_v21 = vpop.permute.xlu1 %2924  ;;  %v4735_v26 = vmul.f32 %v7925_v33, %v4732_v47  ;;  %v4291_v10 = vrot.slane %v4285_v3, 1 }
 0x3d1   : > { %v2930_v49 = vadd.f32 %v2925_v21, %v2858_v9  ;;  %v3599_v23 = vadd.f32 %v3595_v41, %v3455_v38  ;;  %v5237_v40 = vrot.slane %v5236_v59, 2 }
 0x3d2   : > { %s5983_s8 = spop %5982  ;;  %v4742_v43 = vrot.slane %v4735_v26, 2 }
 0x3d3   : > { %s5211_s10 = smul.f32 0.00390625, %s5983_s8  ;;  %v3743_v39 = vadd.f32 %v3739_v1, %v3599_v23  ;;  %v5238_v45 = vadd.f32 %v5237_v40, %v5236_v59  ;;  %v4887_v23 = vpop.permute.xlu0 %4886  ;;  %v4733_v59 = vmul.f32 %v7919_v32, %v4732_v47  ;;  %s5799_s8 = sld [smem:[#allocation2 + $0x9d]] }
 0x3d4   : > { %v3029_v48 = vpop.permute.xlu1 %3028 }
 0x3d5   : > { %s5212_s28 = sadd.f32 1e-05, %s5211_s10  ;;  %v3034_v57 = vadd.f32 %v3029_v48, %v2930_v49  ;;  %v3903_v54 = vadd.f32 %v3899_v0, %v3743_v39  ;;  %v4292_v0 = vrot.slane %v4286_v61, 1  ;;  %v5239_v14 = vrot.slane %v5238_v45, 1 }
 0x3d6   : > { %v4740_v49 = vrot.slane %v4734_v2, 2 }
 0x3d7   : > { %v5213_v6 = vstv %s5212_s28  ;;  %v3150_v4 = vadd.f32 %v3145_v11, %v3034_v57  ;;  %v4007_v25 = vadd.f32 %v4005_v20, %v3903_v54  ;;  %v4295_v22 = vsel %vm797_vm0, %v4292_v0, %v4294_v52  ;;  %v5045_v54 = vpop.permute.xlu0 %5044 }
 0x3d8   : > { %6098 = vrsqrt.f32 %v5213_v6  ;;  %v3289_v1 = vpop.permute.xlu1 %3288  ;;  %v5240_v9 = vadd.f32 %v5239_v14, %v5238_v45  ;;  %v4293_v11 = vsel %vm797_vm0, %v4291_v10, %v4292_v0  ;;  %v4743_v62 = vsel %vm1246_vm1, %v4740_v49, %v4742_v43 }
 0x3d9   : > { %v3294_v31 = vadd.f32 %v3289_v1, %v3150_v4  ;;  %v4079_v5 = vadd.f32 %v4075_v13, %v4007_v25  ;;  %v4739_v4 = vrot.slane %v4733_v59, 2  ;;  %v7942_v45 = vstv %s5791_s27  ;;  %s7992_s27 = sld [smem:[#allocation2 + $0x9b]] }
 0x3db   : > { %v4183_v42 = vadd.f32 %v4179_v19, %v4079_v5  ;;  %v4741_v8 = vsel %vm1246_vm1, %v4739_v4, %v4740_v49  ;;  %v5047_v12 = vpop.permute.xlu0 %5046 }
 0x3dc   : > { %v3449_v60 = vpop.permute.xlu1 %3448 }
 0x3dd   : > { %v3454_v16 = vadd.f32 %v3449_v60, %v3294_v31  ;;  %v4299_v13 = vadd.f32 %v4295_v22, %v4183_v42  ;;  %v7950_v42 = vstv %s5793_s7  ;;  %v7956_v22 = vld [vmem:[%s6441_s11 + $0x8] sm:$0xff]  ;;  %s5800_s7 = sld [smem:[#allocation2 + $0x9e]] }
 0x3df   : > { %v3598_v63 = vadd.f32 %v3593_v51, %v3454_v16  ;;  %v4443_v21 = vadd.f32 %v4439_v34, %v4299_v13  ;;  %v7946_v16 = vmul.f32 %v7436_v18, %v7942_v45  ;;  %v7966_v18 = vld [vmem:[%s6441_s11 + $0x10] sm:$0x3]  ;;  %v7971_v13 = vstv %s5794_s12  ;;  %s5802_s12 = sld [smem:[#allocation2 + $0xa0]] }
 0x3e0   : > { %v3737_v15 = vpop.permute.xlu1 %3736  ;;  %v7977_v3 = vmul.f32 %v7956_v22, %v7971_v13  ;;  %v1611_v26 = vmul.f32 %v7966_v18, %v7971_v13  ;;  %v1888_v4 = vstv %s7992_s27  ;;  %s5786_s27 = sld [smem:[#allocation2 + $0x90]] }
 0x3e1   : > { %v3742_v17 = vadd.f32 %v3737_v15, %v3598_v63  ;;  %v4603_v20 = vadd.f32 %v4599_v28, %v4443_v21  ;;  %v1162_v63 = vmul.f32 %v7443_v58, %v7942_v45  ;;  %v634_v15 = vstv %s7940_s5  ;;  %s5811_s5 = sld [smem:[#allocation2 + $0xa9]] }
 0x3e2   : > { %v636_v14 = vmul.f32 %v7956_v22, %v634_v15  ;;  %v1451_v58 = vmul.f32 %v7966_v18, %v7950_v42  ;;  %v1167_v47 = vrot.slane %v7946_v16, 1  ;;  %v1616_v21 = vrot.slane %v7977_v3, 2 }
 0x3e3   : > { %v4747_v6 = vadd.f32 %v4743_v62, %v4603_v20  ;;  %v1618_v49 = vrot.slane %v1611_v26, 2 }
 0x3e4   : > { %v3897_v55 = vpop.permute.xlu1 %3896 }
 0x3e5   : > { %v6099_v41 = vpop.eup %6098  ;;  %v3902_v38 = vadd.f32 %v3897_v55, %v3742_v17  ;;  %v4891_v1 = vadd.f32 %v4887_v23, %v4747_v6  ;;  %v7963_v17 = vmul.f32 %v7956_v22, %v7950_v42  ;;  %v1458_v55 = vrot.slane %v1451_v58, 2 }
 0x3e6   : > { %5984 = vpush %v6099_v41 }
 0x3e7   : > { %5986 = vpush %v5240_v9  ;;  %v4006_v50 = vadd.f32 %v4004_v7, %v3902_v38  ;;  %v7932_v5 = vadd.f32 %v5047_v12, %v4891_v1  ;;  %v1456_v7 = vrot.slane %v7963_v17, 2  ;;  %v5220_v9 = vstv %s7953_s22  ;;  %s8048_s22 = sld [smem:[#allocation2 + $0x92]] }
 0x3e8   : > { %v4073_v19 = vpop.permute.xlu1 %4072 }
 0x3e9   : > { %v4078_v39 = vadd.f32 %v4073_v19, %v4006_v50  ;;  %v5280_v0 = vsel %vm5132_vm2, %v7932_v5, 0.0  ;;  %v1459_v38 = vsel %vm1246_vm1, %v1456_v7, %v1458_v55 }
 0x3ec   : > { %v4177_v48 = vpop.permute.xlu1 %4176 }
 0x3ed   : > { %v4182_v57 = vadd.f32 %v4177_v48, %v4078_v39 }
 0x3ef   : > { %v4298_v29 = vadd.f32 %v4293_v11, %v4182_v57  ;;  %v1784_v11 = vstv %s7979_s23  ;;  %v8013_v57 = vstv %s5799_s8  ;;  %s8074_s8 = sld [smem:[#allocation2 + $0xa3]] }
 0x3f0   : > { %v4437_v34 = vpop.permute.xlu1 %4436  ;;  %v2151_v1 = vmul.f32 %v7524_v46, %v8013_v57  ;;  %s5821_s23 = sld [smem:[#allocation2 + $0xb3]] }
 0x3f1   : > { %v4442_v25 = vadd.f32 %v4437_v34, %v4298_v29  ;;  %v1786_v34 = vmul.f32 %v7861_v37, %v1784_v11 }
 0x3f2   : > { %v2158_v46 = vrot.slane %v2151_v1, 1 }
 0x3f4   : > { %v4597_v61 = vpop.permute.xlu1 %4596 }
 0x3f5   : > { %v4602_v40 = vadd.f32 %v4597_v61, %v4442_v25  ;;  %v8026_v25 = vmul.f32 %v7861_v37, %v8013_v57  ;;  %v1890_v61 = vmul.f32 %v7861_v37, %v1888_v4 }
 0x3f7   : > { %v4746_v31 = vadd.f32 %v4741_v8, %v4602_v40  ;;  %v8030_v8 = vstv %s5800_s7  ;;  %v8041_v40 = vld [vmem:[%s6441_s11 + $0x28] sm:$0x3]  ;;  %s5812_s7 = sld [smem:[#allocation2 + $0xaa]] }
 0x3f8   : > { %v8038_v12 = vmul.f32 %v7861_v37, %v8030_v8 }
 0x3f9   : > { %v4890_v60 = vadd.f32 %v4885_v53, %v4746_v31  ;;  %v1169_v53 = vrot.slane %v1162_v63, 1  ;;  %v2311_v31 = vmul.f32 %v8041_v40, %v8030_v8 }
 0x3fb   : > { %v7934_v51 = vadd.f32 %v5045_v54, %v4890_v60  ;;  %v1170_v2 = vsel %vm797_vm0, %v1167_v47, %v1169_v53  ;;  %v2156_v60 = vrot.slane %v8026_v25, 1 }
 0x3fd   : > { %v5279_v52 = vsel %vm5132_vm2, %v7934_v51, 0.0  ;;  %v2159_v63 = vsel %vm797_vm0, %v2156_v60, %v2158_v46 }
 0x3fe   : > { %v5281_v28 = vadd.f32 %v5280_v0, %v5279_v52  ;;  %v8046_v0 = vstv %s5802_s12  ;;  %v2316_v52 = vrot.slane %v8038_v12, 1  ;;  %s8171_s12 = sld [smem:[#allocation2 + $0xac]] }
 0x3ff   : > { %v2599_v58 = vmul.f32 %v8041_v40, %v8046_v0 }
 0x400   : > { %5282 = vadd.xlane.f32.xlu0 %v5281_v28  ;;  %v2318_v28 = vrot.slane %v2311_v31, 1 }
 0x401   : > { %v2606_v26 = vrot.slane %v2599_v58, 2 }
 0x402   : > { %v2319_v55 = vsel %vm797_vm0, %v2316_v52, %v2318_v28 }
 0x416   : > { %641 = vrot.lane.b32.xlu0 %v636_v14, %s6303_s14  ;;  %v8057_v14 = vmul.f32 %v7861_v37, %v8046_v0 }
 0x417   : > { %s5985_s6 = spop %5984 }
 0x418   : > { %s5216_s10 = smul.f32 %s5985_s6, %s5930_s20  ;;  %s5987_s28 = spop %5986 }
 0x419   : > { %s5242_s29 = smul.f32 0.00390625, %s5987_s28  ;;  %s5803_s20 = sld [smem:[#allocation2 + $0xa1]] }
 0x41a   : > { %v5217_v41 = vstv %s5216_s10  ;;  %1173 = vrot.lane.b32.xlu0 %v1170_v2, %s6302_s13  ;;  %s5790_s6 = sld [smem:[#allocation2 + $0x94]]  ;;  %v2604_v2 = vrot.slane %v8057_v14, 2 }
 0x41b   : > { %v5218_v50 = vmul.f32 %v5217_v41, %v7466_v56  ;;  %v5219_v19 = vmul.f32 %v5217_v41, %v7469_v30  ;;  %v5243_v10 = vstv %s5242_s29  ;;  %s5808_s10 = sld [smem:[#allocation2 + $0xa6]] }
 0x41c   : > { %v7997_v43 = vsub.f32 %v7423_v35, %v5243_v10  ;;  %v8000_v23 = vsub.f32 %v7427_v24, %v5243_v10  ;;  %v1619_v24 = vsel %vm1246_vm1, %v1616_v21, %v1618_v49  ;;  %s8084_s28 = sld [smem:[#allocation2 + $0xa4]]  ;;  %v2607_v49 = vsel %vm1246_vm1, %v2604_v2, %v2606_v26 }
 0x41d   : > { %v5221_v39 = vadd.f32 %v5220_v9, %v5218_v50  ;;  %v5222_v20 = vadd.f32 %v5220_v9, %v5219_v19  ;;  %v738_v19 = vstv %s8048_s22  ;;  %s5809_s29 = sld [smem:[#allocation2 + $0xa7]] }
 0x41e   : > { %v5246_v48 = vmul.f32 %v7997_v43, %v7997_v43  ;;  %v5247_v56 = vmul.f32 %v8000_v23, %v8000_v23  ;;  %1462 = vrot.lane.b32.xlu0 %v1459_v38, %s6303_s14  ;;  %v8077_v38 = vld [vmem:[%s6441_s11] sm:$0xff]  ;;  %s8178_s22 = sld [smem:[#allocation2 + $0xad]] }
 0x41f   : > { %v5223_v30 = vmul.f32 0.2, %v5221_v39  ;;  %v5224_v35 = vmul.f32 0.2, %v5222_v20  ;;  %v8061_v53 = vstv %s5803_s20  ;;  %v635_v50 = vmul.f32 %v8077_v38, %v634_v15  ;;  %s5817_s20 = sld [smem:[#allocation2 + $0xaf]] }
 0x420   : > { %v5248_v62 = vsel %vm5132_vm2, %v5246_v48, 0.0  ;;  %v5249_v59 = vsel %vm5132_vm2, %v5247_v56, 0.0  ;;  %v8070_v41 = vmul.f32 %v7861_v37, %v8061_v53  ;;  %v2759_v9 = vmul.f32 %v8041_v40, %v8061_v53 }
 0x421   : > { %v5225_v54 = vmax.f32 %v5221_v39, %v5223_v30  ;;  %v5226_v29 = vmax.f32 %v5222_v20, %v5224_v35  ;;  %v5250_v6 = vadd.f32 %v5249_v59, %v5248_v62  ;;  %v999_v10 = vstv %s5790_s6  ;;  %s5818_s6 = sld [smem:[#allocation2 + $0xb0]] }
 0x422   : > { %1622 = vrot.lane.b32.xlu0 %v1619_v24, %s6302_s13  ;;  %v2764_v39 = vrot.slane %v8070_v41, 2  ;;  %v2766_v20 = vrot.slane %v2759_v9, 2  ;;  %v739_v15 = vmul.f32 %v8077_v38, %v738_v19  ;;  %v1000_v48 = vmul.f32 %v8077_v38, %v999_v10 }
 0x423   : > { %5953 = vst.msk [vmem:[%s7499_s9 + $0x10] sm:$0xff] %vm5132_vm2, %v5225_v54  ;;  %5954 = vst.msk [vmem:[%s7499_s9 + $0x18] sm:$0xff] %vm5132_vm2, %v5226_v29  ;;  %5251 = vadd.xlane.f32.xlu1 %v5250_v6  ;;  %v1001_v56 = vmul.f32 %v7956_v22, %v999_v10  ;;  %v2932_v35 = vstv %s8074_s8  ;;  %v740_v24 = vmul.f32 %v7956_v22, %v738_v19  ;;  %v8101_v62 = vstv %s5808_s10  ;;  %s5820_s10 = sld [smem:[#allocation2 + $0xb2]] }
 0x424   : > { %v2767_v30 = vsel %vm1246_vm1, %v2764_v39, %v2766_v20  ;;  %v1006_v59 = vrot.slane %v1000_v48, 1  ;;  %v1002_v29 = vmul.f32 %v7966_v18, %v999_v10  ;;  %v2934_v6 = vmul.f32 %v7889_v44, %v2932_v35  ;;  %s5789_s8 = sld [smem:[#allocation2 + $0x93]] }
 0x425   : > { %v1007_v54 = vrot.slane %v1001_v56, 1  ;;  %v8111_v1 = vmul.f32 %v7889_v44, %v8101_v62  ;;  %v8115_v31 = vstv %s5809_s29  ;;  %v8133_v19 = vstv %s5811_s5  ;;  %v8148_v56 = vld [vmem:[%s6441_s11 + $0x40] sm:$0x3]  ;;  %s5798_s29 = sld [smem:[#allocation2 + $0x9c]] }
 0x426   : > { %1791 = vrot.lane.b32.xlu0 %v1786_v34, %s6303_s14  ;;  %v3036_v34 = vstv %s8084_s28  ;;  %v1009_v28 = vrot.slane %v1002_v29, 1  ;;  %v3459_v26 = vmul.f32 %v7615_v27, %v8115_v31  ;;  %v8145_v48 = vmul.f32 %v7889_v44, %v8133_v19  ;;  %s5792_s28 = sld [smem:[#allocation2 + $0x96]] }
 0x427   : > { %v1008_v46 = vsel %vm797_vm0, %v1006_v59, %v1007_v54  ;;  %v3038_v58 = vmul.f32 %v7889_v44, %v3036_v34  ;;  %v3304_v9 = vrot.slane %v8111_v1, 1  ;;  %s8361_s5 = sld [smem:[#allocation2 + $0x99]] }
 0x42a   : > { %1895 = vrot.lane.b32.xlu0 %v1890_v61, %s6302_s13  ;;  %v3299_v61 = vmul.f32 %v7615_v27, %v8101_v62 }
 0x42e   : > { %2162 = vrot.lane.b32.xlu0 %v2159_v63, %s6303_s14  ;;  %v1160_v63 = vmul.f32 %v8077_v38, %v7942_v45  ;;  %v1010_v45 = vsel %vm797_vm0, %v1007_v54, %v1009_v28  ;;  %v1609_v54 = vmul.f32 %v8077_v38, %v7971_v13 }
 0x430   : > { %v1166_v10 = vrot.slane %v1160_v63, 1  ;;  %v1615_v13 = vrot.slane %v1609_v54, 2 }
 0x432   : > { %2322 = vrot.lane.b32.xlu0 %v2319_v55, %s6302_s13  ;;  %v8127_v55 = vmul.f32 %v7889_v44, %v8115_v31  ;;  %v1617_v17 = vsel %vm1246_vm1, %v1615_v13, %v1616_v21 }
 0x434   : > { %639 = vrot.lane.b32.xlu1 %v635_v50, %s6303_s14  ;;  %v3306_v50 = vrot.slane %v3299_v61, 1  ;;  %v3464_v20 = vrot.slane %v8127_v55, 1 }
 0x436   : > { %2610 = vrot.lane.b32.xlu0 %v2607_v49, %s6303_s14  ;;  %v1449_v49 = vmul.f32 %v8077_v38, %v7950_v42  ;;  %v3307_v27 = vsel %vm797_vm0, %v3304_v9, %v3306_v50  ;;  %v8153_v42 = vstv %s5812_s7  ;;  %v8195_v50 = vld [vmem:[%s6441_s11 + $0x18] sm:$0xff]  ;;  %s5801_s7 = sld [smem:[#allocation2 + $0x9f]] }
 0x437   : > { %v3907_v16 = vmul.f32 %v8148_v56, %v8153_v42  ;;  %v2149_v3 = vmul.f32 %v8195_v50, %v8013_v57  ;;  %v1889_v57 = vmul.f32 %v8195_v50, %v1888_v4  ;;  %v4892_v4 = vstv %s5820_s10  ;;  %s5816_s10 = sld [smem:[#allocation2 + $0xae]] }
 0x438   : > { %743 = vrot.lane.b32.xlu1 %v739_v15, %s6302_s13  ;;  %v3466_v15 = vrot.slane %v3459_v26, 1  ;;  %v1455_v59 = vrot.slane %v1449_v49, 2  ;;  %v4080_v26 = vstv %s8171_s12  ;;  %v4184_v49 = vstv %s8178_s22  ;;  %s5807_s12 = sld [smem:[#allocation2 + $0xa5]] }
 0x439   : > { %v4082_v21 = vmul.f32 %v7912_v36, %v4080_v26  ;;  %v2597_v13 = vmul.f32 %v8195_v50, %v8046_v0  ;;  %v2757_v0 = vmul.f32 %v8195_v50, %v8061_v53  ;;  %v4081_v55 = vmul.f32 %v7919_v32, %v4080_v26  ;;  %s5810_s22 = sld [smem:[#allocation2 + $0xa8]] }
 0x43a   : > { %2770 = vrot.lane.b32.xlu0 %v2767_v30, %s6302_s13  ;;  %v3747_v30 = vmul.f32 %v8148_v56, %v8133_v19  ;;  %v3467_v29 = vsel %vm797_vm0, %v3464_v20, %v3466_v15 }
 0x43c   : > { %745 = vrot.lane.b32.xlu1 %v740_v24, %s6302_s13  ;;  %v1168_v24 = vsel %vm797_vm0, %v1166_v10, %v1167_v47  ;;  %v3754_v61 = vrot.slane %v3747_v30, 2  ;;  %v1457_v47 = vsel %vm1246_vm1, %v1455_v59, %v1456_v7  ;;  %v8200_v10 = vstv %s5817_s20  ;;  %s8387_s20 = sld [smem:[#allocation2 + $0xa2]] }
 0x43d   : > { %v8211_v15 = vmul.f32 %v7912_v36, %v8200_v10  ;;  %v2155_v30 = vrot.slane %v2149_v3, 1  ;;  %v4186_v59 = vmul.f32 %v7912_v36, %v4184_v49 }
 0x43e   : > { %2939 = vrot.lane.b32.xlu0 %v2934_v6, %s6303_s14  ;;  %v3752_v6 = vrot.slane %v8145_v48, 2  ;;  %v4185_v48 = vmul.f32 %v7919_v32, %v4184_v49 }
 0x440   : > { %1011 = vrot.lane.b32.xlu1 %v1008_v46, %s6303_s14  ;;  %v8167_v46 = vmul.f32 %v7889_v44, %v8153_v42  ;;  %v3755_v28 = vsel %vm1246_vm1, %v3752_v6, %v3754_v61 }
 0x442   : > { %3043 = vrot.lane.b32.xlu0 %v3038_v58, %s6302_s13  ;;  %v3912_v63 = vrot.slane %v8167_v46, 2  ;;  %v3914_v58 = vrot.slane %v3907_v16, 2 }
 0x444   : > { %1013 = vrot.lane.b32.xlu1 %v1010_v45, %s6303_s14  ;;  %v3915_v7 = vsel %vm1246_vm1, %v3912_v63, %v3914_v58  ;;  %v1785_v45 = vmul.f32 %v8195_v50, %v1784_v11  ;;  %v8215_v11 = vstv %s5818_s6  ;;  %s8409_s6 = sld [smem:[#allocation2 + $0xab]] }
 0x445   : > { %v8229_v54 = vmul.f32 %v7912_v36, %v8215_v11  ;;  %v4607_v16 = vmul.f32 %v7925_v33, %v8215_v11 }
 0x446   : > { %3310 = vrot.lane.b32.xlu0 %v3307_v27, %s6303_s14  ;;  %v4447_v27 = vmul.f32 %v7925_v33, %v8200_v10 }
 0x448   : > { %1171 = vrot.lane.b32.xlu1 %v1168_v24, %s6302_s13  ;;  %v2309_v24 = vmul.f32 %v8195_v50, %v8030_v8  ;;  %v4454_v61 = vrot.slane %v4447_v27, 1  ;;  %v2157_v8 = vsel %vm797_vm0, %v2155_v30, %v2156_v60  ;;  %v2603_v60 = vrot.slane %v2597_v13, 2 }
 0x449   : > { %v5052_v30 = vstv %s5821_s23 }
 0x44a   : > { %3470 = vrot.lane.b32.xlu0 %v3467_v29, %s6302_s13  ;;  %v4452_v29 = vrot.slane %v8211_v15, 1  ;;  %v2605_v12 = vsel %vm1246_vm1, %v2603_v60, %v2604_v2 }
 0x44c   : > { %1460 = vrot.lane.b32.xlu1 %v1457_v47, %s6303_s14  ;;  %v2315_v47 = vrot.slane %v2309_v24, 1  ;;  %v4455_v58 = vsel %vm797_vm0, %v4452_v29, %v4454_v61  ;;  %v5054_v61 = vmul.f32 %v7912_v36, %v5052_v30 }
 0x44e   : > { %3758 = vrot.lane.b32.xlu0 %v3755_v28, %s6303_s14  ;;  %v4612_v28 = vrot.slane %v8229_v54, 1  ;;  %v2317_v25 = vsel %vm797_vm0, %v2315_v47, %v2316_v52  ;;  %v2763_v52 = vrot.slane %v2757_v0, 2  ;;  %v8275_v47 = vld [vmem:[%s6441_s11 + $0x30] sm:$0xff] }
 0x44f   : > { %v2933_v13 = vmul.f32 %v8275_v47, %v2932_v35  ;;  %v3297_v41 = vmul.f32 %v8275_v47, %v8101_v62  ;;  %v3905_v0 = vmul.f32 %v8275_v47, %v8153_v42 }
 0x450   : > { %1620 = vrot.lane.b32.xlu1 %v1617_v17, %s6302_s13  ;;  %v4614_v17 = vrot.slane %v4607_v16, 1  ;;  %v2765_v14 = vsel %vm1246_vm1, %v2763_v52, %v2764_v39  ;;  %v855_v52 = vstv %s5789_s8 }
 0x452   : > { %3918 = vrot.lane.b32.xlu0 %v3915_v7, %s6302_s13  ;;  %v4893_v7 = vmul.f32 %v7919_v32, %v4892_v4  ;;  %v4615_v3 = vsel %vm797_vm0, %v4612_v28, %v4614_v17  ;;  %v3037_v17 = vmul.f32 %v8275_v47, %v3036_v34  ;;  %v3745_v34 = vmul.f32 %v8275_v47, %v8133_v19 }
 0x454   : > { %1789 = vrot.lane.b32.xlu1 %v1785_v45, %s6303_s14  ;;  %v4894_v45 = vmul.f32 %v7912_v36, %v4892_v4  ;;  %v3751_v60 = vrot.slane %v3745_v34, 2 }
 0x456   : > { %4087 = vrot.lane.b32.xlu0 %v4082_v21, %s6303_s14  ;;  %v4899_v21 = vrot.slane %v4893_v7, 2  ;;  %v4900_v27 = vrot.slane %v4894_v45, 2  ;;  %v3303_v7 = vrot.slane %v3297_v41, 1  ;;  %v3457_v45 = vmul.f32 %v8275_v47, %v8115_v31 }
 0x457   : > { %v3753_v1 = vsel %vm1246_vm1, %v3751_v60, %v3752_v6  ;;  %v4605_v6 = vmul.f32 %v7919_v32, %v8215_v11 }
 0x458   : > { %1893 = vrot.lane.b32.xlu1 %v1889_v57, %s6302_s13  ;;  %v4895_v57 = vmul.f32 %v7925_v33, %v4892_v4  ;;  %v4901_v53 = vsel %vm1246_vm1, %v4899_v21, %v4900_v27  ;;  %v5060_v4 = vrot.slane %v5054_v61, 2  ;;  %v3305_v62 = vsel %vm797_vm0, %v3303_v7, %v3304_v9 }
 0x459   : > { %v3911_v9 = vrot.slane %v3905_v0, 2  ;;  %v4611_v26 = vrot.slane %v4605_v6, 1 }
 0x45a   : > { %4191 = vrot.lane.b32.xlu0 %v4186_v59, %s6302_s13  ;;  %v4902_v24 = vrot.slane %v4895_v57, 2  ;;  %v5053_v59 = vmul.f32 %v7919_v32, %v5052_v30 }
 0x45b   : > { %v3913_v19 = vsel %vm1246_vm1, %v3911_v9, %v3912_v63 }
 0x45c   : > { %2160 = vrot.lane.b32.xlu1 %v2157_v8, %s6303_s14  ;;  %v4903_v2 = vsel %vm1246_vm1, %v4900_v27, %v4902_v24  ;;  %v5059_v16 = vrot.slane %v5053_v59, 2  ;;  %v5055_v8 = vmul.f32 %v7925_v33, %v5052_v30  ;;  %v562_v30 = vstv %s5786_s27 }
 0x45d   : > { %v563_v59 = vmul.f32 %v8077_v38, %v562_v30  ;;  %v564_v61 = vmul.f32 %v7956_v22, %v562_v30 }
 0x45e   : > { %4458 = vrot.lane.b32.xlu0 %v4455_v58, %s6303_s14  ;;  %v5061_v39 = vsel %vm1246_vm1, %v5059_v16, %v5060_v4  ;;  %v5062_v58 = vrot.slane %v5055_v8, 2  ;;  %v858_v16 = vmul.f32 %v7966_v18, %v855_v52 }
 0x460   : > { %2320 = vrot.lane.b32.xlu1 %v2317_v25, %s6302_s13  ;;  %v5063_v35 = vsel %vm1246_vm1, %v5060_v4, %v5062_v58  ;;  %v3463_v25 = vrot.slane %v3457_v45, 1  ;;  %v865_v45 = vrot.slane %v858_v16, 1 }
 0x462   : > { %4618 = vrot.lane.b32.xlu0 %v4615_v3, %s6302_s13  ;;  %v3465_v31 = vsel %vm797_vm0, %v3463_v25, %v3464_v20  ;;  %v4445_v20 = vmul.f32 %v7919_v32, %v8200_v10  ;;  %v4613_v10 = vsel %vm797_vm0, %v4611_v26, %v4612_v28 }
 0x464   : > { %2608 = vrot.lane.b32.xlu1 %v2605_v12, %s6303_s14  ;;  %v4451_v42 = vrot.slane %v4445_v20, 1 }
 0x466   : > { %4904 = vrot.lane.b32.xlu0 %v4901_v53, %s6303_s14  ;;  %v4453_v63 = vsel %vm797_vm0, %v4451_v42, %v4452_v29 }
 0x468   : > { %2768 = vrot.lane.b32.xlu1 %v2765_v14, %s6302_s13  ;;  %v856_v14 = vmul.f32 %v8077_v38, %v855_v52 }
 0x46a   : > { %4906 = vrot.lane.b32.xlu0 %v4903_v2, %s6303_s14  ;;  %v857_v2 = vmul.f32 %v7956_v22, %v855_v52  ;;  %v2004_v52 = vstv %s5798_s29  ;;  %s5827_s29 = sld [smem:[#allocation2 + $0xb9]] }
 0x46b   : > { %v2006_v16 = vmul.f32 %v7861_v37, %v2004_v52 }
 0x46c   : > { %2937 = vrot.lane.b32.xlu1 %v2933_v13, %s6303_s14  ;;  %v863_v7 = vrot.slane %v857_v2, 1 }
 0x46e   : > { %5064 = vrot.lane.b32.xlu0 %v5061_v39, %s6302_s13 }
 0x470   : > { %3041 = vrot.lane.b32.xlu1 %v3037_v17, %s6302_s13  ;;  %v862_v17 = vrot.slane %v856_v14, 1 }
 0x472   : > { %5066 = vrot.lane.b32.xlu0 %v5063_v35, %s6302_s13  ;;  %v864_v0 = vsel %vm797_vm0, %v862_v17, %v863_v7 }
 0x474   : > { %3308 = vrot.lane.b32.xlu1 %v3305_v62, %s6303_s14  ;;  %v1304_v62 = vstv %s5792_s28  ;;  %s5819_s28 = sld [smem:[#allocation2 + $0xb1]] }
 0x475   : > { %v1306_v9 = vmul.f32 %v7956_v22, %v1304_v62  ;;  %v1305_v20 = vmul.f32 %v8077_v38, %v1304_v62 }
 0x477   : > { %v1312_v6 = vrot.slane %v1306_v9, 2 }
 0x478   : > { %3468 = vrot.lane.b32.xlu1 %v3465_v31, %s6302_s13 }
 0x47c   : > { %3756 = vrot.lane.b32.xlu1 %v3753_v1, %s6303_s14  ;;  %v866_v1 = vsel %vm797_vm0, %v863_v7, %v865_v45  ;;  %v2452_v7 = vstv %s5801_s7  ;;  %v2012_v45 = vrot.slane %v2006_v16, 1  ;;  %s8448_s7 = sld [smem:[#allocation2 + $0xb5]] }
 0x480   : > { %3916 = vrot.lane.b32.xlu1 %v3913_v19, %s6302_s13  ;;  %v1307_v19 = vmul.f32 %v7966_v18, %v1304_v62 }
 0x484   : > { %4085 = vrot.lane.b32.xlu1 %v4081_v55, %s6303_s14 }
 0x488   : > { %4189 = vrot.lane.b32.xlu1 %v4185_v48, %s6302_s13 }
 0x489   : > { %v8326_v46 = vpop.xlane.xlu0 %5282 }
 0x48c   : > { %4456 = vrot.lane.b32.xlu1 %v4453_v63, %s6303_s14  ;;  %v1314_v63 = vrot.slane %v1307_v19, 2 }
 0x48d   : > { %v642_v49 = vpop.permute.xlu0 %641 }
 0x48e   : > { %v646_v58 = vadd.f32 %v642_v49, %v564_v61  ;;  %v1311_v49 = vrot.slane %v1305_v20, 2  ;;  %v1315_v30 = vsel %vm1246_vm1, %v1312_v6, %v1314_v63 }
 0x490   : > { %4616 = vrot.lane.b32.xlu1 %v4613_v10, %s6302_s13 }
 0x491   : > { %v1174_v3 = vpop.permute.xlu0 %1173 }
 0x495   : > { %v8336_v11 = vpop.permute.xlu0 %1462 }
 0x499   : > { %v8338_v21 = vpop.permute.xlu0 %1622 }
 0x49d   : > { %v8340_v27 = vpop.permute.xlu0 %1791 }
 0x4a1   : > { %v8342_v15 = vpop.permute.xlu0 %1895 }
 0x4a5   : > { %v8344_v29 = vpop.permute.xlu0 %2162 }
 0x4a9   : > { %v8346_v54 = vpop.permute.xlu0 %2322 }
 0x4ac   : > { %v5252_v57 = vpop.xlane.xlu1 %5251 }
 0x4ad   : > { %v5253_v28 = vrot.slane %v5252_v57, 4  ;;  %v8353_v4 = vpop.permute.xlu0 %2610 }
 0x4af   : > { %v5254_v12 = vadd.f32 %v5253_v28, %v5252_v57 }
 0x4b0   : > { %v640_v53 = vpop.permute.xlu1 %639 }
 0x4b1   : > { %v5255_v24 = vrot.slane %v5254_v12, 2  ;;  %v645_v39 = vadd.f32 %v640_v53, %v563_v59  ;;  %v8355_v34 = vpop.permute.xlu0 %2770  ;;  %v1313_v59 = vsel %vm1246_vm1, %v1311_v49, %v1312_v6 }
 0x4b3   : > { %v5256_v8 = vadd.f32 %v5255_v24, %v5254_v12  ;;  %v1712_v24 = vstv %s8361_s5  ;;  %s5829_s5 = sld [smem:[#allocation2 + $0xbb]] }
 0x4b4   : > { %v744_v13 = vpop.permute.xlu1 %743 }
 0x4b5   : > { %v5257_v41 = vrot.slane %v5256_v8, 1  ;;  %v749_v31 = vadd.f32 %v744_v13, %v645_v39  ;;  %v8364_v26 = vpop.permute.xlu0 %2939 }
 0x4b7   : > { %v5258_v35 = vadd.f32 %v5257_v41, %v5256_v8  ;;  %v869_v48 = vadd.f32 %v864_v0, %v749_v31  ;;  %v2007_v8 = vmul.f32 %v8041_v40, %v2004_v52  ;;  %v1714_v41 = vmul.f32 %v7861_v37, %v1712_v24  ;;  %v8380_v0 = vld [vmem:[%s6441_s11 + $0x20] sm:$0xff] }
 0x4b8   : > { %v746_v25 = vpop.permute.xlu1 %745  ;;  %v1713_v31 = vmul.f32 %v8195_v50, %v1712_v24  ;;  %v2455_v37 = vmul.f32 %v8041_v40, %v2452_v7  ;;  %v3152_v24 = vstv %s5807_s12  ;;  %s5830_s12 = sld [smem:[#allocation2 + $0xbc]] }
 0x4b9   : > { %5988 = vpush %v5258_v35  ;;  %v750_v60 = vadd.f32 %v746_v25, %v646_v58  ;;  %v8369_v61 = vpop.permute.xlu0 %3043  ;;  %v2014_v35 = vrot.slane %v2007_v8, 1 }
 0x4ba   : > { %v2462_v6 = vrot.slane %v2455_v37, 2  ;;  %v8403_v37 = vld [vmem:[%s6441_s11 + $0x38] sm:$0xff] }
 0x4bb   : > { %v870_v42 = vadd.f32 %v866_v1, %v750_v60  ;;  %v2005_v1 = vmul.f32 %v8195_v50, %v2004_v52  ;;  %v2015_v19 = vsel %vm797_vm0, %v2012_v45, %v2014_v35  ;;  %v2453_v52 = vmul.f32 %v8195_v50, %v2452_v7 }
 0x4bc   : > { %v1012_v55 = vpop.permute.xlu1 %1011 }
 0x4bd   : > { %v1017_v57 = vadd.f32 %v1012_v55, %v869_v48  ;;  %v8376_v62 = vpop.permute.xlu0 %3310  ;;  %v2011_v63 = vrot.slane %v2005_v1, 1 }
 0x4c0   : > { %v1014_v10 = vpop.permute.xlu1 %1013 }
 0x4c1   : > { %v1018_v28 = vadd.f32 %v1014_v10, %v870_v42  ;;  %v3471_v10 = vpop.permute.xlu0 %3470 }
 0x4c3   : > { %v1178_v12 = vadd.f32 %v1174_v3, %v1018_v28 }
 0x4c4   : > { %v1172_v53 = vpop.permute.xlu1 %1171 }
 0x4c5   : > { %v1319_v14 = vadd.f32 %v1315_v30, %v1178_v12  ;;  %v1177_v2 = vadd.f32 %v1172_v53, %v1017_v57  ;;  %v2013_v12 = vsel %vm797_vm0, %v2011_v63, %v2012_v45 }
 0x4c7   : > { %v1467_v13 = vadd.f32 %v8336_v11, %v1319_v14  ;;  %v1318_v39 = vadd.f32 %v1313_v59, %v1177_v2  ;;  %v2454_v11 = vmul.f32 %v8380_v0, %v2452_v7  ;;  %v2860_v59 = vstv %s8387_s20  ;;  %v3759_v14 = vpop.permute.xlu0 %3758  ;;  %s5931_s20 = sld [smem:[#allocation5 + $0x2]] }
 0x4c8   : > { %v1461_v3 = vpop.permute.xlu1 %1460  ;;  %v2861_v63 = vmul.f32 %v8275_v47, %v2860_v59 }
 0x4c9   : > { %v1627_v58 = vadd.f32 %v8338_v21, %v1467_v13  ;;  %v1466_v17 = vadd.f32 %v1461_v3, %v1318_v39  ;;  %v2460_v42 = vrot.slane %v2454_v11, 2  ;;  %v2459_v13 = vrot.slane %v2453_v52, 2 }
 0x4cb   : > { %v1716_v25 = vadd.f32 %v1714_v41, %v1627_v58  ;;  %v2463_v30 = vsel %vm1246_vm1, %v2460_v42, %v2462_v6  ;;  %v3155_v41 = vmul.f32 %v8148_v56, %v3152_v24  ;;  %v2862_v58 = vmul.f32 %v7889_v44, %v2860_v59 }
 0x4cc   : > { %v1621_v60 = vpop.permute.xlu1 %1620  ;;  %v2461_v45 = vsel %vm1246_vm1, %v2459_v13, %v2460_v42 }
 0x4cd   : > { %v1796_v21 = vadd.f32 %v8340_v27, %v1716_v25  ;;  %v1626_v9 = vadd.f32 %v1621_v60, %v1466_v17  ;;  %v3600_v17 = vstv %s5810_s22  ;;  %v3162_v25 = vrot.slane %v3155_v41, 1  ;;  %s8461_s22 = sld [smem:[#allocation7 + $0x2]] }
 0x4ce   : > { %v3602_v1 = vmul.f32 %v8403_v37, %v3600_v17 }
 0x4cf   : > { %v1900_v55 = vadd.f32 %v8342_v15, %v1796_v21  ;;  %v1715_v20 = vadd.f32 %v1713_v31, %v1626_v9  ;;  %v3919_v31 = vpop.permute.xlu0 %3918 }
 0x4d0   : > { %v1790_v48 = vpop.permute.xlu1 %1789 }
 0x4d1   : > { %v2019_v49 = vadd.f32 %v2015_v19, %v1900_v55  ;;  %v1795_v57 = vadd.f32 %v1790_v48, %v1715_v20  ;;  %v3608_v20 = vrot.slane %v3602_v1, 2 }
 0x4d3   : > { %v2167_v28 = vadd.f32 %v8344_v29, %v2019_v49  ;;  %v3154_v29 = vmul.f32 %v7889_v44, %v3152_v24  ;;  %v4088_v42 = vpop.permute.xlu0 %4087 }
 0x4d4   : > { %v1894_v27 = vpop.permute.xlu1 %1893 }
 0x4d5   : > { %v2327_v15 = vadd.f32 %v8346_v54, %v2167_v28  ;;  %v1899_v53 = vadd.f32 %v1894_v27, %v1795_v57  ;;  %v3160_v35 = vrot.slane %v3154_v29, 1  ;;  %v3153_v57 = vmul.f32 %v8275_v47, %v3152_v24 }
 0x4d6   : > { %v3601_v29 = vmul.f32 %v8275_v47, %v3600_v17 }
 0x4d7   : > { %v2467_v2 = vadd.f32 %v2463_v30, %v2327_v15  ;;  %v2018_v16 = vadd.f32 %v2013_v12, %v1899_v53  ;;  %v4008_v15 = vstv %s8409_s6  ;;  %v4192_v53 = vpop.permute.xlu0 %4191  ;;  %s8484_s6 = sld [smem:[#allocation2 + $0xbe]] }
 0x4d8   : > { %v2161_v8 = vpop.permute.xlu1 %2160  ;;  %v4010_v24 = vmul.f32 %v7912_v36, %v4008_v15 }
 0x4d9   : > { %v2615_v39 = vadd.f32 %v8353_v4, %v2467_v2  ;;  %v2166_v3 = vadd.f32 %v2161_v8, %v2018_v16  ;;  %v3603_v4 = vmul.f32 %v8148_v56, %v3600_v17  ;;  %v5284_v2 = vrot.slane %v8326_v46, 4 }
 0x4db   : > { %v2775_v54 = vadd.f32 %v8355_v34, %v2615_v39  ;;  %v3163_v34 = vsel %vm797_vm0, %v3160_v35, %v3162_v25  ;;  %v3610_v48 = vrot.slane %v3603_v4, 2 }
 0x4dc   : > { %v2321_v7 = vpop.permute.xlu1 %2320 }
 0x4dd   : > { %v2326_v60 = vadd.f32 %v2321_v7, %v2166_v3  ;;  %v2864_v11 = vadd.f32 %v2862_v58, %v2775_v54  ;;  %v3611_v27 = vsel %vm1246_vm1, %v3608_v20, %v3610_v48  ;;  %v4300_v3 = vstv %s5816_s10  ;;  %v4459_v58 = vpop.permute.xlu0 %4458 }
 0x4df   : > { %v2944_v21 = vadd.f32 %v8364_v26, %v2864_v11  ;;  %v2466_v44 = vadd.f32 %v2461_v45, %v2326_v60  ;;  %v4302_v60 = vmul.f32 %v7912_v36, %v4300_v3  ;;  %v4303_v11 = vmul.f32 %v7925_v33, %v4300_v3 }
 0x4e0   : > { %v2609_v9 = vpop.permute.xlu1 %2608 }
 0x4e1   : > { %v2614_v19 = vadd.f32 %v2609_v9, %v2466_v44  ;;  %v3048_v55 = vadd.f32 %v8369_v61, %v2944_v21  ;;  %v3159_v61 = vrot.slane %v3153_v57, 1  ;;  %v4310_v21 = vrot.slane %v4303_v11, 1  ;;  %v4619_v44 = vpop.permute.xlu0 %4618 }
 0x4e3   : > { %v3167_v6 = vadd.f32 %v3163_v34, %v3048_v55 }
 0x4e4   : > { %v2769_v49 = vpop.permute.xlu1 %2768 }
 0x4e5   : > { %v2774_v26 = vadd.f32 %v2769_v49, %v2614_v19  ;;  %v3315_v28 = vadd.f32 %v8376_v62, %v3167_v6  ;;  %v3161_v62 = vsel %vm797_vm0, %v3159_v61, %v3160_v35  ;;  %v4748_v49 = vstv %s5819_s28  ;;  %v4905_v57 = vpop.permute.xlu0 %4904 }
 0x4e7   : > { %v2863_v30 = vadd.f32 %v2861_v63, %v2774_v26  ;;  %v3475_v12 = vadd.f32 %v3471_v10, %v3315_v28  ;;  %v5285_v10 = vadd.f32 %v5284_v2, %v8326_v46 }
 0x4e8   : > { %v2938_v52 = vpop.permute.xlu1 %2937 }
 0x4e9   : > { %v2943_v16 = vadd.f32 %v2938_v52, %v2863_v30  ;;  %v3615_v8 = vadd.f32 %v3611_v27, %v3475_v12  ;;  %v5286_v35 = vrot.slane %v5285_v10, 2  ;;  %v8429_v27 = vld [vmem:[%s6441_s11 + $0x50] sm:$0xff]  ;;  %v4751_v12 = vmul.f32 %v7925_v33, %v4748_v49 }
 0x4ea   : > { %s5989_s23 = spop %5988  ;;  %v4750_v30 = vmul.f32 %v8429_v27, %v4748_v49 }
 0x4eb   : > { %s5260_s27 = smul.f32 0.00390625, %s5989_s23  ;;  %v3763_v59 = vadd.f32 %v3759_v14, %v3615_v8  ;;  %v3607_v14 = vrot.slane %v3601_v29, 2  ;;  %v5287_v9 = vadd.f32 %v5286_v35, %v5285_v10  ;;  %s5835_s23 = sld [smem:[#allocation2 + $0xc1]] }
 0x4ec   : > { %v3042_v13 = vpop.permute.xlu1 %3041 }
 0x4ed   : > { %s5261_s8 = sadd.f32 1e-05, %s5260_s27  ;;  %v3047_v41 = vadd.f32 %v3042_v13, %v2943_v16  ;;  %v3923_v39 = vadd.f32 %v3919_v31, %v3763_v59  ;;  %v3609_v4 = vsel %vm1246_vm1, %v3607_v14, %v3608_v20  ;;  %v4308_v31 = vrot.slane %v4302_v60, 1  ;;  %v4907_v13 = vpop.permute.xlu0 %4906 }
 0x4ee   : > { %v5288_v6 = vrot.slane %v5287_v9, 1  ;;  %v4301_v20 = vmul.f32 %v7919_v32, %v4300_v3 }
 0x4ef   : > { %v5262_v54 = vstv %s5261_s8  ;;  %v3166_v7 = vadd.f32 %v3161_v62, %v3047_v41  ;;  %v4012_v45 = vadd.f32 %v4010_v24, %v3923_v39  ;;  %v4311_v36 = vsel %vm797_vm0, %v4308_v31, %v4310_v21  ;;  %v8436_v41 = vld [vmem:[%s6441_s11 + $0x48] sm:$0xff] }
 0x4f0   : > { %6100 = vrsqrt.f32 %v5262_v54  ;;  %v3309_v25 = vpop.permute.xlu1 %3308  ;;  %v5289_v61 = vadd.f32 %v5288_v6, %v5287_v9  ;;  %v4307_v59 = vrot.slane %v4301_v20, 1  ;;  %v4758_v24 = vrot.slane %v4751_v12, 2  ;;  %v8478_v12 = vld [vmem:[%s6441_s11 + $0x8] sm:$0xff] }
 0x4f1   : > { %v3314_v1 = vadd.f32 %v3309_v25, %v3166_v7  ;;  %v4092_v17 = vadd.f32 %v4088_v42, %v4012_v45  ;;  %v4009_v42 = vmul.f32 %v7919_v32, %v4008_v15  ;;  %v4756_v15 = vrot.slane %v4750_v30, 2  ;;  %v5065_v54 = vpop.permute.xlu0 %5064 }
 0x4f2   : > { %v4309_v10 = vsel %vm797_vm0, %v4307_v59, %v4308_v31  ;;  %v4749_v39 = vmul.f32 %v8436_v41, %v4748_v49  ;;  %v647_v6 = vstv %s8448_s7  ;;  %s5847_s7 = sld [smem:[#allocation2 + $0xcd]] }
 0x4f3   : > { %v4196_v55 = vadd.f32 %v4192_v53, %v4092_v17  ;;  %v4759_v33 = vsel %vm1246_vm1, %v4756_v15, %v4758_v24 }
 0x4f4   : > { %v3469_v46 = vpop.permute.xlu1 %3468  ;;  %v4755_v25 = vrot.slane %v4749_v39, 2  ;;  %v1797_v39 = vstv %s8484_s6  ;;  %s5857_s6 = sld [smem:[#allocation2 + $0xd7]] }
 0x4f5   : > { %v3474_v34 = vadd.f32 %v3469_v46, %v3314_v1  ;;  %v4315_v26 = vadd.f32 %v4311_v36, %v4196_v55  ;;  %v5067_v1 = vpop.permute.xlu0 %5066  ;;  %v8458_v36 = vstv %s5829_s5  ;;  %s5836_s5 = sld [smem:[#allocation2 + $0xc2]] }
 0x4f6   : > { %v4757_v11 = vsel %vm1246_vm1, %v4755_v25, %v4756_v15  ;;  %v8468_v49 = vmul.f32 %v7956_v22, %v8458_v36 }
 0x4f7   : > { %v3614_v19 = vadd.f32 %v3609_v4, %v3474_v34  ;;  %v4463_v2 = vadd.f32 %v4459_v58, %v4315_v26 }
 0x4f8   : > { %v3757_v48 = vpop.permute.xlu1 %3756  ;;  %v1476_v20 = vrot.slane %v8468_v49, 2 }
 0x4f9   : > { %v3762_v63 = vadd.f32 %v3757_v48, %v3614_v19  ;;  %v4623_v62 = vadd.f32 %v4619_v44, %v4463_v2  ;;  %v8450_v19 = vstv %s5827_s29  ;;  %v5269_v2 = vstv %s8461_s22  ;;  %s8500_s29 = sld [smem:[#allocation2 + $0xbf]] }
 0x4fa   : > { %v8454_v55 = vmul.f32 %v7956_v22, %v8450_v19  ;;  %v1182_v48 = vmul.f32 %v7966_v18, %v8450_v19  ;;  %s8553_s22 = sld [smem:[#allocation2 + $0xb6]] }
 0x4fb   : > { %v4763_v7 = vadd.f32 %v4759_v33, %v4623_v62 }
 0x4fc   : > { %v3917_v28 = vpop.permute.xlu1 %3916  ;;  %v1187_v26 = vrot.slane %v8454_v55, 1  ;;  %v8675_v55 = vld [vmem:[%s6441_s11 + $0x40] sm:$0x3] }
 0x4fd   : > { %v6101_v52 = vpop.eup %6100  ;;  %v3922_v53 = vadd.f32 %v3917_v28, %v3762_v63  ;;  %v4911_v60 = vadd.f32 %v4907_v13, %v4763_v7  ;;  %v649_v63 = vmul.f32 %v7956_v22, %v647_v6  ;;  %v8473_v28 = vstv %s5830_s12  ;;  %s5838_s12 = sld [smem:[#allocation2 + $0xc4]] }
 0x4fe   : > { %5990 = vpush %v6101_v52  ;;  %v8482_v22 = vmul.f32 %v8478_v12, %v8473_v28  ;;  %v8490_v52 = vld [vmem:[%s6441_s11 + $0x10] sm:$0x3] }
 0x4ff   : > { %5992 = vpush %v5289_v61  ;;  %v4011_v16 = vadd.f32 %v4009_v42, %v3922_v53  ;;  %v8440_v4 = vadd.f32 %v5067_v1, %v4911_v60  ;;  %v1189_v42 = vrot.slane %v1182_v48, 1  ;;  %v1631_v61 = vmul.f32 %v8490_v52, %v8473_v28 }
 0x500   : > { %v4086_v8 = vpop.permute.xlu1 %4085  ;;  %v1901_v60 = vstv %s8500_s29  ;;  %v8538_v1 = vstv %s5836_s5  ;;  %s5848_s5 = sld [smem:[#allocation2 + $0xce]] }
 0x501   : > { %v4091_v32 = vadd.f32 %v4086_v8, %v4011_v16  ;;  %v5329_v44 = vsel %vm5132_vm2, %v8440_v4, 0.0  ;;  %v1636_v8 = vrot.slane %v8482_v22, 2  ;;  %v1638_v13 = vrot.slane %v1631_v61, 2  ;;  %s5822_s29 = sld [smem:[#allocation2 + $0xb4]] }
 0x504   : > { %v4190_v29 = vpop.permute.xlu1 %4189 }
 0x505   : > { %v4195_v3 = vadd.f32 %v4190_v29, %v4091_v32 }
 0x507   : > { %v4314_v58 = vadd.f32 %v4309_v10, %v4195_v3 }
 0x508   : > { %v4457_v45 = vpop.permute.xlu1 %4456 }
 0x509   : > { %v4462_v14 = vadd.f32 %v4457_v45, %v4314_v58  ;;  %v8521_v58 = vstv %s5835_s23  ;;  %s8582_s23 = sld [smem:[#allocation2 + $0xc7]] }
 0x50a   : > { %v2169_v22 = vmul.f32 %v8195_v50, %v8521_v58 }
 0x50c   : > { %v4617_v35 = vpop.permute.xlu1 %4616 }
 0x50d   : > { %v4622_v17 = vadd.f32 %v4617_v35, %v4462_v14  ;;  %v1799_v14 = vmul.f32 %v8380_v0, %v1797_v39  ;;  %v2171_v35 = vmul.f32 %v8041_v40, %v8521_v58 }
 0x50f   : > { %v4762_v46 = vadd.f32 %v4757_v11, %v4622_v17  ;;  %v8534_v11 = vmul.f32 %v8380_v0, %v8521_v58  ;;  %v1903_v17 = vmul.f32 %v8380_v0, %v1901_v60 }
 0x511   : > { %v4910_v31 = vadd.f32 %v4905_v57, %v4762_v46  ;;  %v1471_v57 = vmul.f32 %v7966_v18, %v8458_v36  ;;  %v1190_v18 = vsel %vm797_vm0, %v1187_v26, %v1189_v42  ;;  %v8546_v46 = vmul.f32 %v8380_v0, %v8538_v1  ;;  %v8565_v42 = vld [vmem:[%s6441_s11 + $0x28] sm:$0x3] }
 0x513   : > { %v8442_v21 = vadd.f32 %v5065_v54, %v4910_v31  ;;  %v1478_v30 = vrot.slane %v1471_v57, 2  ;;  %v2331_v31 = vmul.f32 %v8041_v40, %v8538_v1  ;;  %v2336_v48 = vrot.slane %v8546_v46, 1 }
 0x515   : > { %v5328_v9 = vsel %vm5132_vm2, %v8442_v21, 0.0  ;;  %v1479_v16 = vsel %vm1246_vm1, %v1476_v20, %v1478_v30 }
 0x516   : > { %v5330_v34 = vadd.f32 %v5329_v44, %v5328_v9  ;;  %v2176_v44 = vrot.slane %v8534_v11, 1  ;;  %v2178_v9 = vrot.slane %v2171_v35, 1 }
 0x518   : > { %5331 = vadd.xlane.f32.xlu0 %v5330_v34  ;;  %v8551_v34 = vstv %s5838_s12  ;;  %v2179_v57 = vsel %vm797_vm0, %v2176_v44, %v2178_v9  ;;  %s8679_s12 = sld [smem:[#allocation2 + $0xd0]] }
 0x519   : > { %v8562_v40 = vmul.f32 %v8380_v0, %v8551_v34  ;;  %v2619_v30 = vmul.f32 %v8565_v42, %v8551_v34 }
 0x52e   : > { %654 = vrot.lane.b32.xlu0 %v649_v63, %s6303_s14  ;;  %v2338_v63 = vrot.slane %v2331_v31, 1 }
 0x52f   : > { %s5991_s10 = spop %5990 }
 0x530   : > { %s5265_s27 = smul.f32 %s5991_s10, %s5931_s20  ;;  %s5993_s8 = spop %5992  ;;  %v2339_v61 = vsel %vm797_vm0, %v2336_v48, %v2338_v63 }
 0x531   : > { %s5291_s28 = smul.f32 0.00390625, %s5993_s8  ;;  %s5839_s20 = sld [smem:[#allocation2 + $0xc5]] }
 0x532   : > { %v5266_v53 = vstv %s5265_s27  ;;  %1193 = vrot.lane.b32.xlu0 %v1190_v18, %s6302_s13  ;;  %s5826_s10 = sld [smem:[#allocation2 + $0xb8]] }
 0x533   : > { %v5267_v59 = vmul.f32 %v5266_v53, %v7997_v43  ;;  %v5268_v15 = vmul.f32 %v5266_v53, %v8000_v23  ;;  %v5292_v24 = vstv %s5291_s28  ;;  %v2624_v53 = vrot.slane %v8562_v40, 2  ;;  %s5844_s27 = sld [smem:[#allocation2 + $0xca]] }
 0x534   : > { %v8505_v32 = vsub.f32 %v7934_v51, %v5292_v24  ;;  %v8508_v62 = vsub.f32 %v7932_v5, %v5292_v24  ;;  %v1639_v5 = vsel %vm1246_vm1, %v1636_v8, %v1638_v13  ;;  %v751_v24 = vstv %s8553_s22  ;;  %s8589_s8 = sld [smem:[#allocation2 + $0xc8]] }
 0x535   : > { %v5270_v29 = vadd.f32 %v5269_v2, %v5267_v59  ;;  %v5271_v10 = vadd.f32 %v5269_v2, %v5268_v15  ;;  %v2626_v2 = vrot.slane %v2619_v30, 2  ;;  %v648_v15 = vmul.f32 %v8077_v38, %v647_v6  ;;  %s5845_s28 = sld [smem:[#allocation2 + $0xcb]]  ;;  %v8597_v38 = vld [vmem:[%s6441_s11] sm:$0xff] }
 0x536   : > { %v5295_v33 = vmul.f32 %v8505_v32, %v8505_v32  ;;  %v5296_v43 = vmul.f32 %v8508_v62, %v8508_v62  ;;  %1482 = vrot.lane.b32.xlu0 %v1479_v16, %s6303_s14  ;;  %v752_v6 = vmul.f32 %v8597_v38, %v751_v24  ;;  %v1180_v30 = vmul.f32 %v8597_v38, %v8450_v19  ;;  %s8686_s22 = sld [smem:[#allocation2 + $0xd1]] }
 0x537   : > { %v5272_v23 = vmul.f32 0.2, %v5270_v29  ;;  %v5273_v51 = vmul.f32 0.2, %v5271_v10  ;;  %v8569_v18 = vstv %s5839_s20  ;;  %s5853_s20 = sld [smem:[#allocation2 + $0xd3]] }
 0x538   : > { %v5297_v3 = vsel %vm5132_vm2, %v5295_v33, 0.0  ;;  %v5298_v54 = vsel %vm5132_vm2, %v5296_v43, 0.0  ;;  %v8578_v16 = vmul.f32 %v8380_v0, %v8569_v18  ;;  %v2779_v59 = vmul.f32 %v8565_v42, %v8569_v18 }
 0x539   : > { %v5274_v7 = vmax.f32 %v5270_v29, %v5272_v23  ;;  %v5275_v45 = vmax.f32 %v5271_v10, %v5273_v51  ;;  %v5299_v25 = vadd.f32 %v5298_v54, %v5297_v3  ;;  %v1019_v13 = vstv %s5826_s10  ;;  %s5854_s10 = sld [smem:[#allocation2 + $0xd4]] }
 0x53a   : > { %1642 = vrot.lane.b32.xlu0 %v1639_v5, %s6302_s13  ;;  %v2627_v29 = vsel %vm1246_vm1, %v2624_v53, %v2626_v2  ;;  %v2784_v10 = vrot.slane %v8578_v16, 2  ;;  %v2786_v33 = vrot.slane %v2779_v59, 2  ;;  %v1020_v43 = vmul.f32 %v8597_v38, %v1019_v13 }
 0x53b   : > { %5955 = vst.msk [vmem:[%s7499_s9 + $0x20] sm:$0xff] %vm5132_vm2, %v5274_v7  ;;  %5956 = vst.msk [vmem:[%s7499_s9 + $0x28] sm:$0xff] %vm5132_vm2, %v5275_v45  ;;  %5300 = vadd.xlane.f32.xlu1 %v5299_v25  ;;  %v1021_v23 = vmul.f32 %v8478_v12, %v1019_v13  ;;  %v2945_v5 = vstv %s8582_s23  ;;  %v753_v3 = vmul.f32 %v8478_v12, %v751_v24  ;;  %v8609_v54 = vstv %s5844_s27  ;;  %s5856_s27 = sld [smem:[#allocation2 + $0xd6]] }
 0x53c   : > { %v2787_v51 = vsel %vm1246_vm1, %v2784_v10, %v2786_v33  ;;  %v1026_v7 = vrot.slane %v1020_v43, 1  ;;  %v1022_v25 = vmul.f32 %v8490_v52, %v1019_v13  ;;  %v3049_v35 = vstv %s8589_s8  ;;  %s5825_s23 = sld [smem:[#allocation2 + $0xb7]] }
 0x53d   : > { %v1027_v45 = vrot.slane %v1021_v23, 1  ;;  %v3319_v31 = vmul.f32 %v8148_v56, %v8609_v54  ;;  %v8623_v9 = vstv %s5845_s28  ;;  %v8641_v13 = vstv %s5847_s7  ;;  %s5828_s8 = sld [smem:[#allocation2 + $0xba]] }
 0x53e   : > { %1804 = vrot.lane.b32.xlu0 %v1799_v14, %s6303_s14  ;;  %v2947_v14 = vmul.f32 %v8403_v37, %v2945_v5  ;;  %v8635_v2 = vmul.f32 %v8403_v37, %v8623_v9  ;;  %v3479_v59 = vmul.f32 %v8148_v56, %v8623_v9  ;;  %v1469_v33 = vmul.f32 %v8597_v38, %v8458_v36  ;;  %s5834_s28 = sld [smem:[#allocation2 + $0xc0]] }
 0x53f   : > { %v1028_v63 = vsel %vm797_vm0, %v1026_v7, %v1027_v45  ;;  %v3326_v24 = vrot.slane %v3319_v31, 1  ;;  %v8658_v36 = vstv %s5848_s5  ;;  %s8872_s7 = sld [smem:[#allocation2 + $0xbd]] }
 0x540   : > { %v3486_v43 = vrot.slane %v3479_v59, 1  ;;  %s5837_s5 = sld [smem:[#allocation2 + $0xc3]] }
 0x542   : > { %1908 = vrot.lane.b32.xlu0 %v1903_v17, %s6302_s13  ;;  %v8619_v17 = vmul.f32 %v8403_v37, %v8609_v54 }
 0x546   : > { %2182 = vrot.lane.b32.xlu0 %v2179_v57, %s6303_s14  ;;  %v1029_v57 = vrot.slane %v1022_v25, 1  ;;  %v1629_v25 = vmul.f32 %v8597_v38, %v8473_v28 }
 0x548   : > { %v1030_v19 = vsel %vm797_vm0, %v1027_v45, %v1029_v57  ;;  %v1475_v45 = vrot.slane %v1469_v33, 2  ;;  %v1635_v57 = vrot.slane %v1629_v25, 2  ;;  %v4197_v33 = vstv %s8686_s22  ;;  %s5846_s22 = sld [smem:[#allocation2 + $0xcc]] }
 0x549   : > { %v4199_v25 = vmul.f32 %v8429_v27, %v4197_v33 }
 0x54a   : > { %2342 = vrot.lane.b32.xlu0 %v2339_v61, %s6302_s13  ;;  %v3051_v61 = vmul.f32 %v8403_v37, %v3049_v35  ;;  %v1477_v28 = vsel %vm1246_vm1, %v1475_v45, %v1476_v20  ;;  %v1637_v49 = vsel %vm1246_vm1, %v1635_v57, %v1636_v8 }
 0x54c   : > { %652 = vrot.lane.b32.xlu1 %v648_v15, %s6303_s14  ;;  %v3324_v15 = vrot.slane %v8619_v17, 1 }
 0x54e   : > { %2630 = vrot.lane.b32.xlu0 %v2627_v29, %s6303_s14  ;;  %v1186_v29 = vrot.slane %v1180_v30, 1  ;;  %v3327_v23 = vsel %vm797_vm0, %v3324_v15, %v3326_v24  ;;  %v4093_v24 = vstv %s8679_s12  ;;  %s5843_s12 = sld [smem:[#allocation2 + $0xc9]] }
 0x54f   : > { %v4095_v8 = vmul.f32 %v8429_v27, %v4093_v24 }
 0x550   : > { %756 = vrot.lane.b32.xlu1 %v752_v6, %s6302_s13  ;;  %v3484_v6 = vrot.slane %v8635_v2, 1  ;;  %v1188_v7 = vsel %vm797_vm0, %v1186_v29, %v1187_v26  ;;  %v3927_v26 = vmul.f32 %v8675_v55, %v8658_v36  ;;  %v8705_v29 = vstv %s5853_s20  ;;  %s8895_s20 = sld [smem:[#allocation2 + $0xc6]] }
 0x551   : > { %v4094_v2 = vmul.f32 %v8436_v41, %v4093_v24 }
 0x552   : > { %2790 = vrot.lane.b32.xlu0 %v2787_v51, %s6302_s13  ;;  %v8653_v51 = vmul.f32 %v8403_v37, %v8641_v13  ;;  %v3934_v59 = vrot.slane %v3927_v26, 2 }
 0x554   : > { %758 = vrot.lane.b32.xlu1 %v753_v3, %s6302_s13  ;;  %v3767_v3 = vmul.f32 %v8148_v56, %v8641_v13  ;;  %v3772_v56 = vrot.slane %v8653_v51, 2  ;;  %v4198_v51 = vmul.f32 %v8436_v41, %v4197_v33 }
 0x556   : > { %2952 = vrot.lane.b32.xlu0 %v2947_v14, %s6303_s14  ;;  %v3487_v14 = vsel %vm797_vm0, %v3484_v6, %v3486_v43  ;;  %v3774_v31 = vrot.slane %v3767_v3, 2  ;;  %v8716_v43 = vmul.f32 %v8429_v27, %v8705_v29  ;;  %v8723_v3 = vstv %s5854_s10  ;;  %s8914_s10 = sld [smem:[#allocation2 + $0xcf]] }
 0x558   : > { %1031 = vrot.lane.b32.xlu1 %v1028_v63, %s6303_s14  ;;  %v8672_v63 = vmul.f32 %v8403_v37, %v8658_v36  ;;  %v3775_v30 = vsel %vm1246_vm1, %v3772_v56, %v3774_v31  ;;  %v4472_v31 = vrot.slane %v8716_v43, 1 }
 0x55a   : > { %3056 = vrot.lane.b32.xlu0 %v3051_v61, %s6302_s13  ;;  %v3932_v61 = vrot.slane %v8672_v63, 2 }
 0x55c   : > { %1033 = vrot.lane.b32.xlu1 %v1030_v19, %s6303_s14  ;;  %v3935_v20 = vsel %vm1246_vm1, %v3932_v61, %v3934_v59  ;;  %v1798_v19 = vmul.f32 %v8195_v50, %v1797_v39  ;;  %v8727_v50 = vld [vmem:[%s6441_s11 + $0x18] sm:$0xff] }
 0x55d   : > { %v1902_v58 = vmul.f32 %v8727_v50, %v1901_v60  ;;  %v2329_v45 = vmul.f32 %v8727_v50, %v8538_v1  ;;  %v4912_v60 = vstv %s5856_s27  ;;  %s5852_s27 = sld [smem:[#allocation2 + $0xd2]] }
 0x55e   : > { %3330 = vrot.lane.b32.xlu0 %v3327_v23, %s6303_s14  ;;  %v8719_v23 = vld [vmem:[%s6441_s11 + $0x58] sm:$0x3] }
 0x55f   : > { %v4467_v39 = vmul.f32 %v8719_v23, %v8705_v29  ;;  %v2335_v57 = vrot.slane %v2329_v45, 1  ;;  %v5072_v45 = vstv %s5857_s6 }
 0x560   : > { %1191 = vrot.lane.b32.xlu1 %v1188_v7, %s6302_s13  ;;  %v2175_v7 = vrot.slane %v2169_v22, 1  ;;  %v4914_v22 = vmul.f32 %v8429_v27, %v4912_v60 }
 0x561   : > { %v4474_v26 = vrot.slane %v4467_v39, 1  ;;  %v2337_v11 = vsel %vm797_vm0, %v2335_v57, %v2336_v48  ;;  %v5075_v57 = vmul.f32 %v8719_v23, %v5072_v45 }
 0x562   : > { %3490 = vrot.lane.b32.xlu0 %v3487_v14, %s6302_s13  ;;  %v8740_v14 = vmul.f32 %v8429_v27, %v8723_v3  ;;  %v2177_v1 = vsel %vm797_vm0, %v2175_v7, %v2176_v44  ;;  %v4915_v7 = vmul.f32 %v8719_v23, %v4912_v60 }
 0x564   : > { %1480 = vrot.lane.b32.xlu1 %v1477_v28, %s6303_s14  ;;  %v4627_v28 = vmul.f32 %v8719_v23, %v8723_v3  ;;  %v4632_v59 = vrot.slane %v8740_v14, 1 }
 0x566   : > { %3778 = vrot.lane.b32.xlu0 %v3775_v30, %s6303_s14  ;;  %v2617_v30 = vmul.f32 %v8727_v50, %v8551_v34  ;;  %v2777_v34 = vmul.f32 %v8727_v50, %v8569_v18 }
 0x568   : > { %1640 = vrot.lane.b32.xlu1 %v1637_v49, %s6302_s13  ;;  %v4475_v49 = vsel %vm797_vm0, %v4472_v31, %v4474_v26  ;;  %v2623_v44 = vrot.slane %v2617_v30, 2  ;;  %v2783_v48 = vrot.slane %v2777_v34, 2  ;;  %v5073_v26 = vmul.f32 %v8436_v41, %v5072_v45 }
 0x569   : > { %v2946_v30 = vmul.f32 %v8275_v47, %v2945_v5 }
 0x56a   : > { %3938 = vrot.lane.b32.xlu0 %v3935_v20, %s6302_s13  ;;  %v4634_v20 = vrot.slane %v4627_v28, 1  ;;  %v2625_v46 = vsel %vm1246_vm1, %v2623_v44, %v2624_v53  ;;  %v5074_v28 = vmul.f32 %v8429_v27, %v5072_v45  ;;  %v2785_v40 = vsel %vm1246_vm1, %v2783_v48, %v2784_v10 }
 0x56b   : > { %v5082_v10 = vrot.slane %v5075_v57, 2  ;;  %v567_v45 = vstv %s5822_s29  ;;  %v871_v48 = vstv %s5825_s23 }
 0x56c   : > { %1802 = vrot.lane.b32.xlu1 %v1798_v19, %s6303_s14  ;;  %v4913_v19 = vmul.f32 %v8436_v41, %v4912_v60  ;;  %v5079_v60 = vrot.slane %v5073_v26, 2  ;;  %v568_v26 = vmul.f32 %v8597_v38, %v567_v45 }
 0x56e   : > { %4100 = vrot.lane.b32.xlu0 %v4095_v8, %s6303_s14  ;;  %v4635_v8 = vsel %vm797_vm0, %v4632_v59, %v4634_v20  ;;  %v4919_v39 = vrot.slane %v4913_v19, 2  ;;  %v8794_v20 = vld [vmem:[%s6441_s11 + $0x30] sm:$0xff] }
 0x56f   : > { %v3050_v19 = vmul.f32 %v8794_v20, %v3049_v35  ;;  %v3765_v35 = vmul.f32 %v8794_v20, %v8641_v13  ;;  %v3925_v34 = vmul.f32 %v8794_v20, %v8658_v36 }
 0x570   : > { %1906 = vrot.lane.b32.xlu1 %v1902_v58, %s6302_s13  ;;  %v4920_v58 = vrot.slane %v4914_v22, 2 }
 0x571   : > { %v3771_v44 = vrot.slane %v3765_v35, 2 }
 0x572   : > { %4204 = vrot.lane.b32.xlu0 %v4199_v25, %s6302_s13  ;;  %v4921_v18 = vsel %vm1246_vm1, %v4919_v39, %v4920_v58  ;;  %v4922_v25 = vrot.slane %v4915_v7, 2 }
 0x573   : > { %v3773_v17 = vsel %vm1246_vm1, %v3771_v44, %v3772_v56  ;;  %v4625_v56 = vmul.f32 %v8436_v41, %v8723_v3 }
 0x574   : > { %2180 = vrot.lane.b32.xlu1 %v2177_v1, %s6303_s14  ;;  %v4923_v53 = vsel %vm1246_vm1, %v4920_v58, %v4922_v25  ;;  %v5080_v1 = vrot.slane %v5074_v28, 2  ;;  %v569_v28 = vmul.f32 %v8478_v12, %v567_v45 }
 0x575   : > { %v4631_v24 = vrot.slane %v4625_v56, 1 }
 0x576   : > { %4478 = vrot.lane.b32.xlu0 %v4475_v49, %s6303_s14  ;;  %v3317_v49 = vmul.f32 %v8275_v47, %v8609_v54  ;;  %v5081_v16 = vsel %vm1246_vm1, %v5079_v60, %v5080_v1  ;;  %v5083_v47 = vsel %vm1246_vm1, %v5080_v1, %v5082_v10  ;;  %v874_v60 = vmul.f32 %v8490_v52, %v871_v48 }
 0x578   : > { %2340 = vrot.lane.b32.xlu1 %v2337_v11, %s6302_s13  ;;  %v3323_v22 = vrot.slane %v3317_v49, 1  ;;  %v3477_v11 = vmul.f32 %v8794_v20, %v8623_v9 }
 0x57a   : > { %4638 = vrot.lane.b32.xlu0 %v4635_v8, %s6302_s13  ;;  %v3325_v5 = vsel %vm797_vm0, %v3323_v22, %v3324_v15  ;;  %v3483_v54 = vrot.slane %v3477_v11, 1  ;;  %v3931_v15 = vrot.slane %v3925_v34, 2  ;;  %v881_v11 = vrot.slane %v874_v60, 1 }
 0x57c   : > { %2628 = vrot.lane.b32.xlu1 %v2625_v46, %s6303_s14  ;;  %v3485_v9 = vsel %vm797_vm0, %v3483_v54, %v3484_v6  ;;  %v3933_v13 = vsel %vm1246_vm1, %v3931_v15, %v3932_v61  ;;  %v4465_v6 = vmul.f32 %v8436_v41, %v8705_v29  ;;  %v4633_v29 = vsel %vm797_vm0, %v4631_v24, %v4632_v59 }
 0x57e   : > { %4924 = vrot.lane.b32.xlu0 %v4921_v18, %s6303_s14  ;;  %v4471_v36 = vrot.slane %v4465_v6, 1 }
 0x580   : > { %2788 = vrot.lane.b32.xlu1 %v2785_v40, %s6302_s13  ;;  %v4473_v61 = vsel %vm797_vm0, %v4471_v36, %v4472_v31  ;;  %v872_v40 = vmul.f32 %v8597_v38, %v871_v48 }
 0x582   : > { %4926 = vrot.lane.b32.xlu0 %v4923_v53, %s6303_s14  ;;  %v873_v53 = vmul.f32 %v8478_v12, %v871_v48  ;;  %v2020_v48 = vstv %s5834_s28  ;;  %s5863_s28 = sld [smem:[#allocation2 + $0xdd]] }
 0x583   : > { %v2022_v60 = vmul.f32 %v8380_v0, %v2020_v48 }
 0x584   : > { %2950 = vrot.lane.b32.xlu1 %v2946_v30, %s6303_s14  ;;  %v879_v22 = vrot.slane %v873_v53, 1 }
 0x586   : > { %5084 = vrot.lane.b32.xlu0 %v5081_v16, %s6302_s13 }
 0x588   : > { %3054 = vrot.lane.b32.xlu1 %v3050_v19, %s6302_s13  ;;  %v878_v19 = vrot.slane %v872_v40, 1 }
 0x58a   : > { %5086 = vrot.lane.b32.xlu0 %v5083_v47, %s6302_s13  ;;  %v880_v34 = vsel %vm797_vm0, %v878_v19, %v879_v22 }
 0x58c   : > { %3328 = vrot.lane.b32.xlu1 %v3325_v5, %s6303_s14  ;;  %v1320_v5 = vstv %s5828_s8  ;;  %s5855_s8 = sld [smem:[#allocation2 + $0xd5]] }
 0x58d   : > { %v1322_v15 = vmul.f32 %v8478_v12, %v1320_v5  ;;  %v1321_v6 = vmul.f32 %v8597_v38, %v1320_v5 }
 0x58f   : > { %v1328_v56 = vrot.slane %v1322_v15, 2 }
 0x590   : > { %3488 = vrot.lane.b32.xlu1 %v3485_v9, %s6302_s13 }
 0x594   : > { %3776 = vrot.lane.b32.xlu1 %v3773_v17, %s6303_s14  ;;  %v882_v17 = vsel %vm797_vm0, %v879_v22, %v881_v11  ;;  %v2468_v22 = vstv %s5837_s5  ;;  %v2028_v11 = vrot.slane %v2022_v60, 1  ;;  %s8947_s5 = sld [smem:[#allocation2 + $0xd9]] }
 0x598   : > { %3936 = vrot.lane.b32.xlu1 %v3933_v13, %s6302_s13  ;;  %v1323_v13 = vmul.f32 %v8490_v52, %v1320_v5 }
 0x59c   : > { %4098 = vrot.lane.b32.xlu1 %v4094_v2, %s6303_s14 }
 0x5a0   : > { %4202 = vrot.lane.b32.xlu1 %v4198_v51, %s6302_s13 }
 0x5a1   : > { %v8837_v63 = vpop.xlane.xlu0 %5331 }
 0x5a4   : > { %4476 = vrot.lane.b32.xlu1 %v4473_v61, %s6303_s14  ;;  %v1330_v61 = vrot.slane %v1323_v13, 2 }
 0x5a5   : > { %v655_v33 = vpop.permute.xlu0 %654 }
 0x5a6   : > { %v659_v10 = vadd.f32 %v655_v33, %v569_v28  ;;  %v1327_v33 = vrot.slane %v1321_v6, 2  ;;  %v1331_v45 = vsel %vm1246_vm1, %v1328_v56, %v1330_v61 }
 0x5a8   : > { %4636 = vrot.lane.b32.xlu1 %v4633_v29, %s6302_s13 }
 0x5a9   : > { %v1194_v8 = vpop.permute.xlu0 %1193 }
 0x5ad   : > { %v8847_v3 = vpop.permute.xlu0 %1482 }
 0x5b1   : > { %v8849_v39 = vpop.permute.xlu0 %1642 }
 0x5b5   : > { %v8851_v58 = vpop.permute.xlu0 %1804 }
 0x5b9   : > { %v8853_v43 = vpop.permute.xlu0 %1908 }
 0x5bd   : > { %v8855_v31 = vpop.permute.xlu0 %2182 }
 0x5c1   : > { %v8857_v14 = vpop.permute.xlu0 %2342 }
 0x5c4   : > { %v5301_v7 = vpop.xlane.xlu1 %5300 }
 0x5c5   : > { %v5302_v59 = vrot.slane %v5301_v7, 4  ;;  %v8864_v1 = vpop.permute.xlu0 %2630 }
 0x5c7   : > { %v5303_v46 = vadd.f32 %v5302_v59, %v5301_v7 }
 0x5c8   : > { %v653_v18 = vpop.permute.xlu1 %652 }
 0x5c9   : > { %v5304_v25 = vrot.slane %v5303_v46, 2  ;;  %v658_v16 = vadd.f32 %v653_v18, %v568_v26  ;;  %v8866_v35 = vpop.permute.xlu0 %2790  ;;  %v1329_v26 = vsel %vm1246_vm1, %v1327_v33, %v1328_v56 }
 0x5cb   : > { %v5305_v57 = vadd.f32 %v5304_v25, %v5303_v46  ;;  %v1717_v25 = vstv %s8872_s7  ;;  %s5865_s7 = sld [smem:[#allocation2 + $0xdf]] }
 0x5cc   : > { %v757_v30 = vpop.permute.xlu1 %756 }
 0x5cd   : > { %v5306_v49 = vrot.slane %v5305_v57, 1  ;;  %v762_v9 = vadd.f32 %v757_v30, %v658_v16  ;;  %v8875_v24 = vpop.permute.xlu0 %2952 }
 0x5cf   : > { %v5307_v47 = vadd.f32 %v5306_v49, %v5305_v57  ;;  %v885_v51 = vadd.f32 %v880_v34, %v762_v9  ;;  %v2023_v57 = vmul.f32 %v8565_v42, %v2020_v48  ;;  %v1719_v49 = vmul.f32 %v8380_v0, %v1717_v25 }
 0x5d0   : > { %v759_v54 = vpop.permute.xlu1 %758  ;;  %v1718_v9 = vmul.f32 %v8727_v50, %v1717_v25  ;;  %v2470_v34 = vmul.f32 %v8380_v0, %v2468_v22  ;;  %v2865_v25 = vstv %s8895_s20  ;;  %s5932_s20 = sld [smem:[#allocation5 + $0x3]] }
 0x5d1   : > { %5994 = vpush %v5307_v47  ;;  %v763_v44 = vadd.f32 %v759_v54, %v659_v10  ;;  %v8880_v28 = vpop.permute.xlu0 %3056  ;;  %v2030_v47 = vrot.slane %v2023_v57, 1 }
 0x5d3   : > { %v886_v36 = vadd.f32 %v882_v17, %v763_v44  ;;  %v2021_v17 = vmul.f32 %v8727_v50, %v2020_v48 }
 0x5d4   : > { %v1032_v2 = vpop.permute.xlu1 %1031 }
 0x5d5   : > { %v1037_v7 = vadd.f32 %v1032_v2, %v885_v51  ;;  %v8887_v5 = vpop.permute.xlu0 %3330  ;;  %v2027_v0 = vrot.slane %v2021_v17, 1 }
 0x5d8   : > { %v1034_v29 = vpop.permute.xlu1 %1033 }
 0x5d9   : > { %v1038_v59 = vadd.f32 %v1034_v29, %v886_v36  ;;  %v2476_v36 = vrot.slane %v2470_v34, 2  ;;  %v3491_v61 = vpop.permute.xlu0 %3490 }
 0x5db   : > { %v1198_v46 = vadd.f32 %v1194_v8, %v1038_v59 }
 0x5dc   : > { %v1192_v18 = vpop.permute.xlu1 %1191 }
 0x5dd   : > { %v1335_v40 = vadd.f32 %v1331_v45, %v1198_v46  ;;  %v1197_v53 = vadd.f32 %v1192_v18, %v1037_v7  ;;  %v2029_v45 = vsel %vm797_vm0, %v2027_v0, %v2028_v11  ;;  %v2469_v46 = vmul.f32 %v8727_v50, %v2468_v22 }
 0x5de   : > { %v3168_v18 = vstv %s5843_s12  ;;  %s5866_s12 = sld [smem:[#allocation2 + $0xe0]] }
 0x5df   : > { %v1487_v30 = vadd.f32 %v8847_v3, %v1335_v40  ;;  %v1334_v16 = vadd.f32 %v1329_v26, %v1197_v53  ;;  %v2471_v3 = vmul.f32 %v8565_v42, %v2468_v22  ;;  %v3779_v26 = vpop.permute.xlu0 %3778  ;;  %v2475_v57 = vrot.slane %v2469_v46, 2 }
 0x5e0   : > { %v1481_v10 = vpop.permute.xlu1 %1480  ;;  %v3169_v0 = vmul.f32 %v8794_v20, %v3168_v18 }
 0x5e1   : > { %v1647_v8 = vadd.f32 %v8849_v39, %v1487_v30  ;;  %v1486_v19 = vadd.f32 %v1481_v10, %v1334_v16  ;;  %v2031_v39 = vsel %vm797_vm0, %v2028_v11, %v2030_v47  ;;  %v2478_v56 = vrot.slane %v2471_v3, 2 }
 0x5e2   : > { %v3171_v30 = vmul.f32 %v8675_v55, %v3168_v18  ;;  %v2867_v10 = vmul.f32 %v8403_v37, %v2865_v25  ;;  %v2477_v22 = vsel %vm1246_vm1, %v2475_v57, %v2476_v36 }
 0x5e3   : > { %v1721_v54 = vadd.f32 %v1719_v49, %v1647_v8  ;;  %v2479_v59 = vsel %vm1246_vm1, %v2476_v36, %v2478_v56 }
 0x5e4   : > { %v1641_v44 = vpop.permute.xlu1 %1640  ;;  %v3178_v47 = vrot.slane %v3171_v30, 1  ;;  %v4316_v30 = vstv %s5852_s27 }
 0x5e5   : > { %v1809_v15 = vadd.f32 %v8851_v58, %v1721_v54  ;;  %v1646_v13 = vadd.f32 %v1641_v44, %v1486_v19  ;;  %v3939_v54 = vpop.permute.xlu0 %3938 }
 0x5e7   : > { %v1913_v2 = vadd.f32 %v8853_v43, %v1809_v15  ;;  %v1720_v6 = vadd.f32 %v1718_v9, %v1646_v13 }
 0x5e8   : > { %v1803_v51 = vpop.permute.xlu1 %1802 }
 0x5e9   : > { %v2035_v29 = vadd.f32 %v2031_v39, %v1913_v2  ;;  %v1808_v33 = vadd.f32 %v1803_v51, %v1720_v6  ;;  %v4101_v51 = vpop.permute.xlu0 %4100 }
 0x5eb   : > { %v2187_v7 = vadd.f32 %v8855_v31, %v2035_v29  ;;  %v3170_v31 = vmul.f32 %v8403_v37, %v3168_v18 }
 0x5ec   : > { %v1907_v58 = vpop.permute.xlu1 %1906 }
 0x5ed   : > { %v2347_v43 = vadd.f32 %v8857_v14, %v2187_v7  ;;  %v1912_v48 = vadd.f32 %v1907_v58, %v1808_v33  ;;  %v3616_v14 = vstv %s5846_s22  ;;  %v3176_v11 = vrot.slane %v3170_v31, 1  ;;  %v4205_v46 = vpop.permute.xlu0 %4204  ;;  %s8960_s22 = sld [smem:[#allocation7 + $0x3]] }
 0x5ee   : > { %v3618_v34 = vmul.f32 %v8403_v37, %v3616_v14  ;;  %v3619_v3 = vmul.f32 %v8675_v55, %v3616_v14  ;;  %v2866_v37 = vmul.f32 %v8794_v20, %v2865_v25 }
 0x5ef   : > { %v2483_v40 = vadd.f32 %v2479_v59, %v2347_v43  ;;  %v2034_v53 = vadd.f32 %v2029_v45, %v1912_v48  ;;  %v3179_v13 = vsel %vm797_vm0, %v3176_v11, %v3178_v47  ;;  %v4013_v45 = vstv %s8914_s10  ;;  %s8980_s10 = sld [smem:[#allocation2 + $0xe2]] }
 0x5f0   : > { %v2181_v60 = vpop.permute.xlu1 %2180  ;;  %v3624_v2 = vrot.slane %v3618_v34, 2  ;;  %v3626_v6 = vrot.slane %v3619_v3, 2  ;;  %v5333_v43 = vrot.slane %v8837_v63, 4  ;;  %v4015_v18 = vmul.f32 %v8429_v27, %v4013_v45 }
 0x5f1   : > { %v2635_v49 = vadd.f32 %v8864_v1, %v2483_v40  ;;  %v2186_v16 = vadd.f32 %v2181_v60, %v2034_v53  ;;  %v3617_v60 = vmul.f32 %v8794_v20, %v3616_v14  ;;  %v4319_v47 = vmul.f32 %v8719_v23, %v4316_v30 }
 0x5f2   : > { %v3627_v33 = vsel %vm1246_vm1, %v3624_v2, %v3626_v6 }
 0x5f3   : > { %v2795_v8 = vadd.f32 %v8866_v35, %v2635_v49  ;;  %v4479_v49 = vpop.permute.xlu0 %4478  ;;  %v4326_v34 = vrot.slane %v4319_v47, 1 }
 0x5f4   : > { %v2341_v19 = vpop.permute.xlu1 %2340 }
 0x5f5   : > { %v2346_v9 = vadd.f32 %v2341_v19, %v2186_v16  ;;  %v2869_v44 = vadd.f32 %v2867_v10, %v2795_v8 }
 0x5f7   : > { %v2957_v1 = vadd.f32 %v8875_v24, %v2869_v44  ;;  %v2482_v17 = vadd.f32 %v2477_v22, %v2346_v9  ;;  %v4318_v22 = vmul.f32 %v8429_v27, %v4316_v30  ;;  %v4639_v3 = vpop.permute.xlu0 %4638 }
 0x5f8   : > { %v2629_v15 = vpop.permute.xlu1 %2628 }
 0x5f9   : > { %v2634_v35 = vadd.f32 %v2629_v15, %v2482_v17  ;;  %v3061_v39 = vadd.f32 %v8880_v28, %v2957_v1  ;;  %v3175_v28 = vrot.slane %v3169_v0, 1 }
 0x5fb   : > { %v3183_v36 = vadd.f32 %v3179_v13, %v3061_v39 }
 0x5fc   : > { %v2789_v56 = vpop.permute.xlu1 %2788 }
 0x5fd   : > { %v2794_v24 = vadd.f32 %v2789_v56, %v2634_v35  ;;  %v3335_v29 = vadd.f32 %v8887_v5, %v3183_v36  ;;  %v3177_v5 = vsel %vm797_vm0, %v3175_v28, %v3176_v11  ;;  %v4925_v56 = vpop.permute.xlu0 %4924 }
 0x5ff   : > { %v2868_v7 = vadd.f32 %v2866_v37, %v2794_v24  ;;  %v3495_v58 = vadd.f32 %v3491_v61, %v3335_v29  ;;  %v5334_v61 = vadd.f32 %v5333_v43, %v8837_v63  ;;  %v4764_v37 = vstv %s5855_s8 }
 0x600   : > { %v2951_v59 = vpop.permute.xlu1 %2950  ;;  %v4766_v29 = vmul.f32 %v8429_v27, %v4764_v37 }
 0x601   : > { %v2956_v48 = vadd.f32 %v2951_v59, %v2868_v7  ;;  %v3631_v40 = vadd.f32 %v3627_v33, %v3495_v58  ;;  %v5335_v11 = vrot.slane %v5334_v61, 2  ;;  %v4767_v33 = vmul.f32 %v8719_v23, %v4764_v37 }
 0x602   : > { %s5995_s6 = spop %5994 }
 0x603   : > { %s5309_s29 = smul.f32 0.00390625, %s5995_s6  ;;  %v3783_v25 = vadd.f32 %v3779_v26, %v3631_v40  ;;  %v3623_v26 = vrot.slane %v3617_v60, 2  ;;  %v5336_v1 = vadd.f32 %v5335_v11, %v5334_v61  ;;  %v4772_v40 = vrot.slane %v4766_v29, 2  ;;  %s5871_s6 = sld [smem:[#allocation2 + $0xe5]] }
 0x604   : > { %v3055_v53 = vpop.permute.xlu1 %3054  ;;  %v4765_v61 = vmul.f32 %v8436_v41, %v4764_v37 }
 0x605   : > { %s5310_s23 = sadd.f32 1e-05, %s5309_s29  ;;  %v3060_v57 = vadd.f32 %v3055_v53, %v2956_v48  ;;  %v3943_v31 = vadd.f32 %v3939_v54, %v3783_v25  ;;  %v3625_v44 = vsel %vm1246_vm1, %v3623_v26, %v3624_v2  ;;  %v4324_v54 = vrot.slane %v4318_v22, 1 }
 0x606   : > { %v5337_v6 = vrot.slane %v5336_v1, 1  ;;  %v4317_v2 = vmul.f32 %v8436_v41, %v4316_v30  ;;  %v4774_v25 = vrot.slane %v4767_v33, 2 }
 0x607   : > { %v5311_v16 = vstv %s5310_s23  ;;  %v3182_v10 = vadd.f32 %v3177_v5, %v3060_v57  ;;  %v4017_v8 = vadd.f32 %v4015_v18, %v3943_v31  ;;  %v4327_v39 = vsel %vm797_vm0, %v4324_v54, %v4326_v34  ;;  %v4927_v18 = vpop.permute.xlu0 %4926 }
 0x608   : > { %6102 = vrsqrt.f32 %v5311_v16  ;;  %v3329_v19 = vpop.permute.xlu1 %3328  ;;  %v5338_v58 = vadd.f32 %v5337_v6, %v5336_v1  ;;  %v4323_v48 = vrot.slane %v4317_v2, 1  ;;  %v4775_v27 = vsel %vm1246_vm1, %v4772_v40, %v4774_v25 }
 0x609   : > { %v3334_v9 = vadd.f32 %v3329_v19, %v3182_v10  ;;  %v4105_v14 = vadd.f32 %v4101_v51, %v4017_v8  ;;  %v4014_v51 = vmul.f32 %v8436_v41, %v4013_v45  ;;  %v4771_v10 = vrot.slane %v4765_v61, 2 }
 0x60a   : > { %v4325_v60 = vsel %vm797_vm0, %v4323_v48, %v4324_v54 }
 0x60b   : > { %v4209_v13 = vadd.f32 %v4205_v46, %v4105_v14  ;;  %v5085_v31 = vpop.permute.xlu0 %5084  ;;  %v4773_v26 = vsel %vm1246_vm1, %v4771_v10, %v4772_v40 }
 0x60c   : > { %v3489_v63 = vpop.permute.xlu1 %3488 }
 0x60d   : > { %v3494_v17 = vadd.f32 %v3489_v63, %v3334_v9  ;;  %v4331_v0 = vadd.f32 %v4327_v39, %v4209_v13  ;;  %v660_v13 = vstv %s8947_s5  ;;  %s5883_s5 = sld [smem:[#allocation2 + $0xf1]] }
 0x60f   : > { %v3630_v15 = vadd.f32 %v3625_v44, %v3494_v17  ;;  %v4483_v28 = vadd.f32 %v4479_v49, %v4331_v0  ;;  %v5087_v47 = vpop.permute.xlu0 %5086 }
 0x610   : > { %v3777_v35 = vpop.permute.xlu1 %3776 }
 0x611   : > { %v3782_v36 = vadd.f32 %v3777_v35, %v3630_v15  ;;  %v4643_v53 = vadd.f32 %v4639_v3, %v4483_v28  ;;  %v8949_v3 = vstv %s5863_s28  ;;  %v8957_v15 = vstv %s5865_s7  ;;  %s8993_s28 = sld [smem:[#allocation2 + $0xe3]] }
 0x612   : > { %v8953_v1 = vmul.f32 %v8478_v12, %v8949_v3  ;;  %v1202_v17 = vmul.f32 %v8490_v52, %v8949_v3  ;;  %v662_v35 = vmul.f32 %v8478_v12, %v660_v13  ;;  %v8967_v39 = vmul.f32 %v8478_v12, %v8957_v15  ;;  %s5872_s7 = sld [smem:[#allocation2 + $0xe6]] }
 0x613   : > { %v4779_v16 = vadd.f32 %v4775_v27, %v4643_v53  ;;  %v1491_v6 = vmul.f32 %v8490_v52, %v8957_v15 }
 0x614   : > { %v3937_v24 = vpop.permute.xlu1 %3936  ;;  %v1209_v37 = vrot.slane %v1202_v17, 1  ;;  %v1496_v0 = vrot.slane %v8967_v39, 2 }
 0x615   : > { %v6103_v7 = vpop.eup %6102  ;;  %v3942_v59 = vadd.f32 %v3937_v24, %v3782_v36  ;;  %v4931_v19 = vadd.f32 %v4927_v18, %v4779_v16  ;;  %v1207_v36 = vrot.slane %v8953_v1, 1 }
 0x616   : > { %5996 = vpush %v6103_v7  ;;  %v5318_v7 = vstv %s8960_s22  ;;  %s9049_s22 = sld [smem:[#allocation2 + $0xda]] }
 0x617   : > { %5998 = vpush %v5338_v58  ;;  %v4016_v46 = vadd.f32 %v4014_v51, %v3942_v59  ;;  %v8939_v14 = vadd.f32 %v5087_v47, %v4931_v19  ;;  %v1498_v51 = vrot.slane %v1491_v6, 2  ;;  %v1210_v2 = vsel %vm797_vm0, %v1207_v36, %v1209_v37 }
 0x618   : > { %v4099_v43 = vpop.permute.xlu1 %4098  ;;  %v1914_v16 = vstv %s8993_s28  ;;  %s5858_s28 = sld [smem:[#allocation2 + $0xd8]] }
 0x619   : > { %v4104_v45 = vadd.f32 %v4099_v43, %v4016_v46  ;;  %v5378_v41 = vsel %vm5132_vm2, %v8939_v14, 0.0 }
 0x61c   : > { %v4203_v5 = vpop.permute.xlu1 %4202 }
 0x61d   : > { %v4208_v57 = vadd.f32 %v4203_v5, %v4104_v45  ;;  %v1810_v45 = vstv %s8980_s10  ;;  %s5893_s10 = sld [smem:[#allocation2 + $0xfb]] }
 0x61f   : > { %v4330_v30 = vadd.f32 %v4325_v60, %v4208_v57  ;;  %v9014_v60 = vstv %s5871_s6  ;;  %s9078_s6 = sld [smem:[#allocation2 + $0xeb]] }
 0x620   : > { %v4477_v49 = vpop.permute.xlu1 %4476  ;;  %v2191_v10 = vmul.f32 %v8565_v42, %v9014_v60 }
 0x621   : > { %v4482_v8 = vadd.f32 %v4477_v49, %v4330_v30 }
 0x624   : > { %v4637_v22 = vpop.permute.xlu1 %4636 }
 0x625   : > { %v4642_v11 = vadd.f32 %v4637_v22, %v4482_v8  ;;  %v9034_v8 = vstv %s5872_s7  ;;  %s5884_s7 = sld [smem:[#allocation2 + $0xf2]] }
 0x626   : > { %v2351_v22 = vmul.f32 %v8565_v42, %v9034_v8 }
 0x627   : > { %v4778_v9 = vadd.f32 %v4773_v26, %v4642_v11  ;;  %v2198_v11 = vrot.slane %v2191_v10, 1 }
 0x629   : > { %v4930_v63 = vadd.f32 %v4925_v56, %v4778_v9  ;;  %v8972_v56 = vstv %s5866_s12  ;;  %s5874_s12 = sld [smem:[#allocation2 + $0xe8]] }
 0x62a   : > { %v8978_v24 = vmul.f32 %v8478_v12, %v8972_v56  ;;  %v1651_v29 = vmul.f32 %v8490_v52, %v8972_v56  ;;  %v1499_v12 = vsel %vm1246_vm1, %v1496_v0, %v1498_v51 }
 0x62b   : > { %v8941_v44 = vadd.f32 %v5085_v31, %v4930_v63  ;;  %v9018_v31 = vld [vmem:[%s6441_s11 + $0x20] sm:$0xff] }
 0x62c   : > { %v1656_v58 = vrot.slane %v8978_v24, 2  ;;  %v1658_v46 = vrot.slane %v1651_v29, 2  ;;  %v1812_v30 = vmul.f32 %v9018_v31, %v1810_v45  ;;  %v9030_v49 = vmul.f32 %v9018_v31, %v9014_v60  ;;  %v9074_v29 = vld [vmem:[%s6441_s11 + $0x28] sm:$0x3] }
 0x62d   : > { %v5377_v54 = vsel %vm5132_vm2, %v8941_v44, 0.0  ;;  %v1916_v19 = vmul.f32 %v9018_v31, %v1914_v16  ;;  %v9042_v26 = vmul.f32 %v9018_v31, %v9034_v8  ;;  %v2189_v24 = vmul.f32 %v8727_v50, %v9014_v60 }
 0x62e   : > { %v5379_v34 = vadd.f32 %v5378_v41, %v5377_v54  ;;  %v2196_v47 = vrot.slane %v9030_v49, 1  ;;  %v2358_v41 = vrot.slane %v2351_v22, 1  ;;  %v1915_v60 = vmul.f32 %v8727_v50, %v1914_v16 }
 0x62f   : > { %v9047_v9 = vstv %s5874_s12  ;;  %v2356_v63 = vrot.slane %v9042_v26, 1  ;;  %s9181_s12 = sld [smem:[#allocation2 + $0xf4]] }
 0x630   : > { %5380 = vadd.xlane.f32.xlu0 %v5379_v34  ;;  %v2199_v54 = vsel %vm797_vm0, %v2196_v47, %v2198_v11  ;;  %v9058_v34 = vmul.f32 %v9018_v31, %v9047_v9  ;;  %v2639_v17 = vmul.f32 %v8565_v42, %v9047_v9 }
 0x631   : > { %v2359_v6 = vsel %vm797_vm0, %v2356_v63, %v2358_v41  ;;  %v9130_v41 = vld [vmem:[%s6441_s11] sm:$0xff] }
 0x632   : > { %v2644_v37 = vrot.slane %v9058_v34, 2  ;;  %v2646_v51 = vrot.slane %v2639_v17, 2 }
 0x646   : > { %667 = vrot.lane.b32.xlu0 %v662_v35, %s6303_s14 }
 0x647   : > { %s5997_s27 = spop %5996 }
 0x648   : > { %s5314_s29 = smul.f32 %s5997_s27, %s5932_s20  ;;  %s5999_s23 = spop %5998 }
 0x649   : > { %s5340_s8 = smul.f32 0.00390625, %s5999_s23  ;;  %s5875_s20 = sld [smem:[#allocation2 + $0xe9]] }
 0x64a   : > { %v5315_v33 = vstv %s5314_s29  ;;  %1213 = vrot.lane.b32.xlu0 %v1210_v2, %s6302_s13  ;;  %s5862_s27 = sld [smem:[#allocation2 + $0xdc]] }
 0x64b   : > { %v5316_v59 = vmul.f32 %v5315_v33, %v8505_v32  ;;  %v5317_v52 = vmul.f32 %v5315_v33, %v8508_v62  ;;  %v5341_v28 = vstv %s5340_s8  ;;  %v661_v33 = vmul.f32 %v8597_v38, %v660_v13  ;;  %s5880_s29 = sld [smem:[#allocation2 + $0xee]] }
 0x64c   : > { %v8998_v43 = vsub.f32 %v8442_v21, %v5341_v28  ;;  %v9001_v48 = vsub.f32 %v8440_v4, %v5341_v28  ;;  %v1659_v4 = vsel %vm1246_vm1, %v1656_v58, %v1658_v46  ;;  %s9085_s23 = sld [smem:[#allocation2 + $0xec]] }
 0x64d   : > { %v5319_v40 = vadd.f32 %v5318_v7, %v5316_v59  ;;  %v5320_v25 = vadd.f32 %v5318_v7, %v5317_v52  ;;  %v764_v7 = vstv %s9049_s22  ;;  %v2647_v59 = vsel %vm1246_vm1, %v2644_v37, %v2646_v51  ;;  %s5881_s8 = sld [smem:[#allocation2 + $0xef]] }
 0x64e   : > { %v5344_v18 = vmul.f32 %v8998_v43, %v8998_v43  ;;  %v5345_v32 = vmul.f32 %v9001_v48, %v9001_v48  ;;  %1502 = vrot.lane.b32.xlu0 %v1499_v12, %s6303_s14  ;;  %v765_v13 = vmul.f32 %v8597_v38, %v764_v7  ;;  %s9188_s22 = sld [smem:[#allocation2 + $0xf5]] }
 0x64f   : > { %v5321_v62 = vmul.f32 0.2, %v5319_v40  ;;  %v5322_v21 = vmul.f32 0.2, %v5320_v25  ;;  %v9062_v35 = vstv %s5875_s20  ;;  %s5889_s20 = sld [smem:[#allocation2 + $0xf7]] }
 0x650   : > { %v5346_v53 = vsel %vm5132_vm2, %v5344_v18, 0.0  ;;  %v5347_v5 = vsel %vm5132_vm2, %v5345_v32, 0.0  ;;  %v9071_v2 = vmul.f32 %v9018_v31, %v9062_v35  ;;  %v2799_v42 = vmul.f32 %v9074_v29, %v9062_v35 }
 0x651   : > { %v5323_v27 = vmax.f32 %v5319_v40, %v5321_v62  ;;  %v5324_v61 = vmax.f32 %v5320_v25, %v5322_v21  ;;  %v5348_v57 = vadd.f32 %v5347_v5, %v5346_v53  ;;  %v1039_v12 = vstv %s5862_s27  ;;  %v9095_v40 = vld [vmem:[%s6441_s11 + $0x8] sm:$0xff]  ;;  %v9108_v53 = vld [vmem:[%s6441_s11 + $0x10] sm:$0x3]  ;;  %s5890_s27 = sld [smem:[#allocation2 + $0xf8]] }
 0x652   : > { %1662 = vrot.lane.b32.xlu0 %v1659_v4, %s6302_s13  ;;  %v2804_v52 = vrot.slane %v9071_v2, 2  ;;  %v2806_v28 = vrot.slane %v2799_v42, 2  ;;  %v1040_v46 = vmul.f32 %v8597_v38, %v1039_v12  ;;  %v1041_v25 = vmul.f32 %v9095_v40, %v1039_v12 }
 0x653   : > { %5957 = vst.msk [vmem:[%s7499_s9 + $0x30] sm:$0xff] %vm5132_vm2, %v5323_v27  ;;  %5958 = vst.msk [vmem:[%s7499_s9 + $0x38] sm:$0xff] %vm5132_vm2, %v5324_v61  ;;  %5349 = vadd.xlane.f32.xlu1 %v5348_v57  ;;  %v2958_v32 = vstv %s9078_s6  ;;  %v766_v62 = vmul.f32 %v9095_v40, %v764_v7  ;;  %v9105_v21 = vstv %s5880_s29  ;;  %v1042_v5 = vmul.f32 %v9108_v53, %v1039_v12  ;;  %s5892_s29 = sld [smem:[#allocation2 + $0xfa]] }
 0x654   : > { %v2807_v18 = vsel %vm1246_vm1, %v2804_v52, %v2806_v28  ;;  %v1046_v38 = vrot.slane %v1040_v46, 1  ;;  %v1047_v4 = vrot.slane %v1041_v25, 1  ;;  %v9113_v27 = vld [vmem:[%s6441_s11 + $0x38] sm:$0xff]  ;;  %v3062_v57 = vstv %s9085_s23  ;;  %s5861_s6 = sld [smem:[#allocation2 + $0xdb]] }
 0x655   : > { %v2960_v61 = vmul.f32 %v9113_v27, %v2958_v32  ;;  %v3339_v10 = vmul.f32 %v8675_v55, %v9105_v21  ;;  %v1049_v11 = vrot.slane %v1042_v5, 1  ;;  %v3064_v17 = vmul.f32 %v9113_v27, %v3062_v57  ;;  %s5864_s23 = sld [smem:[#allocation2 + $0xde]] }
 0x656   : > { %1817 = vrot.lane.b32.xlu0 %v1812_v30, %s6303_s14  ;;  %v9121_v30 = vmul.f32 %v9113_v27, %v9105_v21  ;;  %v1048_v22 = vsel %vm797_vm0, %v1046_v38, %v1047_v4  ;;  %v9146_v7 = vstv %s5883_s5  ;;  %s9380_s5 = sld [smem:[#allocation2 + $0xe1]] }
 0x657   : > { %v9158_v25 = vmul.f32 %v9113_v27, %v9146_v7 }
 0x658   : > { %v3344_v42 = vrot.slane %v9121_v30, 1 }
 0x65a   : > { %1921 = vrot.lane.b32.xlu0 %v1916_v19, %s6302_s13  ;;  %v9125_v19 = vstv %s5881_s8  ;;  %s5870_s8 = sld [smem:[#allocation2 + $0xe4]] }
 0x65b   : > { %v3499_v51 = vmul.f32 %v8675_v55, %v9125_v19 }
 0x65e   : > { %2202 = vrot.lane.b32.xlu0 %v2199_v54, %s6303_s14  ;;  %v1200_v54 = vmul.f32 %v9130_v41, %v8949_v3  ;;  %v1050_v3 = vsel %vm797_vm0, %v1047_v4, %v1049_v11  ;;  %v1649_v4 = vmul.f32 %v9130_v41, %v8972_v56 }
 0x660   : > { %v1206_v12 = vrot.slane %v1200_v54, 1  ;;  %v1655_v56 = vrot.slane %v1649_v4, 2 }
 0x662   : > { %2362 = vrot.lane.b32.xlu0 %v2359_v6, %s6302_s13  ;;  %v9140_v6 = vmul.f32 %v9113_v27, %v9125_v19  ;;  %v1657_v39 = vsel %vm1246_vm1, %v1655_v56, %v1656_v58  ;;  %v9213_v58 = vld [vmem:[%s6441_s11 + $0x50] sm:$0xff] }
 0x664   : > { %665 = vrot.lane.b32.xlu1 %v661_v33, %s6303_s14  ;;  %v3346_v33 = vrot.slane %v3339_v10, 1  ;;  %v3504_v28 = vrot.slane %v9140_v6, 1 }
 0x666   : > { %2650 = vrot.lane.b32.xlu0 %v2647_v59, %s6303_s14  ;;  %v1489_v59 = vmul.f32 %v9130_v41, %v8957_v15  ;;  %v3347_v46 = vsel %vm797_vm0, %v3344_v42, %v3346_v33  ;;  %v1208_v15 = vsel %vm797_vm0, %v1206_v12, %v1207_v36  ;;  %v9207_v33 = vstv %s5889_s20  ;;  %s9403_s20 = sld [smem:[#allocation2 + $0xea]] }
 0x667   : > { %v4210_v12 = vstv %s9188_s22  ;;  %s5882_s22 = sld [smem:[#allocation2 + $0xf0]] }
 0x668   : > { %769 = vrot.lane.b32.xlu1 %v765_v13, %s6302_s13  ;;  %v3506_v13 = vrot.slane %v3499_v51, 1  ;;  %v1495_v38 = vrot.slane %v1489_v59, 2  ;;  %v1811_v51 = vmul.f32 %v8727_v50, %v1810_v45  ;;  %v9221_v59 = vmul.f32 %v9213_v58, %v9207_v33 }
 0x669   : > { %v4487_v45 = vmul.f32 %v8719_v23, %v9207_v33 }
 0x66a   : > { %2810 = vrot.lane.b32.xlu0 %v2807_v18, %s6302_s13  ;;  %v3787_v18 = vmul.f32 %v8675_v55, %v9146_v7  ;;  %v3507_v5 = vsel %vm797_vm0, %v3504_v28, %v3506_v13  ;;  %v1497_v36 = vsel %vm1246_vm1, %v1495_v38, %v1496_v0  ;;  %v9225_v13 = vstv %s5890_s27  ;;  %s9425_s27 = sld [smem:[#allocation2 + $0xf3]] }
 0x66b   : > { %v9239_v23 = vmul.f32 %v9213_v58, %v9225_v13  ;;  %v4492_v38 = vrot.slane %v9221_v59, 1  ;;  %v4494_v4 = vrot.slane %v4487_v45, 1 }
 0x66c   : > { %771 = vrot.lane.b32.xlu1 %v766_v62, %s6302_s13  ;;  %v9163_v62 = vstv %s5884_s7  ;;  %v3794_v10 = vrot.slane %v3787_v18, 2  ;;  %v2349_v18 = vmul.f32 %v8727_v50, %v9034_v8  ;;  %v4932_v50 = vstv %s5892_s29  ;;  %s5873_s7 = sld [smem:[#allocation2 + $0xe7]] }
 0x66d   : > { %v3947_v1 = vmul.f32 %v8675_v55, %v9163_v62  ;;  %v4652_v56 = vrot.slane %v9239_v23, 1  ;;  %s5888_s29 = sld [smem:[#allocation2 + $0xf6]] }
 0x66e   : > { %2965 = vrot.lane.b32.xlu0 %v2960_v61, %s6303_s14  ;;  %v3792_v61 = vrot.slane %v9158_v25, 2 }
 0x66f   : > { %v3954_v54 = vrot.slane %v3947_v1, 2  ;;  %v9252_v1 = vld [vmem:[%s6441_s11 + $0x18] sm:$0xff] }
 0x670   : > { %1051 = vrot.lane.b32.xlu1 %v1048_v22, %s6303_s14  ;;  %v9177_v22 = vmul.f32 %v9113_v27, %v9163_v62  ;;  %v3795_v55 = vsel %vm1246_vm1, %v3792_v61, %v3794_v10  ;;  %v2355_v10 = vrot.slane %v2349_v18, 1 }
 0x672   : > { %3069 = vrot.lane.b32.xlu0 %v3064_v17, %s6302_s13  ;;  %v3952_v11 = vrot.slane %v9177_v22, 2  ;;  %v4106_v17 = vstv %s9181_s12  ;;  %s5879_s12 = sld [smem:[#allocation2 + $0xed]] }
 0x674   : > { %1053 = vrot.lane.b32.xlu1 %v1050_v3, %s6303_s14  ;;  %v3955_v0 = vsel %vm1246_vm1, %v3952_v11, %v3954_v54  ;;  %v4108_v3 = vmul.f32 %v9213_v58, %v4106_v17 }
 0x676   : > { %3350 = vrot.lane.b32.xlu0 %v3347_v46, %s6303_s14  ;;  %v2195_v46 = vrot.slane %v2189_v24, 1 }
 0x678   : > { %1211 = vrot.lane.b32.xlu1 %v1208_v15, %s6302_s13  ;;  %v4212_v15 = vmul.f32 %v9213_v58, %v4210_v12  ;;  %v2197_v8 = vsel %vm797_vm0, %v2195_v46, %v2196_v47  ;;  %v4934_v47 = vmul.f32 %v9213_v58, %v4932_v50  ;;  %v5092_v46 = vstv %s5893_s10 }
 0x67a   : > { %3510 = vrot.lane.b32.xlu0 %v3507_v5, %s6302_s13  ;;  %v9243_v5 = vld [vmem:[%s6441_s11 + $0x58] sm:$0x3]  ;;  %v4940_v45 = vrot.slane %v4934_v47, 2 }
 0x67b   : > { %v4647_v16 = vmul.f32 %v9243_v5, %v9225_v13 }
 0x67c   : > { %1500 = vrot.lane.b32.xlu1 %v1497_v36, %s6303_s14  ;;  %v2637_v36 = vmul.f32 %v9252_v1, %v9047_v9  ;;  %v2357_v9 = vsel %vm797_vm0, %v2355_v10, %v2356_v63  ;;  %v2959_v10 = vmul.f32 %v8794_v20, %v2958_v32 }
 0x67d   : > { %v4654_v54 = vrot.slane %v4647_v16, 1 }
 0x67e   : > { %3798 = vrot.lane.b32.xlu0 %v3795_v55, %s6303_s14  ;;  %v4495_v55 = vsel %vm797_vm0, %v4492_v38, %v4494_v4  ;;  %v5094_v4 = vmul.f32 %v9213_v58, %v5092_v46 }
 0x67f   : > { %v4655_v24 = vsel %vm797_vm0, %v4652_v56, %v4654_v54 }
 0x680   : > { %1660 = vrot.lane.b32.xlu1 %v1657_v39, %s6302_s13  ;;  %v9262_v39 = vld [vmem:[%s6441_s11 + $0x48] sm:$0xff] }
 0x681   : > { %v4933_v49 = vmul.f32 %v9262_v39, %v4932_v50  ;;  %v4107_v6 = vmul.f32 %v9262_v39, %v4106_v17  ;;  %v4211_v25 = vmul.f32 %v9262_v39, %v4210_v12 }
 0x682   : > { %3958 = vrot.lane.b32.xlu0 %v3955_v0, %s6302_s13  ;;  %v2643_v0 = vrot.slane %v2637_v36, 2  ;;  %v3337_v36 = vmul.f32 %v8794_v20, %v9105_v21 }
 0x684   : > { %1815 = vrot.lane.b32.xlu1 %v1811_v51, %s6303_s14  ;;  %v2797_v51 = vmul.f32 %v9252_v1, %v9062_v35  ;;  %v2645_v26 = vsel %vm1246_vm1, %v2643_v0, %v2644_v37  ;;  %v3343_v54 = vrot.slane %v3337_v36, 1 }
 0x686   : > { %4113 = vrot.lane.b32.xlu0 %v4108_v3, %s6303_s14  ;;  %v4939_v3 = vrot.slane %v4933_v49, 2  ;;  %v2803_v63 = vrot.slane %v2797_v51, 2  ;;  %v3497_v49 = vmul.f32 %v8794_v20, %v9125_v19  ;;  %v3345_v21 = vsel %vm797_vm0, %v3343_v54, %v3344_v42 }
 0x688   : > { %1919 = vrot.lane.b32.xlu1 %v1915_v60, %s6302_s13  ;;  %v4935_v60 = vmul.f32 %v9243_v5, %v4932_v50  ;;  %v4941_v35 = vsel %vm1246_vm1, %v4939_v3, %v4940_v45  ;;  %v2805_v34 = vsel %vm1246_vm1, %v2803_v63, %v2804_v52  ;;  %v5100_v50 = vrot.slane %v5094_v4, 2 }
 0x689   : > { %v3503_v47 = vrot.slane %v3497_v49, 1 }
 0x68a   : > { %4217 = vrot.lane.b32.xlu0 %v4212_v15, %s6302_s13  ;;  %v4942_v18 = vrot.slane %v4935_v60, 2  ;;  %v5093_v15 = vmul.f32 %v9262_v39, %v5092_v46  ;;  %v572_v60 = vstv %s5858_s28 }
 0x68c   : > { %2200 = vrot.lane.b32.xlu1 %v2197_v8, %s6303_s14  ;;  %v4943_v37 = vsel %vm1246_vm1, %v4940_v45, %v4942_v18  ;;  %v5099_v16 = vrot.slane %v5093_v15, 2  ;;  %v5095_v8 = vmul.f32 %v9243_v5, %v5092_v46  ;;  %v573_v18 = vmul.f32 %v9130_v41, %v572_v60 }
 0x68d   : > { %v574_v15 = vmul.f32 %v9095_v40, %v572_v60 }
 0x68e   : > { %4498 = vrot.lane.b32.xlu0 %v4495_v55, %s6303_s14  ;;  %v5101_v2 = vsel %vm1246_vm1, %v5099_v16, %v5100_v50  ;;  %v5102_v52 = vrot.slane %v5095_v8, 2  ;;  %v3063_v55 = vmul.f32 %v8794_v20, %v3062_v57  ;;  %v3505_v20 = vsel %vm797_vm0, %v3503_v47, %v3504_v28 }
 0x68f   : > { %v4485_v28 = vmul.f32 %v9262_v39, %v9207_v33 }
 0x690   : > { %2360 = vrot.lane.b32.xlu1 %v2357_v9, %s6302_s13  ;;  %v5103_v32 = vsel %vm1246_vm1, %v5100_v50, %v5102_v52  ;;  %v9313_v9 = vld [vmem:[%s6441_s11 + $0x30] sm:$0xff] }
 0x691   : > { %v3785_v57 = vmul.f32 %v9313_v9, %v9146_v7  ;;  %v3945_v30 = vmul.f32 %v9313_v9, %v9163_v62  ;;  %v4491_v62 = vrot.slane %v4485_v28, 1 }
 0x692   : > { %4658 = vrot.lane.b32.xlu0 %v4655_v24, %s6302_s13 }
 0x693   : > { %v3791_v19 = vrot.slane %v3785_v57, 2  ;;  %v3951_v0 = vrot.slane %v3945_v30, 2 }
 0x694   : > { %2648 = vrot.lane.b32.xlu1 %v2645_v26, %s6303_s14  ;;  %v887_v26 = vstv %s5861_s6 }
 0x695   : > { %v3793_v42 = vsel %vm1246_vm1, %v3791_v19, %v3792_v61  ;;  %v3953_v7 = vsel %vm1246_vm1, %v3951_v0, %v3952_v11  ;;  %v4645_v61 = vmul.f32 %v9262_v39, %v9225_v13  ;;  %v4493_v11 = vsel %vm797_vm0, %v4491_v62, %v4492_v38 }
 0x696   : > { %4944 = vrot.lane.b32.xlu0 %v4941_v35, %s6303_s14  ;;  %v888_v4 = vmul.f32 %v9130_v41, %v887_v26 }
 0x697   : > { %v4651_v17 = vrot.slane %v4645_v61, 1 }
 0x698   : > { %2808 = vrot.lane.b32.xlu1 %v2805_v34, %s6302_s13  ;;  %v889_v34 = vmul.f32 %v9095_v40, %v887_v26  ;;  %v894_v52 = vrot.slane %v888_v4, 1 }
 0x699   : > { %v4653_v33 = vsel %vm797_vm0, %v4651_v17, %v4652_v56 }
 0x69a   : > { %4946 = vrot.lane.b32.xlu0 %v4943_v37, %s6303_s14  ;;  %v890_v37 = vmul.f32 %v9108_v53, %v887_v26 }
 0x69c   : > { %2963 = vrot.lane.b32.xlu1 %v2959_v10, %s6303_s14  ;;  %v897_v54 = vrot.slane %v890_v37, 1 }
 0x69e   : > { %5104 = vrot.lane.b32.xlu0 %v5101_v2, %s6302_s13 }
 0x6a0   : > { %3067 = vrot.lane.b32.xlu1 %v3063_v55, %s6302_s13  ;;  %v895_v55 = vrot.slane %v889_v34, 1 }
 0x6a2   : > { %5106 = vrot.lane.b32.xlu0 %v5103_v32, %s6302_s13  ;;  %v1336_v32 = vstv %s5864_s23  ;;  %v896_v19 = vsel %vm797_vm0, %v894_v52, %v895_v55  ;;  %v898_v30 = vsel %vm797_vm0, %v895_v55, %v897_v54  ;;  %v2484_v52 = vstv %s5873_s7  ;;  %s5891_s23 = sld [smem:[#allocation2 + $0xf9]] }
 0x6a3   : > { %v1339_v0 = vmul.f32 %v9108_v53, %v1336_v32  ;;  %s9458_s7 = sld [smem:[#allocation2 + $0xfd]] }
 0x6a4   : > { %3348 = vrot.lane.b32.xlu1 %v3345_v21, %s6303_s14 }
 0x6a5   : > { %v1346_v61 = vrot.slane %v1339_v0, 2 }
 0x6a8   : > { %3508 = vrot.lane.b32.xlu1 %v3505_v20, %s6302_s13 }
 0x6ac   : > { %3796 = vrot.lane.b32.xlu1 %v3793_v42, %s6303_s14  ;;  %v1338_v42 = vmul.f32 %v9095_v40, %v1336_v32 }
 0x6ae   : > { %v1344_v62 = vrot.slane %v1338_v42, 2 }
 0x6b0   : > { %3956 = vrot.lane.b32.xlu1 %v3953_v7, %s6302_s13 }
 0x6b4   : > { %4111 = vrot.lane.b32.xlu1 %v4107_v6, %s6303_s14  ;;  %v1337_v6 = vmul.f32 %v9130_v41, %v1336_v32 }
 0x6b8   : > { %4215 = vrot.lane.b32.xlu1 %v4211_v25, %s6302_s13 }
 0x6b9   : > { %v9345_v22 = vpop.xlane.xlu0 %5380 }
 0x6bc   : > { %4496 = vrot.lane.b32.xlu1 %v4493_v11, %s6303_s14 }
 0x6bd   : > { %v668_v12 = vpop.permute.xlu0 %667 }
 0x6be   : > { %v672_v2 = vadd.f32 %v668_v12, %v574_v15 }
 0x6c0   : > { %4656 = vrot.lane.b32.xlu1 %v4653_v33, %s6302_s13  ;;  %v1343_v33 = vrot.slane %v1337_v6, 2 }
 0x6c1   : > { %v1214_v51 = vpop.permute.xlu0 %1213 }
 0x6c5   : > { %v9355_v13 = vpop.permute.xlu0 %1502 }
 0x6c9   : > { %v9357_v24 = vpop.permute.xlu0 %1662 }
 0x6cd   : > { %v9359_v3 = vpop.permute.xlu0 %1817 }
 0x6d1   : > { %v9361_v59 = vpop.permute.xlu0 %1921 }
 0x6d5   : > { %v9363_v38 = vpop.permute.xlu0 %2202 }
 0x6d9   : > { %v9365_v23 = vpop.permute.xlu0 %2362 }
 0x6dc   : > { %v5350_v45 = vpop.xlane.xlu1 %5349 }
 0x6dd   : > { %v5351_v56 = vrot.slane %v5350_v45, 4  ;;  %v9372_v16 = vpop.permute.xlu0 %2650 }
 0x6df   : > { %v5352_v46 = vadd.f32 %v5351_v56, %v5350_v45  ;;  %v1347_v56 = vsel %vm1246_vm1, %v1344_v62, %v1346_v61 }
 0x6e0   : > { %v666_v63 = vpop.permute.xlu1 %665 }
 0x6e1   : > { %v5353_v35 = vrot.slane %v5352_v46, 2  ;;  %v671_v36 = vadd.f32 %v666_v63, %v573_v18  ;;  %v9374_v47 = vpop.permute.xlu0 %2810  ;;  %v1722_v63 = vstv %s9380_s5  ;;  %s5901_s5 = sld [smem:[#allocation2 + $0x103]] }
 0x6e3   : > { %v5354_v50 = vadd.f32 %v5353_v35, %v5352_v46  ;;  %v2036_v46 = vstv %s5870_s8  ;;  %v1345_v35 = vsel %vm1246_vm1, %v1343_v33, %v1344_v62  ;;  %s5899_s8 = sld [smem:[#allocation2 + $0x101]] }
 0x6e4   : > { %v770_v8 = vpop.permute.xlu1 %769  ;;  %v2038_v34 = vmul.f32 %v9018_v31, %v2036_v46  ;;  %v2039_v37 = vmul.f32 %v9074_v29, %v2036_v46 }
 0x6e5   : > { %v5355_v10 = vrot.slane %v5354_v50, 1  ;;  %v775_v57 = vadd.f32 %v770_v8, %v671_v36  ;;  %v9383_v11 = vpop.permute.xlu0 %2965  ;;  %v1724_v8 = vmul.f32 %v9018_v31, %v1722_v63 }
 0x6e6   : > { %v2044_v55 = vrot.slane %v2038_v34, 1  ;;  %v2046_v54 = vrot.slane %v2039_v37, 1 }
 0x6e7   : > { %v5356_v49 = vadd.f32 %v5355_v10, %v5354_v50  ;;  %v901_v28 = vadd.f32 %v896_v19, %v775_v57  ;;  %v2037_v19 = vmul.f32 %v9252_v1, %v2036_v46 }
 0x6e8   : > { %v772_v21 = vpop.permute.xlu1 %771 }
 0x6e9   : > { %6000 = vpush %v5356_v49  ;;  %v776_v20 = vadd.f32 %v772_v21, %v672_v2  ;;  %v9388_v18 = vpop.permute.xlu0 %3069  ;;  %v1723_v21 = vmul.f32 %v9252_v1, %v1722_v63  ;;  %v2043_v62 = vrot.slane %v2037_v19, 1  ;;  %v2870_v63 = vstv %s9403_s20  ;;  %s5933_s20 = sld [smem:[#allocation5 + $0x4]] }
 0x6eb   : > { %v902_v25 = vadd.f32 %v898_v30, %v776_v20  ;;  %v2486_v20 = vmul.f32 %v9018_v31, %v2484_v52 }
 0x6ec   : > { %v1052_v7 = vpop.permute.xlu1 %1051 }
 0x6ed   : > { %v1057_v12 = vadd.f32 %v1052_v7, %v901_v28  ;;  %v9395_v49 = vpop.permute.xlu0 %3350  ;;  %v2492_v28 = vrot.slane %v2486_v20, 2 }
 0x6f0   : > { %v1054_v17 = vpop.permute.xlu1 %1053 }
 0x6f1   : > { %v1058_v45 = vadd.f32 %v1054_v17, %v902_v25  ;;  %v3511_v61 = vpop.permute.xlu0 %3510 }
 0x6f3   : > { %v1218_v60 = vadd.f32 %v1214_v51, %v1058_v45 }
 0x6f4   : > { %v1212_v26 = vpop.permute.xlu1 %1211 }
 0x6f5   : > { %v1351_v15 = vadd.f32 %v1347_v56, %v1218_v60  ;;  %v1217_v4 = vadd.f32 %v1212_v26, %v1057_v12  ;;  %v2045_v56 = vsel %vm797_vm0, %v2043_v62, %v2044_v55  ;;  %v3184_v26 = vstv %s5879_s12  ;;  %s5902_s12 = sld [smem:[#allocation2 + $0x104]] }
 0x6f6   : > { %v2871_v62 = vmul.f32 %v9313_v9, %v2870_v63 }
 0x6f7   : > { %v1507_v50 = vadd.f32 %v9355_v13, %v1351_v15  ;;  %v1350_v10 = vadd.f32 %v1345_v35, %v1217_v4  ;;  %v2487_v13 = vmul.f32 %v9074_v29, %v2484_v52  ;;  %v3799_v35 = vpop.permute.xlu0 %3798 }
 0x6f8   : > { %v1501_v36 = vpop.permute.xlu1 %1500 }
 0x6f9   : > { %v1667_v51 = vadd.f32 %v9357_v24, %v1507_v50  ;;  %v1506_v2 = vadd.f32 %v1501_v36, %v1350_v10  ;;  %v2047_v24 = vsel %vm797_vm0, %v2044_v55, %v2046_v54  ;;  %v2494_v25 = vrot.slane %v2487_v13, 2  ;;  %v9414_v50 = vld [vmem:[%s6441_s11 + $0x40] sm:$0x3] }
 0x6fb   : > { %v1726_v32 = vadd.f32 %v1724_v8, %v1667_v51  ;;  %v2495_v45 = vsel %vm1246_vm1, %v2492_v28, %v2494_v25  ;;  %v3187_v8 = vmul.f32 %v9414_v50, %v3184_v26  ;;  %v2872_v51 = vmul.f32 %v9113_v27, %v2870_v63 }
 0x6fc   : > { %v1661_v57 = vpop.permute.xlu1 %1660 }
 0x6fd   : > { %v1822_v30 = vadd.f32 %v9359_v3, %v1726_v32  ;;  %v1666_v42 = vadd.f32 %v1661_v57, %v1506_v2  ;;  %v3632_v2 = vstv %s5882_s22  ;;  %v3194_v32 = vrot.slane %v3187_v8, 1  ;;  %s9471_s22 = sld [smem:[#allocation7 + $0x4]] }
 0x6fe   : > { %v3634_v13 = vmul.f32 %v9113_v27, %v3632_v2  ;;  %v3635_v19 = vmul.f32 %v9414_v50, %v3632_v2 }
 0x6ff   : > { %v1926_v0 = vadd.f32 %v9361_v59, %v1822_v30  ;;  %v1725_v7 = vadd.f32 %v1723_v21, %v1666_v42  ;;  %v2485_v59 = vmul.f32 %v9252_v1, %v2484_v52  ;;  %v3959_v21 = vpop.permute.xlu0 %3958 }
 0x700   : > { %v1816_v6 = vpop.permute.xlu1 %1815 }
 0x701   : > { %v2051_v17 = vadd.f32 %v2047_v24, %v1926_v0  ;;  %v1821_v33 = vadd.f32 %v1816_v6, %v1725_v7  ;;  %v2491_v37 = vrot.slane %v2485_v59, 2  ;;  %v3640_v7 = vrot.slane %v3634_v13, 2 }
 0x702   : > { %v3642_v6 = vrot.slane %v3635_v19, 2 }
 0x703   : > { %v2207_v12 = vadd.f32 %v9363_v38, %v2051_v17  ;;  %v3186_v38 = vmul.f32 %v9113_v27, %v3184_v26  ;;  %v2493_v55 = vsel %vm1246_vm1, %v2491_v37, %v2492_v28  ;;  %v4114_v28 = vpop.permute.xlu0 %4113 }
 0x704   : > { %v1920_v3 = vpop.permute.xlu1 %1919 }
 0x705   : > { %v2367_v60 = vadd.f32 %v9365_v23, %v2207_v12  ;;  %v1925_v46 = vadd.f32 %v1920_v3, %v1821_v33  ;;  %v3192_v54 = vrot.slane %v3186_v38, 1  ;;  %v3185_v33 = vmul.f32 %v9313_v9, %v3184_v26 }
 0x706   : > { %v3643_v3 = vsel %vm1246_vm1, %v3640_v7, %v3642_v6  ;;  %v3633_v38 = vmul.f32 %v9313_v9, %v3632_v2 }
 0x707   : > { %v2499_v15 = vadd.f32 %v2495_v45, %v2367_v60  ;;  %v2050_v4 = vadd.f32 %v2045_v56, %v1925_v46  ;;  %v3195_v24 = vsel %vm797_vm0, %v3192_v54, %v3194_v32  ;;  %v4018_v60 = vstv %s9425_s27  ;;  %v4218_v46 = vpop.permute.xlu0 %4217  ;;  %s9491_s27 = sld [smem:[#allocation2 + $0x106]] }
 0x708   : > { %v2201_v34 = vpop.permute.xlu1 %2200  ;;  %v4020_v26 = vmul.f32 %v9213_v58, %v4018_v60 }
 0x709   : > { %v2655_v10 = vadd.f32 %v9372_v16, %v2499_v15  ;;  %v2206_v36 = vadd.f32 %v2201_v34, %v2050_v4  ;;  %v5382_v15 = vrot.slane %v9345_v22, 4 }
 0x70b   : > { %v2815_v23 = vadd.f32 %v9374_v47, %v2655_v10 }
 0x70c   : > { %v2361_v52 = vpop.permute.xlu1 %2360 }
 0x70d   : > { %v2366_v57 = vadd.f32 %v2361_v52, %v2206_v36  ;;  %v2874_v20 = vadd.f32 %v2872_v51, %v2815_v23  ;;  %v4332_v36 = vstv %s5888_s29  ;;  %v4499_v51 = vpop.permute.xlu0 %4498 }
 0x70f   : > { %v2970_v16 = vadd.f32 %v9383_v11, %v2874_v20  ;;  %v2498_v30 = vadd.f32 %v2493_v55, %v2366_v57  ;;  %v4334_v57 = vmul.f32 %v9213_v58, %v4332_v36  ;;  %v4335_v20 = vmul.f32 %v9243_v5, %v4332_v36 }
 0x710   : > { %v2649_v42 = vpop.permute.xlu1 %2648 }
 0x711   : > { %v2654_v47 = vadd.f32 %v2649_v42, %v2498_v30  ;;  %v3074_v0 = vadd.f32 %v9388_v18, %v2970_v16  ;;  %v3191_v18 = vrot.slane %v3185_v33, 1  ;;  %v4342_v16 = vrot.slane %v4335_v20, 1  ;;  %v4659_v30 = vpop.permute.xlu0 %4658 }
 0x712   : > { %v4780_v33 = vstv %s5891_s23 }
 0x713   : > { %v3199_v25 = vadd.f32 %v3195_v24, %v3074_v0 }
 0x714   : > { %v2809_v17 = vpop.permute.xlu1 %2808 }
 0x715   : > { %v2814_v11 = vadd.f32 %v2809_v17, %v2654_v47  ;;  %v3355_v12 = vadd.f32 %v9395_v49, %v3199_v25  ;;  %v3193_v49 = vsel %vm797_vm0, %v3191_v18, %v3192_v54 }
 0x717   : > { %v2873_v45 = vadd.f32 %v2871_v62, %v2814_v11  ;;  %v3515_v56 = vadd.f32 %v3511_v61, %v3355_v12  ;;  %v5383_v61 = vadd.f32 %v5382_v15, %v9345_v22  ;;  %v4945_v11 = vpop.permute.xlu0 %4944 }
 0x718   : > { %v2964_v59 = vpop.permute.xlu1 %2963 }
 0x719   : > { %v2969_v4 = vadd.f32 %v2964_v59, %v2873_v45  ;;  %v3647_v34 = vadd.f32 %v3643_v3, %v3515_v56  ;;  %v5384_v54 = vrot.slane %v5383_v61, 2  ;;  %v4782_v45 = vmul.f32 %v9213_v58, %v4780_v33 }
 0x71a   : > { %s6001_s10 = spop %6000  ;;  %v4783_v56 = vmul.f32 %v9243_v5, %v4780_v33 }
 0x71b   : > { %s5358_s28 = smul.f32 0.00390625, %s6001_s10  ;;  %v3803_v63 = vadd.f32 %v3799_v35, %v3647_v34  ;;  %v3639_v35 = vrot.slane %v3633_v38, 2  ;;  %v5385_v42 = vadd.f32 %v5384_v54, %v5383_v61  ;;  %s5907_s10 = sld [smem:[#allocation2 + $0x109]] }
 0x71c   : > { %v3068_v37 = vpop.permute.xlu1 %3067 }
 0x71d   : > { %s5359_s6 = sadd.f32 1e-05, %s5358_s28  ;;  %v3073_v8 = vadd.f32 %v3068_v37, %v2969_v4  ;;  %v3963_v10 = vadd.f32 %v3959_v21, %v3803_v63  ;;  %v3641_v19 = vsel %vm1246_vm1, %v3639_v35, %v3640_v7  ;;  %v4340_v21 = vrot.slane %v4334_v57, 1 }
 0x71e   : > { %v5386_v62 = vrot.slane %v5385_v42, 1  ;;  %v4333_v7 = vmul.f32 %v9262_v39, %v4332_v36  ;;  %v4790_v37 = vrot.slane %v4783_v56, 2  ;;  %v4781_v36 = vmul.f32 %v9262_v39, %v4780_v33 }
 0x71f   : > { %v5360_v23 = vstv %s5359_s6  ;;  %v3198_v52 = vadd.f32 %v3193_v49, %v3073_v8  ;;  %v4022_v55 = vadd.f32 %v4020_v26, %v3963_v10  ;;  %v4343_v25 = vsel %vm797_vm0, %v4340_v21, %v4342_v16  ;;  %v4947_v49 = vpop.permute.xlu0 %4946 }
 0x720   : > { %6104 = vrsqrt.f32 %v5360_v23  ;;  %v3349_v32 = vpop.permute.xlu1 %3348  ;;  %v5387_v18 = vadd.f32 %v5386_v62, %v5385_v42  ;;  %v4339_v63 = vrot.slane %v4333_v7, 1  ;;  %v4788_v26 = vrot.slane %v4782_v45, 2 }
 0x721   : > { %v3354_v13 = vadd.f32 %v3349_v32, %v3198_v52  ;;  %v4118_v2 = vadd.f32 %v4114_v28, %v4022_v55  ;;  %v4019_v28 = vmul.f32 %v9262_v39, %v4018_v60  ;;  %v4787_v35 = vrot.slane %v4781_v36, 2 }
 0x722   : > { %v4341_v8 = vsel %vm797_vm0, %v4339_v63, %v4340_v21  ;;  %v4791_v10 = vsel %vm1246_vm1, %v4788_v26, %v4790_v37  ;;  %v9468_v62 = vstv %s5901_s5  ;;  %v9483_v7 = vstv %s5902_s12  ;;  %s5908_s5 = sld [smem:[#allocation2 + $0x10a]] }
 0x723   : > { %v4222_v0 = vadd.f32 %v4218_v46, %v4118_v2  ;;  %v5105_v52 = vpop.permute.xlu0 %5104  ;;  %v4789_v54 = vsel %vm1246_vm1, %v4787_v35, %v4788_v26  ;;  %s5910_s12 = sld [smem:[#allocation2 + $0x10c]] }
 0x724   : > { %v3509_v22 = vpop.permute.xlu1 %3508 }
 0x725   : > { %v3514_v24 = vadd.f32 %v3509_v22, %v3354_v13  ;;  %v4347_v12 = vadd.f32 %v4343_v25, %v4222_v0  ;;  %v9460_v0 = vstv %s5899_s8  ;;  %s9504_s8 = sld [smem:[#allocation2 + $0x107]] }
 0x726   : > { %v1222_v25 = vmul.f32 %v9108_v53, %v9460_v0 }
 0x727   : > { %v3646_v47 = vadd.f32 %v3641_v19, %v3514_v24  ;;  %v4503_v15 = vadd.f32 %v4499_v51, %v4347_v12  ;;  %v5107_v2 = vpop.permute.xlu0 %5106  ;;  %v1511_v12 = vmul.f32 %v9108_v53, %v9468_v62 }
 0x728   : > { %v3797_v6 = vpop.permute.xlu1 %3796 }
 0x729   : > { %v3802_v17 = vadd.f32 %v3797_v6, %v3646_v47  ;;  %v4663_v38 = vadd.f32 %v4659_v30, %v4503_v15  ;;  %v9464_v6 = vmul.f32 %v9095_v40, %v9460_v0  ;;  %v1518_v56 = vrot.slane %v1511_v12, 2 }
 0x72b   : > { %v4795_v32 = vadd.f32 %v4791_v10, %v4663_v38 }
 0x72c   : > { %v3957_v3 = vpop.permute.xlu1 %3956 }
 0x72d   : > { %v6105_v59 = vpop.eup %6104  ;;  %v3962_v46 = vadd.f32 %v3957_v3, %v3802_v17  ;;  %v4951_v20 = vadd.f32 %v4947_v49, %v4795_v32  ;;  %v673_v17 = vstv %s9458_s7  ;;  %v1229_v3 = vrot.slane %v1222_v25, 1  ;;  %s5919_s7 = sld [smem:[#allocation2 + $0x115]] }
 0x72e   : > { %6002 = vpush %v6105_v59  ;;  %v675_v33 = vmul.f32 %v9095_v40, %v673_v17  ;;  %v9489_v59 = vmul.f32 %v9095_v40, %v9483_v7  ;;  %v9525_v32 = vstv %s5907_s10  ;;  %v9558_v25 = vstv %s5910_s12  ;;  %s9586_s10 = sld [smem:[#allocation2 + $0x10f]] }
 0x72f   : > { %6004 = vpush %v5387_v18  ;;  %v4021_v4 = vadd.f32 %v4019_v28, %v3962_v46  ;;  %v9450_v16 = vadd.f32 %v5107_v2, %v4951_v20  ;;  %v1227_v28 = vrot.slane %v9464_v6, 1  ;;  %v1671_v46 = vmul.f32 %v9108_v53, %v9483_v7  ;;  %s9686_s12 = sld [smem:[#allocation2 + $0x118]] }
 0x730   : > { %v4112_v34 = vpop.permute.xlu1 %4111  ;;  %v1676_v63 = vrot.slane %v9489_v59, 2  ;;  %v2209_v59 = vmul.f32 %v9252_v1, %v9525_v32 }
 0x731   : > { %v4117_v60 = vadd.f32 %v4112_v34, %v4021_v4  ;;  %v5427_v42 = vsel %vm5132_vm2, %v9450_v16, 0.0  ;;  %v1230_v18 = vsel %vm797_vm0, %v1227_v28, %v1229_v3  ;;  %v5367_v4 = vstv %s9471_s22  ;;  %s9560_s22 = sld [smem:[#allocation2 + $0xfe]] }
 0x734   : > { %v4216_v61 = vpop.permute.xlu1 %4215 }
 0x735   : > { %v4221_v23 = vadd.f32 %v4216_v61, %v4117_v60  ;;  %v1678_v60 = vrot.slane %v1671_v46, 2 }
 0x737   : > { %v4346_v55 = vadd.f32 %v4341_v8, %v4221_v23  ;;  %v1823_v23 = vstv %s9491_s27  ;;  %s5929_s27 = sld [smem:[#allocation2 + $0x11f]] }
 0x738   : > { %v4497_v51 = vpop.permute.xlu1 %4496  ;;  %v1825_v20 = vmul.f32 %v9018_v31, %v1823_v23 }
 0x739   : > { %v4502_v57 = vadd.f32 %v4497_v51, %v4346_v55 }
 0x73c   : > { %v4657_v13 = vpop.permute.xlu1 %4656 }
 0x73d   : > { %v4662_v22 = vadd.f32 %v4657_v13, %v4502_v57  ;;  %v9537_v13 = vld [vmem:[%s6441_s11 + $0x20] sm:$0xff] }
 0x73e   : > { %v9541_v2 = vmul.f32 %v9537_v13, %v9525_v32 }
 0x73f   : > { %v4794_v19 = vadd.f32 %v4789_v54, %v4662_v22  ;;  %v1927_v54 = vstv %s9504_s8  ;;  %v2211_v22 = vmul.f32 %v9074_v29, %v9525_v32  ;;  %s5894_s8 = sld [smem:[#allocation2 + $0xfc]] }
 0x740   : > { %v1929_v31 = vmul.f32 %v9537_v13, %v1927_v54  ;;  %v1928_v32 = vmul.f32 %v9252_v1, %v1927_v54 }
 0x741   : > { %v4950_v21 = vadd.f32 %v4945_v11, %v4794_v19  ;;  %v9478_v11 = vmul.f32 %v9095_v40, %v9468_v62  ;;  %v9545_v19 = vstv %s5908_s5  ;;  %s5920_s5 = sld [smem:[#allocation2 + $0x116]] }
 0x743   : > { %v9452_v30 = vadd.f32 %v5105_v52, %v4950_v21  ;;  %v1516_v45 = vrot.slane %v9478_v11, 2  ;;  %v9553_v21 = vmul.f32 %v9537_v13, %v9545_v19 }
 0x745   : > { %v5426_v24 = vsel %vm5132_vm2, %v9452_v30, 0.0  ;;  %v1519_v34 = vsel %vm1246_vm1, %v1516_v45, %v1518_v56  ;;  %v9569_v56 = vmul.f32 %v9537_v13, %v9558_v25 }
 0x746   : > { %v5428_v47 = vadd.f32 %v5427_v42, %v5426_v24  ;;  %v2371_v42 = vmul.f32 %v9074_v29, %v9545_v19  ;;  %v2216_v24 = vrot.slane %v9541_v2, 1 }
 0x748   : > { %5429 = vadd.xlane.f32.xlu0 %v5428_v47  ;;  %v2218_v47 = vrot.slane %v2211_v22, 1  ;;  %v2378_v12 = vrot.slane %v2371_v42, 1 }
 0x74a   : > { %v2219_v3 = vsel %vm797_vm0, %v2216_v24, %v2218_v47 }
 0x75e   : > { %680 = vrot.lane.b32.xlu0 %v675_v33, %s6303_s14  ;;  %v2376_v33 = vrot.slane %v9553_v21, 1 }
 0x75f   : > { %s6003_s29 = spop %6002 }
 0x760   : > { %s5363_s28 = smul.f32 %s6003_s29, %s5933_s20  ;;  %s6005_s6 = spop %6004 }
 0x761   : > { %s5389_s23 = smul.f32 0.00390625, %s6005_s6  ;;  %s5911_s20 = sld [smem:[#allocation2 + $0x10d]] }
 0x762   : > { %v5364_v15 = vstv %s5363_s28  ;;  %1233 = vrot.lane.b32.xlu0 %v1230_v18, %s6302_s13  ;;  %s5898_s29 = sld [smem:[#allocation2 + $0x100]]  ;;  %v2659_v18 = vmul.f32 %v9074_v29, %v9558_v25 }
 0x763   : > { %v5365_v26 = vmul.f32 %v5364_v15, %v8998_v43  ;;  %v5366_v37 = vmul.f32 %v5364_v15, %v9001_v48  ;;  %v5390_v49 = vstv %s5389_s23  ;;  %v2379_v15 = vsel %vm797_vm0, %v2376_v33, %v2378_v12  ;;  %s5916_s28 = sld [smem:[#allocation2 + $0x112]] }
 0x764   : > { %v9509_v38 = vsub.f32 %v8941_v44, %v5390_v49  ;;  %v9512_v61 = vsub.f32 %v8939_v14, %v5390_v49  ;;  %v1679_v14 = vsel %vm1246_vm1, %v1676_v63, %v1678_v60  ;;  %v674_v49 = vmul.f32 %v9130_v41, %v673_v17  ;;  %s9593_s6 = sld [smem:[#allocation2 + $0x110]] }
 0x765   : > { %v5368_v8 = vadd.f32 %v5367_v4, %v5365_v26  ;;  %v5369_v10 = vadd.f32 %v5367_v4, %v5366_v37  ;;  %v2664_v4 = vrot.slane %v9569_v56, 2  ;;  %v777_v60 = vstv %s9560_s22  ;;  %s5917_s23 = sld [smem:[#allocation2 + $0x113]] }
 0x766   : > { %v5393_v36 = vmul.f32 %v9509_v38, %v9509_v38  ;;  %v5394_v43 = vmul.f32 %v9512_v61, %v9512_v61  ;;  %1522 = vrot.lane.b32.xlu0 %v1519_v34, %s6303_s14  ;;  %v2666_v34 = vrot.slane %v2659_v18, 2  ;;  %v778_v17 = vmul.f32 %v9130_v41, %v777_v60  ;;  %v9635_v18 = vld [vmem:[%s6441_s11 + $0x38] sm:$0xff]  ;;  %s9693_s22 = sld [smem:[#allocation2 + $0x119]] }
 0x767   : > { %v5370_v48 = vmul.f32 0.2, %v5368_v8  ;;  %v5371_v44 = vmul.f32 0.2, %v5369_v10  ;;  %v9573_v46 = vstv %s5911_s20  ;;  %s5925_s20 = sld [smem:[#allocation2 + $0x11b]] }
 0x768   : > { %v5395_v52 = vsel %vm5132_vm2, %v5393_v36, 0.0  ;;  %v5396_v55 = vsel %vm5132_vm2, %v5394_v43, 0.0  ;;  %v9582_v26 = vmul.f32 %v9537_v13, %v9573_v46  ;;  %v2819_v37 = vmul.f32 %v9074_v29, %v9573_v46 }
 0x769   : > { %v5372_v51 = vmax.f32 %v5368_v8, %v5370_v48  ;;  %v5373_v35 = vmax.f32 %v5369_v10, %v5371_v44  ;;  %v5397_v57 = vadd.f32 %v5396_v55, %v5395_v52  ;;  %v1059_v8 = vstv %s5898_s29  ;;  %v9610_v52 = vld [vmem:[%s6441_s11 + $0x8] sm:$0xff]  ;;  %s5926_s29 = sld [smem:[#allocation2 + $0x11c]] }
 0x76a   : > { %1682 = vrot.lane.b32.xlu0 %v1679_v14, %s6302_s13  ;;  %v2667_v10 = vsel %vm1246_vm1, %v2664_v4, %v2666_v34  ;;  %v2824_v29 = vrot.slane %v9582_v26, 2  ;;  %v2826_v36 = vrot.slane %v2819_v37, 2  ;;  %v1060_v43 = vmul.f32 %v9130_v41, %v1059_v8 }
 0x76b   : > { %5959 = vst.msk [vmem:[%s7499_s9 + $0x40] sm:$0xff] %vm5132_vm2, %v5372_v51  ;;  %5960 = vst.msk [vmem:[%s7499_s9 + $0x48] sm:$0xff] %vm5132_vm2, %v5373_v35  ;;  %5398 = vadd.xlane.f32.xlu1 %v5397_v57  ;;  %v1061_v48 = vmul.f32 %v9095_v40, %v1059_v8  ;;  %v2971_v14 = vstv %s9586_s10  ;;  %v779_v55 = vmul.f32 %v9610_v52, %v777_v60  ;;  %v9613_v51 = vstv %s5916_s28  ;;  %s5928_s28 = sld [smem:[#allocation2 + $0x11e]] }
 0x76c   : > { %v2827_v44 = vsel %vm1246_vm1, %v2824_v29, %v2826_v36  ;;  %v1066_v35 = vrot.slane %v1060_v43, 1  ;;  %v1062_v57 = vmul.f32 %v9108_v53, %v1059_v8  ;;  %v3075_v22 = vstv %s9593_s6  ;;  %v9652_v8 = vld [vmem:[%s6441_s11] sm:$0xff]  ;;  %s5906_s10 = sld [smem:[#allocation2 + $0x108]] }
 0x76d   : > { %v1067_v40 = vrot.slane %v1061_v48, 1  ;;  %v3359_v42 = vmul.f32 %v9414_v50, %v9613_v51  ;;  %v9627_v47 = vstv %s5917_s23  ;;  %s9884_s6 = sld [smem:[#allocation2 + $0x105]] }
 0x76e   : > { %1830 = vrot.lane.b32.xlu0 %v1825_v20, %s6303_s14  ;;  %v2973_v20 = vmul.f32 %v9113_v27, %v2971_v14  ;;  %v1069_v12 = vrot.slane %v1062_v57, 1  ;;  %v3519_v34 = vmul.f32 %v9414_v50, %v9627_v47  ;;  %s5909_s23 = sld [smem:[#allocation2 + $0x10b]] }
 0x76f   : > { %v1068_v53 = vsel %vm797_vm0, %v1066_v35, %v1067_v40 }
 0x772   : > { %1934 = vrot.lane.b32.xlu0 %v1929_v31, %s6302_s13  ;;  %v9623_v31 = vmul.f32 %v9113_v27, %v9613_v51  ;;  %v3077_v27 = vmul.f32 %v9635_v18, %v3075_v22 }
 0x774   : > { %v3364_v37 = vrot.slane %v9623_v31, 1 }
 0x776   : > { %2222 = vrot.lane.b32.xlu0 %v2219_v3, %s6303_s14  ;;  %v1220_v3 = vmul.f32 %v9130_v41, %v9460_v0  ;;  %v9648_v41 = vstv %s5919_s7  ;;  %v1070_v0 = vsel %vm797_vm0, %v1067_v40, %v1069_v12  ;;  %v1669_v40 = vmul.f32 %v9652_v8, %v9483_v7  ;;  %s5915_s7 = sld [smem:[#allocation2 + $0x111]] }
 0x777   : > { %v9663_v48 = vmul.f32 %v9635_v18, %v9648_v41 }
 0x778   : > { %v1226_v60 = vrot.slane %v1220_v3, 1  ;;  %v1675_v7 = vrot.slane %v1669_v40, 2 }
 0x77a   : > { %2382 = vrot.lane.b32.xlu0 %v2379_v15, %s6302_s13  ;;  %v9642_v15 = vmul.f32 %v9635_v18, %v9627_v47  ;;  %v1677_v11 = vsel %vm1246_vm1, %v1675_v7, %v1676_v63 }
 0x77c   : > { %678 = vrot.lane.b32.xlu1 %v674_v49, %s6303_s14  ;;  %v3366_v49 = vrot.slane %v3359_v42, 1  ;;  %v3524_v36 = vrot.slane %v9642_v15, 1 }
 0x77e   : > { %2670 = vrot.lane.b32.xlu0 %v2667_v10, %s6303_s14  ;;  %v1509_v10 = vmul.f32 %v9652_v8, %v9468_v62  ;;  %v3367_v43 = vsel %vm797_vm0, %v3364_v37, %v3366_v49  ;;  %v1228_v62 = vsel %vm797_vm0, %v1226_v60, %v1227_v28  ;;  %v1824_v49 = vmul.f32 %v9252_v1, %v1823_v23 }
 0x77f   : > { %v4223_v60 = vstv %s9693_s22 }
 0x780   : > { %782 = vrot.lane.b32.xlu1 %v778_v17, %s6302_s13  ;;  %v3526_v17 = vrot.slane %v3519_v34, 1  ;;  %v1515_v35 = vrot.slane %v1509_v10, 2  ;;  %v4119_v34 = vstv %s9686_s12  ;;  %s5918_s12 = sld [smem:[#allocation2 + $0x114]] }
 0x781   : > { %v4121_v63 = vmul.f32 %v9213_v58, %v4119_v34 }
 0x782   : > { %2830 = vrot.lane.b32.xlu0 %v2827_v44, %s6302_s13  ;;  %v3807_v44 = vmul.f32 %v9414_v50, %v9648_v41  ;;  %v3527_v57 = vsel %vm797_vm0, %v3524_v36, %v3526_v17  ;;  %v1517_v28 = vsel %vm1246_vm1, %v1515_v35, %v1516_v45  ;;  %v9727_v17 = vstv %s5926_s29 }
 0x783   : > { %v4667_v54 = vmul.f32 %v9243_v5, %v9727_v17 }
 0x784   : > { %784 = vrot.lane.b32.xlu1 %v779_v55, %s6302_s13  ;;  %v9668_v55 = vstv %s5920_s5  ;;  %v3814_v42 = vrot.slane %v3807_v44, 2  ;;  %v2369_v44 = vmul.f32 %v9252_v1, %v9545_v19  ;;  %v4952_v19 = vstv %s5928_s28  ;;  %s9906_s5 = sld [smem:[#allocation2 + $0x10e]] }
 0x785   : > { %v3967_v6 = vmul.f32 %v9414_v50, %v9668_v55 }
 0x786   : > { %2978 = vrot.lane.b32.xlu0 %v2973_v20, %s6303_s14  ;;  %v3812_v20 = vrot.slane %v9663_v48, 2 }
 0x788   : > { %1071 = vrot.lane.b32.xlu1 %v1068_v53, %s6303_s14  ;;  %v9682_v53 = vmul.f32 %v9635_v18, %v9668_v55  ;;  %v3815_v12 = vsel %vm1246_vm1, %v3812_v20, %v3814_v42 }
 0x78a   : > { %3082 = vrot.lane.b32.xlu0 %v3077_v27, %s6302_s13  ;;  %v3972_v3 = vrot.slane %v9682_v53, 2  ;;  %v3974_v27 = vrot.slane %v3967_v6, 2  ;;  %v2375_v6 = vrot.slane %v2369_v44, 1 }
 0x78c   : > { %1073 = vrot.lane.b32.xlu1 %v1070_v0, %s6303_s14  ;;  %v3975_v45 = vsel %vm1246_vm1, %v3972_v3, %v3974_v27  ;;  %v9712_v0 = vstv %s5925_s20  ;;  %v4953_v27 = vmul.f32 %v9262_v39, %v4952_v19  ;;  %s9925_s20 = sld [smem:[#allocation2 + $0x117]] }
 0x78d   : > { %v9723_v10 = vmul.f32 %v9213_v58, %v9712_v0  ;;  %v4507_v23 = vmul.f32 %v9243_v5, %v9712_v0 }
 0x78e   : > { %3370 = vrot.lane.b32.xlu0 %v3367_v43, %s6303_s14  ;;  %v2215_v43 = vrot.slane %v2209_v59, 1  ;;  %v9776_v59 = vld [vmem:[%s6441_s11 + $0x58] sm:$0x3] }
 0x78f   : > { %v4512_v40 = vrot.slane %v9723_v10, 1  ;;  %v4955_v21 = vmul.f32 %v9776_v59, %v4952_v19 }
 0x790   : > { %1231 = vrot.lane.b32.xlu1 %v1228_v62, %s6302_s13  ;;  %v9737_v62 = vld [vmem:[%s6441_s11 + $0x50] sm:$0xff]  ;;  %v2217_v42 = vsel %vm797_vm0, %v2215_v43, %v2216_v24  ;;  %v9786_v43 = vld [vmem:[%s6441_s11 + $0x48] sm:$0xff] }
 0x791   : > { %v4225_v58 = vmul.f32 %v9737_v62, %v4223_v60  ;;  %v9744_v35 = vmul.f32 %v9737_v62, %v9727_v17  ;;  %v4954_v2 = vmul.f32 %v9737_v62, %v4952_v19  ;;  %v4224_v48 = vmul.f32 %v9786_v43, %v4223_v60 }
 0x792   : > { %3530 = vrot.lane.b32.xlu0 %v3527_v57, %s6302_s13  ;;  %v4514_v57 = vrot.slane %v4507_v23, 1 }
 0x793   : > { %v4672_v7 = vrot.slane %v9744_v35, 1 }
 0x794   : > { %1520 = vrot.lane.b32.xlu1 %v1517_v28, %s6303_s14  ;;  %v2657_v28 = vmul.f32 %v9252_v1, %v9558_v25  ;;  %v4515_v5 = vsel %vm797_vm0, %v4512_v40, %v4514_v57  ;;  %v2377_v1 = vsel %vm797_vm0, %v2375_v6, %v2376_v33  ;;  %v9767_v25 = vld [vmem:[%s6441_s11 + $0x18] sm:$0xff]  ;;  %v5112_v33 = vstv %s5929_s27  ;;  %s5927_s27 = sld [smem:[#allocation2 + $0x11d]] }
 0x795   : > { %v5113_v44 = vmul.f32 %v9786_v43, %v5112_v33  ;;  %v5115_v19 = vmul.f32 %v9776_v59, %v5112_v33  ;;  %v3357_v6 = vmul.f32 %v9313_v9, %v9613_v51 }
 0x796   : > { %3818 = vrot.lane.b32.xlu0 %v3815_v12, %s6303_s14  ;;  %v4674_v12 = vrot.slane %v4667_v54, 1  ;;  %v2663_v24 = vrot.slane %v2657_v28, 2  ;;  %v3076_v28 = vmul.f32 %v9313_v9, %v3075_v22 }
 0x797   : > { %v5119_v57 = vrot.slane %v5113_v44, 2 }
 0x798   : > { %1680 = vrot.lane.b32.xlu1 %v1677_v11, %s6302_s13  ;;  %v2817_v11 = vmul.f32 %v9767_v25, %v9573_v46  ;;  %v4675_v39 = vsel %vm797_vm0, %v4672_v7, %v4674_v12  ;;  %v3517_v12 = vmul.f32 %v9313_v9, %v9627_v47 }
 0x79a   : > { %3978 = vrot.lane.b32.xlu0 %v3975_v45, %s6302_s13  ;;  %v4959_v45 = vrot.slane %v4953_v27, 2  ;;  %v2823_v46 = vrot.slane %v2817_v11, 2  ;;  %v3523_v27 = vrot.slane %v3517_v12, 1 }
 0x79c   : > { %1828 = vrot.lane.b32.xlu1 %v1824_v49, %s6303_s14  ;;  %v4960_v49 = vrot.slane %v4954_v2, 2  ;;  %v2825_v56 = vsel %vm1246_vm1, %v2823_v46, %v2824_v29  ;;  %v5122_v29 = vrot.slane %v5115_v19, 2  ;;  %v3805_v2 = vmul.f32 %v9313_v9, %v9648_v41 }
 0x79d   : > { %v3525_v22 = vsel %vm797_vm0, %v3523_v27, %v3524_v36  ;;  %v4120_v41 = vmul.f32 %v9786_v43, %v4119_v34  ;;  %v4505_v36 = vmul.f32 %v9786_v43, %v9712_v0 }
 0x79e   : > { %4126 = vrot.lane.b32.xlu0 %v4121_v63, %s6303_s14  ;;  %v2665_v63 = vsel %vm1246_vm1, %v2663_v24, %v2664_v4  ;;  %v4961_v23 = vsel %vm1246_vm1, %v4959_v45, %v4960_v49  ;;  %v3811_v47 = vrot.slane %v3805_v2, 2 }
 0x7a0   : > { %1932 = vrot.lane.b32.xlu1 %v1928_v32, %s6302_s13  ;;  %v4962_v32 = vrot.slane %v4955_v21, 2 }
 0x7a2   : > { %4230 = vrot.lane.b32.xlu0 %v4225_v58, %s6302_s13  ;;  %v5114_v58 = vmul.f32 %v9737_v62, %v5112_v33  ;;  %v4963_v4 = vsel %vm1246_vm1, %v4960_v49, %v4962_v32  ;;  %v577_v49 = vstv %s5894_s8  ;;  %s5934_s8 = sld [smem:[#allocation5 + $0x5]] }
 0x7a3   : > { %v579_v32 = vmul.f32 %v9610_v52, %v577_v49 }
 0x7a4   : > { %2220 = vrot.lane.b32.xlu1 %v2217_v42, %s6303_s14  ;;  %v5120_v54 = vrot.slane %v5114_v58, 2  ;;  %v2972_v42 = vmul.f32 %v9313_v9, %v2971_v14  ;;  %v3813_v9 = vsel %vm1246_vm1, %v3811_v47, %v3812_v20  ;;  %v4665_v20 = vmul.f32 %v9786_v43, %v9727_v17 }
 0x7a6   : > { %4518 = vrot.lane.b32.xlu0 %v4515_v5, %s6303_s14  ;;  %v5121_v26 = vsel %vm1246_vm1, %v5119_v57, %v5120_v54  ;;  %v3363_v5 = vrot.slane %v3357_v6, 1  ;;  %v5123_v14 = vsel %vm1246_vm1, %v5120_v54, %v5122_v29  ;;  %v4671_v34 = vrot.slane %v4665_v20, 1 }
 0x7a8   : > { %2380 = vrot.lane.b32.xlu1 %v2377_v1, %s6302_s13  ;;  %v3365_v51 = vsel %vm797_vm0, %v3363_v5, %v3364_v37  ;;  %v9825_v1 = vld [vmem:[%s6441_s11 + $0x30] sm:$0xff]  ;;  %v4673_v0 = vsel %vm797_vm0, %v4671_v34, %v4672_v7 }
 0x7a9   : > { %v3965_v31 = vmul.f32 %v9825_v1, %v9668_v55  ;;  %v4511_v55 = vrot.slane %v4505_v36, 1 }
 0x7aa   : > { %4678 = vrot.lane.b32.xlu0 %v4675_v39, %s6302_s13 }
 0x7ab   : > { %v3971_v37 = vrot.slane %v3965_v31, 2 }
 0x7ac   : > { %2668 = vrot.lane.b32.xlu1 %v2665_v63, %s6303_s14 }
 0x7ad   : > { %v3973_v15 = vsel %vm1246_vm1, %v3971_v37, %v3972_v3  ;;  %v4513_v3 = vsel %vm797_vm0, %v4511_v55, %v4512_v40 }
 0x7ae   : > { %4964 = vrot.lane.b32.xlu0 %v4961_v23, %s6303_s14  ;;  %v578_v23 = vmul.f32 %v9652_v8, %v577_v49  ;;  %v2052_v49 = vstv %s5906_s10 }
 0x7b0   : > { %2828 = vrot.lane.b32.xlu1 %v2825_v56, %s6302_s13  ;;  %v6181_v56 = vld [vmem:[%s6441_s11 + $0x10] sm:$0x3] }
 0x7b2   : > { %4966 = vrot.lane.b32.xlu0 %v4963_v4, %s6303_s14 }
 0x7b4   : > { %2976 = vrot.lane.b32.xlu1 %v2972_v42, %s6303_s14 }
 0x7b6   : > { %5124 = vrot.lane.b32.xlu0 %v5121_v26, %s6302_s13 }
 0x7b8   : > { %3080 = vrot.lane.b32.xlu1 %v3076_v28, %s6302_s13 }
 0x7ba   : > { %5126 = vrot.lane.b32.xlu0 %v5123_v14, %s6302_s13 }
 0x7bc   : > { %3368 = vrot.lane.b32.xlu1 %v3365_v51, %s6303_s14 }
 0x7c0   : > { %3528 = vrot.lane.b32.xlu1 %v3525_v22, %s6302_s13 }
 0x7c4   : > { %3816 = vrot.lane.b32.xlu1 %v3813_v9, %s6303_s14 }
 0x7c8   : > { %3976 = vrot.lane.b32.xlu1 %v3973_v15, %s6302_s13 }
 0x7cc   : > { %4124 = vrot.lane.b32.xlu1 %v4120_v41, %s6303_s14 }
 0x7d0   : > { %4228 = vrot.lane.b32.xlu1 %v4224_v48, %s6302_s13 }
 0x7d1   : > { %v9850_v53 = vpop.xlane.xlu0 %5429 }
 0x7d4   : > { %4516 = vrot.lane.b32.xlu1 %v4513_v3, %s6303_s14  ;;  %s5897_s14 = sld [smem:[#allocation2 + $0xff]] }
 0x7d5   : > { %v681_v60 = vpop.permute.xlu0 %680 }
 0x7d6   : > { %v685_v26 = vadd.f32 %v681_v60, %v579_v32  ;;  %v2054_v32 = vmul.f32 %v9537_v13, %v2052_v49 }
 0x7d8   : > { %4676 = vrot.lane.b32.xlu1 %v4673_v0, %s6302_s13  ;;  %s5900_s13 = sld [smem:[#allocation2 + $0x102]] }
 0x7d9   : > { %v1234_v24 = vpop.permute.xlu0 %1233 }
 0x7da   : > { %v903_v33 = vstv %s5897_s14  ;;  %s5941_s14 = sld [smem:[#allocation7 + $0x5]] }
 0x7db   : > { %v904_v44 = vmul.f32 %v9652_v8, %v903_v33  ;;  %v905_v58 = vmul.f32 %v9610_v52, %v903_v33  ;;  %v906_v4 = vmul.f32 %v6181_v56, %v903_v33  ;;  %v1727_v33 = vstv %s9884_s6 }
 0x7dd   : > { %v9860_v17 = vpop.permute.xlu0 %1522  ;;  %v910_v29 = vrot.slane %v904_v44, 1  ;;  %v911_v28 = vrot.slane %v905_v58, 1  ;;  %v913_v5 = vrot.slane %v906_v4, 1  ;;  %v6182_v44 = vld [vmem:[%s6441_s11 + $0x28] sm:$0x3]  ;;  %v1729_v4 = vmul.f32 %v9537_v13, %v1727_v33 }
 0x7de   : > { %v1352_v14 = vstv %s5900_s13  ;;  %v2055_v58 = vmul.f32 %v6182_v44, %v2052_v49 }
 0x7df   : > { %v912_v47 = vsel %vm797_vm0, %v910_v29, %v911_v28  ;;  %v914_v31 = vsel %vm797_vm0, %v911_v28, %v913_v5  ;;  %v1354_v9 = vmul.f32 %v9610_v52, %v1352_v14  ;;  %v1355_v37 = vmul.f32 %v6181_v56, %v1352_v14 }
 0x7e0   : > { %v1353_v41 = vmul.f32 %v9652_v8, %v1352_v14  ;;  %v2062_v29 = vrot.slane %v2055_v58, 1  ;;  %v3648_v58 = vstv %s5918_s12 }
 0x7e1   : > { %v9862_v11 = vpop.permute.xlu0 %1682  ;;  %v1360_v55 = vrot.slane %v1354_v9, 2  ;;  %v1362_v20 = vrot.slane %v1355_v37, 2 }
 0x7e2   : > { %v1359_v0 = vrot.slane %v1353_v41, 2 }
 0x7e3   : > { %v1363_v52 = vsel %vm1246_vm1, %v1360_v55, %v1362_v20 }
 0x7e4   : > { %v1361_v8 = vsel %vm1246_vm1, %v1359_v0, %v1360_v55 }
 0x7e5   : > { %v9864_v39 = vpop.permute.xlu0 %1830 }
 0x7e9   : > { %v9866_v10 = vpop.permute.xlu0 %1934 }
 0x7ed   : > { %v9868_v40 = vpop.permute.xlu0 %2222 }
 0x7f1   : > { %v9870_v45 = vpop.permute.xlu0 %2382 }
 0x7f4   : > { %v5399_v35 = vpop.xlane.xlu1 %5398 }
 0x7f5   : > { %v5400_v7 = vrot.slane %v5399_v35, 4  ;;  %v9877_v57 = vpop.permute.xlu0 %2670 }
 0x7f7   : > { %v5401_v21 = vadd.f32 %v5400_v7, %v5399_v35 }
 0x7f8   : > { %v679_v63 = vpop.permute.xlu1 %678 }
 0x7f9   : > { %v5402_v46 = vrot.slane %v5401_v21, 2  ;;  %v684_v6 = vadd.f32 %v679_v63, %v578_v23  ;;  %v9879_v27 = vpop.permute.xlu0 %2830 }
 0x7fb   : > { %v5403_v54 = vadd.f32 %v5402_v46, %v5401_v21 }
 0x7fc   : > { %v783_v19 = vpop.permute.xlu1 %782 }
 0x7fd   : > { %v5404_v42 = vrot.slane %v5403_v54, 1  ;;  %v788_v2 = vadd.f32 %v783_v19, %v684_v6  ;;  %v9887_v3 = vpop.permute.xlu0 %2978  ;;  %v2500_v6 = vstv %s5909_s23 }
 0x7ff   : > { %v5405_v12 = vadd.f32 %v5404_v42, %v5403_v54  ;;  %v917_v36 = vadd.f32 %v912_v47, %v788_v2  ;;  %v2503_v2 = vmul.f32 %v6182_v44, %v2500_v6 }
 0x800   : > { %v785_v51 = vpop.permute.xlu1 %784 }
 0x801   : > { %6006 = vpush %v5405_v12  ;;  %v789_v22 = vadd.f32 %v785_v51, %v685_v26  ;;  %v9892_v63 = vpop.permute.xlu0 %3082  ;;  %v2060_v26 = vrot.slane %v2054_v32, 1  ;;  %v1728_v12 = vmul.f32 %v9767_v25, %v1727_v33  ;;  %v2502_v51 = vmul.f32 %v9537_v13, %v2500_v6 }
 0x802   : > { %v2510_v41 = vrot.slane %v2503_v2, 2 }
 0x803   : > { %v918_v48 = vadd.f32 %v914_v31, %v789_v22 }
 0x804   : > { %v1072_v15 = vpop.permute.xlu1 %1071 }
 0x805   : > { %v1077_v60 = vadd.f32 %v1072_v15, %v917_v36  ;;  %v9899_v28 = vpop.permute.xlu0 %3370  ;;  %v2508_v15 = vrot.slane %v2502_v51, 2 }
 0x808   : > { %v1074_v34 = vpop.permute.xlu1 %1073 }
 0x809   : > { %v1078_v35 = vadd.f32 %v1074_v34, %v918_v48  ;;  %v3531_v13 = vpop.permute.xlu0 %3530  ;;  %v2511_v34 = vsel %vm1246_vm1, %v2508_v15, %v2510_v41 }
 0x80b   : > { %v1238_v7 = vadd.f32 %v1234_v24, %v1078_v35 }
 0x80c   : > { %v1232_v21 = vpop.permute.xlu1 %1231 }
 0x80d   : > { %v1367_v46 = vadd.f32 %v1363_v52, %v1238_v7  ;;  %v1237_v23 = vadd.f32 %v1232_v21, %v1077_v60  ;;  %v2501_v60 = vmul.f32 %v9767_v25, %v2500_v6  ;;  %v3200_v52 = vstv %s5915_s7 }
 0x80e   : > { %v2875_v7 = vstv %s9906_s5 }
 0x80f   : > { %v1527_v56 = vadd.f32 %v9860_v17, %v1367_v46  ;;  %v1366_v54 = vadd.f32 %v1361_v8, %v1237_v23  ;;  %v2053_v17 = vmul.f32 %v9767_v25, %v2052_v49  ;;  %v3819_v49 = vpop.permute.xlu0 %3818  ;;  %v2507_v46 = vrot.slane %v2501_v60, 2 }
 0x810   : > { %v1521_v19 = vpop.permute.xlu1 %1520  ;;  %v3203_v23 = vmul.f32 %v9414_v50, %v3200_v52  ;;  %v2877_v25 = vmul.f32 %v9635_v18, %v2875_v7 }
 0x811   : > { %v1687_v24 = vadd.f32 %v9862_v11, %v1527_v56  ;;  %v1526_v42 = vadd.f32 %v1521_v19, %v1366_v54  ;;  %v2063_v11 = vsel %vm797_vm0, %v2060_v26, %v2062_v29  ;;  %v2059_v36 = vrot.slane %v2053_v17, 1  ;;  %v6183_v29 = vld [vmem:[%s6441_s11 + $0x40] sm:$0x3]  ;;  %s5924_s11 = sld [smem:[#allocation2 + $0x11a]] }
 0x812   : > { %v3210_v19 = vrot.slane %v3203_v23, 1  ;;  %v3651_v50 = vmul.f32 %v6183_v29, %v3648_v58 }
 0x813   : > { %v1731_v5 = vadd.f32 %v1729_v4, %v1687_v24  ;;  %v2061_v0 = vsel %vm797_vm0, %v2059_v36, %v2060_v26  ;;  %v2509_v4 = vsel %vm1246_vm1, %v2507_v46, %v2508_v15  ;;  %v3979_v24 = vpop.permute.xlu0 %3978  ;;  %v3650_v26 = vmul.f32 %v9635_v18, %v3648_v58 }
 0x814   : > { %v1681_v14 = vpop.permute.xlu1 %1680  ;;  %v3658_v17 = vrot.slane %v3651_v50, 2 }
 0x815   : > { %v1835_v22 = vadd.f32 %v9864_v39, %v1731_v5  ;;  %v1686_v47 = vadd.f32 %v1681_v14, %v1526_v42  ;;  %v3656_v2 = vrot.slane %v3650_v26, 2 }
 0x817   : > { %v1939_v31 = vadd.f32 %v9866_v10, %v1835_v22  ;;  %v1730_v9 = vadd.f32 %v1728_v12, %v1686_v47  ;;  %v4127_v22 = vpop.permute.xlu0 %4126 }
 0x818   : > { %v1829_v37 = vpop.permute.xlu1 %1828 }
 0x819   : > { %v2067_v48 = vadd.f32 %v2063_v11, %v1939_v31  ;;  %v1834_v55 = vadd.f32 %v1829_v37, %v1730_v9  ;;  %v3201_v31 = vmul.f32 %v9825_v1, %v3200_v52  ;;  %v3659_v37 = vsel %vm1246_vm1, %v3656_v2, %v3658_v17 }
 0x81b   : > { %v2227_v20 = vadd.f32 %v9868_v40, %v2067_v48  ;;  %v3202_v40 = vmul.f32 %v9635_v18, %v3200_v52  ;;  %v2876_v18 = vmul.f32 %v9825_v1, %v2875_v7  ;;  %v4023_v48 = vstv %s9925_s20  ;;  %s5935_s20 = sld [smem:[#allocation5 + $0x6]] }
 0x81c   : > { %v1933_v39 = vpop.permute.xlu1 %1932  ;;  %v4025_v60 = vmul.f32 %v9737_v62, %v4023_v48 }
 0x81d   : > { %v2387_v10 = vadd.f32 %v9870_v45, %v2227_v20  ;;  %v1938_v35 = vadd.f32 %v1933_v39, %v1834_v55  ;;  %v3208_v54 = vrot.slane %v3202_v40, 1  ;;  %v4231_v55 = vpop.permute.xlu0 %4230  ;;  %v5431_v20 = vrot.slane %v9850_v53, 4 }
 0x81f   : > { %v2515_v21 = vadd.f32 %v2511_v34, %v2387_v10  ;;  %v2066_v33 = vadd.f32 %v2061_v0, %v1938_v35  ;;  %v3211_v14 = vsel %vm797_vm0, %v3208_v54, %v3210_v19  ;;  %v3649_v35 = vmul.f32 %v9825_v1, %v3648_v58 }
 0x820   : > { %v2221_v8 = vpop.permute.xlu1 %2220 }
 0x821   : > { %v2675_v32 = vadd.f32 %v9877_v57, %v2515_v21  ;;  %v2226_v44 = vadd.f32 %v2221_v8, %v2066_v33  ;;  %v4348_v21 = vstv %s5924_s11  ;;  %v4519_v33 = vpop.permute.xlu0 %4518  ;;  %s5942_s11 = sld [smem:[#allocation7 + $0x6]] }
 0x823   : > { %v2835_v45 = vadd.f32 %v9879_v27, %v2675_v32  ;;  %v4350_v32 = vmul.f32 %v9737_v62, %v4348_v21 }
 0x824   : > { %v2381_v56 = vpop.permute.xlu1 %2380 }
 0x825   : > { %v2386_v42 = vadd.f32 %v2381_v56, %v2226_v44  ;;  %v2879_v6 = vadd.f32 %v2877_v25, %v2835_v45  ;;  %v4351_v44 = vmul.f32 %v9776_v59, %v4348_v21  ;;  %v4356_v56 = vrot.slane %v4350_v32, 1 }
 0x827   : > { %v2983_v57 = vadd.f32 %v9887_v3, %v2879_v6  ;;  %v2514_v5 = vadd.f32 %v2509_v4, %v2386_v42  ;;  %v4358_v4 = vrot.slane %v4351_v44, 1 }
 0x828   : > { %v2669_v12 = vpop.permute.xlu1 %2668 }
 0x829   : > { %v2674_v27 = vadd.f32 %v2669_v12, %v2514_v5  ;;  %v3087_v51 = vadd.f32 %v9892_v63, %v2983_v57  ;;  %v3207_v63 = vrot.slane %v3201_v31, 1  ;;  %v4359_v29 = vsel %vm797_vm0, %v4356_v56, %v4358_v4 }
 0x82a   : > { %v4796_v5 = vstv %s5927_s27 }
 0x82b   : > { %v3215_v47 = vadd.f32 %v3211_v14, %v3087_v51  ;;  %v4798_v17 = vmul.f32 %v9737_v62, %v4796_v5 }
 0x82c   : > { %v2829_v11 = vpop.permute.xlu1 %2828 }
 0x82d   : > { %v2834_v3 = vadd.f32 %v2829_v11, %v2674_v27  ;;  %v3375_v9 = vadd.f32 %v9899_v28, %v3215_v47  ;;  %v3209_v28 = vsel %vm797_vm0, %v3207_v63, %v3208_v54  ;;  %v4679_v54 = vpop.permute.xlu0 %4678  ;;  %v4024_v27 = vmul.f32 %v9786_v43, %v4023_v48 }
 0x82f   : > { %v2878_v15 = vadd.f32 %v2876_v18, %v2834_v3  ;;  %v3535_v41 = vadd.f32 %v3531_v13, %v3375_v9  ;;  %v5432_v13 = vadd.f32 %v5431_v20, %v9850_v53 }
 0x830   : > { %v2977_v36 = vpop.permute.xlu1 %2976 }
 0x831   : > { %v2982_v39 = vadd.f32 %v2977_v36, %v2878_v15  ;;  %v3663_v34 = vadd.f32 %v3659_v37, %v3535_v41  ;;  %v5433_v25 = vrot.slane %v5432_v13, 2  ;;  %v4965_v12 = vpop.permute.xlu0 %4964  ;;  %v4804_v15 = vrot.slane %v4798_v17, 2 }
 0x832   : > { %s6007_s22 = spop %6006 }
 0x833   : > { %s5407_s29 = smul.f32 0.00390625, %s6007_s22  ;;  %v3823_v0 = vadd.f32 %v3819_v49, %v3663_v34  ;;  %v3655_v49 = vrot.slane %v3649_v35, 2  ;;  %v5434_v19 = vadd.f32 %v5433_v25, %v5432_v13  ;;  %v5416_v25 = vstv %s5941_s14 }
 0x834   : > { %v3081_v10 = vpop.permute.xlu1 %3080 }
 0x835   : > { %s5408_s28 = sadd.f32 1e-05, %s5407_s29  ;;  %v3086_v52 = vadd.f32 %v3081_v10, %v2982_v39  ;;  %v3983_v7 = vadd.f32 %v3979_v24, %v3823_v0  ;;  %v3657_v58 = vsel %vm1246_vm1, %v3655_v49, %v3656_v2  ;;  %v5435_v50 = vrot.slane %v5434_v19, 1  ;;  %v4967_v36 = vpop.permute.xlu0 %4966 }
 0x836   : > { %v4349_v2 = vmul.f32 %v9786_v43, %v4348_v21 }
 0x837   : > { %v5409_v8 = vstv %s5408_s28  ;;  %v3214_v46 = vadd.f32 %v3209_v28, %v3086_v52  ;;  %v4027_v40 = vadd.f32 %v4025_v60, %v3983_v7  ;;  %v5436_v18 = vadd.f32 %v5435_v50, %v5434_v19 }
 0x838   : > { %6106 = vrsqrt.f32 %v5409_v8  ;;  %v3369_v23 = vpop.permute.xlu1 %3368  ;;  %v4355_v37 = vrot.slane %v4349_v2, 1 }
 0x839   : > { %v3374_v45 = vadd.f32 %v3369_v23, %v3214_v46  ;;  %v4131_v1 = vadd.f32 %v4127_v22, %v4027_v40  ;;  %v4799_v22 = vmul.f32 %v9776_v59, %v4796_v5  ;;  %v4797_v59 = vmul.f32 %v9786_v43, %v4796_v5  ;;  %v5125_v34 = vpop.permute.xlu0 %5124 }
 0x83a   : > { %v4357_v20 = vsel %vm797_vm0, %v4355_v37, %v4356_v56  ;;  %v5465_v37 = vstv %s5942_s11 }
 0x83b   : > { %v4235_v6 = vadd.f32 %v4231_v55, %v4131_v1  ;;  %v4806_v41 = vrot.slane %v4799_v22, 2  ;;  %v4803_v28 = vrot.slane %v4797_v59, 2 }
 0x83c   : > { %v3529_v53 = vpop.permute.xlu1 %3528 }
 0x83d   : > { %v3534_v24 = vadd.f32 %v3529_v53, %v3374_v45  ;;  %v4363_v14 = vadd.f32 %v4359_v29, %v4235_v6  ;;  %v4807_v62 = vsel %vm1246_vm1, %v4804_v15, %v4806_v41  ;;  %v4805_v52 = vsel %vm1246_vm1, %v4803_v28, %v4804_v15  ;;  %v5127_v21 = vpop.permute.xlu0 %5126 }
 0x83f   : > { %v3662_v42 = vadd.f32 %v3657_v58, %v3534_v24  ;;  %v4523_v31 = vadd.f32 %v4519_v33, %v4363_v14 }
 0x840   : > { %v3817_v26 = vpop.permute.xlu1 %3816 }
 0x841   : > { %v3822_v57 = vadd.f32 %v3817_v26, %v3662_v42  ;;  %v4683_v48 = vadd.f32 %v4679_v54, %v4523_v31 }
 0x843   : > { %v4811_v60 = vadd.f32 %v4807_v62, %v4683_v48 }
 0x844   : > { %v3977_v51 = vpop.permute.xlu1 %3976 }
 0x845   : > { %v6107_v47 = vpop.eup %6106  ;;  %v3982_v11 = vadd.f32 %v3977_v51, %v3822_v57  ;;  %v4971_v13 = vadd.f32 %v4967_v36, %v4811_v60 }
 0x846   : > { %6008 = vpush %v6107_v47 }
 0x847   : > { %6010 = vpush %v5436_v18  ;;  %v4026_v3 = vadd.f32 %v4024_v27, %v3982_v11  ;;  %v9950_v46 = vadd.f32 %v5127_v21, %v4971_v13 }
 0x848   : > { %v4125_v9 = vpop.permute.xlu1 %4124 }
 0x849   : > { %v4130_v63 = vadd.f32 %v4125_v9, %v4026_v3  ;;  %v5476_v43 = vsel %vm5132_vm2, %v9950_v46, 0.0 }
 0x84c   : > { %v4229_v55 = vpop.permute.xlu1 %4228 }
 0x84d   : > { %v4234_v39 = vadd.f32 %v4229_v55, %v4130_v63 }
 0x84f   : > { %v4362_v0 = vadd.f32 %v4357_v20, %v4234_v39 }
 0x850   : > { %v4517_v10 = vpop.permute.xlu1 %4516 }
 0x851   : > { %v4522_v35 = vadd.f32 %v4517_v10, %v4362_v0 }
 0x854   : > { %v4677_v7 = vpop.permute.xlu1 %4676 }
 0x855   : > { %v4682_v33 = vadd.f32 %v4677_v7, %v4522_v35 }
 0x857   : > { %v4810_v8 = vadd.f32 %v4805_v52, %v4682_v33 }
 0x859   : > { %v4970_v40 = vadd.f32 %v4965_v12, %v4810_v8 }
 0x85b   : > { %v9952_v23 = vadd.f32 %v5125_v34, %v4970_v40 }
 0x85d   : > { %v5475_v49 = vsel %vm5132_vm2, %v9952_v23, 0.0 }
 0x85e   : > { %v5477_v32 = vadd.f32 %v5476_v43, %v5475_v49 }
 0x860   : > { %5478 = vadd.xlane.f32.xlu0 %v5477_v32 }
 0x877   : > { %s6009_s13 = spop %6008 }
 0x878   : > { %s5412_s10 = smul.f32 %s6009_s13, %s5934_s8  ;;  %s6011_s6 = spop %6010 }
 0x879   : > { %s5438_s23 = smul.f32 0.00390625, %s6011_s6  ;;  %s5943_s6 = sld [smem:[#allocation7 + $0x7]] }
 0x87a   : > { %v5413_v44 = vstv %s5412_s10  ;;  %s5936_s10 = sld [smem:[#allocation5 + $0x7]] }
 0x87b   : > { %v5414_v45 = vmul.f32 %v5413_v44, %v9509_v38  ;;  %v5415_v1 = vmul.f32 %v5413_v44, %v9512_v61  ;;  %v5439_v53 = vstv %s5438_s23 }
 0x87c   : > { %v5440_v58 = vsub.f32 %v9452_v30, %v5439_v53  ;;  %v5441_v56 = vsub.f32 %v9450_v16, %v5439_v53 }
 0x87d   : > { %v5417_v4 = vadd.f32 %v5416_v25, %v5414_v45  ;;  %v5418_v54 = vadd.f32 %v5416_v25, %v5415_v1 }
 0x87e   : > { %v5442_v19 = vmul.f32 %v5440_v58, %v5440_v58  ;;  %v5443_v24 = vmul.f32 %v5441_v56, %v5441_v56 }
 0x87f   : > { %v5419_v42 = vmul.f32 0.2, %v5417_v4  ;;  %v5420_v6 = vmul.f32 0.2, %v5418_v54  ;;  %v5514_v49 = vstv %s5943_s6 }
 0x880   : > { %v5444_v26 = vsel %vm5132_vm2, %v5442_v19, 0.0  ;;  %v5445_v29 = vsel %vm5132_vm2, %v5443_v24, 0.0 }
 0x881   : > { %v5421_v38 = vmax.f32 %v5417_v4, %v5419_v42  ;;  %v5422_v50 = vmax.f32 %v5418_v54, %v5420_v6  ;;  %v5446_v57 = vadd.f32 %v5445_v29, %v5444_v26 }
 0x883   : > { %5961 = vst.msk [vmem:[%s7499_s9 + $0x50] sm:$0xff] %vm5132_vm2, %v5421_v38  ;;  %5962 = vst.msk [vmem:[%s7499_s9 + $0x58] sm:$0xff] %vm5132_vm2, %v5422_v50  ;;  %5447 = vadd.xlane.f32.xlu1 %v5446_v57 }
 0x8e9   : > { %v5479_v51 = vpop.xlane.xlu0 %5478 }
 0x8ea   : > { %v5480_v2 = vrot.slane %v5479_v51, 4 }
 0x8ec   : > { %v5481_v17 = vadd.f32 %v5480_v2, %v5479_v51 }
 0x8ee   : > { %v5482_v47 = vrot.slane %v5481_v17, 2 }
 0x8f0   : > { %v5483_v18 = vadd.f32 %v5482_v47, %v5481_v17 }
 0x8f2   : > { %v5484_v11 = vrot.slane %v5483_v18, 1 }
 0x8f4   : > { %v5485_v3 = vadd.f32 %v5484_v11, %v5483_v18 }
 0x90c   : > { %v5448_v30 = vpop.xlane.xlu1 %5447 }
 0x90d   : > { %v5449_v16 = vrot.slane %v5448_v30, 4 }
 0x90f   : > { %v5450_v61 = vadd.f32 %v5449_v16, %v5448_v30 }
 0x911   : > { %v5451_v5 = vrot.slane %v5450_v61, 2 }
 0x913   : > { %v5452_v12 = vadd.f32 %v5451_v5, %v5450_v61 }
 0x915   : > { %v5453_v14 = vrot.slane %v5452_v12, 1 }
 0x917   : > { %v5454_v27 = vadd.f32 %v5453_v14, %v5452_v12 }
 0x919   : > { %6012 = vpush %v5454_v27 }
 0x94a   : > { %s6013_s7 = spop %6012 }
 0x94b   : > { %s5456_s5 = smul.f32 0.00390625, %s6013_s7 }
 0x94d   : > { %s5457_s12 = sadd.f32 1e-05, %s5456_s5  ;;  %s5972_s5 = sshll.u32 %s6353_s19, 11 }
 0x94e   : > { %s9991_s19 = scalar_lea.sflag [#allocation3], %s227_s30 }
 0x94f   : > { %v5458_v22 = vstv %s5457_s12  ;;  %s5538_s12 = sshll.u32 %s7499_s9, 4  ;;  %s9983_s12 = int_to_ptr.vmem [resolvable:$true] %s5538_s12 }
 0x950   : > { %6108 = vrsqrt.f32 %v5458_v22 }
 0x95d   : > { %v6109_v31 = vpop.eup %6108 }
 0x95e   : > { %6014 = vpush %v6109_v31 }
 0x95f   : > { %6016 = vpush %v5485_v3 }
 0x98f   : > { %s6015_s22 = spop %6014 }
 0x990   : > { %s5461_s29 = smul.f32 %s6015_s22, %s5935_s20  ;;  %s6017_s28 = spop %6016 }
 0x991   : > { %s5487_s27 = smul.f32 0.00390625, %s6017_s28  ;;  %s9981_s22 = scalar_lea.hbm %s10035_s4, %s5972_s5 }
 0x992   : > { %v5462_v9 = vstv %s5461_s29  ;;  %s6229_s29 = scalar_lea.vmem %s9983_s12, 2048  ;;  %s6304_s28 = smov [#allocation8]  }
 0x993   : > { %v5463_v15 = vmul.f32 %v5462_v9, %v5440_v58  ;;  %v5464_v41 = vmul.f32 %v5462_v9, %v5441_v56  ;;  %v5488_v36 = vstv %s5487_s27  ;;  %p6230_p12 = scmp.ne.s32.totalorder %s9983_s12, %s6229_s29  ;;  %s6233_s27 = sshll.u32 %s6304_s28, 4  ;;  %s6234_s27 = int_to_ptr.vmem [resolvable:$false] %s6233_s27 }
 0x994   : > { %v5489_v63 = vsub.f32 %v9952_v23, %v5488_v36  ;;  %v5490_v48 = vsub.f32 %v9950_v46, %v5488_v36  ;;  %p6236_p4 = scmp.lt.s32.totalorder %s9983_s12, %s6234_s27 }
 0x995   : > { %v5466_v55 = vadd.f32 %v5465_v37, %v5463_v15  ;;  %v5467_v20 = vadd.f32 %v5465_v37, %v5464_v41  ;;  %p6231_p3 = pnand %p6230_p12, %p10048_p2 }
 0x996   : > { %v5491_v62 = vmul.f32 %v5489_v63, %v5489_v63  ;;  %v5492_v59 = vmul.f32 %v5490_v48, %v5490_v48 }
 0x997   : > { %v5468_v39 = vmul.f32 0.2, %v5466_v55  ;;  %v5469_v34 = vmul.f32 0.2, %v5467_v20  ;;  %p6232_p9 = pneg %p6231_p3 }
 0x998   : > { %v5493_v0 = vsel %vm5132_vm2, %v5491_v62, 0.0  ;;  %v5494_v60 = vsel %vm5132_vm2, %v5492_v59, 0.0 }
 0x999   : > { %v5470_v10 = vmax.f32 %v5466_v55, %v5468_v39  ;;  %v5471_v28 = vmax.f32 %v5467_v20, %v5469_v34  ;;  %v5495_v35 = vadd.f32 %v5494_v60, %v5493_v0 }
 0x99b   : > { %5963 = vst.msk [vmem:[%s7499_s9 + $0x60] sm:$0xff] %vm5132_vm2, %v5470_v10  ;;  %5964 = vst.msk [vmem:[%s7499_s9 + $0x68] sm:$0xff] %vm5132_vm2, %v5471_v28  ;;  %5496 = vadd.xlane.f32.xlu1 %v5495_v35 }
 0xa24   : > { %v5497_v13 = vpop.xlane.xlu1 %5496 }
 0xa25   : > { %v5498_v52 = vrot.slane %v5497_v13, 4 }
 0xa27   : > { %v5499_v7 = vadd.f32 %v5498_v52, %v5497_v13 }
 0xa29   : > { %v5500_v21 = vrot.slane %v5499_v7, 2 }
 0xa2b   : > { %v5501_v33 = vadd.f32 %v5500_v21, %v5499_v7 }
 0xa2d   : > { %v5502_v8 = vrot.slane %v5501_v33, 1 }
 0xa2f   : > { %v5503_v46 = vadd.f32 %v5502_v8, %v5501_v33 }
 0xa31   : > { %6018 = vpush %v5503_v46 }
 0xa62   : > { %s6019_s8 = spop %6018 }
 0xa63   : > { %s5505_s14 = smul.f32 0.00390625, %s6019_s8  ;;  %s6235_s8 = scalar_lea.vmem %s6234_s27, 4096 }
 0xa64   : > { %p6237_p7 = scmp.lt.s32.totalorder %s6235_s8, %s6229_s29 }
 0xa65   : > { %s5506_s13 = sadd.f32 1e-05, %s5505_s14 }
 0xa66   : > { %p6238_p5 = por %p6237_p7, %p6236_p4 }
 0xa67   : > { %v5507_v40 = vstv %s5506_s13 }
 0xa68   : > { %6110 = vrsqrt.f32 %v5507_v40  ;;  %p6239_p6 = pnand %p6238_p5, %p6232_p9 }
 0xa75   : > { %v6111_v23 = vpop.eup %6110 }
 0xa76   : > { %6020 = vpush %v6111_v23 }
 0xaa7   : > { %s6021_s23 = spop %6020 }
 0xaa8   : > { %s5510_s7 = smul.f32 %s6021_s23, %s5936_s10 }
 0xaaa   : > { %v5511_v43 = vstv %s5510_s7 }
 0xaab   : > { %v5512_v32 = vmul.f32 %v5511_v43, %v5489_v63  ;;  %v5513_v44 = vmul.f32 %v5511_v43, %v5490_v48 }
 0xaad   : > { %v5515_v25 = vadd.f32 %v5514_v49, %v5512_v32  ;;  %v5516_v45 = vadd.f32 %v5514_v49, %v5513_v44 }
 0xaaf   : > { %v5517_v1 = vmul.f32 0.2, %v5515_v25  ;;  %v5518_v53 = vmul.f32 0.2, %v5516_v45 }
 0xab1   : > { %v5519_v58 = vmax.f32 %v5515_v25, %v5517_v1  ;;  %v5520_v56 = vmax.f32 %v5516_v45, %v5518_v53 }
 0xab3   : > { %5965 = vst.msk [vmem:[%s7499_s9 + $0x70] sm:$0xff] %vm5132_vm2, %v5519_v58  ;;  %5966 = vst.msk [vmem:[%s7499_s9 + $0x78] sm:$0xff] %vm5132_vm2, %v5520_v56 }
 0xab4   : > { %6242 = shalt.err (!%p6239_p6)
}
 0xab5   : > { %s6243_s30 = scalar_lea.hbm %s9981_s22, 2048  ;;  %s6247_s13 = scalar_lea.hbm %s10035_s4, 4096 }
 0xab6   : > { %p6244_p10 = scmp.ne.s32.totalorder %s9981_s22, %s6243_s30  ;;  %p6248_p11 = scmp.lt.s32.totalorder %s9981_s22, %s10035_s4 }
 0xab7   : > { %p6249_p13 = scmp.lt.s32.totalorder %s6247_s13, %s6243_s30 }
 0xab8   : > { %p6245_p8 = pnand %p6244_p10, %p10048_p2 }
 0xab9   : > { %p6250_p1 = por %p6249_p13, %p6248_p11 }
 0xaba   : > { %p6246_p0 = pneg %p6245_p8 }
 0xabc   : > { %p6251_p12 = pnand %p6250_p1, %p6246_p0 }
 0xabe   : > { %6254 = shalt.err (!%p6251_p12)
}
 0xabf   : > { %s6305_s23 = smov 128   ;;  %s6306_s7 = smov 8  }
 0xac0   : > { %6034 = dma.vmem_to_hbm [thread:$0]  (%p10048_p2), %s9983_s12, 2048, %s9981_s22, %s9991_s19, %s6305_s23, %s6305_s23, %s6306_s7  }
 0xac1 PF: > { %p6056_p3 = scmp.ge.s32.totalorder %s6297_s18, 2  ;;  %s5553_s5 = sand.u32 1, %s6285_s15  }
 0xac2   : > { %p10049_p9 = scmp.ne.s32.totalorder %s10040_s26, 0  ;;  %s5554_s20 = scalar_lea.sflag [#allocation3], %s5553_s5 }
 0xac4   : > { %p6047_p4 = pnand %p6056_p3, %p10049_p9 }
 0xac6   : > { %p6048_p7 = pneg %p6047_p4 }
 0xac8   : > { %6280 = dma.done.wait (%p6048_p7), %s5554_s20, 2048  }
 0xac9   : > { %6282 = vsyncadd (%p6048_p7), %s5554_s20, 4294965248  ;;  %p16_p5 = scmp.ge.s32.totalorder %s6357_s21, 4   ;;  %s10050_s15 = smov %s6289_s16 }
 0xaca   : > { %s10051_s16 = smov %s6293_s17  ;;  %s10052_s17 = smov %s6368_s24 }
 0xacb   : > { %s10053_s18 = smov %s6357_s21  ;;  %18 = sbr.rel (!%p16_p5) target bundleno = 5 (0x5), region = 94 }
 0xad0   :  { %5559 = vsyncpa [#allocation3], 1 }
 0xad1   :  { %5561 = vsyncpa [#allocation3 + $0x1], 1 }
 0xad2   :  { %5562 = vsyncpa [#allocation4], 1 }
 0xad3   :  { %5564 = vsyncpa [#allocation4 + $0x1], 1 }
 0xad4   :  { %5565 = vsyncpa [#allocation6], 1 }

</bundles_post_ra>
